<compile_context>
chip_gen: v7x
topology: tpu7x:2x2x1
jax: 0.10.0
libtpu: 0.0.40
codegen_flags: <defaults>
</compile_context>

<pallas_src>
import jax
import jax.numpy as jnp
import numpy as np
from jax import lax
from jax.experimental import pallas as pl
from jax.experimental.pallas import tpu as pltpu


# --------------------------------------------------------------------------
# Static spatial plumbing (32x32 input, CIFAR-like, so AvgPool2d(8) sees 8x8)
# --------------------------------------------------------------------------
H_A, W_A = 32, 32                  # stage A (layers 0-2), tight rows y*32+x
H_B, W_B, WP_B = 16, 16, 18        # stage B (layers 3-5), 3x3 pad-1 conv
H_C, W_C, WP_C = 8, 8, 10          # stage C (layers 6-8), 3x3 pad-1 conv
ROWS_A = H_A * W_A                 # 1024
RB = (H_B + 3) * WP_B              # 19*18 = 342  padded buffer (+1 overrun row)
ROWS_B = H_B * WP_B                # 288          rows y*18+x (junk at x>=16)
RC = (H_C + 3) * WP_C              # 11*10 = 110
ROWS_C = H_C * WP_C                # 80           rows y*10+x (junk at x>=8)


# --------------------------------------------------------------------------
# In-kernel helpers
# --------------------------------------------------------------------------
def _cbr(lhs, w_ref, b_ref):
    """Dense matmul (conv) + folded-BN bias + ReLU, f32 accumulation."""
    y = jnp.dot(lhs, w_ref[...], preferred_element_type=jnp.float32)
    return jnp.maximum(y + b_ref[...], 0.0)


def _im2col3(pad_ref, rows, wp):
    """(rows, 9*C) lhs for a 3x3 conv from a zero-padded flat (rows+, C) ref."""
    taps = []
    for dy in range(3):
        for dx in range(3):
            s = dy * wp + dx                       # static flat-row tap offset
            taps.append(pad_ref[s:s + rows, :])
    return jnp.concatenate(taps, axis=-1)          # taps folded into K


def _maxpool2x2_into(src_ref, dst_ref, h, w, w_src, wp_dst):
    """2x2 / stride-2 max pool of a flat (h*w_src, C) f32 ref (junk at x >= w),
    written into the interior (offset (1,1)) of a zero-filled padded ref."""
    n = (h * w_src) // 2
    he = src_ref[pl.ds(0, n, stride=2), :]         # even-x columns
    ho = src_ref[pl.ds(1, n, stride=2), :]         # odd-x columns
    hm = jnp.maximum(he, ho)                       # rows r' = y*(w_src/2) + x2
    half, wo = w_src // 2, w // 2
    for y2 in range(h // 2):
        top = hm[(2 * y2) * half:(2 * y2) * half + wo, :]
        bot = hm[(2 * y2 + 1) * half:(2 * y2 + 1) * half + wo, :]
        dst_ref[pl.ds((1 + y2) * wp_dst + 1, wo), :] = (
            jnp.maximum(top, bot).astype(dst_ref.dtype))


# --------------------------------------------------------------------------
# The fused whole-network kernel (one image per grid step)
# --------------------------------------------------------------------------
def _net_kernel(x_ref,
                w0, b0, w1, b1, w2, b2, w3, b3, w4, b4,
                w5, b5, w6, b6, w7, b7, w8, b8,
                o_ref,
                pre_a, pad_b, pre_b, pad_c):
    bf16, f32 = jnp.bfloat16, jnp.float32

    # ---- stage A : 32x32 (tight rows y*32 + x) ---------------------------
    a = _cbr(x_ref[0], w0, b0).astype(bf16)               # 5x5 conv, K=75
    a = _cbr(a, w1, b1).astype(bf16)                      # 1x1, g=2
    # keep bf16 activation semantics but store f32 for the strided pool read
    pre_a[...] = _cbr(a, w2, b2).astype(bf16).astype(f32)  # 1x1, g=2 (+shuffle)

    # ---- maxpool 2x2 -> zero-padded stage-B input ------------------------
    pad_b[...] = jnp.zeros(pad_b.shape, pad_b.dtype)
    _maxpool2x2_into(pre_a, pad_b, H_A, W_A, W_A, WP_B)

    # ---- stage B : 16x16 (rows y*18 + x, junk at x >= 16) -----------------
    t = _cbr(_im2col3(pad_b, ROWS_B, WP_B), w3, b3).astype(bf16)  # 3x3, g=16
    t = _cbr(t, w4, b4).astype(bf16)                              # 1x1, g=4
    pre_b[...] = _cbr(t, w5, b5).astype(bf16).astype(f32)         # 1x1, g=4

    pad_c[...] = jnp.zeros(pad_c.shape, pad_c.dtype)
    _maxpool2x2_into(pre_b, pad_c, H_B, W_B, WP_B, WP_C)

    # ---- stage C : 8x8 (rows y*10 + x, junk at x >= 8) --------------------
    t = _cbr(_im2col3(pad_c, ROWS_C, WP_C), w6, b6).astype(bf16)  # 3x3, g=32
    t = _cbr(t, w7, b7).astype(bf16)                              # 1x1, g=8
    t = _cbr(t, w8, b8).astype(bf16).astype(f32)                  # 1x1 -> 10

    # ---- global 8x8 average pool over the 64 valid rows -------------------
    ridx = lax.broadcasted_iota(jnp.int32, t.shape, 0)
    valid = (ridx % WP_C) < W_C
    o_ref[0] = (jnp.sum(jnp.where(valid, t, 0.0), axis=0, keepdims=True)
                * (1.0 / float(H_C * W_C)))


def fused_net_forward(xcol, packed):
    """xcol: (N, 1024, 75) bf16 im2col'd input.  packed: 9 (weight, bias) pairs."""
    N, rows, k0 = xcol.shape
    assert rows == ROWS_A
    flat = [a for wb in packed for a in wb]
    n_out = packed[-1][0].shape[1]
    c2 = packed[2][0].shape[1]      # stage-B input channels
    c5 = packed[5][0].shape[1]      # stage-C input channels

    def resident(a):                 # whole array, same block every grid step
        zeros = (0,) * a.ndim
        return pl.BlockSpec(a.shape, lambda n, _z=zeros: _z)

    # Derived VMEM budget: double-buffered input block + resident weights
    # (conservatively 2x) + scratch + headroom for transient values.
    in_bytes = rows * k0 * 2
    w_bytes = sum(int(np.prod(a.shape)) * a.dtype.itemsize for a in flat)
    scratch_bytes = (ROWS_A * c2 + ROWS_B * c5) * 4 + (RB * c2 + RC * c5) * 2
    vmem_limit = min(2 * in_bytes + 2 * w_bytes + scratch_bytes
                     + 12 * 1024 * 1024, 40 * 1024 * 1024)

    out = pl.pallas_call(
        _net_kernel,
        out_shape=jax.ShapeDtypeStruct((N, 1, n_out), jnp.float32),
        grid=(N,),
        in_specs=([pl.BlockSpec((1, ROWS_A, k0), lambda n: (n, 0, 0))]
                  + [resident(a) for a in flat]),
        out_specs=pl.BlockSpec((1, 1, n_out), lambda n: (n, 0, 0)),
        scratch_shapes=[
            pltpu.VMEM((ROWS_A, c2), jnp.float32),    # stage-A pre-pool act
            pltpu.VMEM((RB, c2), jnp.bfloat16),       # padded stage-B input
            pltpu.VMEM((ROWS_B, c5), jnp.float32),    # stage-B pre-pool act
            pltpu.VMEM((RC, c5), jnp.bfloat16),       # padded stage-C input
        ],
        compiler_params=pltpu.CompilerParams(
            dimension_semantics=("parallel",),        # shard batch across TCs
            vmem_limit_bytes=int(vmem_limit)),
    )(xcol, *flat)
    return out.reshape(N, n_out)


# --------------------------------------------------------------------------
# Jitted wrapper: layer-0 im2col in XLA, everything else inside the kernel
# --------------------------------------------------------------------------
def _input_im2col(x_nchw):
    """NCHW f32 -> (N, 32*32, 25*3) bf16 patches, lane order t*3+c, t=dy*5+dx."""
    x = jnp.transpose(x_nchw, (0, 2, 3, 1))
    N, H, W, C = x.shape
    assert (H, W) == (H_A, W_A)
    xp = jnp.pad(x, ((0, 0), (2, 2), (2, 2), (0, 0)))
    taps = [xp[:, dy:dy + H, dx:dx + W, :] for dy in range(5) for dx in range(5)]
    xcol = jnp.concatenate(taps, axis=-1)             # (N, 32, 32, 75)
    return xcol.reshape(N, H * W, 25 * C).astype(jnp.bfloat16)


def net_forward(x_nchw, packed):
    return fused_net_forward(_input_im2col(x_nchw), packed)


# --------------------------------------------------------------------------
# Network definition (quant_type=0 path of nin_gc.Net) + weight packing
# --------------------------------------------------------------------------
LAYER_CFG = [
    # k, pad, groups, shuffle (shuffle_groups applied before this conv; 0=none)
    dict(k=5, pad=2, groups=1,  shuffle=0),   # Conv(3,cfg0,5)+BN (+first_relu)
    dict(k=1, pad=0, groups=2,  shuffle=0),
    dict(k=1, pad=0, groups=2,  shuffle=2),
    "maxpool",
    dict(k=3, pad=1, groups=16, shuffle=2),
    dict(k=1, pad=0, groups=4,  shuffle=16),
    dict(k=1, pad=0, groups=4,  shuffle=4),
    "maxpool",
    dict(k=3, pad=1, groups=32, shuffle=4),
    dict(k=1, pad=0, groups=8,  shuffle=32),
    dict(k=1, pad=0, groups=1,  shuffle=0),   # Conv(cfg7,10,1)+BN+ReLU
    "avgpool",
]


def init_conv_bn(key, cin, cout, k, groups):
    kw, kb, kg, kbt, km, kv = jax.random.split(key, 6)
    cg = cin // groups
    fan_in = cg * k * k
    return dict(
        w=jax.random.normal(kw, (cout, cg, k, k), jnp.float32) / jnp.sqrt(fan_in),
        b=0.1 * jax.random.normal(kb, (cout,), jnp.float32),
        gamma=1.0 + 0.1 * jax.random.normal(kg, (cout,), jnp.float32),
        beta=0.1 * jax.random.normal(kbt, (cout,), jnp.float32),
        mean=0.1 * jax.random.normal(km, (cout,), jnp.float32),
        var=1.0 + 0.1 * jax.random.uniform(kv, (cout,), jnp.float32),
    )


def make_net_params(key, cfg):
    chans = [3] + list(cfg) + [10]
    conv_specs = [s for s in LAYER_CFG if not isinstance(s, str)]
    keys = jax.random.split(key, len(conv_specs))
    return [init_conv_bn(keys[i], chans[i], chans[i + 1], s["k"], s["groups"])
            for i, s in enumerate(conv_specs)]


def pack_conv_bn(p, *, k, groups, shuffle, eps=1e-5):
    """Fold BN into the conv weight, densify the grouped weight block-diagonally,
    fold the preceding channel_shuffle into the input-channel ordering, and fold
    the k*k taps into the contraction dim.  Returns ((k*k*C, O) bf16, (1, O) f32)."""
    O, Cg = p["w"].shape[0], p["w"].shape[1]
    Og, C = O // groups, Cg * groups
    scale = p["gamma"] / jnp.sqrt(p["var"] + eps)
    w = p["w"] * scale[:, None, None, None]                  # (O, Cg, k, k)
    bias = (p["b"] - p["mean"]) * scale + p["beta"]          # (O,)
    # (O, Cg, k, k) -> (k*k, groups, Cg, Og), tap index t = dy*k + dx
    wr = (w.reshape(groups, Og, Cg, k, k)
            .transpose(3, 4, 0, 2, 1)
            .reshape(k * k, groups, Cg, Og))
    wd = jnp.zeros((k * k, C, O), jnp.float32)
    for g in range(groups):
        wd = wd.at[:, g * Cg:(g + 1) * Cg, g * Og:(g + 1) * Og].set(wr[:, g])
    if shuffle:
        j = np.arange(C)
        perm = (j % shuffle) * (C // shuffle) + (j // shuffle)
        wd = wd[:, np.argsort(perm), :]          # fold shuffle into weight rows
    return (wd.reshape(k * k * C, O).astype(jnp.bfloat16),
            bias.reshape(1, O).astype(jnp.float32))


def pack_net_params(params):
    specs = [s for s in LAYER_CFG if not isinstance(s, str)]
    assert len(specs) == len(params)
    return [pack_conv_bn(p, k=s["k"], groups=s["groups"], shuffle=s["shuffle"])
            for p, s in zip(params, specs)]


# --------------------------------------------------------------------------
# Pure-JAX reference (explicit shuffles + grouped lax convs, same precision)
# --------------------------------------------------------------------------
def channel_shuffle_nhwc(x, groups):
    N, H, W, C = x.shape
    cpg = C // groups
    return (x.reshape(N, H, W, groups, cpg)
              .transpose(0, 1, 2, 4, 3)
              .reshape(N, H, W, C))


def reference_forward(x_nchw, params):
    x = jnp.transpose(x_nchw, (0, 2, 3, 1)).astype(jnp.bfloat16)
    idx = 0
    eps = 1e-5
    for spec in LAYER_CFG:
        if spec == "maxpool":
            x = jnp.maximum(
                jnp.maximum(x[:, 0::2, 0::2, :], x[:, 0::2, 1::2, :]),
                jnp.maximum(x[:, 1::2, 0::2, :], x[:, 1::2, 1::2, :]))
            continue
        if spec == "avgpool":
            x = jnp.mean(x.astype(jnp.float32), axis=(1, 2))
            continue
        p = params[idx]
        idx += 1
        if spec["shuffle"]:
            x = channel_shuffle_nhwc(x, spec["shuffle"])
        scale = p["gamma"] / jnp.sqrt(p["var"] + eps)
        w = (p["w"] * scale[:, None, None, None]).astype(jnp.bfloat16)
        b = (p["b"] - p["mean"]) * scale + p["beta"]
        y = lax.conv_general_dilated(
            x, jnp.transpose(w, (2, 3, 1, 0)), window_strides=(1, 1),
            padding=[(spec["pad"], spec["pad"])] * 2,
            dimension_numbers=("NHWC", "HWIO", "NHWC"),
            feature_group_count=spec["groups"],
            preferred_element_type=jnp.float32)
        # first_relu=1 of the first ConvBNReLU is fused as the ReLU of the
        # preceding Conv+BN (its shuffle flag is 0, so this is equivalent).
        x = jnp.maximum(y + b, 0.0).astype(jnp.bfloat16)
    return x


if __name__ == "__main__":
    # Scaled-down cfg (default is [256,256,256,512,512,512,1024,1024]); all
    # group / shuffle divisibility constraints of the module are preserved.
    cfg = [32, 32, 32, 64, 64, 64, 128, 128]
    key = jax.random.PRNGKey(0)
    kx, kp = jax.random.split(key)
    # CIFAR-like input so the final AvgPool2d(8) reduces an 8x8 map to 1x1.
    x = jax.random.normal(kx, (2, 3, 32, 32), jnp.float32)  # NCHW, like PyTorch
    params = make_net_params(kp, cfg)
    packed = pack_net_params(params)          # packed ONCE, outside the jit

    fwd = jax.jit(net_forward)
    out = jax.block_until_ready(fwd(x, packed))
    assert out.shape == (2, 10)

    ref = jax.block_until_ready(jax.jit(reference_forward)(x, params))
    np.testing.assert_allclose(np.asarray(out), np.asarray(ref),
                               rtol=2e-2, atol=2e-2)
    print("KERNEL_OK")
</pallas_src>

<mosaic_0001>
module attributes {stable_mosaic.version = 11 : i64} {
  func.func @_net_kernel(%arg0: i32, %arg1: memref<1x1024x75xbf16, #tpu.memory_space<vmem>>, %arg2: memref<75x32xbf16, #tpu.memory_space<vmem>>, %arg3: memref<1x32xf32, #tpu.memory_space<vmem>>, %arg4: memref<32x32xbf16, #tpu.memory_space<vmem>>, %arg5: memref<1x32xf32, #tpu.memory_space<vmem>>, %arg6: memref<32x32xbf16, #tpu.memory_space<vmem>>, %arg7: memref<1x32xf32, #tpu.memory_space<vmem>>, %arg8: memref<288x64xbf16, #tpu.memory_space<vmem>>, %arg9: memref<1x64xf32, #tpu.memory_space<vmem>>, %arg10: memref<64x64xbf16, #tpu.memory_space<vmem>>, %arg11: memref<1x64xf32, #tpu.memory_space<vmem>>, %arg12: memref<64x64xbf16, #tpu.memory_space<vmem>>, %arg13: memref<1x64xf32, #tpu.memory_space<vmem>>, %arg14: memref<576x128xbf16, #tpu.memory_space<vmem>>, %arg15: memref<1x128xf32, #tpu.memory_space<vmem>>, %arg16: memref<128x128xbf16, #tpu.memory_space<vmem>>, %arg17: memref<1x128xf32, #tpu.memory_space<vmem>>, %arg18: memref<128x10xbf16, #tpu.memory_space<vmem>>, %arg19: memref<1x10xf32, #tpu.memory_space<vmem>>, %arg20: memref<1x1x10xf32, #tpu.memory_space<vmem>>, %arg21: memref<1024x32xf32, #tpu.memory_space<vmem>>, %arg22: memref<342x32xbf16, #tpu.memory_space<vmem>>, %arg23: memref<288x64xf32, #tpu.memory_space<vmem>>, %arg24: memref<110x64xbf16, #tpu.memory_space<vmem>>) attributes {dimension_semantics = [#tpu.dimension_semantics<parallel>], iteration_bounds = array<i64: 2>, scalar_prefetch = 0 : i64, scratch_operands = 4 : i64, tpu.core_type = #tpu.core_type<tc>, window_params = [{transform_indices = @transform_0, window_bounds = array<i64: 1, 1024, 75>}, {pipeline_mode = #tpu.pipeline_mode<synchronous>, transform_indices = @transform_1, window_bounds = array<i64: 75, 32>}, {pipeline_mode = #tpu.pipeline_mode<synchronous>, transform_indices = @transform_2, window_bounds = array<i64: 1, 32>}, {pipeline_mode = #tpu.pipeline_mode<synchronous>, transform_indices = @transform_3, window_bounds = array<i64: 32, 32>}, {pipeline_mode = #tpu.pipeline_mode<synchronous>, transform_indices = @transform_4, window_bounds = array<i64: 1, 32>}, {pipeline_mode = #tpu.pipeline_mode<synchronous>, transform_indices = @transform_5, window_bounds = array<i64: 32, 32>}, {pipeline_mode = #tpu.pipeline_mode<synchronous>, transform_indices = @transform_6, window_bounds = array<i64: 1, 32>}, {pipeline_mode = #tpu.pipeline_mode<synchronous>, transform_indices = @transform_7, window_bounds = array<i64: 288, 64>}, {pipeline_mode = #tpu.pipeline_mode<synchronous>, transform_indices = @transform_8, window_bounds = array<i64: 1, 64>}, {pipeline_mode = #tpu.pipeline_mode<synchronous>, transform_indices = @transform_9, window_bounds = array<i64: 64, 64>}, {pipeline_mode = #tpu.pipeline_mode<synchronous>, transform_indices = @transform_10, window_bounds = array<i64: 1, 64>}, {pipeline_mode = #tpu.pipeline_mode<synchronous>, transform_indices = @transform_11, window_bounds = array<i64: 64, 64>}, {pipeline_mode = #tpu.pipeline_mode<synchronous>, transform_indices = @transform_12, window_bounds = array<i64: 1, 64>}, {pipeline_mode = #tpu.pipeline_mode<synchronous>, transform_indices = @transform_13, window_bounds = array<i64: 576, 128>}, {pipeline_mode = #tpu.pipeline_mode<synchronous>, transform_indices = @transform_14, window_bounds = array<i64: 1, 128>}, {pipeline_mode = #tpu.pipeline_mode<synchronous>, transform_indices = @transform_15, window_bounds = array<i64: 128, 128>}, {pipeline_mode = #tpu.pipeline_mode<synchronous>, transform_indices = @transform_16, window_bounds = array<i64: 1, 128>}, {pipeline_mode = #tpu.pipeline_mode<synchronous>, transform_indices = @transform_17, window_bounds = array<i64: 128, 10>}, {pipeline_mode = #tpu.pipeline_mode<synchronous>, transform_indices = @transform_18, window_bounds = array<i64: 1, 10>}, {transform_indices = @transform_19, window_bounds = array<i64: 1, 1, 10>}]} {
    %c0 = arith.constant 0 : index
    %c0_0 = arith.constant 0 : index
    %c0_1 = arith.constant 0 : index
    %0 = vector.load %arg1[%c0, %c0_0, %c0_1] : memref<1x1024x75xbf16, #tpu.memory_space<vmem>>, vector<1x1024x75xbf16>
    %1 = vector.shape_cast %0 : vector<1x1024x75xbf16> to vector<1024x75xbf16>
    %c0_2 = arith.constant 0 : index
    %c0_3 = arith.constant 0 : index
    %2 = vector.load %arg2[%c0_2, %c0_3] : memref<75x32xbf16, #tpu.memory_space<vmem>>, vector<75x32xbf16>
    %cst = arith.constant dense<0.000000e+00> : vector<1024x32xf32>
    %3 = tpu.matmul %1, %2, %cst {dimension_numbers = #tpu.dot_dimension_numbers<[1], [0], [0], [1], [0, 0, 1, 1], [], []>} : vector<1024x75xbf16>, vector<75x32xbf16>, vector<1024x32xf32> -> vector<1024x32xf32>
    %c0_4 = arith.constant 0 : index
    %c0_5 = arith.constant 0 : index
    %4 = vector.load %arg3[%c0_4, %c0_5] : memref<1x32xf32, #tpu.memory_space<vmem>>, vector<1x32xf32>
    %5 = vector.broadcast %4 : vector<1x32xf32> to vector<1024x32xf32>
    %6 = arith.addf %3, %5 : vector<1024x32xf32>
    %cst_6 = arith.constant 0.000000e+00 : f32
    %7 = vector.broadcast %cst_6 : f32 to vector<1024x32xf32>
    %8 = arith.maximumf %6, %7 : vector<1024x32xf32>
    %9 = arith.truncf %8 : vector<1024x32xf32> to vector<1024x32xbf16>
    %c0_7 = arith.constant 0 : index
    %c0_8 = arith.constant 0 : index
    %10 = vector.load %arg4[%c0_7, %c0_8] : memref<32x32xbf16, #tpu.memory_space<vmem>>, vector<32x32xbf16>
    %cst_9 = arith.constant dense<0.000000e+00> : vector<1024x32xf32>
    %11 = tpu.matmul %9, %10, %cst_9 {dimension_numbers = #tpu.dot_dimension_numbers<[1], [0], [0], [1], [0, 0, 1, 1], [], []>} : vector<1024x32xbf16>, vector<32x32xbf16>, vector<1024x32xf32> -> vector<1024x32xf32>
    %c0_10 = arith.constant 0 : index
    %c0_11 = arith.constant 0 : index
    %12 = vector.load %arg5[%c0_10, %c0_11] : memref<1x32xf32, #tpu.memory_space<vmem>>, vector<1x32xf32>
    %13 = vector.broadcast %12 : vector<1x32xf32> to vector<1024x32xf32>
    %14 = arith.addf %11, %13 : vector<1024x32xf32>
    %cst_12 = arith.constant 0.000000e+00 : f32
    %15 = vector.broadcast %cst_12 : f32 to vector<1024x32xf32>
    %16 = arith.maximumf %14, %15 : vector<1024x32xf32>
    %17 = arith.truncf %16 : vector<1024x32xf32> to vector<1024x32xbf16>
    %c0_13 = arith.constant 0 : index
    %c0_14 = arith.constant 0 : index
    %18 = vector.load %arg6[%c0_13, %c0_14] : memref<32x32xbf16, #tpu.memory_space<vmem>>, vector<32x32xbf16>
    %cst_15 = arith.constant dense<0.000000e+00> : vector<1024x32xf32>
    %19 = tpu.matmul %17, %18, %cst_15 {dimension_numbers = #tpu.dot_dimension_numbers<[1], [0], [0], [1], [0, 0, 1, 1], [], []>} : vector<1024x32xbf16>, vector<32x32xbf16>, vector<1024x32xf32> -> vector<1024x32xf32>
    %c0_16 = arith.constant 0 : index
    %c0_17 = arith.constant 0 : index
    %20 = vector.load %arg7[%c0_16, %c0_17] : memref<1x32xf32, #tpu.memory_space<vmem>>, vector<1x32xf32>
    %21 = vector.broadcast %20 : vector<1x32xf32> to vector<1024x32xf32>
    %22 = arith.addf %19, %21 : vector<1024x32xf32>
    %cst_18 = arith.constant 0.000000e+00 : f32
    %23 = vector.broadcast %cst_18 : f32 to vector<1024x32xf32>
    %24 = arith.maximumf %22, %23 : vector<1024x32xf32>
    %25 = arith.truncf %24 : vector<1024x32xf32> to vector<1024x32xbf16>
    %26 = arith.extf %25 : vector<1024x32xbf16> to vector<1024x32xf32>
    %c0_19 = arith.constant 0 : index
    %c0_20 = arith.constant 0 : index
    %27 = vector.load %arg21[%c0_19, %c0_20] : memref<1024x32xf32, #tpu.memory_space<vmem>>, vector<1024x32xf32>
    tpu.vector_store %arg21[%c0_19, %c0_20], %26 {strides = array<i32>} : memref<1024x32xf32, #tpu.memory_space<vmem>>, vector<1024x32xf32>,
    %cst_21 = arith.constant 0.000000e+00 : bf16
    %28 = vector.broadcast %cst_21 : bf16 to vector<342x32xbf16>
    %c0_22 = arith.constant 0 : index
    %c0_23 = arith.constant 0 : index
    %29 = vector.load %arg22[%c0_22, %c0_23] : memref<342x32xbf16, #tpu.memory_space<vmem>>, vector<342x32xbf16>
    tpu.vector_store %arg22[%c0_22, %c0_23], %28 {strides = array<i32>} : memref<342x32xbf16, #tpu.memory_space<vmem>>, vector<342x32xbf16>,
    %c0_24 = arith.constant 0 : index
    %c0_25 = arith.constant 0 : index
    %30 = tpu.strided_load %arg21[%c0_24, %c0_25] {strides = array<i32: 2, 1>} : memref<1024x32xf32, #tpu.memory_space<vmem>>, vector<512x32xf32>
    %c1 = arith.constant 1 : index
    %c0_26 = arith.constant 0 : index
    %31 = tpu.strided_load %arg21[%c1, %c0_26] {strides = array<i32: 2, 1>} : memref<1024x32xf32, #tpu.memory_space<vmem>>, vector<512x32xf32>
    %32 = arith.maximumf %30, %31 : vector<512x32xf32>
    %33 = vector.extract_strided_slice %32 {offsets = [0, 0], sizes = [16, 32], strides = [1, 1]} : vector<512x32xf32> to vector<16x32xf32>
    %34 = vector.extract_strided_slice %32 {offsets = [16, 0], sizes = [16, 32], strides = [1, 1]} : vector<512x32xf32> to vector<16x32xf32>
    %35 = arith.maximumf %33, %34 : vector<16x32xf32>
    %36 = arith.truncf %35 : vector<16x32xf32> to vector<16x32xbf16>
    %c19 = arith.constant 19 : index
    %c0_27 = arith.constant 0 : index
    %37 = vector.load %arg22[%c19, %c0_27] : memref<342x32xbf16, #tpu.memory_space<vmem>>, vector<16x32xbf16>
    tpu.vector_store %arg22[%c19, %c0_27], %36 {strides = array<i32>} : memref<342x32xbf16, #tpu.memory_space<vmem>>, vector<16x32xbf16>,
    %38 = vector.extract_strided_slice %32 {offsets = [32, 0], sizes = [16, 32], strides = [1, 1]} : vector<512x32xf32> to vector<16x32xf32>
    %39 = vector.extract_strided_slice %32 {offsets = [48, 0], sizes = [16, 32], strides = [1, 1]} : vector<512x32xf32> to vector<16x32xf32>
    %40 = arith.maximumf %38, %39 : vector<16x32xf32>
    %41 = arith.truncf %40 : vector<16x32xf32> to vector<16x32xbf16>
    %c37 = arith.constant 37 : index
    %c0_28 = arith.constant 0 : index
    %42 = vector.load %arg22[%c37, %c0_28] : memref<342x32xbf16, #tpu.memory_space<vmem>>, vector<16x32xbf16>
    tpu.vector_store %arg22[%c37, %c0_28], %41 {strides = array<i32>} : memref<342x32xbf16, #tpu.memory_space<vmem>>, vector<16x32xbf16>,
    %43 = vector.extract_strided_slice %32 {offsets = [64, 0], sizes = [16, 32], strides = [1, 1]} : vector<512x32xf32> to vector<16x32xf32>
    %44 = vector.extract_strided_slice %32 {offsets = [80, 0], sizes = [16, 32], strides = [1, 1]} : vector<512x32xf32> to vector<16x32xf32>
    %45 = arith.maximumf %43, %44 : vector<16x32xf32>
    %46 = arith.truncf %45 : vector<16x32xf32> to vector<16x32xbf16>
    %c55 = arith.constant 55 : index
    %c0_29 = arith.constant 0 : index
    %47 = vector.load %arg22[%c55, %c0_29] : memref<342x32xbf16, #tpu.memory_space<vmem>>, vector<16x32xbf16>
    tpu.vector_store %arg22[%c55, %c0_29], %46 {strides = array<i32>} : memref<342x32xbf16, #tpu.memory_space<vmem>>, vector<16x32xbf16>,
    %48 = vector.extract_strided_slice %32 {offsets = [96, 0], sizes = [16, 32], strides = [1, 1]} : vector<512x32xf32> to vector<16x32xf32>
    %49 = vector.extract_strided_slice %32 {offsets = [112, 0], sizes = [16, 32], strides = [1, 1]} : vector<512x32xf32> to vector<16x32xf32>
    %50 = arith.maximumf %48, %49 : vector<16x32xf32>
    %51 = arith.truncf %50 : vector<16x32xf32> to vector<16x32xbf16>
    %c73 = arith.constant 73 : index
    %c0_30 = arith.constant 0 : index
    %52 = vector.load %arg22[%c73, %c0_30] : memref<342x32xbf16, #tpu.memory_space<vmem>>, vector<16x32xbf16>
    tpu.vector_store %arg22[%c73, %c0_30], %51 {strides = array<i32>} : memref<342x32xbf16, #tpu.memory_space<vmem>>, vector<16x32xbf16>,
    %53 = vector.extract_strided_slice %32 {offsets = [128, 0], sizes = [16, 32], strides = [1, 1]} : vector<512x32xf32> to vector<16x32xf32>
    %54 = vector.extract_strided_slice %32 {offsets = [144, 0], sizes = [16, 32], strides = [1, 1]} : vector<512x32xf32> to vector<16x32xf32>
    %55 = arith.maximumf %53, %54 : vector<16x32xf32>
    %56 = arith.truncf %55 : vector<16x32xf32> to vector<16x32xbf16>
    %c91 = arith.constant 91 : index
    %c0_31 = arith.constant 0 : index
    %57 = vector.load %arg22[%c91, %c0_31] : memref<342x32xbf16, #tpu.memory_space<vmem>>, vector<16x32xbf16>
    tpu.vector_store %arg22[%c91, %c0_31], %56 {strides = array<i32>} : memref<342x32xbf16, #tpu.memory_space<vmem>>, vector<16x32xbf16>,
    %58 = vector.extract_strided_slice %32 {offsets = [160, 0], sizes = [16, 32], strides = [1, 1]} : vector<512x32xf32> to vector<16x32xf32>
    %59 = vector.extract_strided_slice %32 {offsets = [176, 0], sizes = [16, 32], strides = [1, 1]} : vector<512x32xf32> to vector<16x32xf32>
    %60 = arith.maximumf %58, %59 : vector<16x32xf32>
    %61 = arith.truncf %60 : vector<16x32xf32> to vector<16x32xbf16>
    %c109 = arith.constant 109 : index
    %c0_32 = arith.constant 0 : index
    %62 = vector.load %arg22[%c109, %c0_32] : memref<342x32xbf16, #tpu.memory_space<vmem>>, vector<16x32xbf16>
    tpu.vector_store %arg22[%c109, %c0_32], %61 {strides = array<i32>} : memref<342x32xbf16, #tpu.memory_space<vmem>>, vector<16x32xbf16>,
    %63 = vector.extract_strided_slice %32 {offsets = [192, 0], sizes = [16, 32], strides = [1, 1]} : vector<512x32xf32> to vector<16x32xf32>
    %64 = vector.extract_strided_slice %32 {offsets = [208, 0], sizes = [16, 32], strides = [1, 1]} : vector<512x32xf32> to vector<16x32xf32>
    %65 = arith.maximumf %63, %64 : vector<16x32xf32>
    %66 = arith.truncf %65 : vector<16x32xf32> to vector<16x32xbf16>
    %c127 = arith.constant 127 : index
    %c0_33 = arith.constant 0 : index
    %67 = vector.load %arg22[%c127, %c0_33] : memref<342x32xbf16, #tpu.memory_space<vmem>>, vector<16x32xbf16>
    tpu.vector_store %arg22[%c127, %c0_33], %66 {strides = array<i32>} : memref<342x32xbf16, #tpu.memory_space<vmem>>, vector<16x32xbf16>,
    %68 = vector.extract_strided_slice %32 {offsets = [224, 0], sizes = [16, 32], strides = [1, 1]} : vector<512x32xf32> to vector<16x32xf32>
    %69 = vector.extract_strided_slice %32 {offsets = [240, 0], sizes = [16, 32], strides = [1, 1]} : vector<512x32xf32> to vector<16x32xf32>
    %70 = arith.maximumf %68, %69 : vector<16x32xf32>
    %71 = arith.truncf %70 : vector<16x32xf32> to vector<16x32xbf16>
    %c145 = arith.constant 145 : index
    %c0_34 = arith.constant 0 : index
    %72 = vector.load %arg22[%c145, %c0_34] : memref<342x32xbf16, #tpu.memory_space<vmem>>, vector<16x32xbf16>
    tpu.vector_store %arg22[%c145, %c0_34], %71 {strides = array<i32>} : memref<342x32xbf16, #tpu.memory_space<vmem>>, vector<16x32xbf16>,
    %73 = vector.extract_strided_slice %32 {offsets = [256, 0], sizes = [16, 32], strides = [1, 1]} : vector<512x32xf32> to vector<16x32xf32>
    %74 = vector.extract_strided_slice %32 {offsets = [272, 0], sizes = [16, 32], strides = [1, 1]} : vector<512x32xf32> to vector<16x32xf32>
    %75 = arith.maximumf %73, %74 : vector<16x32xf32>
    %76 = arith.truncf %75 : vector<16x32xf32> to vector<16x32xbf16>
    %c163 = arith.constant 163 : index
    %c0_35 = arith.constant 0 : index
    %77 = vector.load %arg22[%c163, %c0_35] : memref<342x32xbf16, #tpu.memory_space<vmem>>, vector<16x32xbf16>
    tpu.vector_store %arg22[%c163, %c0_35], %76 {strides = array<i32>} : memref<342x32xbf16, #tpu.memory_space<vmem>>, vector<16x32xbf16>,
    %78 = vector.extract_strided_slice %32 {offsets = [288, 0], sizes = [16, 32], strides = [1, 1]} : vector<512x32xf32> to vector<16x32xf32>
    %79 = vector.extract_strided_slice %32 {offsets = [304, 0], sizes = [16, 32], strides = [1, 1]} : vector<512x32xf32> to vector<16x32xf32>
    %80 = arith.maximumf %78, %79 : vector<16x32xf32>
    %81 = arith.truncf %80 : vector<16x32xf32> to vector<16x32xbf16>
    %c181 = arith.constant 181 : index
    %c0_36 = arith.constant 0 : index
    %82 = vector.load %arg22[%c181, %c0_36] : memref<342x32xbf16, #tpu.memory_space<vmem>>, vector<16x32xbf16>
    tpu.vector_store %arg22[%c181, %c0_36], %81 {strides = array<i32>} : memref<342x32xbf16, #tpu.memory_space<vmem>>, vector<16x32xbf16>,
    %83 = vector.extract_strided_slice %32 {offsets = [320, 0], sizes = [16, 32], strides = [1, 1]} : vector<512x32xf32> to vector<16x32xf32>
    %84 = vector.extract_strided_slice %32 {offsets = [336, 0], sizes = [16, 32], strides = [1, 1]} : vector<512x32xf32> to vector<16x32xf32>
    %85 = arith.maximumf %83, %84 : vector<16x32xf32>
    %86 = arith.truncf %85 : vector<16x32xf32> to vector<16x32xbf16>
    %c199 = arith.constant 199 : index
    %c0_37 = arith.constant 0 : index
    %87 = vector.load %arg22[%c199, %c0_37] : memref<342x32xbf16, #tpu.memory_space<vmem>>, vector<16x32xbf16>
    tpu.vector_store %arg22[%c199, %c0_37], %86 {strides = array<i32>} : memref<342x32xbf16, #tpu.memory_space<vmem>>, vector<16x32xbf16>,
    %88 = vector.extract_strided_slice %32 {offsets = [352, 0], sizes = [16, 32], strides = [1, 1]} : vector<512x32xf32> to vector<16x32xf32>
    %89 = vector.extract_strided_slice %32 {offsets = [368, 0], sizes = [16, 32], strides = [1, 1]} : vector<512x32xf32> to vector<16x32xf32>
    %90 = arith.maximumf %88, %89 : vector<16x32xf32>
    %91 = arith.truncf %90 : vector<16x32xf32> to vector<16x32xbf16>
    %c217 = arith.constant 217 : index
    %c0_38 = arith.constant 0 : index
    %92 = vector.load %arg22[%c217, %c0_38] : memref<342x32xbf16, #tpu.memory_space<vmem>>, vector<16x32xbf16>
    tpu.vector_store %arg22[%c217, %c0_38], %91 {strides = array<i32>} : memref<342x32xbf16, #tpu.memory_space<vmem>>, vector<16x32xbf16>,
    %93 = vector.extract_strided_slice %32 {offsets = [384, 0], sizes = [16, 32], strides = [1, 1]} : vector<512x32xf32> to vector<16x32xf32>
    %94 = vector.extract_strided_slice %32 {offsets = [400, 0], sizes = [16, 32], strides = [1, 1]} : vector<512x32xf32> to vector<16x32xf32>
    %95 = arith.maximumf %93, %94 : vector<16x32xf32>
    %96 = arith.truncf %95 : vector<16x32xf32> to vector<16x32xbf16>
    %c235 = arith.constant 235 : index
    %c0_39 = arith.constant 0 : index
    %97 = vector.load %arg22[%c235, %c0_39] : memref<342x32xbf16, #tpu.memory_space<vmem>>, vector<16x32xbf16>
    tpu.vector_store %arg22[%c235, %c0_39], %96 {strides = array<i32>} : memref<342x32xbf16, #tpu.memory_space<vmem>>, vector<16x32xbf16>,
    %98 = vector.extract_strided_slice %32 {offsets = [416, 0], sizes = [16, 32], strides = [1, 1]} : vector<512x32xf32> to vector<16x32xf32>
    %99 = vector.extract_strided_slice %32 {offsets = [432, 0], sizes = [16, 32], strides = [1, 1]} : vector<512x32xf32> to vector<16x32xf32>
    %100 = arith.maximumf %98, %99 : vector<16x32xf32>
    %101 = arith.truncf %100 : vector<16x32xf32> to vector<16x32xbf16>
    %c253 = arith.constant 253 : index
    %c0_40 = arith.constant 0 : index
    %102 = vector.load %arg22[%c253, %c0_40] : memref<342x32xbf16, #tpu.memory_space<vmem>>, vector<16x32xbf16>
    tpu.vector_store %arg22[%c253, %c0_40], %101 {strides = array<i32>} : memref<342x32xbf16, #tpu.memory_space<vmem>>, vector<16x32xbf16>,
    %103 = vector.extract_strided_slice %32 {offsets = [448, 0], sizes = [16, 32], strides = [1, 1]} : vector<512x32xf32> to vector<16x32xf32>
    %104 = vector.extract_strided_slice %32 {offsets = [464, 0], sizes = [16, 32], strides = [1, 1]} : vector<512x32xf32> to vector<16x32xf32>
    %105 = arith.maximumf %103, %104 : vector<16x32xf32>
    %106 = arith.truncf %105 : vector<16x32xf32> to vector<16x32xbf16>
    %c271 = arith.constant 271 : index
    %c0_41 = arith.constant 0 : index
    %107 = vector.load %arg22[%c271, %c0_41] : memref<342x32xbf16, #tpu.memory_space<vmem>>, vector<16x32xbf16>
    tpu.vector_store %arg22[%c271, %c0_41], %106 {strides = array<i32>} : memref<342x32xbf16, #tpu.memory_space<vmem>>, vector<16x32xbf16>,
    %108 = vector.extract_strided_slice %32 {offsets = [480, 0], sizes = [16, 32], strides = [1, 1]} : vector<512x32xf32> to vector<16x32xf32>
    %109 = vector.extract_strided_slice %32 {offsets = [496, 0], sizes = [16, 32], strides = [1, 1]} : vector<512x32xf32> to vector<16x32xf32>
    %110 = arith.maximumf %108, %109 : vector<16x32xf32>
    %111 = arith.truncf %110 : vector<16x32xf32> to vector<16x32xbf16>
    %c289 = arith.constant 289 : index
    %c0_42 = arith.constant 0 : index
    %112 = vector.load %arg22[%c289, %c0_42] : memref<342x32xbf16, #tpu.memory_space<vmem>>, vector<16x32xbf16>
    tpu.vector_store %arg22[%c289, %c0_42], %111 {strides = array<i32>} : memref<342x32xbf16, #tpu.memory_space<vmem>>, vector<16x32xbf16>,
    %c0_43 = arith.constant 0 : index
    %c0_44 = arith.constant 0 : index
    %113 = vector.load %arg22[%c0_43, %c0_44] : memref<342x32xbf16, #tpu.memory_space<vmem>>, vector<288x32xbf16>
    %c1_45 = arith.constant 1 : index
    %c0_46 = arith.constant 0 : index
    %114 = vector.load %arg22[%c1_45, %c0_46] : memref<342x32xbf16, #tpu.memory_space<vmem>>, vector<288x32xbf16>
    %c2 = arith.constant 2 : index
    %c0_47 = arith.constant 0 : index
    %115 = vector.load %arg22[%c2, %c0_47] : memref<342x32xbf16, #tpu.memory_space<vmem>>, vector<288x32xbf16>
    %c18 = arith.constant 18 : index
    %c0_48 = arith.constant 0 : index
    %116 = vector.load %arg22[%c18, %c0_48] : memref<342x32xbf16, #tpu.memory_space<vmem>>, vector<288x32xbf16>
    %c19_49 = arith.constant 19 : index
    %c0_50 = arith.constant 0 : index
    %117 = vector.load %arg22[%c19_49, %c0_50] : memref<342x32xbf16, #tpu.memory_space<vmem>>, vector<288x32xbf16>
    %c20 = arith.constant 20 : index
    %c0_51 = arith.constant 0 : index
    %118 = vector.load %arg22[%c20, %c0_51] : memref<342x32xbf16, #tpu.memory_space<vmem>>, vector<288x32xbf16>
    %c36 = arith.constant 36 : index
    %c0_52 = arith.constant 0 : index
    %119 = vector.load %arg22[%c36, %c0_52] : memref<342x32xbf16, #tpu.memory_space<vmem>>, vector<288x32xbf16>
    %c37_53 = arith.constant 37 : index
    %c0_54 = arith.constant 0 : index
    %120 = vector.load %arg22[%c37_53, %c0_54] : memref<342x32xbf16, #tpu.memory_space<vmem>>, vector<288x32xbf16>
    %c38 = arith.constant 38 : index
    %c0_55 = arith.constant 0 : index
    %121 = vector.load %arg22[%c38, %c0_55] : memref<342x32xbf16, #tpu.memory_space<vmem>>, vector<288x32xbf16>
    %122 = tpu.concatenate %113, %114, %115, %116, %117, %118, %119, %120, %121 in 1 : vector<288x32xbf16>, vector<288x32xbf16>, vector<288x32xbf16>, vector<288x32xbf16>, vector<288x32xbf16>, vector<288x32xbf16>, vector<288x32xbf16>, vector<288x32xbf16>, vector<288x32xbf16> -> vector<288x288xbf16>
    %c0_56 = arith.constant 0 : index
    %c0_57 = arith.constant 0 : index
    %123 = vector.load %arg8[%c0_56, %c0_57] : memref<288x64xbf16, #tpu.memory_space<vmem>>, vector<288x64xbf16>
    %cst_58 = arith.constant dense<0.000000e+00> : vector<288x64xf32>
    %124 = tpu.matmul %122, %123, %cst_58 {dimension_numbers = #tpu.dot_dimension_numbers<[1], [0], [0], [1], [0, 0, 1, 1], [], []>} : vector<288x288xbf16>, vector<288x64xbf16>, vector<288x64xf32> -> vector<288x64xf32>
    %c0_59 = arith.constant 0 : index
    %c0_60 = arith.constant 0 : index
    %125 = vector.load %arg9[%c0_59, %c0_60] : memref<1x64xf32, #tpu.memory_space<vmem>>, vector<1x64xf32>
    %126 = vector.broadcast %125 : vector<1x64xf32> to vector<288x64xf32>
    %127 = arith.addf %124, %126 : vector<288x64xf32>
    %cst_61 = arith.constant 0.000000e+00 : f32
    %128 = vector.broadcast %cst_61 : f32 to vector<288x64xf32>
    %129 = arith.maximumf %127, %128 : vector<288x64xf32>
    %130 = arith.truncf %129 : vector<288x64xf32> to vector<288x64xbf16>
    %c0_62 = arith.constant 0 : index
    %c0_63 = arith.constant 0 : index
    %131 = vector.load %arg10[%c0_62, %c0_63] : memref<64x64xbf16, #tpu.memory_space<vmem>>, vector<64x64xbf16>
    %cst_64 = arith.constant dense<0.000000e+00> : vector<288x64xf32>
    %132 = tpu.matmul %130, %131, %cst_64 {dimension_numbers = #tpu.dot_dimension_numbers<[1], [0], [0], [1], [0, 0, 1, 1], [], []>} : vector<288x64xbf16>, vector<64x64xbf16>, vector<288x64xf32> -> vector<288x64xf32>
    %c0_65 = arith.constant 0 : index
    %c0_66 = arith.constant 0 : index
    %133 = vector.load %arg11[%c0_65, %c0_66] : memref<1x64xf32, #tpu.memory_space<vmem>>, vector<1x64xf32>
    %134 = vector.broadcast %133 : vector<1x64xf32> to vector<288x64xf32>
    %135 = arith.addf %132, %134 : vector<288x64xf32>
    %cst_67 = arith.constant 0.000000e+00 : f32
    %136 = vector.broadcast %cst_67 : f32 to vector<288x64xf32>
    %137 = arith.maximumf %135, %136 : vector<288x64xf32>
    %138 = arith.truncf %137 : vector<288x64xf32> to vector<288x64xbf16>
    %c0_68 = arith.constant 0 : index
    %c0_69 = arith.constant 0 : index
    %139 = vector.load %arg12[%c0_68, %c0_69] : memref<64x64xbf16, #tpu.memory_space<vmem>>, vector<64x64xbf16>
    %cst_70 = arith.constant dense<0.000000e+00> : vector<288x64xf32>
    %140 = tpu.matmul %138, %139, %cst_70 {dimension_numbers = #tpu.dot_dimension_numbers<[1], [0], [0], [1], [0, 0, 1, 1], [], []>} : vector<288x64xbf16>, vector<64x64xbf16>, vector<288x64xf32> -> vector<288x64xf32>
    %c0_71 = arith.constant 0 : index
    %c0_72 = arith.constant 0 : index
    %141 = vector.load %arg13[%c0_71, %c0_72] : memref<1x64xf32, #tpu.memory_space<vmem>>, vector<1x64xf32>
    %142 = vector.broadcast %141 : vector<1x64xf32> to vector<288x64xf32>
    %143 = arith.addf %140, %142 : vector<288x64xf32>
    %cst_73 = arith.constant 0.000000e+00 : f32
    %144 = vector.broadcast %cst_73 : f32 to vector<288x64xf32>
    %145 = arith.maximumf %143, %144 : vector<288x64xf32>
    %146 = arith.truncf %145 : vector<288x64xf32> to vector<288x64xbf16>
    %147 = arith.extf %146 : vector<288x64xbf16> to vector<288x64xf32>
    %c0_74 = arith.constant 0 : index
    %c0_75 = arith.constant 0 : index
    %148 = vector.load %arg23[%c0_74, %c0_75] : memref<288x64xf32, #tpu.memory_space<vmem>>, vector<288x64xf32>
    tpu.vector_store %arg23[%c0_74, %c0_75], %147 {strides = array<i32>} : memref<288x64xf32, #tpu.memory_space<vmem>>, vector<288x64xf32>,
    %cst_76 = arith.constant 0.000000e+00 : bf16
    %149 = vector.broadcast %cst_76 : bf16 to vector<110x64xbf16>
    %c0_77 = arith.constant 0 : index
    %c0_78 = arith.constant 0 : index
    %150 = vector.load %arg24[%c0_77, %c0_78] : memref<110x64xbf16, #tpu.memory_space<vmem>>, vector<110x64xbf16>
    tpu.vector_store %arg24[%c0_77, %c0_78], %149 {strides = array<i32>} : memref<110x64xbf16, #tpu.memory_space<vmem>>, vector<110x64xbf16>,
    %c0_79 = arith.constant 0 : index
    %c0_80 = arith.constant 0 : index
    %151 = tpu.strided_load %arg23[%c0_79, %c0_80] {strides = array<i32: 2, 1>} : memref<288x64xf32, #tpu.memory_space<vmem>>, vector<144x64xf32>
    %c1_81 = arith.constant 1 : index
    %c0_82 = arith.constant 0 : index
    %152 = tpu.strided_load %arg23[%c1_81, %c0_82] {strides = array<i32: 2, 1>} : memref<288x64xf32, #tpu.memory_space<vmem>>, vector<144x64xf32>
    %153 = arith.maximumf %151, %152 : vector<144x64xf32>
    %154 = vector.extract_strided_slice %153 {offsets = [0, 0], sizes = [8, 64], strides = [1, 1]} : vector<144x64xf32> to vector<8x64xf32>
    %155 = vector.extract_strided_slice %153 {offsets = [9, 0], sizes = [8, 64], strides = [1, 1]} : vector<144x64xf32> to vector<8x64xf32>
    %156 = arith.maximumf %154, %155 : vector<8x64xf32>
    %157 = arith.truncf %156 : vector<8x64xf32> to vector<8x64xbf16>
    %c11 = arith.constant 11 : index
    %c0_83 = arith.constant 0 : index
    %158 = vector.load %arg24[%c11, %c0_83] : memref<110x64xbf16, #tpu.memory_space<vmem>>, vector<8x64xbf16>
    tpu.vector_store %arg24[%c11, %c0_83], %157 {strides = array<i32>} : memref<110x64xbf16, #tpu.memory_space<vmem>>, vector<8x64xbf16>,
    %159 = vector.extract_strided_slice %153 {offsets = [18, 0], sizes = [8, 64], strides = [1, 1]} : vector<144x64xf32> to vector<8x64xf32>
    %160 = vector.extract_strided_slice %153 {offsets = [27, 0], sizes = [8, 64], strides = [1, 1]} : vector<144x64xf32> to vector<8x64xf32>
    %161 = arith.maximumf %159, %160 : vector<8x64xf32>
    %162 = arith.truncf %161 : vector<8x64xf32> to vector<8x64xbf16>
    %c21 = arith.constant 21 : index
    %c0_84 = arith.constant 0 : index
    %163 = vector.load %arg24[%c21, %c0_84] : memref<110x64xbf16, #tpu.memory_space<vmem>>, vector<8x64xbf16>
    tpu.vector_store %arg24[%c21, %c0_84], %162 {strides = array<i32>} : memref<110x64xbf16, #tpu.memory_space<vmem>>, vector<8x64xbf16>,
    %164 = vector.extract_strided_slice %153 {offsets = [36, 0], sizes = [8, 64], strides = [1, 1]} : vector<144x64xf32> to vector<8x64xf32>
    %165 = vector.extract_strided_slice %153 {offsets = [45, 0], sizes = [8, 64], strides = [1, 1]} : vector<144x64xf32> to vector<8x64xf32>
    %166 = arith.maximumf %164, %165 : vector<8x64xf32>
    %167 = arith.truncf %166 : vector<8x64xf32> to vector<8x64xbf16>
    %c31 = arith.constant 31 : index
    %c0_85 = arith.constant 0 : index
    %168 = vector.load %arg24[%c31, %c0_85] : memref<110x64xbf16, #tpu.memory_space<vmem>>, vector<8x64xbf16>
    tpu.vector_store %arg24[%c31, %c0_85], %167 {strides = array<i32>} : memref<110x64xbf16, #tpu.memory_space<vmem>>, vector<8x64xbf16>,
    %169 = vector.extract_strided_slice %153 {offsets = [54, 0], sizes = [8, 64], strides = [1, 1]} : vector<144x64xf32> to vector<8x64xf32>
    %170 = vector.extract_strided_slice %153 {offsets = [63, 0], sizes = [8, 64], strides = [1, 1]} : vector<144x64xf32> to vector<8x64xf32>
    %171 = arith.maximumf %169, %170 : vector<8x64xf32>
    %172 = arith.truncf %171 : vector<8x64xf32> to vector<8x64xbf16>
    %c41 = arith.constant 41 : index
    %c0_86 = arith.constant 0 : index
    %173 = vector.load %arg24[%c41, %c0_86] : memref<110x64xbf16, #tpu.memory_space<vmem>>, vector<8x64xbf16>
    tpu.vector_store %arg24[%c41, %c0_86], %172 {strides = array<i32>} : memref<110x64xbf16, #tpu.memory_space<vmem>>, vector<8x64xbf16>,
    %174 = vector.extract_strided_slice %153 {offsets = [72, 0], sizes = [8, 64], strides = [1, 1]} : vector<144x64xf32> to vector<8x64xf32>
    %175 = vector.extract_strided_slice %153 {offsets = [81, 0], sizes = [8, 64], strides = [1, 1]} : vector<144x64xf32> to vector<8x64xf32>
    %176 = arith.maximumf %174, %175 : vector<8x64xf32>
    %177 = arith.truncf %176 : vector<8x64xf32> to vector<8x64xbf16>
    %c51 = arith.constant 51 : index
    %c0_87 = arith.constant 0 : index
    %178 = vector.load %arg24[%c51, %c0_87] : memref<110x64xbf16, #tpu.memory_space<vmem>>, vector<8x64xbf16>
    tpu.vector_store %arg24[%c51, %c0_87], %177 {strides = array<i32>} : memref<110x64xbf16, #tpu.memory_space<vmem>>, vector<8x64xbf16>,
    %179 = vector.extract_strided_slice %153 {offsets = [90, 0], sizes = [8, 64], strides = [1, 1]} : vector<144x64xf32> to vector<8x64xf32>
    %180 = vector.extract_strided_slice %153 {offsets = [99, 0], sizes = [8, 64], strides = [1, 1]} : vector<144x64xf32> to vector<8x64xf32>
    %181 = arith.maximumf %179, %180 : vector<8x64xf32>
    %182 = arith.truncf %181 : vector<8x64xf32> to vector<8x64xbf16>
    %c61 = arith.constant 61 : index
    %c0_88 = arith.constant 0 : index
    %183 = vector.load %arg24[%c61, %c0_88] : memref<110x64xbf16, #tpu.memory_space<vmem>>, vector<8x64xbf16>
    tpu.vector_store %arg24[%c61, %c0_88], %182 {strides = array<i32>} : memref<110x64xbf16, #tpu.memory_space<vmem>>, vector<8x64xbf16>,
    %184 = vector.extract_strided_slice %153 {offsets = [108, 0], sizes = [8, 64], strides = [1, 1]} : vector<144x64xf32> to vector<8x64xf32>
    %185 = vector.extract_strided_slice %153 {offsets = [117, 0], sizes = [8, 64], strides = [1, 1]} : vector<144x64xf32> to vector<8x64xf32>
    %186 = arith.maximumf %184, %185 : vector<8x64xf32>
    %187 = arith.truncf %186 : vector<8x64xf32> to vector<8x64xbf16>
    %c71 = arith.constant 71 : index
    %c0_89 = arith.constant 0 : index
    %188 = vector.load %arg24[%c71, %c0_89] : memref<110x64xbf16, #tpu.memory_space<vmem>>, vector<8x64xbf16>
    tpu.vector_store %arg24[%c71, %c0_89], %187 {strides = array<i32>} : memref<110x64xbf16, #tpu.memory_space<vmem>>, vector<8x64xbf16>,
    %189 = vector.extract_strided_slice %153 {offsets = [126, 0], sizes = [8, 64], strides = [1, 1]} : vector<144x64xf32> to vector<8x64xf32>
    %190 = vector.extract_strided_slice %153 {offsets = [135, 0], sizes = [8, 64], strides = [1, 1]} : vector<144x64xf32> to vector<8x64xf32>
    %191 = arith.maximumf %189, %190 : vector<8x64xf32>
    %192 = arith.truncf %191 : vector<8x64xf32> to vector<8x64xbf16>
    %c81 = arith.constant 81 : index
    %c0_90 = arith.constant 0 : index
    %193 = vector.load %arg24[%c81, %c0_90] : memref<110x64xbf16, #tpu.memory_space<vmem>>, vector<8x64xbf16>
    tpu.vector_store %arg24[%c81, %c0_90], %192 {strides = array<i32>} : memref<110x64xbf16, #tpu.memory_space<vmem>>, vector<8x64xbf16>,
    %c0_91 = arith.constant 0 : index
    %c0_92 = arith.constant 0 : index
    %194 = vector.load %arg24[%c0_91, %c0_92] : memref<110x64xbf16, #tpu.memory_space<vmem>>, vector<80x64xbf16>
    %c1_93 = arith.constant 1 : index
    %c0_94 = arith.constant 0 : index
    %195 = vector.load %arg24[%c1_93, %c0_94] : memref<110x64xbf16, #tpu.memory_space<vmem>>, vector<80x64xbf16>
    %c2_95 = arith.constant 2 : index
    %c0_96 = arith.constant 0 : index
    %196 = vector.load %arg24[%c2_95, %c0_96] : memref<110x64xbf16, #tpu.memory_space<vmem>>, vector<80x64xbf16>
    %c10 = arith.constant 10 : index
    %c0_97 = arith.constant 0 : index
    %197 = vector.load %arg24[%c10, %c0_97] : memref<110x64xbf16, #tpu.memory_space<vmem>>, vector<80x64xbf16>
    %c11_98 = arith.constant 11 : index
    %c0_99 = arith.constant 0 : index
    %198 = vector.load %arg24[%c11_98, %c0_99] : memref<110x64xbf16, #tpu.memory_space<vmem>>, vector<80x64xbf16>
    %c12 = arith.constant 12 : index
    %c0_100 = arith.constant 0 : index
    %199 = vector.load %arg24[%c12, %c0_100] : memref<110x64xbf16, #tpu.memory_space<vmem>>, vector<80x64xbf16>
    %c20_101 = arith.constant 20 : index
    %c0_102 = arith.constant 0 : index
    %200 = vector.load %arg24[%c20_101, %c0_102] : memref<110x64xbf16, #tpu.memory_space<vmem>>, vector<80x64xbf16>
    %c21_103 = arith.constant 21 : index
    %c0_104 = arith.constant 0 : index
    %201 = vector.load %arg24[%c21_103, %c0_104] : memref<110x64xbf16, #tpu.memory_space<vmem>>, vector<80x64xbf16>
    %c22 = arith.constant 22 : index
    %c0_105 = arith.constant 0 : index
    %202 = vector.load %arg24[%c22, %c0_105] : memref<110x64xbf16, #tpu.memory_space<vmem>>, vector<80x64xbf16>
    %203 = tpu.concatenate %194, %195, %196, %197, %198, %199, %200, %201, %202 in 1 : vector<80x64xbf16>, vector<80x64xbf16>, vector<80x64xbf16>, vector<80x64xbf16>, vector<80x64xbf16>, vector<80x64xbf16>, vector<80x64xbf16>, vector<80x64xbf16>, vector<80x64xbf16> -> vector<80x576xbf16>
    %c0_106 = arith.constant 0 : index
    %c0_107 = arith.constant 0 : index
    %204 = vector.load %arg14[%c0_106, %c0_107] : memref<576x128xbf16, #tpu.memory_space<vmem>>, vector<576x128xbf16>
    %cst_108 = arith.constant dense<0.000000e+00> : vector<80x128xf32>
    %205 = tpu.matmul %203, %204, %cst_108 {dimension_numbers = #tpu.dot_dimension_numbers<[1], [0], [0], [1], [0, 0, 1, 1], [], []>} : vector<80x576xbf16>, vector<576x128xbf16>, vector<80x128xf32> -> vector<80x128xf32>
    %c0_109 = arith.constant 0 : index
    %c0_110 = arith.constant 0 : index
    %206 = vector.load %arg15[%c0_109, %c0_110] : memref<1x128xf32, #tpu.memory_space<vmem>>, vector<1x128xf32>
    %207 = vector.broadcast %206 : vector<1x128xf32> to vector<80x128xf32>
    %208 = arith.addf %205, %207 : vector<80x128xf32>
    %cst_111 = arith.constant 0.000000e+00 : f32
    %209 = vector.broadcast %cst_111 : f32 to vector<80x128xf32>
    %210 = arith.maximumf %208, %209 : vector<80x128xf32>
    %211 = arith.truncf %210 : vector<80x128xf32> to vector<80x128xbf16>
    %c0_112 = arith.constant 0 : index
    %c0_113 = arith.constant 0 : index
    %212 = vector.load %arg16[%c0_112, %c0_113] : memref<128x128xbf16, #tpu.memory_space<vmem>>, vector<128x128xbf16>
    %cst_114 = arith.constant dense<0.000000e+00> : vector<80x128xf32>
    %213 = tpu.matmul %211, %212, %cst_114 {dimension_numbers = #tpu.dot_dimension_numbers<[1], [0], [0], [1], [0, 0, 1, 1], [], []>} : vector<80x128xbf16>, vector<128x128xbf16>, vector<80x128xf32> -> vector<80x128xf32>
    %c0_115 = arith.constant 0 : index
    %c0_116 = arith.constant 0 : index
    %214 = vector.load %arg17[%c0_115, %c0_116] : memref<1x128xf32, #tpu.memory_space<vmem>>, vector<1x128xf32>
    %215 = vector.broadcast %214 : vector<1x128xf32> to vector<80x128xf32>
    %216 = arith.addf %213, %215 : vector<80x128xf32>
    %cst_117 = arith.constant 0.000000e+00 : f32
    %217 = vector.broadcast %cst_117 : f32 to vector<80x128xf32>
    %218 = arith.maximumf %216, %217 : vector<80x128xf32>
    %219 = arith.truncf %218 : vector<80x128xf32> to vector<80x128xbf16>
    %c0_118 = arith.constant 0 : index
    %c0_119 = arith.constant 0 : index
    %220 = vector.load %arg18[%c0_118, %c0_119] : memref<128x10xbf16, #tpu.memory_space<vmem>>, vector<128x10xbf16>
    %cst_120 = arith.constant dense<0.000000e+00> : vector<80x10xf32>
    %221 = tpu.matmul %219, %220, %cst_120 {dimension_numbers = #tpu.dot_dimension_numbers<[1], [0], [0], [1], [0, 0, 1, 1], [], []>} : vector<80x128xbf16>, vector<128x10xbf16>, vector<80x10xf32> -> vector<80x10xf32>
    %c0_121 = arith.constant 0 : index
    %c0_122 = arith.constant 0 : index
    %222 = vector.load %arg19[%c0_121, %c0_122] : memref<1x10xf32, #tpu.memory_space<vmem>>, vector<1x10xf32>
    %223 = vector.broadcast %222 : vector<1x10xf32> to vector<80x10xf32>
    %224 = arith.addf %221, %223 : vector<80x10xf32>
    %cst_123 = arith.constant 0.000000e+00 : f32
    %225 = vector.broadcast %cst_123 : f32 to vector<80x10xf32>
    %226 = arith.maximumf %224, %225 : vector<80x10xf32>
    %227 = arith.truncf %226 : vector<80x10xf32> to vector<80x10xbf16>
    %228 = arith.extf %227 : vector<80x10xbf16> to vector<80x10xf32>
    %229 = tpu.iota {dimensions = array<i32: 0>} : vector<80x10xi32>
    %c10_i32 = arith.constant 10 : i32
    %c0_i32 = arith.constant 0 : i32
    %230 = arith.cmpi eq, %c10_i32, %c0_i32 : i32
    %c1_i32 = arith.constant 1 : i32
    %231 = arith.select %230, %c1_i32, %c10_i32 : i32
    %232 = vector.broadcast %231 : i32 to vector<80x10xi32>
    %233 = arith.remsi %229, %232 : vector<80x10xi32>
    %c0_i32_124 = arith.constant 0 : i32
    %234 = vector.broadcast %c0_i32_124 : i32 to vector<80x10xi32>
    %235 = arith.cmpi ne, %233, %234 : vector<80x10xi32>
    %c0_i32_125 = arith.constant 0 : i32
    %236 = vector.broadcast %c0_i32_125 : i32 to vector<80x10xi32>
    %237 = arith.cmpi slt, %233, %236 : vector<80x10xi32>
    %c0_i32_126 = arith.constant 0 : i32
    %238 = arith.cmpi slt, %231, %c0_i32_126 : i32
    %239 = vector.broadcast %238 : i1 to vector<80x10xi1>
    %240 = vector.broadcast %239 : vector<80x10xi1> to vector<80x10xi1>
    %241 = arith.xori %237, %240 : vector<80x10xi1>
    %242 = arith.andi %241, %235 : vector<80x10xi1>
    %243 = vector.broadcast %231 : i32 to vector<80x10xi32>
    %244 = arith.addi %233, %243 : vector<80x10xi32>
    %245 = arith.select %242, %244, %233 : vector<80x10xi1>, vector<80x10xi32>
    %c8_i32 = arith.constant 8 : i32
    %246 = vector.broadcast %c8_i32 : i32 to vector<80x10xi32>
    %247 = arith.cmpi slt, %245, %246 : vector<80x10xi32>
    %cst_127 = arith.constant 0.000000e+00 : f32
    %248 = vector.broadcast %cst_127 : f32 to vector<80x10xf32>
    %249 = arith.select %247, %228, %248 : vector<80x10xi1>, vector<80x10xf32>
    %cst_128 = arith.constant dense<0.000000e+00> : vector<10xf32>
    %250 = vector.multi_reduction <add>, %249, %cst_128 [0] : vector<80x10xf32> to vector<10xf32>
    %251 = vector.shape_cast %250 : vector<10xf32> to vector<1x10xf32>
    %cst_129 = arith.constant 1.562500e-02 : f32
    %252 = vector.broadcast %cst_129 : f32 to vector<1x10xf32>
    %253 = arith.mulf %251, %252 : vector<1x10xf32>
    %c0_130 = arith.constant 0 : index
    %c0_131 = arith.constant 0 : index
    %c0_132 = arith.constant 0 : index
    %254 = vector.load %arg20[%c0_130, %c0_131, %c0_132] : memref<1x1x10xf32, #tpu.memory_space<vmem>>, vector<1x1x10xf32>
    %255 = vector.shape_cast %254 : vector<1x1x10xf32> to vector<1x10xf32>
    %256 = vector.shape_cast %253 : vector<1x10xf32> to vector<1x1x10xf32>
    tpu.vector_store %arg20[%c0_130, %c0_131, %c0_132], %256 {strides = array<i32>} : memref<1x1x10xf32, #tpu.memory_space<vmem>>, vector<1x1x10xf32>,
    return
  }
  func.func @transform_0(%arg0: i32) -> (i32, i32, i32) {
    %c0_i32 = arith.constant 0 : i32
    %c0_i32_0 = arith.constant 0 : i32
    %c0_i32_1 = arith.constant 0 : i32
    return %arg0, %c0_i32, %c0_i32_0 : i32, i32, i32
  }
  func.func @transform_1(%arg0: i32) -> (i32, i32) {
    %c0_i32 = arith.constant 0 : i32
    %c0_i32_0 = arith.constant 0 : i32
    %c0_i32_1 = arith.constant 0 : i32
    return %c0_i32, %c0_i32_0 : i32, i32
  }
  func.func @transform_2(%arg0: i32) -> (i32, i32) {
    %c0_i32 = arith.constant 0 : i32
    %c0_i32_0 = arith.constant 0 : i32
    %c0_i32_1 = arith.constant 0 : i32
    return %c0_i32, %c0_i32_0 : i32, i32
  }
  func.func @transform_3(%arg0: i32) -> (i32, i32) {
    %c0_i32 = arith.constant 0 : i32
    %c0_i32_0 = arith.constant 0 : i32
    %c0_i32_1 = arith.constant 0 : i32
    return %c0_i32, %c0_i32_0 : i32, i32
  }
  func.func @transform_4(%arg0: i32) -> (i32, i32) {
    %c0_i32 = arith.constant 0 : i32
    %c0_i32_0 = arith.constant 0 : i32
    %c0_i32_1 = arith.constant 0 : i32
    return %c0_i32, %c0_i32_0 : i32, i32
  }
  func.func @transform_5(%arg0: i32) -> (i32, i32) {
    %c0_i32 = arith.constant 0 : i32
    %c0_i32_0 = arith.constant 0 : i32
    %c0_i32_1 = arith.constant 0 : i32
    return %c0_i32, %c0_i32_0 : i32, i32
  }
  func.func @transform_6(%arg0: i32) -> (i32, i32) {
    %c0_i32 = arith.constant 0 : i32
    %c0_i32_0 = arith.constant 0 : i32
    %c0_i32_1 = arith.constant 0 : i32
    return %c0_i32, %c0_i32_0 : i32, i32
  }
  func.func @transform_7(%arg0: i32) -> (i32, i32) {
    %c0_i32 = arith.constant 0 : i32
    %c0_i32_0 = arith.constant 0 : i32
    %c0_i32_1 = arith.constant 0 : i32
    return %c0_i32, %c0_i32_0 : i32, i32
  }
  func.func @transform_8(%arg0: i32) -> (i32, i32) {
    %c0_i32 = arith.constant 0 : i32
    %c0_i32_0 = arith.constant 0 : i32
    %c0_i32_1 = arith.constant 0 : i32
    return %c0_i32, %c0_i32_0 : i32, i32
  }
  func.func @transform_9(%arg0: i32) -> (i32, i32) {
    %c0_i32 = arith.constant 0 : i32
    %c0_i32_0 = arith.constant 0 : i32
    %c0_i32_1 = arith.constant 0 : i32
    return %c0_i32, %c0_i32_0 : i32, i32
  }
  func.func @transform_10(%arg0: i32) -> (i32, i32) {
    %c0_i32 = arith.constant 0 : i32
    %c0_i32_0 = arith.constant 0 : i32
    %c0_i32_1 = arith.constant 0 : i32
    return %c0_i32, %c0_i32_0 : i32, i32
  }
  func.func @transform_11(%arg0: i32) -> (i32, i32) {
    %c0_i32 = arith.constant 0 : i32
    %c0_i32_0 = arith.constant 0 : i32
    %c0_i32_1 = arith.constant 0 : i32
    return %c0_i32, %c0_i32_0 : i32, i32
  }
  func.func @transform_12(%arg0: i32) -> (i32, i32) {
    %c0_i32 = arith.constant 0 : i32
    %c0_i32_0 = arith.constant 0 : i32
    %c0_i32_1 = arith.constant 0 : i32
    return %c0_i32, %c0_i32_0 : i32, i32
  }
  func.func @transform_13(%arg0: i32) -> (i32, i32) {
    %c0_i32 = arith.constant 0 : i32
    %c0_i32_0 = arith.constant 0 : i32
    %c0_i32_1 = arith.constant 0 : i32
    return %c0_i32, %c0_i32_0 : i32, i32
  }
  func.func @transform_14(%arg0: i32) -> (i32, i32) {
    %c0_i32 = arith.constant 0 : i32
    %c0_i32_0 = arith.constant 0 : i32
    %c0_i32_1 = arith.constant 0 : i32
    return %c0_i32, %c0_i32_0 : i32, i32
  }
  func.func @transform_15(%arg0: i32) -> (i32, i32) {
    %c0_i32 = arith.constant 0 : i32
    %c0_i32_0 = arith.constant 0 : i32
    %c0_i32_1 = arith.constant 0 : i32
    return %c0_i32, %c0_i32_0 : i32, i32
  }
  func.func @transform_16(%arg0: i32) -> (i32, i32) {
    %c0_i32 = arith.constant 0 : i32
    %c0_i32_0 = arith.constant 0 : i32
    %c0_i32_1 = arith.constant 0 : i32
    return %c0_i32, %c0_i32_0 : i32, i32
  }
  func.func @transform_17(%arg0: i32) -> (i32, i32) {
    %c0_i32 = arith.constant 0 : i32
    %c0_i32_0 = arith.constant 0 : i32
    %c0_i32_1 = arith.constant 0 : i32
    return %c0_i32, %c0_i32_0 : i32, i32
  }
  func.func @transform_18(%arg0: i32) -> (i32, i32) {
    %c0_i32 = arith.constant 0 : i32
    %c0_i32_0 = arith.constant 0 : i32
    %c0_i32_1 = arith.constant 0 : i32
    return %c0_i32, %c0_i32_0 : i32, i32
  }
  func.func @transform_19(%arg0: i32) -> (i32, i32, i32) {
    %c0_i32 = arith.constant 0 : i32
    %c0_i32_0 = arith.constant 0 : i32
    %c0_i32_1 = arith.constant 0 : i32
    return %arg0, %c0_i32, %c0_i32_0 : i32, i32, i32
  }
}

</mosaic_0001>

<bundles_post_ra>
// kernel: net_forward.1
= control target key start
LH: loop header
LB: loop body
LE: loop exit
PB: predicated region body
PF: predicated region fallthrough
CT: control target
= control target key end

     0   :  { %s15629_s0 = inlined_call_operand.vmem [shape: bf16[2,1024,75], index: 0, kind: input, shape index: {}]   ;;  %s15630_s1 = inlined_call_operand.vmem [shape: bf16[75,32], index: 1, kind: input, shape index: {}]   ;;  %s15631_s2 = inlined_call_operand.vmem [shape: f32[1,32], index: 2, kind: input, shape index: {}]   ;;  %s15632_s3 = inlined_call_operand.vmem [shape: bf16[32,32], index: 3, kind: input, shape index: {}]   ;;  %s15633_s4 = inlined_call_operand.vmem [shape: f32[1,32], index: 4, kind: input, shape index: {}]   ;;  %s15634_s5 = inlined_call_operand.vmem [shape: bf16[32,32], index: 5, kind: input, shape index: {}]   ;;  %s15635_s6 = inlined_call_operand.vmem [shape: f32[1,32], index: 6, kind: input, shape index: {}]   ;;  %s15636_s7 = inlined_call_operand.vmem [shape: bf16[288,64], index: 7, kind: input, shape index: {}]   ;;  %s15637_s8 = inlined_call_operand.vmem [shape: f32[1,64], index: 8, kind: input, shape index: {}]   ;;  %s15638_s9 = inlined_call_operand.vmem [shape: bf16[64,64], index: 9, kind: input, shape index: {}]   ;;  %s15639_s10 = inlined_call_operand.vmem [shape: f32[1,64], index: 10, kind: input, shape index: {}]   ;;  %s15640_s11 = inlined_call_operand.vmem [shape: bf16[64,64], index: 11, kind: input, shape index: {}]   ;;  %s15641_s12 = inlined_call_operand.vmem [shape: f32[1,64], index: 12, kind: input, shape index: {}]   ;;  %s15642_s13 = inlined_call_operand.vmem [shape: bf16[576,128], index: 13, kind: input, shape index: {}]   ;;  %s15643_s14 = inlined_call_operand.vmem [shape: f32[1,128], index: 14, kind: input, shape index: {}]   ;;  %s15644_s15 = inlined_call_operand.vmem [shape: bf16[128,128], index: 15, kind: input, shape index: {}]   ;;  %s15645_s16 = inlined_call_operand.vmem [shape: f32[1,128], index: 16, kind: input, shape index: {}]   ;;  %s15646_s17 = inlined_call_operand.vmem [shape: bf16[128,10], index: 17, kind: input, shape index: {}]   ;;  %s15647_s18 = inlined_call_operand.vmem [shape: f32[1,10], index: 18, kind: input, shape index: {}]   ;;  %s15648_s19 = inlined_call_operand.hbm [shape: f32[2,1,10], index: 19, kind: output, shape index: {}]  }
   0x1   :  { %15703 = sst [smem:[#allocation27_spill]] %s15629_s0 }
   0x2   :  { %15704 = sst [smem:[#allocation28_spill]] %s15630_s1 }
   0x3   :  { %15705 = sst [smem:[#allocation29_spill]] %s15631_s2 }
   0x4   :  { %15706 = sst [smem:[#allocation30_spill]] %s15632_s3 }
   0x5   :  { %15707 = sst [smem:[#allocation31_spill]] %s15633_s4 }
   0x6   :  { %15708 = sst [smem:[#allocation32_spill]] %s15634_s5 }
   0x7   :  { %24 = vsyncpa [#allocation7], 0 }
   0x8   :  { %26 = vsyncpa [#allocation7 + $0x1], 0  ;;  %s11641_s0 = smov 0   ;;  %s11643_s30 = smov 0  }
   0x9   :  { %s11645_s20 = smov 0   ;;  %s11647_s21 = smov 0  }
   0xa LB: > { %15709 = sst [smem:[#allocation9_spill]] %s11519_s0  ;;  %s11662_s1 = sadd.s32 4294967295, %s11531_s21   ;;  %s11531_s21 = sphi %s11647_s21, %s16297_s21   ;;  %s11527_s20 = sphi %s11645_s20, %s16299_s20   ;;  %s11523_s30 = sphi %s11643_s30, %s16301_s30   ;;  %s11519_s0 = sphi %s11641_s0, %s16300_s0  }
   0xb   : > { %15710 = sst [smem:[#allocation10_spill]] %s11527_s20  ;;  %s9606_s22 = sadd.s32 4294967294, %s11531_s21  }
   0xc   : > { %s11666_s2 = sadd.s32 1, %s11531_s21   ;;  %s443_s23 = sadd.s32 1, %s11527_s20 }
   0xd   : > { %15711 = sst [smem:[#allocation11_spill]] %s11666_s2  ;;  %s440_s24 = ssub.s32 %s11531_s21, %s11666_s2 }
   0xe   : > { %p453_p0 = scmp.ne.s32.totalorder %s11527_s20, %s11523_s30  ;;  %p441_p1 = scmp.eq.s32.totalorder %s440_s24, 0 }
   0xf   : > { %p454_p2 = scmp.eq.s32.totalorder %s11662_s1, 1  ;;  %p459_p3 = scmp.ne.s32.totalorder %s11523_s30, %s11519_s0 }
  0x10   : > { %p460_p4 = scmp.eq.s32.totalorder %s9606_s22, 1  ;;  %p9609_p7 = scmp.ge.s32.totalorder %s11531_s21, 1 }
  0x11   : > { %s11677_s25 = scalar_select %p441_p1, %s11527_s20, %s443_s23  }
  0x12   : > { %p11679_p5 = por %p454_p2, %p453_p0  ;;  %p11683_p6 = por %p460_p4, %p459_p3 }
  0x13   : > { %15712 = sst [smem:[#allocation12_spill]] %s11677_s25  ;;  %p540_p8 = scmp.lt.s32.totalorder %s11531_s21, 3 }
  0x14   : > { %s15714_s26 = scalar_select %p11683_p6, 1, 0 }
  0x15   : > { %p541_p9 = pnand %p9609_p7, %p540_p8 }
  0x16   : > { %15715 = sst [smem:[#allocation13_spill]] %s15714_s26 }
  0x17   : > { %544 = sbr.rel (%p541_p9) target bundleno = 2890 (0xb4a), region = 96 }
  0x1e   : > { %s15716_s29 = sld [smem:[#allocation28_spill]]  ;;  %vm15661_vm0 = vcmask 1044480   ;;  %vm15664_vm1 = vcmask 1045504   ;;  %v11533_v3 = vmov 65535   ;;  %p595_p10 = scmp.lt.s32.totalorder %s11662_s1, 1  ;;  %vm1095_vm2 = vcmask 613376  }
  0x1f   : > { %v1290_v4 = vsel %vm15661_vm0, 4294967295, %v11533_v3  ;;  %s15717_s26 = sld [smem:[#allocation27_spill]]  ;;  %s15719_s5 = sld [smem:[#allocation32_spill]]  ;;  %vm15669_vm3 = vcmask 261120   ;;  %vm15670_vm4 = vcmask 257024   ;;  %vm4236_vm5 = vcmask 256000  }
  0x20   : > { %v1291_v7 = vsel %vm15664_vm1, %v1290_v4, 0  ;;  %s596_s23 = scalar_select %p595_p10, %s11662_s1, 1  ;;  %vm15657_vm6 = vsmask.f32 1280  ;;  %vm4590_vm7 = vcmask 257025   ;;  %vm4597_vm9 = vcmask 254976  }
  0x21   : > { %s15720_s20 = sld [smem:[#allocation29_spill]]  ;;  %s15722_s4 = sld [smem:[#allocation31_spill]]  ;;  %vm15658_vm8 = vsmask.f32 7942  ;;  %vm4566_vm10 = vsmask.f32 5392  ;;  %vm12583_vm12 = vmand %vm4597_vm9, %vm15657_vm6 }
  0x22   : > { %s10122_s2 = sshll.u32 %s596_s23, 9  ;;  %vm12574_vm11 = vmand %vm4590_vm7, %vm15658_vm8  ;;  %vm4635_vm14 = vcmask 257026   ;;  %vm15659_vm15 = vsmask.f32 2304  ;;  %vm4611_vm7 = vsmask.f32 6416 }
  0x23   : > { %vm12590_vm13 = vmor %vm15657_vm6, %vm4566_vm10  ;;  %vm15666_vm9 = vcmask 1046528   ;;  %vm15663_vm6 = vsmask.f32 7424  ;;  %s15700_s27 = smov 64   ;;  %s11536_s22 = smov 32   ;;  %vm4729_vm1 = vcmask 253952  }
  0x24   : > { %v11257_v0 = vld [vmem:[%s15716_s29] sm:$0xff]   ;;  %v11258_v1 = vld [vmem:[%s15716_s29 + $0x8] sm:$0xff]   ;;  %v11259_v2 = vld [vmem:[%s15716_s29 + $0x10] sm:$0xff]   ;;  %s11537_s23 = smov 96   ;;  %s593_s24 = sand.u32 1, %s11523_s30  }
  0x25   : > { %10561 = vmatprep.subr.bf16.mxu0 %v11257_v0  ;;  %v11260_v5 = vld [vmem:[%s15716_s29 + $0x18] sm:$0xff]   ;;  %v11261_v6 = vld [vmem:[%s15716_s29 + $0x20] sm:$0x3f]   ;;  %s11711_s0 = scalar_lea.vmem %s15717_s26, %s10122_s2  ;;  %s15718_s26 = sld [smem:[#allocation30_spill]]  ;;  %vm12638_vm8 = vmand %vm4236_vm5, %vm15659_vm15  ;;  %vm15665_vm5 = vsmask.f32 3328 }
  0x26   : > { %10562 = vmatpush3.bf16.msra.mxu0 %v11257_v0  ;;  %v11262_v8 = vld [vmem:[%s11711_s0] sm:$0xff]   ;;  %v1293_v9 = vand.u32 %v11261_v6, %v1291_v7  ;;  %v11263_v10 = vld [vmem:[%s11711_s0 + $0x8] sm:$0xff]   ;;  %v11264_v11 = vld [vmem:[%s11711_s0 + $0x10] sm:$0xff]  }
  0x27   : > { %10563 = vmatprep.subr.bf16.mxu0 %v11258_v1  ;;  %10571 = vmatprep.mubr.msk.bf16.mxu0 %vm1095_vm2, %v11262_v8  ;;  %v11265_v12 = vld [vmem:[%s11711_s0 + $0x18] sm:$0xff]   ;;  %v11266_v13 = vld [vmem:[%s11711_s0 + $0x20] sm:$0xff]   ;;  %v11267_v14 = vld [vmem:[%s11711_s0 + $0x28] sm:$0xff]   ;;  %s15721_s2 = smov %s15720_s20 }
  0x28   : > { %v11268_v15 = vld [vmem:[%s11711_s0 + $0x30] sm:$0xff]   ;;  %v11269_v16 = vld [vmem:[%s11711_s0 + $0x38] sm:$0xff]   ;;  %v11270_v17 = vld [vmem:[%s11711_s0 + $0x40] sm:$0xff]  }
  0x29   : > { %v11271_v18 = vld [vmem:[%s11711_s0 + $0x48] sm:$0xff]   ;;  %v11272_v19 = vld [vmem:[%s11711_s0 + $0x50] sm:$0xff]   ;;  %v11273_v20 = vld [vmem:[%s11711_s0 + $0x58] sm:$0xff]  }
  0x2a   : > { %10564 = vmatpush3.bf16.msra.mxu0 %v11258_v1  ;;  %v11274_v21 = vld [vmem:[%s11711_s0 + $0x60] sm:$0xff]   ;;  %v11275_v22 = vld [vmem:[%s11711_s0 + $0x68] sm:$0xff]   ;;  %v11276_v23 = vld [vmem:[%s11711_s0 + $0x70] sm:$0xff]  }
  0x2b   : > { %10565 = vmatprep.subr.bf16.mxu0 %v11259_v2  ;;  %v11277_v24 = vld [vmem:[%s11711_s0 + $0x78] sm:$0xff]   ;;  %v11278_v25 = vld [vmem:[%s11711_s0 + $0x80] sm:$0xff]   ;;  %v11279_v26 = vld [vmem:[%s11711_s0 + $0x88] sm:$0xff]  }
  0x2c   : > { %v11280_v27 = vld [vmem:[%s11711_s0 + $0x90] sm:$0xff]   ;;  %v11281_v28 = vld [vmem:[%s11711_s0 + $0x98] sm:$0xff]   ;;  %v11282_v29 = vld [vmem:[%s11711_s0 + $0xa0] sm:$0xff]  }
  0x2d   : > { %v11283_v30 = vld [vmem:[%s11711_s0 + $0xa8] sm:$0xff]   ;;  %v11284_v31 = vld [vmem:[%s11711_s0 + $0xb0] sm:$0xff]   ;;  %v11285_v32 = vld [vmem:[%s11711_s0 + $0xb8] sm:$0xff]  }
  0x2e   : > { %10566 = vmatpush3.bf16.msra.mxu0 %v11259_v2  ;;  %v11316_v33 = vld [vmem:[%s15718_s26] sm:$0xff]   ;;  %v11319_v35 = vld [vmem:[%s15718_s26 + $0x8] sm:$0xff]   ;;  %v11288_v37 = vld [vmem:[%s11711_s0 + $0xd0] sm:$0xff]  }
  0x2f   : > { %10567 = vmatprep.subr.bf16.mxu0 %v11260_v5  ;;  %v11286_v34 = vld [vmem:[%s11711_s0 + $0xc0] sm:$0xff]   ;;  %10699 = vmatprep.subr.bf16.mxu1 %v11316_v33  ;;  %v11287_v36 = vld [vmem:[%s11711_s0 + $0xc8] sm:$0xff]   ;;  %v11289_v38 = vld [vmem:[%s11711_s0 + $0xd8] sm:$0xff]  }
  0x30   : > { %10700 = vmatpush3.bf16.msra.mxu1 %v11316_v33  ;;  %v11777_v39 = vld [vmem:[%s15719_s5] sm:$0xff]   ;;  %v11291_v41 = vld [vmem:[%s11711_s0 + $0xe8] sm:$0xff]   ;;  %v11292_v42 = vld [vmem:[%s11711_s0 + $0xf0] sm:$0xff]  }
  0x31   : > { %10701 = vmatprep.subr.bf16.mxu1 %v11319_v35  ;;  %v11290_v40 = vld [vmem:[%s11711_s0 + $0xe0] sm:$0xff]   ;;  %v11293_v43 = vld [vmem:[%s11711_s0 + $0xf8] sm:$0xff]   ;;  %v11295_v45 = vld [vmem:[%s11711_s0 + $0x108] sm:$0xff]  }
  0x32   : > { %10568 = vmatpush3.bf16.msra.mxu0 %v11260_v5  ;;  %v11294_v44 = vld [vmem:[%s11711_s0 + $0x100] sm:$0xff]   ;;  %v11296_v46 = vld [vmem:[%s11711_s0 + $0x110] sm:$0xff]   ;;  %v11297_v47 = vld [vmem:[%s11711_s0 + $0x118] sm:$0xff]  }
  0x33   : > { %10569 = vmatprep.subr.bf16.mxu0 %v1293_v9  ;;  %v11298_v48 = vld [vmem:[%s11711_s0 + $0x120] sm:$0xff]   ;;  %v11299_v49 = vld [vmem:[%s11711_s0 + $0x128] sm:$0xff]   ;;  %v11300_v50 = vld [vmem:[%s11711_s0 + $0x130] sm:$0xff]  }
  0x34   : > { %10702 = vmatpush3.bf16.msra.mxu1 %v11319_v35  ;;  %v11301_v51 = vld [vmem:[%s11711_s0 + $0x138] sm:$0xff]   ;;  %v11302_v52 = vld [vmem:[%s11711_s0 + $0x140] sm:$0xff]   ;;  %v11303_v53 = vld [vmem:[%s11711_s0 + $0x148] sm:$0xff]  }
  0x35   : > { %10831 = vmatprep.subr.bf16.mxu1 %v11777_v39  ;;  %v11304_v54 = vld [vmem:[%s11711_s0 + $0x150] sm:$0xff]   ;;  %v11305_v55 = vld [vmem:[%s11711_s0 + $0x158] sm:$0xff]   ;;  %v11306_v56 = vld [vmem:[%s11711_s0 + $0x160] sm:$0xff]  }
  0x36   : > { %10570 = vmatpush3.bf16.msra.mxu0 %v1293_v9  ;;  %v11307_v57 = vld [vmem:[%s11711_s0 + $0x168] sm:$0xff]   ;;  %v11308_v58 = vld [vmem:[%s11711_s0 + $0x170] sm:$0xff]   ;;  %v11309_v59 = vld [vmem:[%s11711_s0 + $0x178] sm:$0xff]  }
  0x37   : > { %v11310_v60 = vld [vmem:[%s11711_s0 + $0x180] sm:$0xff]   ;;  %v11311_v61 = vld [vmem:[%s11711_s0 + $0x188] sm:$0xff]   ;;  %v11312_v62 = vld [vmem:[%s11711_s0 + $0x190] sm:$0xff]  }
  0x38   : > { %v11313_v63 = vld [vmem:[%s11711_s0 + $0x198] sm:$0xff]   ;;  %v11314_v0 = vld [vmem:[%s11711_s0 + $0x1a0] sm:$0xff]   ;;  %v11315_v1 = vld [vmem:[%s11711_s0 + $0x1a8] sm:$0xff]  }
  0x39   : > { %10572 = vmatmul.mubr.msk.bf16.vlgmr.msra.gmra.mrb[0].mxu0 %vm1095_vm2, %v11263_v10  ;;  %v11317_v2 = vld [vmem:[%s11711_s0 + $0x1b0] sm:$0xff]   ;;  %v11837_v3 = vld [vmem:[%s15720_s20] ss:$0 sm:$0xff]  ;;  %v11318_v7 = vld [vmem:[%s11711_s0 + $0x1b8] sm:$0xff]   ;;  %s10119_s20 = sshll.u32 %s11662_s1, 4  ;;  %s11540_s1 = smov [#allocation6]  }
  0x3a   : > { %10575 = vmatprep.mubr.msk.bf16.mxu0 %vm1095_vm2, %v11264_v11  ;;  %v11321_v10 = vld [vmem:[%s11711_s0 + $0x1c0] sm:$0xff]   ;;  %v11329_v35 = vld [vmem:[%s15719_s5 + $0x8] sm:$0xff]  }
  0x41   : > { %10576 = vmatmul.mubr.msk.bf16.gmra.mrb[4].mxu0 %vm1095_vm2, %v11265_v12 }
  0x42   : > { %10579 = vmatprep.mubr.msk.bf16.mxu0 %vm1095_vm2, %v11266_v13 }
  0x49   : > { %10580 = vmatmul.mubr.msk.bf16.gmra.mrb[8].mxu0 %vm1095_vm2, %v11267_v14 }
  0x4a   : > { %10583 = vmatprep.mubr.msk.bf16.mxu0 %vm1095_vm2, %v11268_v15 }
  0x51   : > { %10584 = vmatmul.mubr.msk.bf16.gmra.mrb[12].mxu0 %vm1095_vm2, %v11269_v16 }
  0x52   : > { %10587 = vmatprep.mubr.msk.bf16.mxu0 %vm1095_vm2, %v11270_v17 }
  0x59   : > { %10588 = vmatmul.mubr.msk.bf16.gmra.mrb[16].mxu0 %vm1095_vm2, %v11271_v18 }
  0x5a   : > { %10591 = vmatprep.mubr.msk.bf16.mxu0 %vm1095_vm2, %v11272_v19 }
  0x61   : > { %10592 = vmatmul.mubr.msk.bf16.gmra.mrb[20].mxu0 %vm1095_vm2, %v11273_v20 }
  0x62   : > { %10595 = vmatprep.mubr.msk.bf16.mxu0 %vm1095_vm2, %v11274_v21 }
  0x69   : > { %10596 = vmatmul.mubr.msk.bf16.gmra.mrb[24].mxu0 %vm1095_vm2, %v11275_v22 }
  0x6a   : > { %10599 = vmatprep.mubr.msk.bf16.mxu0 %vm1095_vm2, %v11276_v23  ;;  %v11322_v23 = vld [vmem:[%s11711_s0 + $0x1c8] sm:$0xff]  }
  0x71   : > { %10600 = vmatmul.mubr.msk.bf16.gmra.mrb[28].mxu0 %vm1095_vm2, %v11277_v24 }
  0x72   : > { %10603 = vmatprep.mubr.msk.bf16.mxu0 %vm1095_vm2, %v11278_v25 }
  0x79   : > { %10604 = vmatmul.mubr.msk.bf16.gmra.mrb[32].mxu0 %vm1095_vm2, %v11279_v26  ;;  %v11323_v26 = vld [vmem:[%s11711_s0 + $0x1d0] sm:$0xff]  }
  0x7a   : > { %10607 = vmatprep.mubr.msk.bf16.mxu0 %vm1095_vm2, %v11280_v27 }
  0x81   : > { %10608 = vmatmul.mubr.msk.bf16.gmra.mrb[36].mxu0 %vm1095_vm2, %v11281_v28 }
  0x82   : > { %10611 = vmatprep.mubr.msk.bf16.mxu0 %vm1095_vm2, %v11282_v29 }
  0x89   : > { %10612 = vmatmul.mubr.msk.bf16.gmra.mrb[40].mxu0 %vm1095_vm2, %v11283_v30 }
  0x8a   : > { %10615 = vmatprep.mubr.msk.bf16.mxu0 %vm1095_vm2, %v11284_v31 }
  0x91   : > { %10616 = vmatmul.mubr.msk.bf16.gmra.mrb[44].mxu0 %vm1095_vm2, %v11285_v32 }
  0x92   : > { %10619 = vmatprep.mubr.msk.bf16.mxu0 %vm1095_vm2, %v11286_v34 }
  0x99   : > { %10620 = vmatmul.mubr.msk.bf16.gmra.mrb[48].mxu0 %vm1095_vm2, %v11287_v36 }
  0x9a   : > { %10623 = vmatprep.mubr.msk.bf16.mxu0 %vm1095_vm2, %v11288_v37 }
  0xa1   : > { %10624 = vmatmul.mubr.msk.bf16.gmra.mrb[52].mxu0 %vm1095_vm2, %v11289_v38 }
  0xa2   : > { %10627 = vmatprep.mubr.msk.bf16.mxu0 %vm1095_vm2, %v11290_v40 }
  0xa9   : > { %10628 = vmatmul.mubr.msk.bf16.gmra.mrb[56].mxu0 %vm1095_vm2, %v11291_v41 }
  0xaa   : > { %10631 = vmatprep.mubr.msk.bf16.mxu0 %vm1095_vm2, %v11292_v42 }
  0xb1   : > { %10632 = vmatmul.mubr.msk.bf16.gmra.mrb[60].mxu0 %vm1095_vm2, %v11293_v43  ;;  %v11325_v43 = vld [vmem:[%s11711_s0 + $0x1e0] sm:$0xff]  }
  0xb2   : > { %10635 = vmatprep.mubr.msk.bf16.mxu0 %vm1095_vm2, %v11294_v44 }
  0xb9   : > { %10636 = vmatmul.mubr.msk.bf16.gmra.mrb[64].mxu0 %vm1095_vm2, %v11295_v45 }
  0xba   : > { %10639 = vmatprep.mubr.msk.bf16.mxu0 %vm1095_vm2, %v11296_v46 }
  0xc1   : > { %10640 = vmatmul.mubr.msk.bf16.gmra.mrb[68].mxu0 %vm1095_vm2, %v11297_v47 }
  0xc2   : > { %10643 = vmatprep.mubr.msk.bf16.mxu0 %vm1095_vm2, %v11298_v48 }
  0xc9   : > { %10644 = vmatmul.mubr.msk.bf16.gmra.mrb[72].mxu0 %vm1095_vm2, %v11299_v49 }
  0xca   : > { %10647 = vmatprep.mubr.msk.bf16.mxu0 %vm1095_vm2, %v11300_v50 }
  0xd1   : > { %10648 = vmatmul.mubr.msk.bf16.gmra.mrb[76].mxu0 %vm1095_vm2, %v11301_v51 }
  0xd2   : > { %10651 = vmatprep.mubr.msk.bf16.mxu0 %vm1095_vm2, %v11302_v52 }
  0xd9   : > { %10652 = vmatmul.mubr.msk.bf16.gmra.mrb[80].mxu0 %vm1095_vm2, %v11303_v53 }
  0xda   : > { %10655 = vmatprep.mubr.msk.bf16.mxu0 %vm1095_vm2, %v11304_v54 }
  0xe1   : > { %10656 = vmatmul.mubr.msk.bf16.gmra.mrb[84].mxu0 %vm1095_vm2, %v11305_v55 }
  0xe2   : > { %10659 = vmatprep.mubr.msk.bf16.mxu0 %vm1095_vm2, %v11306_v56  ;;  %v11326_v56 = vld [vmem:[%s11711_s0 + $0x1e8] sm:$0xff]  }
  0xe9   : > { %10660 = vmatmul.mubr.msk.bf16.gmra.mrb[88].mxu0 %vm1095_vm2, %v11307_v57 }
  0xea   : > { %10663 = vmatprep.mubr.msk.bf16.mxu0 %vm1095_vm2, %v11308_v58 }
  0xf1   : > { %10664 = vmatmul.mubr.msk.bf16.gmra.mrb[92].mxu0 %vm1095_vm2, %v11309_v59  ;;  %v11327_v59 = vld [vmem:[%s11711_s0 + $0x1f0] sm:$0xff]  }
  0xf2   : > { %10667 = vmatprep.mubr.msk.bf16.mxu0 %vm1095_vm2, %v11310_v60 }
  0xf9   : > { %10668 = vmatmul.mubr.msk.bf16.gmra.mrb[96].mxu0 %vm1095_vm2, %v11311_v61 }
  0xfa   : > { %10671 = vmatprep.mubr.msk.bf16.mxu0 %vm1095_vm2, %v11312_v62 }
 0x101   : > { %10672 = vmatmul.mubr.msk.bf16.gmra.mrb[100].mxu0 %vm1095_vm2, %v11313_v63 }
 0x102   : > { %10675 = vmatprep.mubr.msk.bf16.mxu0 %vm1095_vm2, %v11314_v0 }
 0x109   : > { %10676 = vmatmul.mubr.msk.bf16.gmra.mrb[104].mxu0 %vm1095_vm2, %v11315_v1 }
 0x10a   : > { %10679 = vmatprep.mubr.msk.bf16.mxu0 %vm1095_vm2, %v11317_v2 }
 0x10c   : > { %v10573_v4 = vpop.f32.mrb[0].mxu0 }
 0x10d   : > { %v1338_v5 = vadd.f32 %v10573_v4, %v11837_v3  ;;  %v1329_v6 = vpop.f32.mrb[1].mxu0 }
 0x10e   : > { %v1330_v8 = vadd.f32 %v11837_v3, %v1329_v6  ;;  %v10574_v9 = vpop.f32.mrb[2].mxu0 }
 0x10f   : > { %v1341_v11 = vadd.f32 %v10574_v9, %v11837_v3  ;;  %v1332_v12 = vpop.f32.mrb[3].mxu0  ;;  %v1842_v14 = vmax.f32 %v1338_v5, 0.0  ;;  %v11328_v9 = vld [vmem:[%s11711_s0 + $0x1f8] sm:$0xff]  }
 0x110   : > { %v1333_v13 = vadd.f32 %v11837_v3, %v1332_v12  ;;  %v1840_v16 = vmax.f32 %v1330_v8, 0.0 }
 0x111   : > { %v1843_v15 = vmax.f32 %v1341_v11, 0.0  ;;  %10680 = vmatmul.mubr.msk.bf16.gmra.mrb[108].mxu0 %vm1095_vm2, %v11318_v7 }
 0x112   : > { %v1841_v17 = vmax.f32 %v1333_v13, 0.0  ;;  %10683 = vmatprep.mubr.msk.bf16.mxu0 %vm1095_vm2, %v11321_v10 }
 0x113   : > { %v1969_v18 = vpack.c.bf16 %v1843_v15, %v1842_v14 }
 0x114   : > { %v10577_v19 = vpop.f32.mrb[4].mxu0  ;;  %v1968_v20 = vpack.c.bf16 %v1841_v17, %v1840_v16 }
 0x115   : > { %v1354_v21 = vadd.f32 %v10577_v19, %v11837_v3  ;;  %v1345_v22 = vpop.f32.mrb[5].mxu0 }
 0x116   : > { %v1346_v24 = vadd.f32 %v11837_v3, %v1345_v22  ;;  %v10578_v25 = vpop.f32.mrb[6].mxu0  ;;  %10703 = vmatprep.mubr.msk.bf16.mxu1 %vm15669_vm3, %v1968_v20 }
 0x117   : > { %v1357_v27 = vadd.f32 %v10578_v25, %v11837_v3  ;;  %v1348_v28 = vpop.f32.mrb[7].mxu0  ;;  %10704 = vmatmul.mubr.msk.bf16.vlgmr.msra.gmra.mrb[0].mxu1 %vm15669_vm3, %v1969_v18  ;;  %v1846_v30 = vmax.f32 %v1354_v21, 0.0 }
 0x118   : > { %v1349_v29 = vadd.f32 %v11837_v3, %v1348_v28  ;;  %10832 = vmatpush3.bf16.msra.mxu1 %v11777_v39  ;;  %v1844_v32 = vmax.f32 %v1346_v24, 0.0  ;;  %v11324_v39 = vld [vmem:[%s11711_s0 + $0x1d8] sm:$0xff]  }
 0x119   : > { %v1847_v31 = vmax.f32 %v1357_v27, 0.0  ;;  %10684 = vmatmul.mubr.msk.bf16.gmra.mrb[112].mxu0 %vm1095_vm2, %v11322_v23  ;;  %10833 = vmatprep.subr.bf16.mxu1 %v11329_v35 }
 0x11a   : > { %v1845_v33 = vmax.f32 %v1349_v29, 0.0  ;;  %10687 = vmatprep.mubr.msk.bf16.mxu0 %vm1095_vm2, %v11323_v26 }
 0x11b   : > { %v1971_v34 = vpack.c.bf16 %v1847_v31, %v1846_v30 }
 0x11c   : > { %v1970_v36 = vpack.c.bf16 %v1845_v33, %v1844_v32  ;;  %v10581_v37 = vpop.f32.mrb[8].mxu0  ;;  %10834 = vmatpush3.bf16.msra.mxu1 %v11329_v35 }
 0x11d   : > { %v1370_v38 = vadd.f32 %v10581_v37, %v11837_v3  ;;  %v1361_v40 = vpop.f32.mrb[9].mxu0 }
 0x11e   : > { %v1362_v41 = vadd.f32 %v11837_v3, %v1361_v40  ;;  %v10582_v42 = vpop.f32.mrb[10].mxu0  ;;  %10707 = vmatprep.mubr.msk.bf16.mxu1 %vm15669_vm3, %v1970_v36 }
 0x11f   : > { %v1373_v44 = vadd.f32 %v10582_v42, %v11837_v3  ;;  %v1364_v45 = vpop.f32.mrb[11].mxu0  ;;  %10708 = vmatmul.mubr.msk.bf16.gmra.mrb[4].mxu1 %vm15669_vm3, %v1971_v34  ;;  %v1850_v47 = vmax.f32 %v1370_v38, 0.0 }
 0x120   : > { %v1365_v46 = vadd.f32 %v11837_v3, %v1364_v45  ;;  %v1848_v49 = vmax.f32 %v1362_v41, 0.0 }
 0x121   : > { %v1851_v48 = vmax.f32 %v1373_v44, 0.0  ;;  %10688 = vmatmul.mubr.msk.bf16.gmra.mrb[116].mxu0 %vm1095_vm2, %v11324_v39 }
 0x122   : > { %v1849_v50 = vmax.f32 %v1365_v46, 0.0  ;;  %10691 = vmatprep.mubr.msk.bf16.mxu0 %vm1095_vm2, %v11325_v43 }
 0x123   : > { %v1973_v51 = vpack.c.bf16 %v1851_v48, %v1850_v47 }
 0x124   : > { %v1972_v52 = vpack.c.bf16 %v1849_v50, %v1848_v49  ;;  %v10585_v53 = vpop.f32.mrb[12].mxu0 }
 0x125   : > { %v1386_v54 = vadd.f32 %v10585_v53, %v11837_v3  ;;  %v1377_v55 = vpop.f32.mrb[13].mxu0 }
 0x126   : > { %v1378_v57 = vadd.f32 %v11837_v3, %v1377_v55  ;;  %v10586_v58 = vpop.f32.mrb[14].mxu0  ;;  %10711 = vmatprep.mubr.msk.bf16.mxu1 %vm15669_vm3, %v1972_v52 }
 0x127   : > { %v1389_v60 = vadd.f32 %v10586_v58, %v11837_v3  ;;  %v1380_v61 = vpop.f32.mrb[15].mxu0  ;;  %10712 = vmatmul.mubr.msk.bf16.gmra.mrb[8].mxu1 %vm15669_vm3, %v1973_v51  ;;  %v1854_v63 = vmax.f32 %v1386_v54, 0.0 }
 0x128   : > { %v1381_v62 = vadd.f32 %v11837_v3, %v1380_v61  ;;  %v1852_v1 = vmax.f32 %v1378_v57, 0.0 }
 0x129   : > { %v1855_v0 = vmax.f32 %v1389_v60, 0.0  ;;  %10692 = vmatmul.mubr.msk.bf16.gmra.mrb[120].mxu0 %vm1095_vm2, %v11326_v56 }
 0x12a   : > { %v1853_v2 = vmax.f32 %v1381_v62, 0.0  ;;  %10695 = vmatprep.mubr.msk.bf16.mxu0 %vm1095_vm2, %v11327_v59 }
 0x12b   : > { %v1975_v4 = vpack.c.bf16 %v1855_v0, %v1854_v63 }
 0x12c   : > { %v1974_v5 = vpack.c.bf16 %v1853_v2, %v1852_v1  ;;  %v10589_v6 = vpop.f32.mrb[16].mxu0 }
 0x12d   : > { %v1402_v7 = vadd.f32 %v10589_v6, %v11837_v3  ;;  %v1393_v8 = vpop.f32.mrb[17].mxu0 }
 0x12e   : > { %v1394_v10 = vadd.f32 %v11837_v3, %v1393_v8  ;;  %v10590_v11 = vpop.f32.mrb[18].mxu0  ;;  %10715 = vmatprep.mubr.msk.bf16.mxu1 %vm15669_vm3, %v1974_v5 }
 0x12f   : > { %v1405_v12 = vadd.f32 %v10590_v11, %v11837_v3  ;;  %v1396_v13 = vpop.f32.mrb[19].mxu0  ;;  %10716 = vmatmul.mubr.msk.bf16.gmra.mrb[12].mxu1 %vm15669_vm3, %v1975_v4  ;;  %v1858_v15 = vmax.f32 %v1402_v7, 0.0 }
 0x130   : > { %v1397_v14 = vadd.f32 %v11837_v3, %v1396_v13  ;;  %v1856_v17 = vmax.f32 %v1394_v10, 0.0 }
 0x131   : > { %v1859_v16 = vmax.f32 %v1405_v12, 0.0  ;;  %10696 = vmatmul.mubr.msk.bf16.gmra.mrb[124].mxu0 %vm1095_vm2, %v11328_v9  ;;  %vm15660_vm2 = vsmask.f32 7946 }
 0x132   : > { %v1857_v18 = vmax.f32 %v1397_v14, 0.0  ;;  %vm12628_vm10 = vmand %vm4635_vm14, %vm15660_vm2  ;;  %vm15662_vm2 = vsmask.f32 7950 }
 0x133   : > { %v1977_v19 = vpack.c.bf16 %v1859_v16, %v1858_v15  ;;  %vm12648_vm14 = vmor %vm15659_vm15, %vm4611_vm7  ;;  %vm4680_vm7 = vcmask 257027   ;;  %vm4656_vm15 = vsmask.f32 7440 }
 0x134   : > { %v1976_v20 = vpack.c.bf16 %v1857_v18, %v1856_v17  ;;  %v10593_v21 = vpop.f32.mrb[20].mxu0  ;;  %vm12706_vm0 = vmand %vm4680_vm7, %vm15662_vm2 }
 0x135   : > { %v1418_v22 = vadd.f32 %v10593_v21, %v11837_v3  ;;  %v1409_v23 = vpop.f32.mrb[21].mxu0  ;;  %vm12721_vm7 = vmand %vm15670_vm4, %vm15665_vm5 }
 0x136   : > { %v1410_v24 = vadd.f32 %v11837_v3, %v1409_v23  ;;  %v10594_v25 = vpop.f32.mrb[22].mxu0  ;;  %10719 = vmatprep.mubr.msk.bf16.mxu1 %vm15669_vm3, %v1976_v20  ;;  %vm12732_vm2 = vmor %vm15665_vm5, %vm4656_vm15  ;;  %vm15668_vm5 = vsmask.f32 7938  ;;  %vm15741_vm15 = vcmask 1045504  }
 0x137   : > { %v1421_v26 = vadd.f32 %v10594_v25, %v11837_v3  ;;  %v1412_v27 = vpop.f32.mrb[23].mxu0  ;;  %10720 = vmatmul.mubr.msk.bf16.gmra.mrb[16].mxu1 %vm15669_vm3, %v1977_v19  ;;  %v1862_v29 = vmax.f32 %v1418_v22, 0.0 }
 0x138   : > { %v1413_v28 = vadd.f32 %v11837_v3, %v1412_v27  ;;  %v1860_v31 = vmax.f32 %v1410_v24, 0.0 }
 0x139   : > { %v1863_v30 = vmax.f32 %v1421_v26, 0.0 }
 0x13a   : > { %v1861_v32 = vmax.f32 %v1413_v28, 0.0 }
 0x13b   : > { %v1979_v33 = vpack.c.bf16 %v1863_v30, %v1862_v29 }
 0x13c   : > { %v1978_v34 = vpack.c.bf16 %v1861_v32, %v1860_v31  ;;  %v10597_v35 = vpop.f32.mrb[24].mxu0 }
 0x13d   : > { %v1434_v36 = vadd.f32 %v10597_v35, %v11837_v3  ;;  %v1425_v37 = vpop.f32.mrb[25].mxu0 }
 0x13e   : > { %v1426_v38 = vadd.f32 %v11837_v3, %v1425_v37  ;;  %v10598_v40 = vpop.f32.mrb[26].mxu0  ;;  %10723 = vmatprep.mubr.msk.bf16.mxu1 %vm15669_vm3, %v1978_v34 }
 0x13f   : > { %v1437_v39 = vadd.f32 %v10598_v40, %v11837_v3  ;;  %v1428_v41 = vpop.f32.mrb[27].mxu0  ;;  %10724 = vmatmul.mubr.msk.bf16.gmra.mrb[20].mxu1 %vm15669_vm3, %v1979_v33  ;;  %v1866_v43 = vmax.f32 %v1434_v36, 0.0 }
 0x140   : > { %v1429_v42 = vadd.f32 %v11837_v3, %v1428_v41  ;;  %v1864_v45 = vmax.f32 %v1426_v38, 0.0 }
 0x141   : > { %v1867_v44 = vmax.f32 %v1437_v39, 0.0 }
 0x142   : > { %v1865_v46 = vmax.f32 %v1429_v42, 0.0 }
 0x143   : > { %v1981_v47 = vpack.c.bf16 %v1867_v44, %v1866_v43 }
 0x144   : > { %v1980_v48 = vpack.c.bf16 %v1865_v46, %v1864_v45  ;;  %v10601_v49 = vpop.f32.mrb[28].mxu0 }
 0x145   : > { %v1450_v50 = vadd.f32 %v10601_v49, %v11837_v3  ;;  %v1441_v51 = vpop.f32.mrb[29].mxu0 }
 0x146   : > { %v1442_v52 = vadd.f32 %v11837_v3, %v1441_v51  ;;  %v10602_v53 = vpop.f32.mrb[30].mxu0  ;;  %10727 = vmatprep.mubr.msk.bf16.mxu1 %vm15669_vm3, %v1980_v48 }
 0x147   : > { %v1453_v54 = vadd.f32 %v10602_v53, %v11837_v3  ;;  %v1444_v55 = vpop.f32.mrb[31].mxu0  ;;  %10728 = vmatmul.mubr.msk.bf16.gmra.mrb[24].mxu1 %vm15669_vm3, %v1981_v47  ;;  %v1870_v57 = vmax.f32 %v1450_v50, 0.0 }
 0x148   : > { %v1445_v56 = vadd.f32 %v11837_v3, %v1444_v55  ;;  %v1868_v59 = vmax.f32 %v1442_v52, 0.0 }
 0x149   : > { %v1871_v58 = vmax.f32 %v1453_v54, 0.0 }
 0x14a   : > { %v1869_v60 = vmax.f32 %v1445_v56, 0.0 }
 0x14b   : > { %v1983_v61 = vpack.c.bf16 %v1871_v58, %v1870_v57 }
 0x14c   : > { %v1982_v62 = vpack.c.bf16 %v1869_v60, %v1868_v59  ;;  %v10605_v63 = vpop.f32.mrb[32].mxu0 }
 0x14d   : > { %v1466_v0 = vadd.f32 %v10605_v63, %v11837_v3  ;;  %v1457_v1 = vpop.f32.mrb[33].mxu0 }
 0x14e   : > { %v1458_v2 = vadd.f32 %v11837_v3, %v1457_v1  ;;  %v10606_v4 = vpop.f32.mrb[34].mxu0  ;;  %10731 = vmatprep.mubr.msk.bf16.mxu1 %vm15669_vm3, %v1982_v62 }
 0x14f   : > { %v1469_v5 = vadd.f32 %v10606_v4, %v11837_v3  ;;  %v1460_v6 = vpop.f32.mrb[35].mxu0  ;;  %10732 = vmatmul.mubr.msk.bf16.gmra.mrb[28].mxu1 %vm15669_vm3, %v1983_v61  ;;  %v1874_v8 = vmax.f32 %v1466_v0, 0.0 }
 0x150   : > { %v1461_v7 = vadd.f32 %v11837_v3, %v1460_v6  ;;  %v1872_v10 = vmax.f32 %v1458_v2, 0.0 }
 0x151   : > { %v1875_v9 = vmax.f32 %v1469_v5, 0.0 }
 0x152   : > { %v1873_v11 = vmax.f32 %v1461_v7, 0.0 }
 0x153   : > { %v1985_v12 = vpack.c.bf16 %v1875_v9, %v1874_v8 }
 0x154   : > { %v1984_v13 = vpack.c.bf16 %v1873_v11, %v1872_v10  ;;  %v10609_v14 = vpop.f32.mrb[36].mxu0 }
 0x155   : > { %v1482_v15 = vadd.f32 %v10609_v14, %v11837_v3  ;;  %v1473_v16 = vpop.f32.mrb[37].mxu0 }
 0x156   : > { %v1474_v17 = vadd.f32 %v11837_v3, %v1473_v16  ;;  %v10610_v18 = vpop.f32.mrb[38].mxu0  ;;  %10735 = vmatprep.mubr.msk.bf16.mxu1 %vm15669_vm3, %v1984_v13 }
 0x157   : > { %v1485_v19 = vadd.f32 %v10610_v18, %v11837_v3  ;;  %v1476_v20 = vpop.f32.mrb[39].mxu0  ;;  %10736 = vmatmul.mubr.msk.bf16.gmra.mrb[32].mxu1 %vm15669_vm3, %v1985_v12  ;;  %v1878_v22 = vmax.f32 %v1482_v15, 0.0 }
 0x158   : > { %v1477_v21 = vadd.f32 %v11837_v3, %v1476_v20  ;;  %v1876_v24 = vmax.f32 %v1474_v17, 0.0 }
 0x159   : > { %v1879_v23 = vmax.f32 %v1485_v19, 0.0 }
 0x15a   : > { %v1877_v25 = vmax.f32 %v1477_v21, 0.0 }
 0x15b   : > { %v1987_v26 = vpack.c.bf16 %v1879_v23, %v1878_v22 }
 0x15c   : > { %v1986_v27 = vpack.c.bf16 %v1877_v25, %v1876_v24  ;;  %v10613_v28 = vpop.f32.mrb[40].mxu0 }
 0x15d   : > { %v1498_v29 = vadd.f32 %v10613_v28, %v11837_v3  ;;  %v1489_v30 = vpop.f32.mrb[41].mxu0 }
 0x15e   : > { %v1490_v31 = vadd.f32 %v11837_v3, %v1489_v30  ;;  %v10614_v32 = vpop.f32.mrb[42].mxu0  ;;  %10739 = vmatprep.mubr.msk.bf16.mxu1 %vm15669_vm3, %v1986_v27 }
 0x15f   : > { %v1501_v33 = vadd.f32 %v10614_v32, %v11837_v3  ;;  %v1492_v34 = vpop.f32.mrb[43].mxu0  ;;  %10740 = vmatmul.mubr.msk.bf16.gmra.mrb[36].mxu1 %vm15669_vm3, %v1987_v26  ;;  %v1882_v36 = vmax.f32 %v1498_v29, 0.0 }
 0x160   : > { %v1493_v35 = vadd.f32 %v11837_v3, %v1492_v34  ;;  %v1880_v38 = vmax.f32 %v1490_v31, 0.0 }
 0x161   : > { %v1883_v37 = vmax.f32 %v1501_v33, 0.0 }
 0x162   : > { %v1881_v40 = vmax.f32 %v1493_v35, 0.0 }
 0x163   : > { %v1989_v39 = vpack.c.bf16 %v1883_v37, %v1882_v36 }
 0x164   : > { %v1988_v41 = vpack.c.bf16 %v1881_v40, %v1880_v38  ;;  %v10617_v42 = vpop.f32.mrb[44].mxu0 }
 0x165   : > { %v1514_v43 = vadd.f32 %v10617_v42, %v11837_v3  ;;  %v1505_v44 = vpop.f32.mrb[45].mxu0 }
 0x166   : > { %v1506_v45 = vadd.f32 %v11837_v3, %v1505_v44  ;;  %v10618_v46 = vpop.f32.mrb[46].mxu0  ;;  %10743 = vmatprep.mubr.msk.bf16.mxu1 %vm15669_vm3, %v1988_v41 }
 0x167   : > { %v1517_v47 = vadd.f32 %v10618_v46, %v11837_v3  ;;  %v1508_v48 = vpop.f32.mrb[47].mxu0  ;;  %10744 = vmatmul.mubr.msk.bf16.gmra.mrb[40].mxu1 %vm15669_vm3, %v1989_v39  ;;  %v1886_v50 = vmax.f32 %v1514_v43, 0.0 }
 0x168   : > { %v1509_v49 = vadd.f32 %v11837_v3, %v1508_v48  ;;  %v1884_v52 = vmax.f32 %v1506_v45, 0.0 }
 0x169   : > { %v1887_v51 = vmax.f32 %v1517_v47, 0.0 }
 0x16a   : > { %v1885_v53 = vmax.f32 %v1509_v49, 0.0 }
 0x16b   : > { %v1991_v54 = vpack.c.bf16 %v1887_v51, %v1886_v50 }
 0x16c   : > { %v1990_v55 = vpack.c.bf16 %v1885_v53, %v1884_v52  ;;  %v10621_v56 = vpop.f32.mrb[48].mxu0 }
 0x16d   : > { %v1530_v57 = vadd.f32 %v10621_v56, %v11837_v3  ;;  %v1521_v58 = vpop.f32.mrb[49].mxu0 }
 0x16e   : > { %v1522_v59 = vadd.f32 %v11837_v3, %v1521_v58  ;;  %v10622_v60 = vpop.f32.mrb[50].mxu0  ;;  %10747 = vmatprep.mubr.msk.bf16.mxu1 %vm15669_vm3, %v1990_v55 }
 0x16f   : > { %v1533_v61 = vadd.f32 %v10622_v60, %v11837_v3  ;;  %v1524_v62 = vpop.f32.mrb[51].mxu0  ;;  %10748 = vmatmul.mubr.msk.bf16.gmra.mrb[44].mxu1 %vm15669_vm3, %v1991_v54  ;;  %v1890_v0 = vmax.f32 %v1530_v57, 0.0 }
 0x170   : > { %v1525_v63 = vadd.f32 %v11837_v3, %v1524_v62  ;;  %v1888_v2 = vmax.f32 %v1522_v59, 0.0 }
 0x171   : > { %v1891_v1 = vmax.f32 %v1533_v61, 0.0 }
 0x172   : > { %v1889_v4 = vmax.f32 %v1525_v63, 0.0 }
 0x173   : > { %v1993_v5 = vpack.c.bf16 %v1891_v1, %v1890_v0 }
 0x174   : > { %v1992_v6 = vpack.c.bf16 %v1889_v4, %v1888_v2  ;;  %v10625_v7 = vpop.f32.mrb[52].mxu0 }
 0x175   : > { %v1546_v8 = vadd.f32 %v10625_v7, %v11837_v3  ;;  %v1537_v9 = vpop.f32.mrb[53].mxu0 }
 0x176   : > { %v1538_v10 = vadd.f32 %v11837_v3, %v1537_v9  ;;  %v10626_v11 = vpop.f32.mrb[54].mxu0  ;;  %10751 = vmatprep.mubr.msk.bf16.mxu1 %vm15669_vm3, %v1992_v6 }
 0x177   : > { %v1549_v12 = vadd.f32 %v10626_v11, %v11837_v3  ;;  %v1540_v13 = vpop.f32.mrb[55].mxu0  ;;  %10752 = vmatmul.mubr.msk.bf16.gmra.mrb[48].mxu1 %vm15669_vm3, %v1993_v5  ;;  %v1894_v15 = vmax.f32 %v1546_v8, 0.0 }
 0x178   : > { %v1541_v14 = vadd.f32 %v11837_v3, %v1540_v13  ;;  %v1892_v17 = vmax.f32 %v1538_v10, 0.0 }
 0x179   : > { %v1895_v16 = vmax.f32 %v1549_v12, 0.0 }
 0x17a   : > { %v1893_v18 = vmax.f32 %v1541_v14, 0.0 }
 0x17b   : > { %v1995_v19 = vpack.c.bf16 %v1895_v16, %v1894_v15 }
 0x17c   : > { %v1994_v20 = vpack.c.bf16 %v1893_v18, %v1892_v17  ;;  %v10629_v21 = vpop.f32.mrb[56].mxu0 }
 0x17d   : > { %v1562_v22 = vadd.f32 %v10629_v21, %v11837_v3  ;;  %v1553_v23 = vpop.f32.mrb[57].mxu0 }
 0x17e   : > { %v1554_v24 = vadd.f32 %v11837_v3, %v1553_v23  ;;  %v10630_v25 = vpop.f32.mrb[58].mxu0  ;;  %10755 = vmatprep.mubr.msk.bf16.mxu1 %vm15669_vm3, %v1994_v20 }
 0x17f   : > { %v1565_v26 = vadd.f32 %v10630_v25, %v11837_v3  ;;  %v1556_v27 = vpop.f32.mrb[59].mxu0  ;;  %10756 = vmatmul.mubr.msk.bf16.gmra.mrb[52].mxu1 %vm15669_vm3, %v1995_v19  ;;  %v1898_v29 = vmax.f32 %v1562_v22, 0.0 }
 0x180   : > { %v1557_v28 = vadd.f32 %v11837_v3, %v1556_v27  ;;  %v1896_v31 = vmax.f32 %v1554_v24, 0.0 }
 0x181   : > { %v1899_v30 = vmax.f32 %v1565_v26, 0.0 }
 0x182   : > { %v1897_v32 = vmax.f32 %v1557_v28, 0.0 }
 0x183   : > { %v1997_v33 = vpack.c.bf16 %v1899_v30, %v1898_v29 }
 0x184   : > { %v1996_v34 = vpack.c.bf16 %v1897_v32, %v1896_v31  ;;  %v10633_v35 = vpop.f32.mrb[60].mxu0 }
 0x185   : > { %v1578_v36 = vadd.f32 %v10633_v35, %v11837_v3  ;;  %v1569_v37 = vpop.f32.mrb[61].mxu0 }
 0x186   : > { %v1570_v38 = vadd.f32 %v11837_v3, %v1569_v37  ;;  %v10634_v40 = vpop.f32.mrb[62].mxu0  ;;  %10759 = vmatprep.mubr.msk.bf16.mxu1 %vm15669_vm3, %v1996_v34 }
 0x187   : > { %v1581_v39 = vadd.f32 %v10634_v40, %v11837_v3  ;;  %v1572_v41 = vpop.f32.mrb[63].mxu0  ;;  %10760 = vmatmul.mubr.msk.bf16.gmra.mrb[56].mxu1 %vm15669_vm3, %v1997_v33  ;;  %v1902_v43 = vmax.f32 %v1578_v36, 0.0 }
 0x188   : > { %v1573_v42 = vadd.f32 %v11837_v3, %v1572_v41  ;;  %v1900_v45 = vmax.f32 %v1570_v38, 0.0 }
 0x189   : > { %v1903_v44 = vmax.f32 %v1581_v39, 0.0 }
 0x18a   : > { %v1901_v46 = vmax.f32 %v1573_v42, 0.0 }
 0x18b   : > { %v1999_v47 = vpack.c.bf16 %v1903_v44, %v1902_v43 }
 0x18c   : > { %v1998_v48 = vpack.c.bf16 %v1901_v46, %v1900_v45  ;;  %v10637_v49 = vpop.f32.mrb[64].mxu0 }
 0x18d   : > { %v1594_v50 = vadd.f32 %v10637_v49, %v11837_v3  ;;  %v1585_v51 = vpop.f32.mrb[65].mxu0 }
 0x18e   : > { %v1586_v52 = vadd.f32 %v11837_v3, %v1585_v51  ;;  %v10638_v53 = vpop.f32.mrb[66].mxu0  ;;  %10763 = vmatprep.mubr.msk.bf16.mxu1 %vm15669_vm3, %v1998_v48 }
 0x18f   : > { %v1597_v54 = vadd.f32 %v10638_v53, %v11837_v3  ;;  %v1588_v55 = vpop.f32.mrb[67].mxu0  ;;  %10764 = vmatmul.mubr.msk.bf16.gmra.mrb[60].mxu1 %vm15669_vm3, %v1999_v47  ;;  %v1906_v57 = vmax.f32 %v1594_v50, 0.0 }
 0x190   : > { %v1589_v56 = vadd.f32 %v11837_v3, %v1588_v55  ;;  %v1904_v59 = vmax.f32 %v1586_v52, 0.0 }
 0x191   : > { %v1907_v58 = vmax.f32 %v1597_v54, 0.0 }
 0x192   : > { %v1905_v60 = vmax.f32 %v1589_v56, 0.0 }
 0x193   : > { %v2001_v61 = vpack.c.bf16 %v1907_v58, %v1906_v57 }
 0x194   : > { %v2000_v62 = vpack.c.bf16 %v1905_v60, %v1904_v59  ;;  %v10641_v63 = vpop.f32.mrb[68].mxu0 }
 0x195   : > { %v1610_v0 = vadd.f32 %v10641_v63, %v11837_v3  ;;  %v1601_v1 = vpop.f32.mrb[69].mxu0 }
 0x196   : > { %v1602_v2 = vadd.f32 %v11837_v3, %v1601_v1  ;;  %v10642_v4 = vpop.f32.mrb[70].mxu0  ;;  %10767 = vmatprep.mubr.msk.bf16.mxu1 %vm15669_vm3, %v2000_v62 }
 0x197   : > { %v1613_v5 = vadd.f32 %v10642_v4, %v11837_v3  ;;  %v1604_v6 = vpop.f32.mrb[71].mxu0  ;;  %10768 = vmatmul.mubr.msk.bf16.gmra.mrb[64].mxu1 %vm15669_vm3, %v2001_v61  ;;  %v1910_v8 = vmax.f32 %v1610_v0, 0.0 }
 0x198   : > { %v1605_v7 = vadd.f32 %v11837_v3, %v1604_v6  ;;  %v1908_v10 = vmax.f32 %v1602_v2, 0.0 }
 0x199   : > { %v1911_v9 = vmax.f32 %v1613_v5, 0.0 }
 0x19a   : > { %v1909_v11 = vmax.f32 %v1605_v7, 0.0 }
 0x19b   : > { %v2003_v12 = vpack.c.bf16 %v1911_v9, %v1910_v8 }
 0x19c   : > { %v2002_v13 = vpack.c.bf16 %v1909_v11, %v1908_v10  ;;  %v10645_v14 = vpop.f32.mrb[72].mxu0 }
 0x19d   : > { %v1626_v15 = vadd.f32 %v10645_v14, %v11837_v3  ;;  %v1617_v16 = vpop.f32.mrb[73].mxu0 }
 0x19e   : > { %v1618_v17 = vadd.f32 %v11837_v3, %v1617_v16  ;;  %v10646_v18 = vpop.f32.mrb[74].mxu0  ;;  %10771 = vmatprep.mubr.msk.bf16.mxu1 %vm15669_vm3, %v2002_v13 }
 0x19f   : > { %v1629_v19 = vadd.f32 %v10646_v18, %v11837_v3  ;;  %v1620_v20 = vpop.f32.mrb[75].mxu0  ;;  %10772 = vmatmul.mubr.msk.bf16.gmra.mrb[68].mxu1 %vm15669_vm3, %v2003_v12  ;;  %v1914_v22 = vmax.f32 %v1626_v15, 0.0 }
 0x1a0   : > { %v1621_v21 = vadd.f32 %v11837_v3, %v1620_v20  ;;  %v1912_v24 = vmax.f32 %v1618_v17, 0.0 }
 0x1a1   : > { %v1915_v23 = vmax.f32 %v1629_v19, 0.0 }
 0x1a2   : > { %v1913_v25 = vmax.f32 %v1621_v21, 0.0 }
 0x1a3   : > { %v2005_v26 = vpack.c.bf16 %v1915_v23, %v1914_v22 }
 0x1a4   : > { %v2004_v27 = vpack.c.bf16 %v1913_v25, %v1912_v24  ;;  %v10649_v28 = vpop.f32.mrb[76].mxu0 }
 0x1a5   : > { %v1642_v29 = vadd.f32 %v10649_v28, %v11837_v3  ;;  %v1633_v30 = vpop.f32.mrb[77].mxu0 }
 0x1a6   : > { %v1634_v31 = vadd.f32 %v11837_v3, %v1633_v30  ;;  %v10650_v32 = vpop.f32.mrb[78].mxu0  ;;  %10775 = vmatprep.mubr.msk.bf16.mxu1 %vm15669_vm3, %v2004_v27 }
 0x1a7   : > { %v1645_v33 = vadd.f32 %v10650_v32, %v11837_v3  ;;  %v1636_v34 = vpop.f32.mrb[79].mxu0  ;;  %10776 = vmatmul.mubr.msk.bf16.gmra.mrb[72].mxu1 %vm15669_vm3, %v2005_v26  ;;  %v1918_v36 = vmax.f32 %v1642_v29, 0.0 }
 0x1a8   : > { %v1637_v35 = vadd.f32 %v11837_v3, %v1636_v34  ;;  %v1916_v38 = vmax.f32 %v1634_v31, 0.0 }
 0x1a9   : > { %v1919_v37 = vmax.f32 %v1645_v33, 0.0 }
 0x1aa   : > { %v1917_v40 = vmax.f32 %v1637_v35, 0.0 }
 0x1ab   : > { %v2007_v39 = vpack.c.bf16 %v1919_v37, %v1918_v36 }
 0x1ac   : > { %v2006_v41 = vpack.c.bf16 %v1917_v40, %v1916_v38  ;;  %v10653_v42 = vpop.f32.mrb[80].mxu0 }
 0x1ad   : > { %v1658_v43 = vadd.f32 %v10653_v42, %v11837_v3  ;;  %v1649_v44 = vpop.f32.mrb[81].mxu0 }
 0x1ae   : > { %v1650_v45 = vadd.f32 %v11837_v3, %v1649_v44  ;;  %v10654_v46 = vpop.f32.mrb[82].mxu0  ;;  %10779 = vmatprep.mubr.msk.bf16.mxu1 %vm15669_vm3, %v2006_v41 }
 0x1af   : > { %v1661_v47 = vadd.f32 %v10654_v46, %v11837_v3  ;;  %v1652_v48 = vpop.f32.mrb[83].mxu0  ;;  %10780 = vmatmul.mubr.msk.bf16.gmra.mrb[76].mxu1 %vm15669_vm3, %v2007_v39  ;;  %v1922_v50 = vmax.f32 %v1658_v43, 0.0 }
 0x1b0   : > { %v1653_v49 = vadd.f32 %v11837_v3, %v1652_v48  ;;  %v1920_v52 = vmax.f32 %v1650_v45, 0.0 }
 0x1b1   : > { %v1923_v51 = vmax.f32 %v1661_v47, 0.0 }
 0x1b2   : > { %v1921_v53 = vmax.f32 %v1653_v49, 0.0 }
 0x1b3   : > { %v2009_v54 = vpack.c.bf16 %v1923_v51, %v1922_v50 }
 0x1b4   : > { %v2008_v55 = vpack.c.bf16 %v1921_v53, %v1920_v52  ;;  %v10657_v56 = vpop.f32.mrb[84].mxu0 }
 0x1b5   : > { %v1674_v57 = vadd.f32 %v10657_v56, %v11837_v3  ;;  %v1665_v58 = vpop.f32.mrb[85].mxu0 }
 0x1b6   : > { %v1666_v59 = vadd.f32 %v11837_v3, %v1665_v58  ;;  %v10658_v60 = vpop.f32.mrb[86].mxu0  ;;  %10783 = vmatprep.mubr.msk.bf16.mxu1 %vm15669_vm3, %v2008_v55 }
 0x1b7   : > { %v1677_v61 = vadd.f32 %v10658_v60, %v11837_v3  ;;  %v1668_v62 = vpop.f32.mrb[87].mxu0  ;;  %10784 = vmatmul.mubr.msk.bf16.gmra.mrb[80].mxu1 %vm15669_vm3, %v2009_v54  ;;  %v1926_v0 = vmax.f32 %v1674_v57, 0.0 }
 0x1b8   : > { %v1669_v63 = vadd.f32 %v11837_v3, %v1668_v62  ;;  %v1924_v2 = vmax.f32 %v1666_v59, 0.0 }
 0x1b9   : > { %v1927_v1 = vmax.f32 %v1677_v61, 0.0 }
 0x1ba   : > { %v1925_v4 = vmax.f32 %v1669_v63, 0.0 }
 0x1bb   : > { %v2011_v5 = vpack.c.bf16 %v1927_v1, %v1926_v0 }
 0x1bc   : > { %v2010_v6 = vpack.c.bf16 %v1925_v4, %v1924_v2  ;;  %v10661_v7 = vpop.f32.mrb[88].mxu0 }
 0x1bd   : > { %v1690_v8 = vadd.f32 %v10661_v7, %v11837_v3  ;;  %v1681_v9 = vpop.f32.mrb[89].mxu0 }
 0x1be   : > { %v1682_v10 = vadd.f32 %v11837_v3, %v1681_v9  ;;  %v10662_v11 = vpop.f32.mrb[90].mxu0  ;;  %10787 = vmatprep.mubr.msk.bf16.mxu1 %vm15669_vm3, %v2010_v6 }
 0x1bf   : > { %v1693_v12 = vadd.f32 %v10662_v11, %v11837_v3  ;;  %v1684_v13 = vpop.f32.mrb[91].mxu0  ;;  %10788 = vmatmul.mubr.msk.bf16.gmra.mrb[84].mxu1 %vm15669_vm3, %v2011_v5  ;;  %v1930_v15 = vmax.f32 %v1690_v8, 0.0 }
 0x1c0   : > { %v1685_v14 = vadd.f32 %v11837_v3, %v1684_v13  ;;  %v1928_v17 = vmax.f32 %v1682_v10, 0.0 }
 0x1c1   : > { %v1931_v16 = vmax.f32 %v1693_v12, 0.0 }
 0x1c2   : > { %v1929_v18 = vmax.f32 %v1685_v14, 0.0 }
 0x1c3   : > { %v2013_v19 = vpack.c.bf16 %v1931_v16, %v1930_v15 }
 0x1c4   : > { %v2012_v20 = vpack.c.bf16 %v1929_v18, %v1928_v17  ;;  %v10665_v21 = vpop.f32.mrb[92].mxu0 }
 0x1c5   : > { %v1706_v22 = vadd.f32 %v10665_v21, %v11837_v3  ;;  %v1697_v23 = vpop.f32.mrb[93].mxu0 }
 0x1c6   : > { %v1698_v24 = vadd.f32 %v11837_v3, %v1697_v23  ;;  %v10666_v25 = vpop.f32.mrb[94].mxu0  ;;  %10791 = vmatprep.mubr.msk.bf16.mxu1 %vm15669_vm3, %v2012_v20 }
 0x1c7   : > { %v1709_v26 = vadd.f32 %v10666_v25, %v11837_v3  ;;  %v1700_v27 = vpop.f32.mrb[95].mxu0  ;;  %10792 = vmatmul.mubr.msk.bf16.gmra.mrb[88].mxu1 %vm15669_vm3, %v2013_v19  ;;  %v1934_v29 = vmax.f32 %v1706_v22, 0.0  ;;  %v12031_v22 = vld [vmem:[%s15722_s4] ss:$0 sm:$0xff] }
 0x1c8   : > { %v1701_v28 = vadd.f32 %v11837_v3, %v1700_v27  ;;  %v1932_v31 = vmax.f32 %v1698_v24, 0.0 }
 0x1c9   : > { %v1935_v30 = vmax.f32 %v1709_v26, 0.0 }
 0x1ca   : > { %v1933_v32 = vmax.f32 %v1701_v28, 0.0 }
 0x1cb   : > { %v2015_v33 = vpack.c.bf16 %v1935_v30, %v1934_v29 }
 0x1cc   : > { %v2014_v34 = vpack.c.bf16 %v1933_v32, %v1932_v31  ;;  %v10669_v35 = vpop.f32.mrb[96].mxu0 }
 0x1cd   : > { %v1722_v36 = vadd.f32 %v10669_v35, %v11837_v3  ;;  %v1713_v37 = vpop.f32.mrb[97].mxu0 }
 0x1ce   : > { %v1714_v38 = vadd.f32 %v11837_v3, %v1713_v37  ;;  %v10670_v40 = vpop.f32.mrb[98].mxu0  ;;  %10795 = vmatprep.mubr.msk.bf16.mxu1 %vm15669_vm3, %v2014_v34 }
 0x1cf   : > { %v1725_v39 = vadd.f32 %v10670_v40, %v11837_v3  ;;  %v1716_v41 = vpop.f32.mrb[99].mxu0  ;;  %10796 = vmatmul.mubr.msk.bf16.gmra.mrb[92].mxu1 %vm15669_vm3, %v2015_v33  ;;  %v1938_v43 = vmax.f32 %v1722_v36, 0.0 }
 0x1d0   : > { %v1717_v42 = vadd.f32 %v11837_v3, %v1716_v41  ;;  %v1936_v45 = vmax.f32 %v1714_v38, 0.0 }
 0x1d1   : > { %v1939_v44 = vmax.f32 %v1725_v39, 0.0 }
 0x1d2   : > { %v1937_v46 = vmax.f32 %v1717_v42, 0.0 }
 0x1d3   : > { %v2017_v47 = vpack.c.bf16 %v1939_v44, %v1938_v43 }
 0x1d4   : > { %v2016_v48 = vpack.c.bf16 %v1937_v46, %v1936_v45  ;;  %v10673_v49 = vpop.f32.mrb[100].mxu0 }
 0x1d5   : > { %v1738_v50 = vadd.f32 %v10673_v49, %v11837_v3  ;;  %v1729_v51 = vpop.f32.mrb[101].mxu0 }
 0x1d6   : > { %v1730_v52 = vadd.f32 %v11837_v3, %v1729_v51  ;;  %v10674_v53 = vpop.f32.mrb[102].mxu0  ;;  %10799 = vmatprep.mubr.msk.bf16.mxu1 %vm15669_vm3, %v2016_v48 }
 0x1d7   : > { %v1741_v54 = vadd.f32 %v10674_v53, %v11837_v3  ;;  %v1732_v55 = vpop.f32.mrb[103].mxu0  ;;  %10800 = vmatmul.mubr.msk.bf16.gmra.mrb[96].mxu1 %vm15669_vm3, %v2017_v47  ;;  %v1942_v57 = vmax.f32 %v1738_v50, 0.0 }
 0x1d8   : > { %v1733_v56 = vadd.f32 %v11837_v3, %v1732_v55  ;;  %v1940_v59 = vmax.f32 %v1730_v52, 0.0 }
 0x1d9   : > { %v1943_v58 = vmax.f32 %v1741_v54, 0.0 }
 0x1da   : > { %v1941_v60 = vmax.f32 %v1733_v56, 0.0 }
 0x1db   : > { %v2019_v61 = vpack.c.bf16 %v1943_v58, %v1942_v57 }
 0x1dc   : > { %v2018_v62 = vpack.c.bf16 %v1941_v60, %v1940_v59  ;;  %v10677_v63 = vpop.f32.mrb[104].mxu0 }
 0x1dd   : > { %v1754_v0 = vadd.f32 %v10677_v63, %v11837_v3  ;;  %v1745_v1 = vpop.f32.mrb[105].mxu0 }
 0x1de   : > { %v1746_v2 = vadd.f32 %v11837_v3, %v1745_v1  ;;  %v10678_v4 = vpop.f32.mrb[106].mxu0  ;;  %10803 = vmatprep.mubr.msk.bf16.mxu1 %vm15669_vm3, %v2018_v62 }
 0x1df   : > { %v1757_v5 = vadd.f32 %v10678_v4, %v11837_v3  ;;  %v1748_v6 = vpop.f32.mrb[107].mxu0  ;;  %10804 = vmatmul.mubr.msk.bf16.gmra.mrb[100].mxu1 %vm15669_vm3, %v2019_v61  ;;  %v1946_v8 = vmax.f32 %v1754_v0, 0.0  ;;  %v12054_v4 = vld [vmem:[%s15721_s2] ss:$0 sm:$0xff] }
 0x1e0   : > { %v1749_v7 = vadd.f32 %v11837_v3, %v1748_v6  ;;  %v1944_v10 = vmax.f32 %v1746_v2, 0.0 }
 0x1e1   : > { %v1947_v9 = vmax.f32 %v1757_v5, 0.0 }
 0x1e2   : > { %v1945_v11 = vmax.f32 %v1749_v7, 0.0 }
 0x1e3   : > { %v2021_v12 = vpack.c.bf16 %v1947_v9, %v1946_v8 }
 0x1e4   : > { %v2020_v13 = vpack.c.bf16 %v1945_v11, %v1944_v10  ;;  %v10681_v14 = vpop.f32.mrb[108].mxu0 }
 0x1e5   : > { %v1770_v15 = vadd.f32 %v10681_v14, %v11837_v3  ;;  %v1761_v16 = vpop.f32.mrb[109].mxu0 }
 0x1e6   : > { %v1762_v17 = vadd.f32 %v11837_v3, %v1761_v16  ;;  %v10682_v18 = vpop.f32.mrb[110].mxu0  ;;  %10807 = vmatprep.mubr.msk.bf16.mxu1 %vm15669_vm3, %v2020_v13 }
 0x1e7   : > { %v1773_v19 = vadd.f32 %v10682_v18, %v11837_v3  ;;  %v1764_v20 = vpop.f32.mrb[111].mxu0  ;;  %10808 = vmatmul.mubr.msk.bf16.gmra.mrb[104].mxu1 %vm15669_vm3, %v2021_v12  ;;  %v1950_v23 = vmax.f32 %v1770_v15, 0.0 }
 0x1e8   : > { %v1765_v21 = vadd.f32 %v11837_v3, %v1764_v20  ;;  %v1948_v25 = vmax.f32 %v1762_v17, 0.0 }
 0x1e9   : > { %v1951_v24 = vmax.f32 %v1773_v19, 0.0 }
 0x1ea   : > { %v1949_v26 = vmax.f32 %v1765_v21, 0.0  ;;  %v10705_v27 = vpop.f32.mrb[0].mxu1 }
 0x1eb   : > { %v2023_v28 = vpack.c.bf16 %v1951_v24, %v1950_v23  ;;  %v2291_v29 = vadd.f32 %v10705_v27, %v12031_v22  ;;  %v2282_v30 = vpop.f32.mrb[1].mxu1 }
 0x1ec   : > { %v2022_v31 = vpack.c.bf16 %v1949_v26, %v1948_v25  ;;  %v2283_v32 = vadd.f32 %v12031_v22, %v2282_v30  ;;  %v10685_v33 = vpop.f32.mrb[112].mxu0  ;;  %v10706_v34 = vpop.f32.mrb[2].mxu1 }
 0x1ed   : > { %v1786_v35 = vadd.f32 %v10685_v33, %v11837_v3  ;;  %v2294_v36 = vadd.f32 %v10706_v34, %v12031_v22  ;;  %v1777_v37 = vpop.f32.mrb[113].mxu0  ;;  %v2285_v38 = vpop.f32.mrb[3].mxu1  ;;  %v2795_v42 = vmax.f32 %v2291_v29, 0.0 }
 0x1ee   : > { %v1778_v40 = vadd.f32 %v11837_v3, %v1777_v37  ;;  %v2286_v39 = vadd.f32 %v12031_v22, %v2285_v38  ;;  %v10686_v41 = vpop.f32.mrb[114].mxu0  ;;  %10811 = vmatprep.mubr.msk.bf16.mxu1 %vm15669_vm3, %v2022_v31  ;;  %v2793_v46 = vmax.f32 %v2283_v32, 0.0 }
 0x1ef   : > { %v2796_v43 = vmax.f32 %v2294_v36, 0.0  ;;  %v1789_v44 = vadd.f32 %v10686_v41, %v11837_v3  ;;  %v1780_v45 = vpop.f32.mrb[115].mxu0  ;;  %10812 = vmatmul.mubr.msk.bf16.gmra.mrb[108].mxu1 %vm15669_vm3, %v2023_v28  ;;  %v1954_v49 = vmax.f32 %v1786_v35, 0.0 }
 0x1f0   : > { %v2794_v47 = vmax.f32 %v2286_v39, 0.0  ;;  %v1781_v48 = vadd.f32 %v11837_v3, %v1780_v45  ;;  %v1952_v52 = vmax.f32 %v1778_v40, 0.0 }
 0x1f1   : > { %v12043_v50 = vpack.c.bf16 %v2796_v43, %v2795_v42  ;;  %v1955_v51 = vmax.f32 %v1789_v44, 0.0 }
 0x1f2   : > { %v12045_v53 = vpack.c.bf16 %v2794_v47, %v2793_v46  ;;  %v1953_v54 = vmax.f32 %v1781_v48, 0.0  ;;  %v10709_v55 = vpop.f32.mrb[4].mxu1 }
 0x1f3   : > { %v2025_v56 = vpack.c.bf16 %v1955_v51, %v1954_v49  ;;  %v2307_v57 = vadd.f32 %v10709_v55, %v12031_v22  ;;  %v2298_v58 = vpop.f32.mrb[5].mxu1 }
 0x1f4   : > { %v2024_v59 = vpack.c.bf16 %v1953_v54, %v1952_v52  ;;  %v2299_v60 = vadd.f32 %v12031_v22, %v2298_v58  ;;  %v10689_v61 = vpop.f32.mrb[116].mxu0  ;;  %v10710_v62 = vpop.f32.mrb[6].mxu1 }
 0x1f5   : > { %v1802_v63 = vadd.f32 %v10689_v61, %v11837_v3  ;;  %v2310_v0 = vadd.f32 %v10710_v62, %v12031_v22  ;;  %v1793_v1 = vpop.f32.mrb[117].mxu0  ;;  %v2301_v2 = vpop.f32.mrb[7].mxu1  ;;  %v2799_v8 = vmax.f32 %v2307_v57, 0.0 }
 0x1f6   : > { %v1794_v5 = vadd.f32 %v12054_v4, %v1793_v1  ;;  %v2302_v6 = vadd.f32 %v12031_v22, %v2301_v2  ;;  %v10690_v7 = vpop.f32.mrb[118].mxu0  ;;  %10815 = vmatprep.mubr.msk.bf16.mxu1 %vm15669_vm3, %v2024_v59  ;;  %v2797_v11 = vmax.f32 %v2299_v60, 0.0 }
 0x1f7   : > { %v2800_v9 = vmax.f32 %v2310_v0, 0.0  ;;  %v1805_v3 = vadd.f32 %v12054_v4, %v10690_v7  ;;  %v1796_v10 = vpop.f32.mrb[119].mxu0  ;;  %10816 = vmatmul.mubr.msk.bf16.gmra.mrb[112].mxu1 %vm15669_vm3, %v2025_v56  ;;  %v1958_v14 = vmax.f32 %v1802_v63, 0.0 }
 0x1f8   : > { %v2798_v12 = vmax.f32 %v2302_v6, 0.0  ;;  %v1797_v13 = vadd.f32 %v12054_v4, %v1796_v10  ;;  %v1956_v17 = vmax.f32 %v1794_v5, 0.0 }
 0x1f9   : > { %v12062_v15 = vpack.c.bf16 %v2800_v9, %v2799_v8  ;;  %v1959_v16 = vmax.f32 %v1805_v3, 0.0 }
 0x1fa   : > { %v12064_v18 = vpack.c.bf16 %v2798_v12, %v2797_v11  ;;  %v1957_v19 = vmax.f32 %v1797_v13, 0.0  ;;  %v10713_v20 = vpop.f32.mrb[8].mxu1 }
 0x1fb   : > { %v2027_v21 = vpack.c.bf16 %v1959_v16, %v1958_v14  ;;  %v2323_v23 = vadd.f32 %v10713_v20, %v12031_v22  ;;  %v2314_v24 = vpop.f32.mrb[9].mxu1 }
 0x1fc   : > { %v2026_v25 = vpack.c.bf16 %v1957_v19, %v1956_v17  ;;  %v2315_v26 = vadd.f32 %v12031_v22, %v2314_v24  ;;  %v10693_v27 = vpop.f32.mrb[120].mxu0  ;;  %v10714_v28 = vpop.f32.mrb[10].mxu1 }
 0x1fd   : > { %v1818_v29 = vadd.f32 %v12054_v4, %v10693_v27  ;;  %v2326_v30 = vadd.f32 %v10714_v28, %v12031_v22  ;;  %v1809_v31 = vpop.f32.mrb[121].mxu0  ;;  %v2317_v32 = vpop.f32.mrb[11].mxu1  ;;  %v2803_v36 = vmax.f32 %v2323_v23, 0.0 }
 0x1fe   : > { %v1810_v33 = vadd.f32 %v12054_v4, %v1809_v31  ;;  %v2318_v34 = vadd.f32 %v12031_v22, %v2317_v32  ;;  %v10694_v35 = vpop.f32.mrb[122].mxu0  ;;  %10819 = vmatprep.mubr.msk.bf16.mxu1 %vm15669_vm3, %v2026_v25  ;;  %v2801_v39 = vmax.f32 %v2315_v26, 0.0 }
 0x1ff   : > { %v2804_v37 = vmax.f32 %v2326_v30, 0.0  ;;  %v1821_v38 = vadd.f32 %v12054_v4, %v10694_v35  ;;  %v1812_v40 = vpop.f32.mrb[123].mxu0  ;;  %10820 = vmatmul.mubr.msk.bf16.gmra.mrb[116].mxu1 %vm15669_vm3, %v2027_v21  ;;  %v1962_v43 = vmax.f32 %v1818_v29, 0.0 }
 0x200   : > { %v2802_v41 = vmax.f32 %v2318_v34, 0.0  ;;  %v1813_v42 = vadd.f32 %v12054_v4, %v1812_v40  ;;  %v1960_v46 = vmax.f32 %v1810_v33, 0.0 }
 0x201   : > { %v12076_v44 = vpack.c.bf16 %v2804_v37, %v2803_v36  ;;  %v1963_v45 = vmax.f32 %v1821_v38, 0.0 }
 0x202   : > { %v12078_v47 = vpack.c.bf16 %v2802_v41, %v2801_v39  ;;  %v1961_v48 = vmax.f32 %v1813_v42, 0.0  ;;  %v10717_v49 = vpop.f32.mrb[12].mxu1 }
 0x203   : > { %v2029_v51 = vpack.c.bf16 %v1963_v45, %v1962_v43  ;;  %v2339_v52 = vadd.f32 %v10717_v49, %v12031_v22  ;;  %v2330_v54 = vpop.f32.mrb[13].mxu1 }
 0x204   : > { %v2028_v55 = vpack.c.bf16 %v1961_v48, %v1960_v46  ;;  %v2331_v56 = vadd.f32 %v12031_v22, %v2330_v54  ;;  %v10697_v57 = vpop.f32.mrb[124].mxu0  ;;  %v10718_v58 = vpop.f32.mrb[14].mxu1 }
 0x205   : > { %v1834_v59 = vadd.f32 %v12054_v4, %v10697_v57  ;;  %v2342_v60 = vadd.f32 %v10718_v58, %v12031_v22  ;;  %v1825_v61 = vpop.f32.mrb[125].mxu0  ;;  %v2333_v62 = vpop.f32.mrb[15].mxu1  ;;  %v2807_v2 = vmax.f32 %v2339_v52, 0.0 }
 0x206   : > { %v1826_v63 = vadd.f32 %v12054_v4, %v1825_v61  ;;  %v2334_v0 = vadd.f32 %v12031_v22, %v2333_v62  ;;  %v10698_v1 = vpop.f32.mrb[126].mxu0  ;;  %10823 = vmatprep.mubr.msk.bf16.mxu1 %vm15669_vm3, %v2028_v55  ;;  %v2805_v8 = vmax.f32 %v2331_v56, 0.0 }
 0x207   : > { %v2808_v5 = vmax.f32 %v2342_v60, 0.0  ;;  %v1837_v6 = vadd.f32 %v12054_v4, %v10698_v1  ;;  %v1828_v7 = vpop.f32.mrb[127].mxu0  ;;  %10824 = vmatmul.mubr.msk.bf16.gmra.mrb[120].mxu1 %vm15669_vm3, %v2029_v51  ;;  %v1966_v10 = vmax.f32 %v1834_v59, 0.0 }
 0x208   : > { %v2806_v9 = vmax.f32 %v2334_v0, 0.0  ;;  %v1829_v3 = vadd.f32 %v12054_v4, %v1828_v7  ;;  %v1964_v13 = vmax.f32 %v1826_v63, 0.0 }
 0x209   : > { %v12090_v11 = vpack.c.bf16 %v2808_v5, %v2807_v2  ;;  %v1967_v12 = vmax.f32 %v1837_v6, 0.0 }
 0x20a   : > { %v12092_v14 = vpack.c.bf16 %v2806_v9, %v2805_v8  ;;  %v1965_v16 = vmax.f32 %v1829_v3, 0.0  ;;  %v10721_v17 = vpop.f32.mrb[16].mxu1 }
 0x20b   : > { %v2031_v19 = vpack.c.bf16 %v1967_v12, %v1966_v10  ;;  %v2355_v20 = vadd.f32 %v10721_v17, %v12031_v22  ;;  %v2346_v21 = vpop.f32.mrb[17].mxu1 }
 0x20c   : > { %v2030_v23 = vpack.c.bf16 %v1965_v16, %v1964_v13  ;;  %v2347_v24 = vadd.f32 %v12031_v22, %v2346_v21  ;;  %v10722_v25 = vpop.f32.mrb[18].mxu1 }
 0x20d   : > { %v2358_v26 = vadd.f32 %v10722_v25, %v12031_v22  ;;  %v2349_v4 = vpop.f32.mrb[19].mxu1  ;;  %v2811_v28 = vmax.f32 %v2355_v20, 0.0 }
 0x20e   : > { %v2350_v27 = vadd.f32 %v12031_v22, %v2349_v4  ;;  %10827 = vmatprep.mubr.msk.bf16.mxu1 %vm15669_vm3, %v2030_v23  ;;  %v2809_v30 = vmax.f32 %v2347_v24, 0.0 }
 0x20f   : > { %v2812_v29 = vmax.f32 %v2358_v26, 0.0  ;;  %10828 = vmatmul.mubr.msk.bf16.gmra.mrb[124].mxu1 %vm15669_vm3, %v2031_v19 }
 0x210   : > { %v2810_v31 = vmax.f32 %v2350_v27, 0.0  ;;  %10835 = vmatprep.mubr.msk.bf16.mxu1 %vm15669_vm3, %v12045_v53 }
 0x211   : > { %v12102_v32 = vpack.c.bf16 %v2812_v29, %v2811_v28 }
 0x212   : > { %v2929_v33 = vpack.c.bf16 %v2810_v31, %v2809_v30  ;;  %v10725_v34 = vpop.f32.mrb[20].mxu1 }
 0x213   : > { %v2371_v35 = vadd.f32 %v10725_v34, %v12031_v22  ;;  %v2362_v36 = vpop.f32.mrb[21].mxu1 }
 0x214   : > { %v2363_v37 = vadd.f32 %v12031_v22, %v2362_v36  ;;  %v10726_v38 = vpop.f32.mrb[22].mxu1 }
 0x215   : > { %v2374_v40 = vadd.f32 %v10726_v38, %v12031_v22  ;;  %v2365_v39 = vpop.f32.mrb[23].mxu1  ;;  %v2815_v42 = vmax.f32 %v2371_v35, 0.0 }
 0x216   : > { %v2366_v41 = vadd.f32 %v12031_v22, %v2365_v39  ;;  %v2813_v53 = vmax.f32 %v2363_v37, 0.0 }
 0x217   : > { %v2816_v43 = vmax.f32 %v2374_v40, 0.0  ;;  %10836 = vmatmul.mubr.msk.bf16.vlgmr.msra.gmra.mrb[128].mxu1 %vm15669_vm3, %v12043_v50 }
 0x218   : > { %v2814_v45 = vmax.f32 %v2366_v41, 0.0  ;;  %10839 = vmatprep.mubr.msk.bf16.mxu1 %vm15669_vm3, %v12064_v18 }
 0x219   : > { %v12112_v46 = vpack.c.bf16 %v2816_v43, %v2815_v42 }
 0x21a   : > { %v2931_v48 = vpack.c.bf16 %v2814_v45, %v2813_v53  ;;  %v10729_v49 = vpop.f32.mrb[24].mxu1 }
 0x21b   : > { %v2387_v51 = vadd.f32 %v10729_v49, %v12031_v22  ;;  %v2378_v52 = vpop.f32.mrb[25].mxu1 }
 0x21c   : > { %v2379_v54 = vadd.f32 %v12031_v22, %v2378_v52  ;;  %v10730_v55 = vpop.f32.mrb[26].mxu1 }
 0x21d   : > { %v2390_v56 = vadd.f32 %v10730_v55, %v12031_v22  ;;  %v2381_v57 = vpop.f32.mrb[27].mxu1  ;;  %v2819_v58 = vmax.f32 %v2387_v51, 0.0 }
 0x21e   : > { %v2382_v50 = vadd.f32 %v12031_v22, %v2381_v57  ;;  %v2817_v18 = vmax.f32 %v2379_v54, 0.0 }
 0x21f   : > { %v2820_v59 = vmax.f32 %v2390_v56, 0.0  ;;  %10840 = vmatmul.mubr.msk.bf16.gmra.mrb[132].mxu1 %vm15669_vm3, %v12062_v15 }
 0x220   : > { %v2818_v60 = vmax.f32 %v2382_v50, 0.0  ;;  %10843 = vmatprep.mubr.msk.bf16.mxu1 %vm15669_vm3, %v12078_v47 }
 0x221   : > { %v12122_v61 = vpack.c.bf16 %v2820_v59, %v2819_v58 }
 0x222   : > { %v2933_v62 = vpack.c.bf16 %v2818_v60, %v2817_v18  ;;  %v10733_v63 = vpop.f32.mrb[28].mxu1 }
 0x223   : > { %v2403_v0 = vadd.f32 %v10733_v63, %v12031_v22  ;;  %v2394_v1 = vpop.f32.mrb[29].mxu1 }
 0x224   : > { %v2395_v2 = vadd.f32 %v12031_v22, %v2394_v1  ;;  %v10734_v5 = vpop.f32.mrb[30].mxu1 }
 0x225   : > { %v2406_v6 = vadd.f32 %v10734_v5, %v12031_v22  ;;  %v2397_v7 = vpop.f32.mrb[31].mxu1  ;;  %v2823_v8 = vmax.f32 %v2403_v0, 0.0 }
 0x226   : > { %v2398_v15 = vadd.f32 %v12031_v22, %v2397_v7  ;;  %v2821_v47 = vmax.f32 %v2395_v2, 0.0 }
 0x227   : > { %v2824_v9 = vmax.f32 %v2406_v6, 0.0  ;;  %10844 = vmatmul.mubr.msk.bf16.gmra.mrb[136].mxu1 %vm15669_vm3, %v12076_v44 }
 0x228   : > { %v2822_v3 = vmax.f32 %v2398_v15, 0.0  ;;  %10847 = vmatprep.mubr.msk.bf16.mxu1 %vm15669_vm3, %v12092_v14 }
 0x229   : > { %v12132_v10 = vpack.c.bf16 %v2824_v9, %v2823_v8 }
 0x22a   : > { %v2935_v12 = vpack.c.bf16 %v2822_v3, %v2821_v47  ;;  %v10737_v13 = vpop.f32.mrb[32].mxu1 }
 0x22b   : > { %v2419_v16 = vadd.f32 %v10737_v13, %v12031_v22  ;;  %v2410_v17 = vpop.f32.mrb[33].mxu1 }
 0x22c   : > { %v2411_v19 = vadd.f32 %v12031_v22, %v2410_v17  ;;  %v10738_v20 = vpop.f32.mrb[34].mxu1 }
 0x22d   : > { %v2422_v21 = vadd.f32 %v10738_v20, %v12031_v22  ;;  %v2413_v23 = vpop.f32.mrb[35].mxu1  ;;  %v2827_v24 = vmax.f32 %v2419_v16, 0.0 }
 0x22e   : > { %v2414_v44 = vadd.f32 %v12031_v22, %v2413_v23  ;;  %v2825_v14 = vmax.f32 %v2411_v19, 0.0 }
 0x22f   : > { %v2828_v25 = vmax.f32 %v2422_v21, 0.0  ;;  %10848 = vmatmul.mubr.msk.bf16.gmra.mrb[140].mxu1 %vm15669_vm3, %v12090_v11 }
 0x230   : > { %v2826_v26 = vmax.f32 %v2414_v44, 0.0  ;;  %10851 = vmatprep.mubr.msk.bf16.mxu1 %vm15669_vm3, %v2929_v33 }
 0x231   : > { %v12141_v4 = vpack.c.bf16 %v2828_v25, %v2827_v24 }
 0x232   : > { %v2937_v27 = vpack.c.bf16 %v2826_v26, %v2825_v14  ;;  %v10741_v28 = vpop.f32.mrb[36].mxu1 }
 0x233   : > { %v2435_v29 = vadd.f32 %v10741_v28, %v12031_v22  ;;  %v2426_v30 = vpop.f32.mrb[37].mxu1 }
 0x234   : > { %v2427_v31 = vadd.f32 %v12031_v22, %v2426_v30  ;;  %v10742_v34 = vpop.f32.mrb[38].mxu1 }
 0x235   : > { %v2438_v35 = vadd.f32 %v10742_v34, %v12031_v22  ;;  %v2429_v36 = vpop.f32.mrb[39].mxu1  ;;  %v2831_v11 = vmax.f32 %v2435_v29, 0.0 }
 0x236   : > { %v2430_v37 = vadd.f32 %v12031_v22, %v2429_v36  ;;  %v2829_v33 = vmax.f32 %v2427_v31, 0.0 }
 0x237   : > { %v2832_v38 = vmax.f32 %v2438_v35, 0.0  ;;  %10852 = vmatmul.mubr.msk.bf16.gmra.mrb[144].mxu1 %vm15669_vm3, %v12102_v32 }
 0x238   : > { %v2830_v40 = vmax.f32 %v2430_v37, 0.0  ;;  %10855 = vmatprep.mubr.msk.bf16.mxu1 %vm15669_vm3, %v2931_v48 }
 0x239   : > { %v12150_v39 = vpack.c.bf16 %v2832_v38, %v2831_v11 }
 0x23a   : > { %v2939_v41 = vpack.c.bf16 %v2830_v40, %v2829_v33  ;;  %v10745_v42 = vpop.f32.mrb[40].mxu1 }
 0x23b   : > { %v2451_v43 = vadd.f32 %v10745_v42, %v12031_v22  ;;  %v2442_v53 = vpop.f32.mrb[41].mxu1 }
 0x23c   : > { %v2443_v45 = vadd.f32 %v12031_v22, %v2442_v53  ;;  %v10746_v49 = vpop.f32.mrb[42].mxu1 }
 0x23d   : > { %v2454_v51 = vadd.f32 %v10746_v49, %v12031_v22  ;;  %v2445_v52 = vpop.f32.mrb[43].mxu1  ;;  %v2835_v32 = vmax.f32 %v2451_v43, 0.0 }
 0x23e   : > { %v2446_v54 = vadd.f32 %v12031_v22, %v2445_v52  ;;  %v2833_v48 = vmax.f32 %v2443_v45, 0.0 }
 0x23f   : > { %v2836_v55 = vmax.f32 %v2454_v51, 0.0  ;;  %10856 = vmatmul.mubr.msk.bf16.gmra.mrb[148].mxu1 %vm15669_vm3, %v12112_v46 }
 0x240   : > { %v2834_v56 = vmax.f32 %v2446_v54, 0.0  ;;  %10859 = vmatprep.mubr.msk.bf16.mxu1 %vm15669_vm3, %v2933_v62 }
 0x241   : > { %v12159_v57 = vpack.c.bf16 %v2836_v55, %v2835_v32 }
 0x242   : > { %v2941_v50 = vpack.c.bf16 %v2834_v56, %v2833_v48  ;;  %v10749_v58 = vpop.f32.mrb[44].mxu1 }
 0x243   : > { %v2467_v59 = vadd.f32 %v10749_v58, %v12031_v22  ;;  %v2458_v18 = vpop.f32.mrb[45].mxu1 }
 0x244   : > { %v2459_v60 = vadd.f32 %v12031_v22, %v2458_v18  ;;  %v10750_v63 = vpop.f32.mrb[46].mxu1 }
 0x245   : > { %v2470_v0 = vadd.f32 %v10750_v63, %v12031_v22  ;;  %v2461_v1 = vpop.f32.mrb[47].mxu1  ;;  %v2839_v46 = vmax.f32 %v2467_v59, 0.0 }
 0x246   : > { %v2462_v2 = vadd.f32 %v12031_v22, %v2461_v1  ;;  %v2837_v62 = vmax.f32 %v2459_v60, 0.0 }
 0x247   : > { %v2840_v5 = vmax.f32 %v2470_v0, 0.0  ;;  %10860 = vmatmul.mubr.msk.bf16.gmra.mrb[152].mxu1 %vm15669_vm3, %v12122_v61 }
 0x248   : > { %v2838_v6 = vmax.f32 %v2462_v2, 0.0  ;;  %10863 = vmatprep.mubr.msk.bf16.mxu1 %vm15669_vm3, %v2935_v12 }
 0x249   : > { %v12168_v7 = vpack.c.bf16 %v2840_v5, %v2839_v46 }
 0x24a   : > { %v2943_v15 = vpack.c.bf16 %v2838_v6, %v2837_v62  ;;  %v10753_v8 = vpop.f32.mrb[48].mxu1 }
 0x24b   : > { %v2483_v9 = vadd.f32 %v10753_v8, %v12031_v22  ;;  %v2474_v47 = vpop.f32.mrb[49].mxu1 }
 0x24c   : > { %v2475_v3 = vadd.f32 %v12031_v22, %v2474_v47  ;;  %v10754_v13 = vpop.f32.mrb[50].mxu1 }
 0x24d   : > { %v2486_v16 = vadd.f32 %v10754_v13, %v12031_v22  ;;  %v2477_v17 = vpop.f32.mrb[51].mxu1  ;;  %v2843_v61 = vmax.f32 %v2483_v9, 0.0 }
 0x24e   : > { %v2478_v19 = vadd.f32 %v12031_v22, %v2477_v17  ;;  %v2841_v12 = vmax.f32 %v2475_v3, 0.0 }
 0x24f   : > { %v2844_v20 = vmax.f32 %v2486_v16, 0.0  ;;  %10864 = vmatmul.mubr.msk.bf16.gmra.mrb[156].mxu1 %vm15669_vm3, %v12132_v10 }
 0x250   : > { %v2842_v21 = vmax.f32 %v2478_v19, 0.0  ;;  %10867 = vmatprep.mubr.msk.bf16.mxu1 %vm15669_vm3, %v2937_v27 }
 0x251   : > { %v12177_v23 = vpack.c.bf16 %v2844_v20, %v2843_v61 }
 0x252   : > { %v2945_v44 = vpack.c.bf16 %v2842_v21, %v2841_v12  ;;  %v10757_v24 = vpop.f32.mrb[52].mxu1 }
 0x253   : > { %v2499_v25 = vadd.f32 %v10757_v24, %v12031_v22  ;;  %v2490_v14 = vpop.f32.mrb[53].mxu1 }
 0x254   : > { %v2491_v26 = vadd.f32 %v12031_v22, %v2490_v14  ;;  %v10758_v28 = vpop.f32.mrb[54].mxu1 }
 0x255   : > { %v2502_v29 = vadd.f32 %v10758_v28, %v12031_v22  ;;  %v2493_v30 = vpop.f32.mrb[55].mxu1  ;;  %v2847_v10 = vmax.f32 %v2499_v25, 0.0 }
 0x256   : > { %v2494_v31 = vadd.f32 %v12031_v22, %v2493_v30  ;;  %v2845_v27 = vmax.f32 %v2491_v26, 0.0 }
 0x257   : > { %v2848_v34 = vmax.f32 %v2502_v29, 0.0  ;;  %10868 = vmatmul.mubr.msk.bf16.gmra.mrb[160].mxu1 %vm15669_vm3, %v12141_v4 }
 0x258   : > { %v2846_v35 = vmax.f32 %v2494_v31, 0.0  ;;  %10871 = vmatprep.mubr.msk.bf16.mxu1 %vm15669_vm3, %v2939_v41 }
 0x259   : > { %v12186_v36 = vpack.c.bf16 %v2848_v34, %v2847_v10 }
 0x25a   : > { %v2947_v37 = vpack.c.bf16 %v2846_v35, %v2845_v27  ;;  %v10761_v11 = vpop.f32.mrb[56].mxu1 }
 0x25b   : > { %v2515_v38 = vadd.f32 %v10761_v11, %v12031_v22  ;;  %v2506_v33 = vpop.f32.mrb[57].mxu1 }
 0x25c   : > { %v2507_v40 = vadd.f32 %v12031_v22, %v2506_v33  ;;  %v10762_v42 = vpop.f32.mrb[58].mxu1 }
 0x25d   : > { %v2518_v43 = vadd.f32 %v10762_v42, %v12031_v22  ;;  %v2509_v53 = vpop.f32.mrb[59].mxu1  ;;  %v2851_v4 = vmax.f32 %v2515_v38, 0.0 }
 0x25e   : > { %v2510_v45 = vadd.f32 %v12031_v22, %v2509_v53  ;;  %v2849_v41 = vmax.f32 %v2507_v40, 0.0 }
 0x25f   : > { %v2852_v49 = vmax.f32 %v2518_v43, 0.0  ;;  %10872 = vmatmul.mubr.msk.bf16.gmra.mrb[164].mxu1 %vm15669_vm3, %v12150_v39 }
 0x260   : > { %v2850_v51 = vmax.f32 %v2510_v45, 0.0  ;;  %10875 = vmatprep.mubr.msk.bf16.mxu1 %vm15669_vm3, %v2941_v50 }
 0x261   : > { %v12195_v52 = vpack.c.bf16 %v2852_v49, %v2851_v4 }
 0x262   : > { %v12197_v54 = vpack.c.bf16 %v2850_v51, %v2849_v41  ;;  %v10765_v32 = vpop.f32.mrb[60].mxu1 }
 0x263   : > { %v2531_v55 = vadd.f32 %v10765_v32, %v12031_v22  ;;  %v2522_v48 = vpop.f32.mrb[61].mxu1 }
 0x264   : > { %v2523_v56 = vadd.f32 %v12031_v22, %v2522_v48  ;;  %v10766_v58 = vpop.f32.mrb[62].mxu1 }
 0x265   : > { %v2534_v59 = vadd.f32 %v10766_v58, %v12031_v22  ;;  %v2525_v18 = vpop.f32.mrb[63].mxu1  ;;  %v2855_v60 = vmax.f32 %v2531_v55, 0.0 }
 0x266   : > { %v2526_v39 = vadd.f32 %v12031_v22, %v2525_v18  ;;  %v2853_v50 = vmax.f32 %v2523_v56, 0.0 }
 0x267   : > { %v2856_v63 = vmax.f32 %v2534_v59, 0.0  ;;  %10876 = vmatmul.mubr.msk.bf16.gmra.mrb[168].mxu1 %vm15669_vm3, %v12159_v57 }
 0x268   : > { %v2854_v0 = vmax.f32 %v2526_v39, 0.0  ;;  %10879 = vmatprep.mubr.msk.bf16.mxu1 %vm15669_vm3, %v2943_v15 }
 0x269   : > { %v12206_v1 = vpack.c.bf16 %v2856_v63, %v2855_v60 }
 0x26a   : > { %v12208_v2 = vpack.c.bf16 %v2854_v0, %v2853_v50  ;;  %v10769_v46 = vpop.f32.mrb[64].mxu1 }
 0x26b   : > { %v2547_v5 = vadd.f32 %v10769_v46, %v12031_v22  ;;  %v2538_v62 = vpop.f32.mrb[65].mxu1 }
 0x26c   : > { %v2539_v6 = vadd.f32 %v12031_v22, %v2538_v62  ;;  %v10770_v8 = vpop.f32.mrb[66].mxu1 }
 0x26d   : > { %v2550_v9 = vadd.f32 %v10770_v8, %v12031_v22  ;;  %v2541_v47 = vpop.f32.mrb[67].mxu1  ;;  %v2859_v3 = vmax.f32 %v2547_v5, 0.0 }
 0x26e   : > { %v2542_v57 = vadd.f32 %v12031_v22, %v2541_v47  ;;  %v2857_v15 = vmax.f32 %v2539_v6, 0.0 }
 0x26f   : > { %v2860_v13 = vmax.f32 %v2550_v9, 0.0  ;;  %10880 = vmatmul.mubr.msk.bf16.gmra.mrb[172].mxu1 %vm15669_vm3, %v12168_v7 }
 0x270   : > { %v2858_v16 = vmax.f32 %v2542_v57, 0.0  ;;  %10883 = vmatprep.mubr.msk.bf16.mxu1 %vm15669_vm3, %v2945_v44 }
 0x271   : > { %v12217_v17 = vpack.c.bf16 %v2860_v13, %v2859_v3 }
 0x272   : > { %v12219_v19 = vpack.c.bf16 %v2858_v16, %v2857_v15  ;;  %v10773_v61 = vpop.f32.mrb[68].mxu1 }
 0x273   : > { %v2563_v20 = vadd.f32 %v10773_v61, %v12031_v22  ;;  %v2554_v12 = vpop.f32.mrb[69].mxu1 }
 0x274   : > { %v2555_v21 = vadd.f32 %v12031_v22, %v2554_v12  ;;  %v10774_v24 = vpop.f32.mrb[70].mxu1 }
 0x275   : > { %v2566_v25 = vadd.f32 %v10774_v24, %v12031_v22  ;;  %v2557_v14 = vpop.f32.mrb[71].mxu1  ;;  %v2863_v26 = vmax.f32 %v2563_v20, 0.0 }
 0x276   : > { %v2558_v7 = vadd.f32 %v12031_v22, %v2557_v14  ;;  %v2861_v44 = vmax.f32 %v2555_v21, 0.0 }
 0x277   : > { %v2864_v28 = vmax.f32 %v2566_v25, 0.0  ;;  %10884 = vmatmul.mubr.msk.bf16.gmra.mrb[176].mxu1 %vm15669_vm3, %v12177_v23 }
 0x278   : > { %v2862_v29 = vmax.f32 %v2558_v7, 0.0  ;;  %10887 = vmatprep.mubr.msk.bf16.mxu1 %vm15669_vm3, %v2947_v37  ;;  %v15675_v37 = vmov 0  }
 0x279   : > { %v12228_v30 = vpack.c.bf16 %v2864_v28, %v2863_v26  ;;  %4198 = vst.msk [vmem:[#allocation3 + $0x10] sm:$0xf] %vm15670_vm4, %v15675_v37  ;;  %4194 = vst.msk [vmem:[#allocation3] sm:$0xf] %vm15670_vm4, %v15675_v37  ;;  %6502 = vmatprep.subr.bf16.mxu0 %v15675_v37 }
 0x27a   : > { %v12230_v31 = vpack.c.bf16 %v2862_v29, %v2861_v44  ;;  %v10777_v10 = vpop.f32.mrb[72].mxu1  ;;  %4195 = vst.msk [vmem:[#allocation3 + $0x4] sm:$0xf] %vm15670_vm4, %v15675_v37  ;;  %4196 = vst.msk [vmem:[#allocation3 + $0x8] sm:$0xf] %vm15670_vm4, %v15675_v37 }
 0x27b   : > { %v2579_v34 = vadd.f32 %v10777_v10, %v12031_v22  ;;  %v2570_v27 = vpop.f32.mrb[73].mxu1  ;;  %4197 = vst.msk [vmem:[#allocation3 + $0xc] sm:$0xf] %vm15670_vm4, %v15675_v37  ;;  %4199 = vst.msk [vmem:[#allocation3 + $0x14] sm:$0xf] %vm15670_vm4, %v15675_v37 }
 0x27c   : > { %v2571_v35 = vadd.f32 %v12031_v22, %v2570_v27  ;;  %v10778_v11 = vpop.f32.mrb[74].mxu1  ;;  %4200 = vst.msk [vmem:[#allocation3 + $0x18] sm:$0xf] %vm15670_vm4, %v15675_v37  ;;  %4201 = vst.msk [vmem:[#allocation3 + $0x1c] sm:$0xf] %vm15670_vm4, %v15675_v37 }
 0x27d   : > { %v2582_v38 = vadd.f32 %v10778_v11, %v12031_v22  ;;  %v2573_v33 = vpop.f32.mrb[75].mxu1  ;;  %v2867_v40 = vmax.f32 %v2579_v34, 0.0  ;;  %4202 = vst.msk [vmem:[#allocation3 + $0x20] sm:$0xf] %vm15670_vm4, %v15675_v37  ;;  %4203 = vst.msk [vmem:[#allocation3 + $0x24] sm:$0xf] %vm15670_vm4, %v15675_v37 }
 0x27e   : > { %v2574_v23 = vadd.f32 %v12031_v22, %v2573_v33  ;;  %4204 = vst.msk [vmem:[#allocation3 + $0x28] sm:$0xf] %vm15670_vm4, %v15675_v37  ;;  %4205 = vst.msk [vmem:[#allocation3 + $0x2c] sm:$0xf] %vm15670_vm4, %v15675_v37 }
 0x27f   : > { %v2868_v42 = vmax.f32 %v2582_v38, 0.0  ;;  %10888 = vmatmul.mubr.msk.bf16.gmra.mrb[180].mxu1 %vm15669_vm3, %v12186_v36  ;;  %4206 = vst.msk [vmem:[#allocation3 + $0x30] sm:$0xf] %vm15670_vm4, %v15675_v37  ;;  %4207 = vst.msk [vmem:[#allocation3 + $0x34] sm:$0xf] %vm15670_vm4, %v15675_v37  ;;  %v2865_v36 = vmax.f32 %v2571_v35, 0.0 }
 0x280   : > { %4208 = vst.msk [vmem:[#allocation3 + $0x38] sm:$0xf] %vm15670_vm4, %v15675_v37  ;;  %4209 = vst.msk [vmem:[#allocation3 + $0x3c] sm:$0xf] %vm15670_vm4, %v15675_v37  ;;  %v2866_v43 = vmax.f32 %v2574_v23, 0.0  ;;  %10891 = vmatprep.mubr.msk.bf16.mxu1 %vm15669_vm3, %v12197_v54 }
 0x281   : > { %4210 = vst.msk [vmem:[#allocation3 + $0x40] sm:$0xf] %vm15670_vm4, %v15675_v37  ;;  %4211 = vst.msk [vmem:[#allocation3 + $0x44] sm:$0xf] %vm15670_vm4, %v15675_v37  ;;  %v12323_v53 = vpack.c.bf16 %v2868_v42, %v2867_v40 }
 0x282   : > { %4212 = vst.msk [vmem:[#allocation3 + $0x48] sm:$0xf] %vm15670_vm4, %v15675_v37  ;;  %4213 = vst.msk [vmem:[#allocation3 + $0x4c] sm:$0xf] %vm15670_vm4, %v15675_v37  ;;  %v12325_v45 = vpack.c.bf16 %v2866_v43, %v2865_v36  ;;  %v10781_v4 = vpop.f32.mrb[76].mxu1 }
 0x283   : > { %4214 = vst.msk [vmem:[#allocation3 + $0x50] sm:$0xf] %vm15670_vm4, %v15675_v37  ;;  %4215 = vst.msk [vmem:[#allocation3 + $0x54] sm:$0xf] %vm15670_vm4, %v15675_v37  ;;  %v2595_v49 = vadd.f32 %v10781_v4, %v12031_v22  ;;  %v2586_v41 = vpop.f32.mrb[77].mxu1 }
 0x284   : > { %4216 = vst.msk [vmem:[#allocation3 + $0x58] sm:$0xf] %vm15670_vm4, %v15675_v37  ;;  %4217 = vst.msk [vmem:[#allocation3 + $0x5c] sm:$0xf] %vm15670_vm4, %v15675_v37  ;;  %v2587_v51 = vadd.f32 %v12031_v22, %v2586_v41  ;;  %v10782_v32 = vpop.f32.mrb[78].mxu1 }
 0x285   : > { %4218 = vst.msk [vmem:[#allocation3 + $0x60] sm:$0xf] %vm15670_vm4, %v15675_v37  ;;  %4219 = vst.msk [vmem:[#allocation3 + $0x64] sm:$0xf] %vm15670_vm4, %v15675_v37  ;;  %v2598_v55 = vadd.f32 %v10782_v32, %v12031_v22  ;;  %v2589_v48 = vpop.f32.mrb[79].mxu1  ;;  %v2871_v58 = vmax.f32 %v2595_v49, 0.0 }
 0x286   : > { %4220 = vst.msk [vmem:[#allocation3 + $0x68] sm:$0xf] %vm15670_vm4, %v15675_v37  ;;  %4221 = vst.msk [vmem:[#allocation3 + $0x6c] sm:$0xf] %vm15670_vm4, %v15675_v37  ;;  %v2590_v56 = vadd.f32 %v12031_v22, %v2589_v48  ;;  %v2869_v54 = vmax.f32 %v2587_v51, 0.0 }
 0x287   : > { %4222 = vst.msk [vmem:[#allocation3 + $0x70] sm:$0xf] %vm15670_vm4, %v15675_v37  ;;  %4223 = vst.msk [vmem:[#allocation3 + $0x74] sm:$0xf] %vm15670_vm4, %v15675_v37  ;;  %v2872_v59 = vmax.f32 %v2598_v55, 0.0  ;;  %10892 = vmatmul.mubr.msk.bf16.gmra.mrb[184].mxu1 %vm15669_vm3, %v12195_v52 }
 0x288   : > { %4224 = vst.msk [vmem:[#allocation3 + $0x78] sm:$0xf] %vm15670_vm4, %v15675_v37  ;;  %4225 = vst.msk [vmem:[#allocation3 + $0x7c] sm:$0xf] %vm15670_vm4, %v15675_v37  ;;  %v2870_v18 = vmax.f32 %v2590_v56, 0.0  ;;  %10895 = vmatprep.mubr.msk.bf16.mxu1 %vm15669_vm3, %v12208_v2 }
 0x289   : > { %4226 = vst.msk [vmem:[#allocation3 + $0x80] sm:$0xf] %vm15670_vm4, %v15675_v37  ;;  %4227 = vst.msk [vmem:[#allocation3 + $0x84] sm:$0xf] %vm15670_vm4, %v15675_v37  ;;  %v12335_v39 = vpack.c.bf16 %v2872_v59, %v2871_v58 }
 0x28a   : > { %4228 = vst.msk [vmem:[#allocation3 + $0x88] sm:$0xf] %vm15670_vm4, %v15675_v37  ;;  %4229 = vst.msk [vmem:[#allocation3 + $0x8c] sm:$0xf] %vm15670_vm4, %v15675_v37  ;;  %v12337_v60 = vpack.c.bf16 %v2870_v18, %v2869_v54  ;;  %v10785_v63 = vpop.f32.mrb[80].mxu1 }
 0x28b   : > { %4230 = vst.msk [vmem:[#allocation3 + $0x90] sm:$0xf] %vm15670_vm4, %v15675_v37  ;;  %4231 = vst.msk [vmem:[#allocation3 + $0x94] sm:$0xf] %vm15670_vm4, %v15675_v37  ;;  %v2611_v50 = vadd.f32 %v10785_v63, %v12031_v22  ;;  %v2602_v0 = vpop.f32.mrb[81].mxu1 }
 0x28c   : > { %4232 = vst.msk [vmem:[#allocation3 + $0x98] sm:$0xf] %vm15670_vm4, %v15675_v37  ;;  %4233 = vst.msk [vmem:[#allocation3 + $0x9c] sm:$0xf] %vm15670_vm4, %v15675_v37  ;;  %v2603_v46 = vadd.f32 %v12031_v22, %v2602_v0  ;;  %v10786_v5 = vpop.f32.mrb[82].mxu1 }
 0x28d   : > { %4234 = vst.msk [vmem:[#allocation3 + $0xa0] sm:$0xf] %vm15670_vm4, %v15675_v37  ;;  %v2614_v62 = vadd.f32 %v10786_v5, %v12031_v22  ;;  %v2605_v6 = vpop.f32.mrb[83].mxu1  ;;  %v2875_v8 = vmax.f32 %v2611_v50, 0.0 }
 0x28e   : > { %v2606_v52 = vadd.f32 %v12031_v22, %v2605_v6  ;;  %v2873_v2 = vmax.f32 %v2603_v46, 0.0 }
 0x28f   : > { %v2876_v9 = vmax.f32 %v2614_v62, 0.0  ;;  %10896 = vmatmul.mubr.msk.bf16.gmra.mrb[188].mxu1 %vm15669_vm3, %v12206_v1 }
 0x290   : > { %v2874_v47 = vmax.f32 %v2606_v52, 0.0  ;;  %10899 = vmatprep.mubr.msk.bf16.mxu1 %vm15669_vm3, %v12219_v19 }
 0x291   : > { %v12347_v57 = vpack.c.bf16 %v2876_v9, %v2875_v8 }
 0x292   : > { %v12349_v3 = vpack.c.bf16 %v2874_v47, %v2873_v2  ;;  %v10789_v13 = vpop.f32.mrb[84].mxu1  ;;  %v12402_v2 = vld [vmem:[%s15722_s4] ss:$0 sm:$0xff]  ;;  %s11473_s4 = sshll.u32 %s11540_s1, 4  ;;  %s11474_s4 = int_to_ptr.vmem [resolvable:$false] %s11473_s4 }
 0x293   : > { %v2627_v15 = vadd.f32 %v10789_v13, %v12031_v22  ;;  %v2618_v16 = vpop.f32.mrb[85].mxu1  ;;  %s11475_s5 = scalar_lea.vmem %s11474_s4, 32 }
 0x294   : > { %v2619_v61 = vadd.f32 %v12031_v22, %v2618_v16  ;;  %v10790_v20 = vpop.f32.mrb[86].mxu1 }
 0x295   : > { %v2630_v12 = vadd.f32 %v10790_v20, %v12031_v22  ;;  %v2621_v1 = vpop.f32.mrb[87].mxu1  ;;  %v2879_v24 = vmax.f32 %v2627_v15, 0.0 }
 0x296   : > { %v2622_v21 = vadd.f32 %v12031_v22, %v2621_v1  ;;  %v2877_v19 = vmax.f32 %v2619_v61, 0.0 }
 0x297   : > { %v2880_v25 = vmax.f32 %v2630_v12, 0.0  ;;  %10900 = vmatmul.mubr.msk.bf16.gmra.mrb[192].mxu1 %vm15669_vm3, %v12217_v17  ;;  %v11330_v12 = vld [vmem:[%s15636_s7] sm:$0xff]  }
 0x298   : > { %v2878_v14 = vmax.f32 %v2622_v21, 0.0  ;;  %10903 = vmatprep.mubr.msk.bf16.mxu1 %vm15669_vm3, %v12230_v31  ;;  %6503 = vmatpush1.bf16.msra.mxu0 %v11330_v12 }
 0x299   : > { %v12359_v7 = vpack.c.bf16 %v2880_v25, %v2879_v24  ;;  %6504 = vmatprep.subr.bf16.mxu0 %v15675_v37 }
 0x29a   : > { %v12361_v26 = vpack.c.bf16 %v2878_v14, %v2877_v19  ;;  %v10793_v28 = vpop.f32.mrb[88].mxu1 }
 0x29b   : > { %v2643_v44 = vadd.f32 %v10793_v28, %v12031_v22  ;;  %v2634_v29 = vpop.f32.mrb[89].mxu1 }
 0x29c   : > { %v2635_v10 = vadd.f32 %v12031_v22, %v2634_v29  ;;  %v10794_v34 = vpop.f32.mrb[90].mxu1 }
 0x29d   : > { %v2646_v27 = vadd.f32 %v10794_v34, %v12031_v22  ;;  %v2637_v35 = vpop.f32.mrb[91].mxu1  ;;  %v2883_v11 = vmax.f32 %v2643_v44, 0.0 }
 0x29e   : > { %v2638_v17 = vadd.f32 %v12031_v22, %v2637_v35  ;;  %v2881_v31 = vmax.f32 %v2635_v10, 0.0 }
 0x29f   : > { %v2884_v38 = vmax.f32 %v2646_v27, 0.0  ;;  %10904 = vmatmul.mubr.msk.bf16.gmra.mrb[196].mxu1 %vm15669_vm3, %v12228_v30 }
 0x2a0   : > { %v2882_v33 = vmax.f32 %v2638_v17, 0.0  ;;  %10907 = vmatprep.mubr.msk.bf16.mxu1 %vm15669_vm3, %v12325_v45 }
 0x2a1   : > { %v12371_v23 = vpack.c.bf16 %v2884_v38, %v2883_v11 }
 0x2a2   : > { %v12373_v40 = vpack.c.bf16 %v2882_v33, %v2881_v31  ;;  %v10797_v42 = vpop.f32.mrb[92].mxu1 }
 0x2a3   : > { %v2659_v36 = vadd.f32 %v10797_v42, %v12031_v22  ;;  %v2650_v43 = vpop.f32.mrb[93].mxu1 }
 0x2a4   : > { %v2651_v4 = vadd.f32 %v12031_v22, %v2650_v43  ;;  %v10798_v49 = vpop.f32.mrb[94].mxu1 }
 0x2a5   : > { %v2662_v41 = vadd.f32 %v10798_v49, %v12031_v22  ;;  %v2653_v51 = vpop.f32.mrb[95].mxu1  ;;  %v2887_v32 = vmax.f32 %v2659_v36, 0.0 }
 0x2a6   : > { %v2654_v30 = vadd.f32 %v12031_v22, %v2653_v51  ;;  %v2885_v45 = vmax.f32 %v2651_v4, 0.0 }
 0x2a7   : > { %v2888_v55 = vmax.f32 %v2662_v41, 0.0  ;;  %10908 = vmatmul.mubr.msk.bf16.gmra.mrb[200].mxu1 %vm15669_vm3, %v12323_v53 }
 0x2a8   : > { %v2886_v48 = vmax.f32 %v2654_v30, 0.0  ;;  %10911 = vmatprep.mubr.msk.bf16.mxu1 %vm15669_vm3, %v12337_v60 }
 0x2a9   : > { %v12383_v56 = vpack.c.bf16 %v2888_v55, %v2887_v32 }
 0x2aa   : > { %v12385_v58 = vpack.c.bf16 %v2886_v48, %v2885_v45  ;;  %v10801_v59 = vpop.f32.mrb[96].mxu1 }
 0x2ab   : > { %v2675_v54 = vadd.f32 %v10801_v59, %v12031_v22  ;;  %v2666_v18 = vpop.f32.mrb[97].mxu1 }
 0x2ac   : > { %v2667_v63 = vadd.f32 %v12031_v22, %v2666_v18  ;;  %v10802_v50 = vpop.f32.mrb[98].mxu1 }
 0x2ad   : > { %v2678_v0 = vadd.f32 %v10802_v50, %v12031_v22  ;;  %v2669_v46 = vpop.f32.mrb[99].mxu1  ;;  %v2891_v5 = vmax.f32 %v2675_v54, 0.0 }
 0x2ae   : > { %v2670_v53 = vadd.f32 %v12031_v22, %v2669_v46  ;;  %v2889_v60 = vmax.f32 %v2667_v63, 0.0 }
 0x2af   : > { %v2892_v62 = vmax.f32 %v2678_v0, 0.0  ;;  %10912 = vmatmul.mubr.msk.bf16.gmra.mrb[204].mxu1 %vm15669_vm3, %v12335_v39 }
 0x2b0   : > { %v2890_v6 = vmax.f32 %v2670_v53, 0.0  ;;  %10915 = vmatprep.mubr.msk.bf16.mxu1 %vm15669_vm3, %v12349_v3 }
 0x2b1   : > { %v12395_v52 = vpack.c.bf16 %v2892_v62, %v2891_v5 }
 0x2b2   : > { %v12397_v8 = vpack.c.bf16 %v2890_v6, %v2889_v60  ;;  %v10805_v9 = vpop.f32.mrb[100].mxu1 }
 0x2b3   : > { %v2691_v22 = vadd.f32 %v12402_v2, %v10805_v9  ;;  %v2682_v47 = vpop.f32.mrb[101].mxu1 }
 0x2b4   : > { %v2683_v39 = vadd.f32 %v12402_v2, %v2682_v47  ;;  %v10806_v13 = vpop.f32.mrb[102].mxu1 }
 0x2b5   : > { %v2694_v15 = vadd.f32 %v12402_v2, %v10806_v13  ;;  %v2685_v16 = vpop.f32.mrb[103].mxu1  ;;  %v2895_v61 = vmax.f32 %v2691_v22, 0.0 }
 0x2b6   : > { %v2686_v3 = vadd.f32 %v12402_v2, %v2685_v16  ;;  %v2893_v1 = vmax.f32 %v2683_v39, 0.0 }
 0x2b7   : > { %v2896_v20 = vmax.f32 %v2694_v15, 0.0  ;;  %10916 = vmatmul.mubr.msk.bf16.gmra.mrb[208].mxu1 %vm15669_vm3, %v12347_v57 }
 0x2b8   : > { %v2894_v21 = vmax.f32 %v2686_v3, 0.0  ;;  %10919 = vmatprep.mubr.msk.bf16.mxu1 %vm15669_vm3, %v12361_v26 }
 0x2b9   : > { %v12415_v24 = vpack.c.bf16 %v2896_v20, %v2895_v61 }
 0x2ba   : > { %v12417_v25 = vpack.c.bf16 %v2894_v21, %v2893_v1  ;;  %v10809_v19 = vpop.f32.mrb[104].mxu1 }
 0x2bb   : > { %v2707_v14 = vadd.f32 %v12402_v2, %v10809_v19  ;;  %v2698_v57 = vpop.f32.mrb[105].mxu1 }
 0x2bc   : > { %v2699_v28 = vadd.f32 %v12402_v2, %v2698_v57  ;;  %v10810_v44 = vpop.f32.mrb[106].mxu1 }
 0x2bd   : > { %v2710_v29 = vadd.f32 %v12402_v2, %v10810_v44  ;;  %v2701_v10 = vpop.f32.mrb[107].mxu1  ;;  %v2899_v26 = vmax.f32 %v2707_v14, 0.0 }
 0x2be   : > { %v2702_v34 = vadd.f32 %v12402_v2, %v2701_v10  ;;  %v2897_v35 = vmax.f32 %v2699_v28, 0.0 }
 0x2bf   : > { %v2900_v27 = vmax.f32 %v2710_v29, 0.0  ;;  %10920 = vmatmul.mubr.msk.bf16.gmra.mrb[212].mxu1 %vm15669_vm3, %v12359_v7  ;;  %v11334_v7 = vld [vmem:[%s15636_s7 + $0x8] sm:$0xff]  }
 0x2c0   : > { %v2898_v17 = vmax.f32 %v2702_v34, 0.0  ;;  %10923 = vmatprep.mubr.msk.bf16.mxu1 %vm15669_vm3, %v12373_v40  ;;  %6505 = vmatpush1.bf16.msra.mxu0 %v11334_v7 }
 0x2c1   : > { %v12428_v11 = vpack.c.bf16 %v2900_v27, %v2899_v26  ;;  %6506 = vmatprep.subr.bf16.mxu0 %v15675_v37 }
 0x2c2   : > { %v12430_v38 = vpack.c.bf16 %v2898_v17, %v2897_v35  ;;  %v10813_v31 = vpop.f32.mrb[108].mxu1 }
 0x2c3   : > { %v2723_v33 = vadd.f32 %v12402_v2, %v10813_v31  ;;  %v2714_v42 = vpop.f32.mrb[109].mxu1 }
 0x2c4   : > { %v2715_v36 = vadd.f32 %v12402_v2, %v2714_v42  ;;  %v10814_v43 = vpop.f32.mrb[110].mxu1 }
 0x2c5   : > { %v2726_v4 = vadd.f32 %v12402_v2, %v10814_v43  ;;  %v2717_v49 = vpop.f32.mrb[111].mxu1  ;;  %v2903_v41 = vmax.f32 %v2723_v33, 0.0 }
 0x2c6   : > { %v2718_v40 = vadd.f32 %v12402_v2, %v2717_v49  ;;  %v2901_v30 = vmax.f32 %v2715_v36, 0.0 }
 0x2c7   : > { %v2904_v51 = vmax.f32 %v2726_v4, 0.0  ;;  %10924 = vmatmul.mubr.msk.bf16.gmra.mrb[216].mxu1 %vm15669_vm3, %v12371_v23 }
 0x2c8   : > { %v2902_v32 = vmax.f32 %v2718_v40, 0.0  ;;  %10927 = vmatprep.mubr.msk.bf16.mxu1 %vm15669_vm3, %v12385_v58 }
 0x2c9   : > { %v12444_v55 = vpack.c.bf16 %v2904_v51, %v2903_v41  ;;  %v12502_v51 = vld [vmem:[%s15635_s6] ss:$0 sm:$0xff] }
 0x2ca   : > { %v12446_v45 = vpack.c.bf16 %v2902_v32, %v2901_v30  ;;  %v10817_v48 = vpop.f32.mrb[112].mxu1 }
 0x2cb   : > { %v2739_v59 = vadd.f32 %v12402_v2, %v10817_v48  ;;  %v2730_v54 = vpop.f32.mrb[113].mxu1 }
 0x2cc   : > { %v2731_v18 = vadd.f32 %v12402_v2, %v2730_v54  ;;  %v10818_v63 = vpop.f32.mrb[114].mxu1 }
 0x2cd   : > { %v2742_v23 = vadd.f32 %v12402_v2, %v10818_v63  ;;  %v2733_v50 = vpop.f32.mrb[115].mxu1  ;;  %v2907_v46 = vmax.f32 %v2739_v59, 0.0 }
 0x2ce   : > { %v2734_v0 = vadd.f32 %v12402_v2, %v2733_v50  ;;  %v2905_v53 = vmax.f32 %v2731_v18, 0.0 }
 0x2cf   : > { %v2908_v58 = vmax.f32 %v2742_v23, 0.0  ;;  %10928 = vmatmul.mubr.msk.bf16.gmra.mrb[220].mxu1 %vm15669_vm3, %v12383_v56 }
 0x2d0   : > { %v2906_v5 = vmax.f32 %v2734_v0, 0.0  ;;  %10931 = vmatprep.mubr.msk.bf16.mxu1 %vm15669_vm3, %v12397_v8  ;;  %v11336_v8 = vld [vmem:[%s15636_s7 + $0x10] sm:$0xff]  }
 0x2d1   : > { %v12456_v62 = vpack.c.bf16 %v2908_v58, %v2907_v46  ;;  %6507 = vmatpush1.bf16.msra.mxu0 %v11336_v8 }
 0x2d2   : > { %v12458_v60 = vpack.c.bf16 %v2906_v5, %v2905_v53  ;;  %v10821_v6 = vpop.f32.mrb[116].mxu1  ;;  %6508 = vmatprep.subr.bf16.mxu0 %v15675_v37 }
 0x2d3   : > { %v2755_v9 = vadd.f32 %v12402_v2, %v10821_v6  ;;  %v2746_v22 = vpop.f32.mrb[117].mxu1 }
 0x2d4   : > { %v2747_v47 = vadd.f32 %v12402_v2, %v2746_v22  ;;  %v10822_v39 = vpop.f32.mrb[118].mxu1 }
 0x2d5   : > { %v2758_v13 = vadd.f32 %v12402_v2, %v10822_v39  ;;  %v2749_v15 = vpop.f32.mrb[119].mxu1  ;;  %v2911_v16 = vmax.f32 %v2755_v9, 0.0 }
 0x2d6   : > { %v2750_v56 = vadd.f32 %v12402_v2, %v2749_v15  ;;  %v2909_v61 = vmax.f32 %v2747_v47, 0.0 }
 0x2d7   : > { %v2912_v3 = vmax.f32 %v2758_v13, 0.0  ;;  %10932 = vmatmul.mubr.msk.bf16.gmra.mrb[224].mxu1 %vm15669_vm3, %v12395_v52 }
 0x2d8   : > { %v2910_v20 = vmax.f32 %v2750_v56, 0.0  ;;  %10935 = vmatprep.mubr.msk.bf16.mxu1 %vm15669_vm3, %v12417_v25 }
 0x2d9   : > { %v12471_v12 = vpack.c.bf16 %v2912_v3, %v2911_v16 }
 0x2da   : > { %v12473_v1 = vpack.c.bf16 %v2910_v20, %v2909_v61  ;;  %v10825_v21 = vpop.f32.mrb[120].mxu1 }
 0x2db   : > { %v2771_v19 = vadd.f32 %v12402_v2, %v10825_v21  ;;  %v2762_v52 = vpop.f32.mrb[121].mxu1  ;;  %v11340_v21 = vld [vmem:[%s15636_s7 + $0x20] sm:$0xff]  }
 0x2dc   : > { %v2763_v14 = vadd.f32 %v12402_v2, %v2762_v52  ;;  %v10826_v57 = vpop.f32.mrb[122].mxu1 }
 0x2dd   : > { %v2774_v28 = vadd.f32 %v12402_v2, %v10826_v57  ;;  %v2765_v44 = vpop.f32.mrb[123].mxu1  ;;  %v2915_v25 = vmax.f32 %v2771_v19, 0.0 }
 0x2de   : > { %v2766_v29 = vadd.f32 %v12402_v2, %v2765_v44  ;;  %v2913_v34 = vmax.f32 %v2763_v14, 0.0 }
 0x2df   : > { %v2916_v10 = vmax.f32 %v2774_v28, 0.0  ;;  %10936 = vmatmul.mubr.msk.bf16.gmra.mrb[228].mxu1 %vm15669_vm3, %v12415_v24 }
 0x2e0   : > { %v2914_v26 = vmax.f32 %v2766_v29, 0.0  ;;  %10939 = vmatprep.mubr.msk.bf16.mxu1 %vm15669_vm3, %v12430_v38  ;;  %v11338_v38 = vld [vmem:[%s15636_s7 + $0x18] sm:$0xff]  }
 0x2e1   : > { %v12484_v27 = vpack.c.bf16 %v2916_v10, %v2915_v25  ;;  %6509 = vmatpush1.bf16.msra.mxu0 %v11338_v38 }
 0x2e2   : > { %v12486_v35 = vpack.c.bf16 %v2914_v26, %v2913_v34  ;;  %v10829_v17 = vpop.f32.mrb[124].mxu1  ;;  %6510 = vmatprep.subr.bf16.mxu0 %v15675_v37 }
 0x2e3   : > { %v2787_v31 = vadd.f32 %v12402_v2, %v10829_v17  ;;  %v2778_v33 = vpop.f32.mrb[125].mxu1 }
 0x2e4   : > { %v2779_v42 = vadd.f32 %v12402_v2, %v2778_v33  ;;  %v10830_v36 = vpop.f32.mrb[126].mxu1 }
 0x2e5   : > { %v2790_v43 = vadd.f32 %v12402_v2, %v10830_v36  ;;  %v2781_v4 = vpop.f32.mrb[127].mxu1  ;;  %v2919_v49 = vmax.f32 %v2787_v31, 0.0  ;;  %6511 = vmatpush1.bf16.msra.mxu0 %v11340_v21 }
 0x2e6   : > { %v2782_v24 = vadd.f32 %v12402_v2, %v2781_v4  ;;  %v2917_v40 = vmax.f32 %v2779_v42, 0.0  ;;  %6512 = vmatprep.subr.bf16.mxu0 %v15675_v37 }
 0x2e7   : > { %v2920_v7 = vmax.f32 %v2790_v43, 0.0  ;;  %10940 = vmatmul.mubr.msk.bf16.gmra.mrb[232].mxu1 %vm15669_vm3, %v12428_v11 }
 0x2e8   : > { %v2918_v41 = vmax.f32 %v2782_v24, 0.0  ;;  %10943 = vmatprep.mubr.msk.bf16.mxu1 %vm15669_vm3, %v12446_v45 }
 0x2e9   : > { %v12504_v2 = vpack.c.bf16 %v2920_v7, %v2919_v49 }
 0x2ea   : > { %v12506_v30 = vpack.c.bf16 %v2918_v41, %v2917_v40  ;;  %v10837_v11 = vpop.f32.mrb[128].mxu1 }
 0x2eb   : > { %v3243_v32 = vadd.f32 %v10837_v11, %v12502_v51  ;;  %v3234_v48 = vpop.f32.mrb[129].mxu1 }
 0x2ec   : > { %v3235_v59 = vadd.f32 %v12502_v51, %v3234_v48  ;;  %v10838_v54 = vpop.f32.mrb[130].mxu1 }
 0x2ed   : > { %v3246_v45 = vadd.f32 %v10838_v54, %v12502_v51  ;;  %v3237_v18 = vpop.f32.mrb[131].mxu1  ;;  %v3747_v23 = vmax.f32 %v3243_v32, 0.0 }
 0x2ee   : > { %v3238_v63 = vadd.f32 %v12502_v51, %v3237_v18  ;;  %v3745_v0 = vmax.f32 %v3235_v59, 0.0 }
 0x2ef   : > { %v3748_v50 = vmax.f32 %v3246_v45, 0.0  ;;  %10944 = vmatmul.mubr.msk.bf16.gmra.mrb[236].mxu1 %vm15669_vm3, %v12444_v55 }
 0x2f0   : > { %v3746_v46 = vmax.f32 %v3238_v63, 0.0  ;;  %10947 = vmatprep.mubr.msk.bf16.mxu1 %vm15669_vm3, %v12458_v60 }
 0x2f1   : > { %v3874_v58 = vpack.c.bf16 %v3748_v50, %v3747_v23 }
 0x2f2   : > { %v3873_v53 = vpack.c.bf16 %v3746_v46, %v3745_v0  ;;  %v10841_v5 = vpop.f32.mrb[132].mxu1 }
 0x2f3   : > { %v3939_v6 = vunpack.c.l.bf16 %v3874_v58  ;;  %v3940_v9 = vunpack.c.h.bf16 %v3874_v58  ;;  %v3259_v22 = vadd.f32 %v10841_v5, %v12502_v51  ;;  %v3250_v47 = vpop.f32.mrb[133].mxu1 }
 0x2f4   : > { %v3937_v39 = vunpack.c.l.bf16 %v3873_v53  ;;  %v3938_v13 = vunpack.c.h.bf16 %v3873_v53  ;;  %v3251_v15 = vadd.f32 %v12502_v51, %v3250_v47  ;;  %v10842_v56 = vpop.f32.mrb[134].mxu1 }
 0x2f5   : > { %4067 = vst.msk [vmem:[#allocation2 + $0x10] sm:$0xff] %vm15669_vm3, %v3939_v6  ;;  %4068 = vst.msk [vmem:[#allocation2 + $0x18] sm:$0xff] %vm15669_vm3, %v3940_v9  ;;  %v3262_v55 = vadd.f32 %v10842_v56, %v12502_v51  ;;  %v3253_v60 = vpop.f32.mrb[135].mxu1  ;;  %v3751_v3 = vmax.f32 %v3259_v22, 0.0  ;;  %v11342_v9 = vld [vmem:[%s15636_s7 + $0x28] sm:$0xff]  }
 0x2f6   : > { %4065 = vst.msk [vmem:[#allocation2] sm:$0xff] %vm15669_vm3, %v3937_v39  ;;  %4066 = vst.msk [vmem:[#allocation2 + $0x8] sm:$0xff] %vm15669_vm3, %v3938_v13  ;;  %v3254_v16 = vadd.f32 %v12502_v51, %v3253_v60  ;;  %v3749_v61 = vmax.f32 %v3251_v15, 0.0  ;;  %6513 = vmatpush1.bf16.msra.mxu0 %v11342_v9 }
 0x2f7   : > { %v3752_v8 = vmax.f32 %v3262_v55, 0.0  ;;  %10948 = vmatmul.mubr.msk.bf16.gmra.mrb[240].mxu1 %vm15669_vm3, %v12456_v62  ;;  %6514 = vmatprep.subr.bf16.mxu0 %v15675_v37 }
 0x2f8   : > { %v3750_v20 = vmax.f32 %v3254_v16, 0.0  ;;  %10951 = vmatprep.mubr.msk.bf16.mxu1 %vm15669_vm3, %v12473_v1 }
 0x2f9   : > { %v3876_v19 = vpack.c.bf16 %v3752_v8, %v3751_v3 }
 0x2fa   : > { %v3875_v52 = vpack.c.bf16 %v3750_v20, %v3749_v61  ;;  %v10845_v14 = vpop.f32.mrb[136].mxu1 }
 0x2fb   : > { %v3943_v57 = vunpack.c.l.bf16 %v3876_v19  ;;  %v3944_v28 = vunpack.c.h.bf16 %v3876_v19  ;;  %v3275_v44 = vadd.f32 %v10845_v14, %v12502_v51  ;;  %v3266_v29 = vpop.f32.mrb[137].mxu1 }
 0x2fc   : > { %v3941_v62 = vunpack.c.l.bf16 %v3875_v52  ;;  %v3942_v25 = vunpack.c.h.bf16 %v3875_v52  ;;  %v3267_v10 = vadd.f32 %v12502_v51, %v3266_v29  ;;  %v10846_v1 = vpop.f32.mrb[138].mxu1  ;;  %v4240_v4 = vld [vmem:[#allocation2 + $0x10] ss:$2 sm:$0xff]  ;;  %v4368_v24 = vld [vmem:[#allocation2 + $0x11] ss:$2 sm:$0xff] }
 0x2fd   : > { %4071 = vst.msk [vmem:[#allocation2 + $0x30] sm:$0xff] %vm15669_vm3, %v3943_v57  ;;  %4072 = vst.msk [vmem:[#allocation2 + $0x38] sm:$0xff] %vm15669_vm3, %v3944_v28  ;;  %v3278_v34 = vadd.f32 %v10846_v1, %v12502_v51  ;;  %v3269_v26 = vpop.f32.mrb[139].mxu1  ;;  %v3755_v31 = vmax.f32 %v3275_v44, 0.0  ;;  %v4238_v38 = vld [vmem:[#allocation2] ss:$2 sm:$0xff] }
 0x2fe   : > { %4069 = vst.msk [vmem:[#allocation2 + $0x20] sm:$0xff] %vm15669_vm3, %v3941_v62  ;;  %4070 = vst.msk [vmem:[#allocation2 + $0x28] sm:$0xff] %vm15669_vm3, %v3942_v25  ;;  %v3270_v17 = vadd.f32 %v12502_v51, %v3269_v26  ;;  %v3753_v42 = vmax.f32 %v3267_v10, 0.0  ;;  %v4366_v40 = vld [vmem:[#allocation2 + $0x1] ss:$2 sm:$0xff] }
 0x2ff   : > { %v3756_v33 = vmax.f32 %v3278_v34, 0.0  ;;  %10952 = vmatmul.mubr.msk.bf16.gmra.mrb[244].mxu1 %vm15669_vm3, %v12471_v12  ;;  %v4493_v53 = vmax.f32 %v4238_v38, %v4366_v40  ;;  %v5172_v28 = vld [vmem:[#allocation3] sm:$0xf]  ;;  %v12561_v44 = vld [vmem:[#allocation3 + $0x4] sm:$0xf]  ;;  %v15727_v40 = vmov 0 }
 0x300   : > { %v3754_v36 = vmax.f32 %v3270_v17, 0.0  ;;  %10955 = vmatprep.mubr.msk.bf16.mxu1 %vm15669_vm3, %v12486_v35  ;;  %v4494_v35 = vmax.f32 %v4240_v4, %v4368_v24  ;;  %v12579_v4 = vcombine.low %v5172_v28, %v12561_v44  ;;  %v5209_v38 = vld [vmem:[#allocation3] sm:$0xe]  ;;  %v15728_v40 = vsel %vm12590_vm13, 4294967295, %v15727_v40  ;;  %v11345_v28 = vld [vmem:[%s15636_s7 + $0x30] sm:$0xff]  }
 0x301   : > { %v3878_v43 = vpack.c.bf16 %v3756_v33, %v3755_v31  ;;  %v4599_v31 = vld [vmem:[#allocation3 + $0x10] sm:$0x3]  ;;  %6515 = vmatpush1.bf16.msra.mxu0 %v11345_v28 }
 0x302   : > { %v3877_v49 = vpack.c.bf16 %v3754_v36, %v3753_v42  ;;  %v10849_v7 = vpop.f32.mrb[140].mxu1  ;;  %6516 = vmatprep.subr.bf16.mxu0 %v15675_v37 }
 0x303   : > { %v3947_v41 = vunpack.c.l.bf16 %v3878_v43  ;;  %v3948_v11 = vunpack.c.h.bf16 %v3878_v43  ;;  %v3291_v32 = vadd.f32 %v10849_v7, %v12502_v51  ;;  %v3282_v48 = vpop.f32.mrb[141].mxu1  ;;  %v4593_v43 = vld [vmem:[#allocation3 + $0x8] sm:$0xe] }
 0x304   : > { %v4244_v59 = vld [vmem:[#allocation2 + $0x30] ss:$2 sm:$0xff]  ;;  %v4372_v54 = vld [vmem:[#allocation2 + $0x31] ss:$2 sm:$0xff]  ;;  %v3945_v12 = vunpack.c.l.bf16 %v3877_v49  ;;  %v3946_v45 = vunpack.c.h.bf16 %v3877_v49  ;;  %v3283_v18 = vadd.f32 %v12502_v51, %v3282_v48  ;;  %v10850_v63 = vpop.f32.mrb[142].mxu1 }
 0x305   : > { %v4496_v23 = vmax.f32 %v4244_v59, %v4372_v54  ;;  %v4242_v50 = vld [vmem:[#allocation2 + $0x20] ss:$2 sm:$0xff]  ;;  %v4370_v0 = vld [vmem:[#allocation2 + $0x21] ss:$2 sm:$0xff]  ;;  %4075 = vst.msk [vmem:[#allocation2 + $0x50] sm:$0xff] %vm15669_vm3, %v3947_v41  ;;  %4076 = vst.msk [vmem:[#allocation2 + $0x58] sm:$0xff] %vm15669_vm3, %v3948_v11  ;;  %v3294_v46 = vadd.f32 %v10850_v63, %v12502_v51 }
 0x306   : > { %v3285_v58 = vpop.f32.mrb[143].mxu1  ;;  %v4495_v5 = vmax.f32 %v4242_v50, %v4370_v0  ;;  %4073 = vst.msk [vmem:[#allocation2 + $0x40] sm:$0xff] %vm15669_vm3, %v3945_v12  ;;  %4074 = vst.msk [vmem:[#allocation2 + $0x48] sm:$0xff] %vm15669_vm3, %v3946_v45  ;;  %v3759_v47 = vmax.f32 %v3291_v32, 0.0  ;;  %v3757_v15 = vmax.f32 %v3283_v18, 0.0 }
 0x307   : > { %v3286_v6 = vadd.f32 %v12502_v51, %v3285_v58  ;;  %v4558_v22 = vmax.f32 %v4494_v35, %v4496_v23  ;;  %v3760_v39 = vmax.f32 %v3294_v46, 0.0  ;;  %10956 = vmatmul.mubr.msk.bf16.gmra.mrb[248].mxu1 %vm15669_vm3, %v12484_v27  ;;  %v9931_v46 = vcombine.low %v5209_v38, %v12561_v44 }
 0x308   : > { %v4557_v13 = vmax.f32 %v4493_v53, %v4495_v5  ;;  %10959 = vmatprep.mubr.msk.bf16.mxu1 %vm15669_vm3, %v12506_v30  ;;  %v5319_v58 = vshll.u32 %v12579_v4, 16 }
 0x309   : > { %v3758_v56 = vmax.f32 %v3286_v6, 0.0  ;;  %v10124_v55 = vpack.c.bf16 %v4558_v22, %v4558_v22  ;;  %v3880_v60 = vpack.c.bf16 %v3760_v39, %v3759_v47 }
 0x30a   : > { %v10123_v16 = vpack.c.bf16 %v4557_v13, %v4557_v13  ;;  %v10853_v8 = vpop.f32.mrb[144].mxu1 }
 0x30b   : > { %v3879_v3 = vpack.c.bf16 %v3758_v56, %v3757_v15  ;;  %v4578_v61 = vshrl.u32 %v10124_v55, 16  ;;  %v4581_v20 = vshll.u32 %v10124_v55, 16  ;;  %v3951_v27 = vunpack.c.l.bf16 %v3880_v60  ;;  %v3298_v19 = vpop.f32.mrb[145].mxu1 }
 0x30c   : > { %v3952_v21 = vunpack.c.h.bf16 %v3880_v60  ;;  %v4569_v52 = vshrl.u32 %v10123_v16, 16  ;;  %v4572_v14 = vshll.u32 %v10123_v16, 16  ;;  %v3307_v25 = vadd.f32 %v10853_v8, %v12502_v51  ;;  %v10854_v26 = vpop.f32.mrb[146].mxu1  ;;  %v4248_v7 = vld [vmem:[#allocation2 + $0x50] ss:$2 sm:$0xff] }
 0x30d   : > { %v3949_v57 = vunpack.c.l.bf16 %v3879_v3  ;;  %v3950_v30 = vunpack.c.h.bf16 %v3879_v3  ;;  %v4580_v29 = vrot.slane %v4578_v61, 6  ;;  %v4583_v62 = vrot.slane %v4581_v20, 7  ;;  %4079 = vst.msk [vmem:[#allocation2 + $0x70] sm:$0xff] %vm15669_vm3, %v3951_v27  ;;  %v3301_v42 = vpop.f32.mrb[147].mxu1  ;;  %v4376_v11 = vld [vmem:[#allocation2 + $0x51] ss:$2 sm:$0xff] }
 0x30e   : > { %4080 = vst.msk [vmem:[#allocation2 + $0x78] sm:$0xff] %vm15669_vm3, %v3952_v21  ;;  %v4571_v10 = vrot.slane %v4569_v52, 6  ;;  %v4574_v1 = vrot.slane %v4572_v14, 7  ;;  %v3299_v34 = vadd.f32 %v12502_v51, %v3298_v19  ;;  %v3310_v33 = vadd.f32 %v10854_v26, %v12502_v51  ;;  %v4246_v35 = vld [vmem:[#allocation2 + $0x40] ss:$2 sm:$0xff] }
 0x30f   : > { %4077 = vst.msk [vmem:[#allocation2 + $0x60] sm:$0xff] %vm15669_vm3, %v3949_v57  ;;  %4078 = vst.msk [vmem:[#allocation2 + $0x68] sm:$0xff] %vm15669_vm3, %v3950_v30  ;;  %v4584_v17 = vor.u32 %v4583_v62, %v4580_v29  ;;  %10960 = vmatmul.mubr.msk.bf16.gmra.mrb[252].mxu1 %vm15669_vm3, %v12504_v2  ;;  %v3302_v2 = vadd.f32 %v12502_v51, %v3301_v42  ;;  %v3763_v32 = vmax.f32 %v3307_v25, 0.0  ;;  %v4374_v23 = vld [vmem:[#allocation2 + $0x41] ss:$2 sm:$0xff]  ;;  %v12611_v30 = vrot.slane %v9931_v46, 1 }
 0x310   : > { %v4575_v49 = vor.u32 %v4574_v1, %v4571_v10  ;;  %v3764_v48 = vmax.f32 %v3310_v33, 0.0  ;;  %v3761_v54 = vmax.f32 %v3299_v34, 0.0  ;;  %v4498_v53 = vmax.f32 %v4248_v7, %v4376_v11  ;;  %v4644_v46 = vld [vmem:[#allocation3 + $0x18] sm:$0x7] }
 0x311   : > { %v4586_v41 = vrot.slane %v4584_v17, 4  ;;  %v3762_v12 = vmax.f32 %v3302_v2, 0.0  ;;  %v4497_v8 = vmax.f32 %v4246_v35, %v4374_v23  ;;  %v5317_v34 = vshrl.u32 %v12579_v4, 16 }
 0x312   : > { %v4576_v59 = vrot.slane %v4575_v49, 4  ;;  %v10857_v45 = vpop.f32.mrb[148].mxu1  ;;  %v4594_v18 = vsel %vm12574_vm11, %v4575_v49, %v4593_v43  ;;  %v3882_v50 = vpack.c.bf16 %v3764_v48, %v3763_v32  ;;  %v5321_v26 = vrot.slane %v5319_v58, 1 }
 0x313   : > { %v4600_v63 = vsel %vm12583_vm12, %v4586_v41, %v4599_v31  ;;  %v3314_v0 = vpop.f32.mrb[149].mxu1  ;;  %4595 = vst [vmem:[#allocation3 + $0x8] sm:$0xe] %v4594_v18  ;;  %v3881_v9 = vpack.c.bf16 %v3762_v12, %v3761_v54  ;;  %v3323_v22 = vadd.f32 %v10857_v45, %v12502_v51 }
 0x314   : > { %4601 = vst [vmem:[#allocation3 + $0x10] sm:$0x3] %v4600_v63  ;;  %v10858_v47 = vpop.f32.mrb[150].mxu1  ;;  %v4585_v39 = vsel %vm12590_vm13, %v4576_v59, %v4584_v17  ;;  %v3955_v55 = vunpack.c.l.bf16 %v3882_v50  ;;  %v3956_v60 = vunpack.c.h.bf16 %v3882_v50  ;;  %v3315_v16 = vadd.f32 %v12502_v51, %v3314_v0 }
 0x315   : > { %v4252_v5 = vld [vmem:[#allocation2 + $0x70] ss:$2 sm:$0xff]  ;;  %v4380_v6 = vld [vmem:[#allocation2 + $0x71] ss:$2 sm:$0xff]  ;;  %v3317_v3 = vpop.f32.mrb[151].mxu1  ;;  %v3953_v20 = vunpack.c.l.bf16 %v3881_v9  ;;  %v3954_v27 = vunpack.c.h.bf16 %v3881_v9  ;;  %v3326_v19 = vadd.f32 %v10858_v47, %v12502_v51  ;;  %v3767_v57 = vmax.f32 %v3323_v22, 0.0 }
 0x316   : > { %v4500_v13 = vmax.f32 %v4252_v5, %v4380_v6  ;;  %v4250_v15 = vld [vmem:[#allocation2 + $0x60] ss:$2 sm:$0xff]  ;;  %v4378_v56 = vld [vmem:[#allocation2 + $0x61] ss:$2 sm:$0xff]  ;;  %4596 = vst.msk [vmem:[#allocation3 + $0xc] sm:$0xf] %vm15670_vm4, %v4585_v39  ;;  %v3318_v52 = vadd.f32 %v12502_v51, %v3317_v3  ;;  %v5322_v6 = vor.u32 %v5321_v26, %v5317_v34 }
 0x317   : > { %v4499_v61 = vmax.f32 %v4250_v15, %v4378_v56  ;;  %4083 = vst.msk [vmem:[#allocation2 + $0x90] sm:$0xff] %vm15669_vm3, %v3955_v55  ;;  %4084 = vst.msk [vmem:[#allocation2 + $0x98] sm:$0xff] %vm15669_vm3, %v3956_v60  ;;  %v3765_v29 = vmax.f32 %v3315_v16, 0.0  ;;  %v3768_v62 = vmax.f32 %v3326_v19, 0.0  ;;  %v15733_v60 = vmov 0 }
 0x318   : > { %v4603_v21 = vmax.f32 %v4498_v53, %v4500_v13  ;;  %4081 = vst.msk [vmem:[#allocation2 + $0x80] sm:$0xff] %vm15669_vm3, %v3953_v20  ;;  %4082 = vst.msk [vmem:[#allocation2 + $0x88] sm:$0xff] %vm15669_vm3, %v3954_v27  ;;  %v3766_v25 = vmax.f32 %v3318_v52, 0.0  ;;  %v4638_v53 = vld [vmem:[#allocation3 + $0x10] sm:$0xc]  ;;  %v15734_v60 = vsel %vm12648_vm14, 4294967295, %v15733_v60 }
 0x319   : > { %v4602_v14 = vmax.f32 %v4497_v8, %v4499_v61  ;;  %v3884_v33 = vpack.c.bf16 %v3768_v62, %v3767_v57 }
 0x31a   : > { %v10126_v44 = vpack.c.bf16 %v4603_v21, %v4603_v21  ;;  %v10861_v1 = vpop.f32.mrb[152].mxu1  ;;  %v3883_v42 = vpack.c.bf16 %v3766_v25, %v3765_v29  ;;  %v5174_v15 = vld [vmem:[#allocation3 + $0x8] sm:$0xf] }
 0x31b   : > { %v10125_v10 = vpack.c.bf16 %v4602_v14, %v4602_v14  ;;  %v3330_v43 = vpop.f32.mrb[153].mxu1  ;;  %v3339_v2 = vadd.f32 %v10861_v1, %v12502_v51  ;;  %v3959_v48 = vunpack.c.l.bf16 %v3884_v33  ;;  %v3960_v59 = vunpack.c.h.bf16 %v3884_v33  ;;  %v5210_v56 = vld [vmem:[#allocation3 + $0x8] sm:$0xe] }
 0x31c   : > { %v4623_v17 = vshrl.u32 %v10126_v44, 16  ;;  %v4626_v31 = vshll.u32 %v10126_v44, 16  ;;  %v3331_v38 = vadd.f32 %v12502_v51, %v3330_v43  ;;  %v10862_v41 = vpop.f32.mrb[154].mxu1  ;;  %v3957_v23 = vunpack.c.l.bf16 %v3883_v42  ;;  %v5215_v29 = vld [vmem:[#allocation3 + $0x8] sm:$0xc] }
 0x31d   : > { %v4614_v49 = vshrl.u32 %v10125_v10, 16  ;;  %v4617_v7 = vshll.u32 %v10125_v10, 16  ;;  %v3333_v54 = vpop.f32.mrb[155].mxu1  ;;  %v12620_v12 = vld [vmem:[#allocation3 + $0xc] sm:$0xf]  ;;  %v3958_v50 = vunpack.c.h.bf16 %v3883_v42  ;;  %4087 = vst.msk [vmem:[#allocation2 + $0xb0] sm:$0xff] %vm15669_vm3, %v3959_v48  ;;  %v3342_v39 = vadd.f32 %v10862_v41, %v12502_v51 }
 0x31e   : > { %v4625_v11 = vrot.slane %v4623_v17, 5  ;;  %v4628_v32 = vrot.slane %v4626_v31, 6  ;;  %v12622_v63 = vld [vmem:[#allocation2 + $0x90] ss:$2 sm:$0xff]  ;;  %v12624_v35 = vld [vmem:[#allocation2 + $0x91] ss:$2 sm:$0xff]  ;;  %v3334_v13 = vadd.f32 %v12502_v51, %v3333_v54  ;;  %v12653_v3 = vcombine.low %v5174_v15, %v12620_v12 }
 0x31f   : > { %v4616_v45 = vrot.slane %v4614_v49, 5  ;;  %v4619_v18 = vrot.slane %v4617_v7, 6  ;;  %v4502_v5 = vmax.f32 %v12622_v63, %v12624_v35  ;;  %4088 = vst.msk [vmem:[#allocation2 + $0xb8] sm:$0xff] %vm15669_vm3, %v3960_v59  ;;  %4085 = vst.msk [vmem:[#allocation2 + $0xa0] sm:$0xff] %vm15669_vm3, %v3957_v23  ;;  %v3771_v47 = vmax.f32 %v3339_v2, 0.0 }
 0x320   : > { %v4629_v0 = vor.u32 %v4628_v32, %v4625_v11  ;;  %4086 = vst.msk [vmem:[#allocation2 + $0xa8] sm:$0xff] %vm15669_vm3, %v3958_v50  ;;  %v3769_v16 = vmax.f32 %v3331_v38, 0.0  ;;  %v12656_v8 = vcombine.low %v5210_v56, %v12620_v12  ;;  %v3772_v27 = vmax.f32 %v3342_v39, 0.0  ;;  %v4254_v26 = vld [vmem:[#allocation2 + $0x80] ss:$2 sm:$0xff] }
 0x321   : > { %v4620_v22 = vor.u32 %v4619_v18, %v4616_v45  ;;  %v3770_v21 = vmax.f32 %v3334_v13, 0.0  ;;  %v5505_v57 = vrot.slane %v12653_v3, 1  ;;  %v5324_v44 = vshll.u32 %v12653_v3, 16  ;;  %v4382_v17 = vld [vmem:[#allocation2 + $0x81] ss:$2 sm:$0xff] }
 0x322   : > { %v4631_v55 = vrot.slane %v4629_v0, 4  ;;  %v10865_v19 = vpop.f32.mrb[156].mxu1  ;;  %v3886_v25 = vpack.c.bf16 %v3772_v27, %v3771_v47  ;;  %v9936_v34 = vcombine.low %v5215_v29, %v12620_v12  ;;  %v4501_v23 = vmax.f32 %v4254_v26, %v4382_v17 }
 0x323   : > { %v4621_v61 = vrot.slane %v4620_v22, 4  ;;  %v4639_v20 = vsel %vm12628_vm10, %v4620_v22, %v4638_v53  ;;  %v3355_v14 = vadd.f32 %v10865_v19, %v12502_v51  ;;  %v3346_v28 = vpop.f32.mrb[157].mxu1  ;;  %v3885_v10 = vpack.c.bf16 %v3770_v21, %v3769_v16 }
 0x324   : > { %v4645_v52 = vsel %vm12638_vm8, %v4631_v55, %v4644_v46  ;;  %4640 = vst [vmem:[#allocation3 + $0x10] sm:$0xc] %v4639_v20  ;;  %v10866_v1 = vpop.f32.mrb[158].mxu1  ;;  %v5506_v31 = vsel %vm15666_vm9, %v12611_v30, %v5505_v57  ;;  %v3347_v33 = vadd.f32 %v12502_v51, %v3346_v28  ;;  %v12675_v43 = vrot.slane %v5324_v44, 1  ;;  %v11347_v30 = vld [vmem:[%s15636_s7 + $0x38] sm:$0xff]  }
 0x325   : > { %4646 = vst [vmem:[#allocation3 + $0x18] sm:$0x7] %v4645_v52  ;;  %v4630_v62 = vsel %vm12648_vm14, %v4621_v61, %v4629_v0  ;;  %v3358_v42 = vadd.f32 %v10866_v1, %v12502_v51  ;;  %v3349_v49 = vpop.f32.mrb[159].mxu1  ;;  %v3963_v38 = vunpack.c.l.bf16 %v3886_v25  ;;  %v3964_v41 = vunpack.c.h.bf16 %v3886_v25  ;;  %5541 = vrot.lane.b32.xlu1 %v5506_v31, %s15700_s27  ;;  %6517 = vmatpush1.bf16.msra.mxu0 %v11347_v30  ;;  %v4683_v25 = vld [vmem:[#allocation3 + $0x18] sm:$0x8] }
 0x326   : > { %4641 = vst.msk [vmem:[#allocation3 + $0x14] sm:$0xf] %vm15670_vm4, %v4630_v62  ;;  %v4260_v7 = vld [vmem:[#allocation2 + $0xb0] ss:$2 sm:$0xff]  ;;  %v4388_v2 = vld [vmem:[#allocation2 + $0xb1] ss:$2 sm:$0xff]  ;;  %v3961_v11 = vunpack.c.l.bf16 %v3885_v10  ;;  %v3962_v32 = vunpack.c.h.bf16 %v3885_v10  ;;  %v5327_v18 = vsel %vm15663_vm6, %v5322_v6, %v12675_v43  ;;  %v3350_v0 = vadd.f32 %v12502_v51, %v3349_v49  ;;  %6518 = vmatprep.subr.bf16.mxu0 %v15675_v37 }
 0x327   : > { %v4504_v48 = vmax.f32 %v4260_v7, %v4388_v2  ;;  %v4258_v59 = vld [vmem:[#allocation2 + $0xa0] ss:$2 sm:$0xff]  ;;  %v4386_v54 = vld [vmem:[#allocation2 + $0xa1] ss:$2 sm:$0xff]  ;;  %v3775_v12 = vmax.f32 %v3355_v14, 0.0  ;;  %v3776_v45 = vmax.f32 %v3358_v42, 0.0  ;;  %5464 = vrot.lane.b32.xlu0 %v5327_v18, %s11536_s22 }
 0x328   : > { %v4503_v50 = vmax.f32 %v4258_v59, %v4386_v54  ;;  %4091 = vst.msk [vmem:[#allocation2 + $0xd0] sm:$0xff] %vm15669_vm3, %v3963_v38  ;;  %4092 = vst.msk [vmem:[#allocation2 + $0xd8] sm:$0xff] %vm15669_vm3, %v3964_v41  ;;  %v3773_v22 = vmax.f32 %v3347_v33, 0.0  ;;  %v3774_v47 = vmax.f32 %v3350_v0, 0.0  ;;  %v5588_v13 = vrot.slane %v12656_v8, 1 }
 0x329   : > { %4089 = vst.msk [vmem:[#allocation2 + $0xc0] sm:$0xff] %vm15669_vm3, %v3961_v11  ;;  %4090 = vst.msk [vmem:[#allocation2 + $0xc8] sm:$0xff] %vm15669_vm3, %v3962_v32  ;;  %v4648_v46 = vmax.f32 %v4502_v5, %v4504_v48  ;;  %v3888_v53 = vpack.c.bf16 %v3776_v45, %v3775_v12  ;;  %v12694_v61 = vrot.slane %v9936_v34, 2  ;;  %v5328_v21 = vshrl.u32 %v12653_v3, 16  ;;  %v4689_v30 = vld [vmem:[#allocation3 + $0x20] sm:$0xf] }
 0x32a   : > { %v4647_v6 = vmax.f32 %v4501_v23, %v4503_v50  ;;  %v10869_v39 = vpop.f32.mrb[160].mxu1  ;;  %v3887_v63 = vpack.c.bf16 %v3774_v47, %v3773_v22  ;;  %vm15667_vm6 = vsmask.f32 256 }
 0x32b   : > { %v10128_v15 = vpack.c.bf16 %v4648_v46, %v4648_v46  ;;  %v3967_v56 = vunpack.c.l.bf16 %v3888_v53  ;;  %v3968_v55 = vunpack.c.h.bf16 %v3888_v53  ;;  %v3362_v16 = vpop.f32.mrb[161].mxu1  ;;  %v3371_v35 = vadd.f32 %v10869_v39, %v12502_v51  ;;  %v5176_v34 = vld [vmem:[#allocation3 + $0x10] sm:$0xf] }
 0x32c   : > { %v10127_v20 = vpack.c.bf16 %v4647_v6, %v4647_v6  ;;  %v10870_v5 = vpop.f32.mrb[162].mxu1  ;;  %v3363_v14 = vadd.f32 %v12502_v51, %v3362_v16  ;;  %v3965_v10 = vunpack.c.l.bf16 %v3887_v63  ;;  %v3966_v1 = vunpack.c.h.bf16 %v3887_v63 }
 0x32d   : > { %v12697_v27 = vld [vmem:[#allocation3 + $0x14] sm:$0xf]  ;;  %v4668_v19 = vshll.u32 %v10128_v15, 16  ;;  %v4672_v52 = vshrl.u32 %v10128_v15, 16  ;;  %4095 = vst.msk [vmem:[#allocation2 + $0xf0] sm:$0xff] %vm15669_vm3, %v3967_v56  ;;  %4096 = vst.msk [vmem:[#allocation2 + $0xf8] sm:$0xff] %vm15669_vm3, %v3968_v55  ;;  %v3374_v28 = vadd.f32 %v10870_v5, %v12502_v51  ;;  %v12717_v11 = vor.u32 %v5328_v21, %v12675_v43 }
 0x32e   : > { %v3365_v44 = vpop.f32.mrb[163].mxu1  ;;  %v4659_v29 = vshll.u32 %v10127_v20, 16  ;;  %v4662_v62 = vshrl.u32 %v10127_v20, 16  ;;  %v12712_v7 = vcombine.low %v5176_v34, %v12697_v27  ;;  %4093 = vst.msk [vmem:[#allocation2 + $0xe0] sm:$0xff] %vm15669_vm3, %v3965_v10  ;;  %4094 = vst.msk [vmem:[#allocation2 + $0xe8] sm:$0xff] %vm15669_vm3, %v3966_v1  ;;  %v3779_v41 = vmax.f32 %v3371_v35, 0.0 }
 0x32f   : > { %v4670_v26 = vrot.slane %v4668_v19, 5  ;;  %v4674_v17 = vrot.slane %v4672_v52, 4  ;;  %v4264_v33 = vld [vmem:[#allocation2 + $0xd0] ss:$2 sm:$0xff]  ;;  %v4392_v42 = vld [vmem:[#allocation2 + $0xd1] ss:$2 sm:$0xff]  ;;  %v3366_v49 = vadd.f32 %v12502_v51, %v3365_v44 }
 0x330   : > { %v4661_v2 = vrot.slane %v4659_v29, 5  ;;  %v4664_v38 = vrot.slane %v4662_v62, 4  ;;  %v4506_v48 = vmax.f32 %v4264_v33, %v4392_v42  ;;  %v3777_v59 = vmax.f32 %v3363_v14, 0.0  ;;  %v4262_v23 = vld [vmem:[#allocation2 + $0xc0] ss:$2 sm:$0xff] }
 0x331   : > { %v4675_v32 = vor.u32 %v4674_v17, %v4670_v26  ;;  %v3780_v54 = vmax.f32 %v3374_v28, 0.0  ;;  %v3778_v50 = vmax.f32 %v3366_v49, 0.0  ;;  %v12728_v43 = vrot.slane %v12712_v7, 1  ;;  %v4390_v6 = vld [vmem:[#allocation2 + $0xc1] ss:$2 sm:$0xff] }
 0x332   : > { %v4665_v45 = vor.u32 %v4664_v38, %v4661_v2  ;;  %v4684_v18 = vsel %vm12706_vm0, %v4661_v2, %v4683_v25  ;;  %v10873_v0 = vpop.f32.mrb[164].mxu1  ;;  %v5729_v39 = vrot.slane %v12712_v7, 2  ;;  %v5216_v44 = vld [vmem:[#allocation3 + $0x10] sm:$0xc]  ;;  %v4505_v10 = vmax.f32 %v4262_v23, %v4390_v6  ;;  %v4731_v6 = vld [vmem:[#allocation3 + $0x2c] sm:$0x1] }
 0x333   : > { %v4676_v46 = vrot.slane %v4675_v32, 4  ;;  %4685 = vst [vmem:[#allocation3 + $0x18] sm:$0x8] %v4684_v18  ;;  %v3890_v22 = vpack.c.bf16 %v3780_v54, %v3779_v41  ;;  %v3387_v47 = vadd.f32 %v10873_v0, %v12502_v51  ;;  %v3378_v15 = vpop.f32.mrb[165].mxu1  ;;  %v3889_v20 = vpack.c.bf16 %v3778_v50, %v3777_v59 }
 0x334   : > { %v4666_v56 = vrot.slane %v4665_v45, 4  ;;  %v4268_v55 = vld [vmem:[#allocation2 + $0xf0] ss:$2 sm:$0xff]  ;;  %v4396_v16 = vld [vmem:[#allocation2 + $0xf1] ss:$2 sm:$0xff]  ;;  %v5589_v63 = vsel %vm15666_vm9, %v5588_v13, %v12728_v43  ;;  %v3379_v35 = vadd.f32 %v12502_v51, %v3378_v15  ;;  %v10874_v5 = vpop.f32.mrb[166].mxu1  ;;  %v12749_v25 = vcombine.low %v5216_v44, %v12697_v27 }
 0x335   : > { %v4690_v21 = vsel %vm12721_vm7, %v4676_v46, %v4689_v30  ;;  %v4508_v19 = vmax.f32 %v4268_v55, %v4396_v16  ;;  %v3971_v52 = vunpack.c.l.bf16 %v3890_v22  ;;  %v3972_v14 = vunpack.c.h.bf16 %v3890_v22  ;;  %5594 = vrot.lane.b32.xlu1 %v5589_v63, %s11537_s23  ;;  %v3381_v28 = vpop.f32.mrb[167].mxu1  ;;  %v4266_v34 = vld [vmem:[#allocation2 + $0xe0] ss:$2 sm:$0xff]  ;;  %v4394_v17 = vld [vmem:[#allocation2 + $0xe1] ss:$2 sm:$0xff] }
 0x336   : > { %4691 = vst [vmem:[#allocation3 + $0x20] sm:$0xf] %v4690_v21  ;;  %v4671_v29 = vsel %vm12732_vm2, %v4666_v56, %v4670_v26  ;;  %v3969_v13 = vunpack.c.l.bf16 %v3889_v20  ;;  %v3970_v62 = vunpack.c.h.bf16 %v3889_v20  ;;  %v5730_v26 = vsel %vm15741_vm15, %v12694_v61, %v5729_v39  ;;  %v11349_v46 = vld [vmem:[%s15636_s7 + $0x40] sm:$0xff]   ;;  %v11350_v21 = vld [vmem:[%s15636_s7 + $0x48] sm:$0xff]  }
 0x337   : > { %4686 = vst.msk [vmem:[#allocation3 + $0x1c] sm:$0xf] %vm15670_vm4, %v4671_v29  ;;  %v4693_v1 = vmax.f32 %v4506_v48, %v4508_v19  ;;  %v3390_v33 = vadd.f32 %v10874_v5, %v12502_v51  ;;  %v4507_v42 = vmax.f32 %v4266_v34, %v4394_v17  ;;  %5765 = vrot.lane.b32.xlu0 %v5730_v26, %s11536_s22  ;;  %v5332_v2 = vshll.u32 %v12712_v7, 16 }
 0x338   : > { %4099 = vst.msk [vmem:[#allocation2 + $0x110] sm:$0xff] %vm15669_vm3, %v3971_v52  ;;  %4100 = vst.msk [vmem:[#allocation2 + $0x118] sm:$0xff] %vm15669_vm3, %v3972_v14  ;;  %v3382_v27 = vadd.f32 %v12502_v51, %v3381_v28  ;;  %v5508_v49 = vsel %vm15666_vm9, %v5505_v57, %v12728_v43  ;;  %v3783_v61 = vmax.f32 %v3387_v47, 0.0  ;;  %v3781_v41 = vmax.f32 %v3379_v35, 0.0  ;;  %6519 = vmatpush1.bf16.msra.mxu0 %v11349_v46 }
 0x339   : > { %4097 = vst.msk [vmem:[#allocation2 + $0x100] sm:$0xff] %vm15669_vm3, %v3969_v13  ;;  %4098 = vst.msk [vmem:[#allocation2 + $0x108] sm:$0xff] %vm15669_vm3, %v3970_v62  ;;  %v10130_v38 = vpack.c.bf16 %v4693_v1, %v4693_v1  ;;  %v3784_v32 = vmax.f32 %v3390_v33, 0.0  ;;  %5543 = vrot.lane.b32.xlu1 %v5508_v49, %s15700_s27  ;;  %v4692_v30 = vmax.f32 %v4505_v10, %v4507_v42  ;;  %v12771_v54 = vrot.slane %v5332_v2, 1 }
 0x33a   : > { %v3782_v48 = vmax.f32 %v3382_v27, 0.0  ;;  %v10877_v59 = vpop.f32.mrb[168].mxu1  ;;  %v5812_v45 = vrot.slane %v12749_v25, 2  ;;  %v5859_v0 = vshrl.u32 %v12749_v25, 16  ;;  %vm15742_vm15 = vsmask.f32 7424  ;;  %vm12791_vm9 = vmand %vm4729_vm1, %vm15667_vm6  ;;  %6520 = vmatprep.subr.bf16.mxu0 %v15675_v37 }
 0x33b   : > { %v4712_v18 = vshrl.u32 %v10130_v38, 16  ;;  %v3892_v23 = vpack.c.bf16 %v3784_v32, %v3783_v61  ;;  %v12775_v57 = vadd.f32 %v10877_v59, %v12502_v51  ;;  %v3394_v50 = vpop.f32.mrb[169].mxu1  ;;  %v10129_v22 = vpack.c.bf16 %v4692_v30, %v4692_v30  ;;  %v4725_v32 = vld [vmem:[#allocation3 + $0x24] sm:$0xf] }
 0x33c   : > { %v3891_v47 = vpack.c.bf16 %v3782_v48, %v3781_v41  ;;  %v5335_v15 = vsel %vm15742_vm15, %v12717_v11, %v12771_v54  ;;  %v3395_v56 = vadd.f32 %v12502_v51, %v3394_v50  ;;  %v10878_v55 = vpop.f32.mrb[170].mxu1  ;;  %v4715_v20 = vshll.u32 %v10130_v38, 16  ;;  %6521 = vmatpush1.bf16.msra.mxu0 %v11350_v21 }
 0x33d   : > { %v4714_v16 = vrot.slane %v4712_v18, 7  ;;  %v3975_v63 = vunpack.c.l.bf16 %v3892_v23  ;;  %v3976_v35 = vunpack.c.h.bf16 %v3892_v23  ;;  %5466 = vrot.lane.b32.xlu1 %v5335_v15, %s11536_s22  ;;  %v3397_v5 = vpop.f32.mrb[171].mxu1  ;;  %v15743_v19 = vmov 0  ;;  %6522 = vmatprep.subr.bf16.mxu0 %v15675_v37 }
 0x33e   : > { %v15744_v19 = vsel %vm12791_vm9, 4294967295, %v15743_v19  ;;  %v4704_v11 = vshrl.u32 %v10129_v22, 16  ;;  %v3973_v28 = vunpack.c.l.bf16 %v3891_v47  ;;  %v3974_v44 = vunpack.c.h.bf16 %v3891_v47  ;;  %v12819_v38 = vld [vmem:[#allocation3 + $0x18] sm:$0xff]  }
 0x33f   : > { %15745 = vst [vmem:[#allocation14_spill] sm:$0xff] %v15744_v19  ;;  %v12795_v52 = vld [vmem:[#allocation2 + $0x110] ss:$2 sm:$0xff]  ;;  %v12797_v14 = vld [vmem:[#allocation2 + $0x111] ss:$2 sm:$0xff]  ;;  %v3787_v29 = vmax.f32 %v12775_v57, 0.0  ;;  %v4717_v13 = vor.u32 %v4715_v20, %v4714_v16  ;;  %v3406_v27 = vadd.f32 %v10878_v55, %v12502_v51  ;;  %v3398_v49 = vadd.f32 %v12502_v51, %v3397_v5 }
 0x340   : > { %v4719_v62 = vrot.slane %v4714_v16, 4  ;;  %v4707_v10 = vshll.u32 %v10129_v22, 16  ;;  %v4510_v1 = vmax.f32 %v12795_v52, %v12797_v14  ;;  %v12803_v34 = vld [vmem:[#allocation2 + $0x100] ss:$2 sm:$0xff]  ;;  %v12805_v17 = vld [vmem:[#allocation2 + $0x101] ss:$2 sm:$0xff] }
 0x341   : > { %4103 = vst.msk [vmem:[#allocation2 + $0x130] sm:$0xff] %vm15669_vm3, %v3975_v63  ;;  %4104 = vst.msk [vmem:[#allocation2 + $0x138] sm:$0xff] %vm15669_vm3, %v3976_v35  ;;  %vm15746_vm1 = vsmask.f32 4368  ;;  %v15747_v26 = vmov 0  ;;  %v4706_v33 = vrot.slane %v4704_v11, 7  ;;  %v4509_v30 = vmax.f32 %v12803_v34, %v12805_v17 }
 0x342   : > { %vm12811_vm15 = vmor %vm15667_vm6, %vm15746_vm1  ;;  %4101 = vst.msk [vmem:[#allocation2 + $0x120] sm:$0xff] %vm15669_vm3, %v3973_v28  ;;  %v3785_v42 = vmax.f32 %v3395_v56, 0.0  ;;  %v4732_v61 = vsel %vm12791_vm9, %v4719_v62, %v4731_v6  ;;  %v15750_v41 = vmov 0  ;;  %v12831_v48 = vrot.slane %v5859_v0, 2  ;;  %v10881_v46 = vpop.f32.mrb[172].mxu1  ;;  %v11352_v56 = vld [vmem:[%s15636_s7 + $0x50] sm:$0xff]  }
 0x343   : > { %v15748_v26 = vsel %vm12811_vm15, 4294967295, %v15747_v26  ;;  %4102 = vst.msk [vmem:[#allocation2 + $0x128] sm:$0xff] %vm15669_vm3, %v3974_v44  ;;  %vm12825_vm1 = vmand %vm15670_vm4, %vm15668_vm5  ;;  %v5862_v59 = vshll.u32 %v12749_v25, 16  ;;  %v4709_v18 = vor.u32 %v4707_v10, %v4706_v33  ;;  %v4710_v23 = vrot.slane %v4706_v33, 4  ;;  %v3410_v47 = vpop.f32.mrb[173].mxu1  ;;  %6523 = vmatpush1.bf16.msra.mxu0 %v11352_v56 }
 0x344   : > { %15749 = vst [vmem:[#allocation15_spill] sm:$0xff] %v15748_v26  ;;  %v15751_v41 = vsel %vm12825_vm1, 4294967295, %v15750_v41  ;;  %4733 = vst [vmem:[#allocation3 + $0x2c] sm:$0x1] %v4732_v61  ;;  %v3788_v57 = vmax.f32 %v3406_v27, 0.0  ;;  %v3786_v50 = vmax.f32 %v3398_v49, 0.0  ;;  %v3419_v6 = vadd.f32 %v10881_v46, %v12502_v51  ;;  %6524 = vmatprep.subr.bf16.mxu0 %v15675_v37 }
 0x345   : > { %15752 = vst [vmem:[#allocation16_spill] sm:$0xff] %v15751_v41  ;;  %v12837_v22 = vrot.slane %v12819_v38, 2  ;;  %v5509_v0 = vrot.slane %v12819_v38, 1  ;;  %v12841_v15 = vshll.u32 %v12819_v38, 16  ;;  %v4718_v55 = vsel %vm12811_vm15, %v4710_v23, %v4717_v13  ;;  %v10882_v63 = vpop.f32.mrb[174].mxu1 }
 0x346   : > { %v4726_v16 = vsel %vm12825_vm1, %v4709_v18, %v4725_v32  ;;  %v3894_v51 = vpack.c.bf16 %v3788_v57, %v3787_v29  ;;  %v3893_v20 = vpack.c.bf16 %v3786_v50, %v3785_v42  ;;  %4728 = vst.msk [vmem:[#allocation3 + $0x28] sm:$0xf] %vm15670_vm4, %v4718_v55  ;;  %v3791_v35 = vmax.f32 %v3419_v6, 0.0  ;;  %v12862_v11 = vld [vmem:[%s15635_s6] ss:$0 sm:$0xff]  ;;  %v3413_v44 = vpop.f32.mrb[175].mxu1 }
 0x347   : > { %4727 = vst [vmem:[#allocation3 + $0x24] sm:$0xf] %v4726_v16  ;;  %vm15753_vm5 = vcmask 1045504   ;;  %v3411_v28 = vadd.f32 %v12862_v11, %v3410_v47  ;;  %v3422_v42 = vadd.f32 %v12862_v11, %v10882_v63  ;;  %v3414_v27 = vadd.f32 %v12862_v11, %v3413_v44 }
 0x348   : > { %v5813_v5 = vsel %vm15753_vm5, %v5812_v45, %v12837_v22  ;;  %vm15754_vm3 = vmmov %vm15753_vm5  ;;  %v4276_v29 = vld [vmem:[#allocation2 + $0x130] ss:$2 sm:$0xff]  ;;  %v4404_v13 = vld [vmem:[#allocation2 + $0x131] ss:$2 sm:$0xff]  ;;  %v3979_v62 = vunpack.c.l.bf16 %v3894_v51  ;;  %v3980_v25 = vunpack.c.h.bf16 %v3894_v51  ;;  %v3977_v10 = vunpack.c.l.bf16 %v3893_v20 }
 0x349   : > { %v5732_v21 = vsel %vm15754_vm3, %v5729_v39, %v12837_v22  ;;  %v3978_v45 = vunpack.c.h.bf16 %v3893_v20  ;;  %5818 = vrot.lane.b32.xlu1 %v5813_v5, %s15700_s27  ;;  %v4512_v39 = vmax.f32 %v4276_v29, %v4404_v13  ;;  %v3789_v33 = vmax.f32 %v3411_v28, 0.0 }
 0x34a   : > { %5767 = vrot.lane.b32.xlu0 %v5732_v21, %s11536_s22  ;;  %v4274_v34 = vld [vmem:[#allocation2 + $0x120] ss:$2 sm:$0xff]  ;;  %v4402_v17 = vld [vmem:[#allocation2 + $0x121] ss:$2 sm:$0xff]  ;;  %vm15755_vm3 = vcmask 261120   ;;  %vm15759_vm1 = vcmask 1046528  }
 0x34b   : > { %v4511_v49 = vmax.f32 %v4274_v34, %v4402_v17  ;;  %4107 = vst.msk [vmem:[#allocation2 + $0x150] sm:$0xff] %vm15755_vm3, %v3979_v62  ;;  %vm15756_vm5 = vmmov %vm15755_vm3  ;;  %v5510_v61 = vsel %vm15759_vm1, %v12728_v43, %v5509_v0  ;;  %v12879_v32 = vshrl.u32 %v12819_v38, 16  ;;  %v5864_v18 = vrot.slane %v5862_v59, 3  ;;  %v10885_v43 = vpop.f32.mrb[176].mxu1 }
 0x34c   : > { %4108 = vst.msk [vmem:[#allocation2 + $0x158] sm:$0xff] %vm15756_vm5, %v3980_v25  ;;  %vm15757_vm4 = vmmov %vm15755_vm3  ;;  %v4735_v23 = vmax.f32 %v4510_v1, %v4512_v39  ;;  %v3792_v57 = vmax.f32 %v3422_v42, 0.0  ;;  %v3790_v50 = vmax.f32 %v3414_v27, 0.0  ;;  %v5867_v46 = vrot.slane %v12841_v15, 3  ;;  %v3426_v14 = vpop.f32.mrb[177].mxu1  ;;  %v11354_v39 = vld [vmem:[%s15636_s7 + $0x60] sm:$0xff]  }
 0x34d   : > { %4105 = vst.msk [vmem:[#allocation2 + $0x140] sm:$0xff] %vm15757_vm4, %v3977_v10  ;;  %vm15758_vm6 = vmmov %vm15755_vm3  ;;  %v4734_v6 = vmax.f32 %v4509_v30, %v4511_v49  ;;  %5596 = vrot.lane.b32.xlu1 %v5510_v61, %s11537_s23  ;;  %v5865_v47 = vor.u32 %v5864_v18, %v12831_v48  ;;  %v5866_v56 = vrot.slane %v12879_v32, 2  ;;  %v5336_v55 = vshrl.u32 %v12712_v7, 16  ;;  %v10886_v63 = vpop.f32.mrb[178].mxu1  ;;  %v11353_v48 = vld [vmem:[%s15636_s7 + $0x58] sm:$0xff]  }
 0x34e   : > { %4106 = vst.msk [vmem:[#allocation2 + $0x148] sm:$0xff] %vm15758_vm6, %v3978_v45  ;;  %v10132_v16 = vpack.c.bf16 %v4735_v23, %v4735_v23  ;;  %v3896_v59 = vpack.c.bf16 %v3792_v57, %v3791_v35  ;;  %v3895_v51 = vpack.c.bf16 %v3790_v50, %v3789_v33  ;;  %v3435_v52 = vadd.f32 %v12862_v11, %v10885_v43  ;;  %v3429_v29 = vpop.f32.mrb[179].mxu1  ;;  %v12898_v45 = vld [vmem:[#allocation3 + $0x20] sm:$0xff]   ;;  %vm15760_vm4 = vmmov %vm15755_vm3 }
 0x34f   : > { %v10131_v1 = vpack.c.bf16 %v4734_v6, %v4734_v6  ;;  %v12890_v20 = vor.u32 %v5867_v46, %v5866_v56  ;;  %v3427_v30 = vadd.f32 %v12862_v11, %v3426_v14  ;;  %v5342_v5 = vrot.slane %v12841_v15, 1  ;;  %6525 = vmatpush1.bf16.msra.mxu0 %v11353_v48  ;;  %vm15761_vm6 = vmmov %vm15755_vm3 }
 0x350   : > { %v4752_v21 = vshrl.u32 %v10132_v16, 16  ;;  %v4755_v28 = vshll.u32 %v10132_v16, 16  ;;  %v3983_v44 = vunpack.c.l.bf16 %v3896_v59  ;;  %v3984_v35 = vunpack.c.h.bf16 %v3896_v59  ;;  %6526 = vmatprep.subr.bf16.mxu0 %v15675_v37  ;;  %vm15763_vm5 = vmmov %vm15755_vm3  ;;  %v4768_v59 = vld [vmem:[#allocation3 + $0x34] sm:$0x3] }
 0x351   : > { %v4743_v13 = vshrl.u32 %v10131_v1, 16  ;;  %v4746_v62 = vshll.u32 %v10131_v1, 16  ;;  %v3981_v25 = vunpack.c.l.bf16 %v3895_v51  ;;  %v3982_v10 = vunpack.c.h.bf16 %v3895_v51  ;;  %5545 = vrot.lane.b32.xlu1 %v5510_v61, %s15700_s27 }
 0x352   : > { %v4754_v34 = vrot.slane %v4752_v21, 6  ;;  %v4757_v17 = vrot.slane %v4755_v28, 7  ;;  %4111 = vst.msk [vmem:[#allocation2 + $0x170] sm:$0xff] %vm15760_vm4, %v3983_v44  ;;  %vm15762_vm1 = vsmask.f32 5376  ;;  %v3438_v49 = vadd.f32 %v12862_v11, %v10886_v63  ;;  %v10889_v48 = vpop.f32.mrb[180].mxu1 }
 0x353   : > { %v12903_v33 = vld [vmem:[#allocation2 + $0x150] ss:$2 sm:$0xff]  ;;  %v12905_v42 = vld [vmem:[#allocation2 + $0x151] ss:$2 sm:$0xff]  ;;  %4112 = vst.msk [vmem:[#allocation2 + $0x178] sm:$0xff] %vm15761_vm6, %v3984_v35  ;;  %v5869_v27 = vsel %vm15762_vm1, %v5865_v47, %v12890_v20  ;;  %v4745_v61 = vrot.slane %v4743_v13, 6  ;;  %v3430_v50 = vadd.f32 %v12862_v11, %v3429_v29  ;;  %v5338_v46 = vor.u32 %v5336_v55, %v12771_v54  ;;  %6527 = vmatpush1.bf16.msra.mxu0 %v11354_v39 }
 0x354   : > { %v4748_v18 = vrot.slane %v4746_v62, 7  ;;  %4109 = vst.msk [vmem:[#allocation2 + $0x160] sm:$0xff] %vm15755_vm3, %v3981_v25  ;;  %5948 = vrot.lane.b32.xlu0 %v5869_v27, %s11537_s23  ;;  %v4758_v6 = vor.u32 %v4757_v17, %v4754_v34  ;;  %v4764_v47 = vld [vmem:[#allocation3 + $0x2c] sm:$0xe]  ;;  %v4514_v56 = vmax.f32 %v12903_v33, %v12905_v42  ;;  %v3795_v43 = vmax.f32 %v3435_v52, 0.0  ;;  %v3442_v44 = vpop.f32.mrb[181].mxu1  ;;  %6528 = vmatprep.subr.bf16.mxu0 %v15675_v37 }
 0x355   : > { %v12913_v23 = vld [vmem:[#allocation2 + $0x140] ss:$2 sm:$0xff]  ;;  %v12915_v57 = vld [vmem:[#allocation2 + $0x141] ss:$2 sm:$0xff]  ;;  %4110 = vst.msk [vmem:[#allocation2 + $0x168] sm:$0xff] %vm15763_vm5, %v3982_v10  ;;  %v3793_v16 = vmax.f32 %v3427_v30, 0.0  ;;  %v3451_v30 = vadd.f32 %v12862_v11, %v10889_v48 }
 0x356   : > { %v4749_v51 = vor.u32 %v4748_v18, %v4745_v61  ;;  %v3796_v14 = vmax.f32 %v3438_v49, 0.0  ;;  %v3794_v1 = vmax.f32 %v3430_v50, 0.0  ;;  %vm15764_vm4 = vsmask.f32 7424  ;;  %v11355_v54 = vld [vmem:[%s15636_s7 + $0x68] sm:$0xff]   ;;  %v10890_v25 = vpop.f32.mrb[182].mxu1 }
 0x357   : > { %v5343_v63 = vsel %vm15764_vm4, %v5338_v46, %v5342_v5  ;;  %v4760_v21 = vrot.slane %v4758_v6, 4  ;;  %v4513_v28 = vmax.f32 %v12913_v23, %v12915_v57  ;;  %v5733_v52 = vrot.slane %v12898_v45, 2  ;;  %v3445_v33 = vpop.f32.mrb[183].mxu1  ;;  %6529 = vmatpush1.bf16.msra.mxu0 %v11355_v54  ;;  %vm15768_vm4 = vmmov %vm15763_vm5 }
 0x358   : > { %5468 = vrot.lane.b32.xlu1 %v5343_v63, %s11536_s22  ;;  %v4750_v35 = vrot.slane %v4749_v51, 4  ;;  %v4765_v29 = vsel %vm12574_vm11, %v4749_v51, %v4764_v47  ;;  %v3898_v13 = vpack.c.bf16 %v3796_v14, %v3795_v43  ;;  %v3897_v62 = vpack.c.bf16 %v3794_v1, %v3793_v16  ;;  %6530 = vmatprep.subr.bf16.mxu0 %v15675_v37 }
 0x359   : > { %v4769_v10 = vsel %vm12583_vm12, %v4760_v21, %v4768_v59  ;;  %4766 = vst [vmem:[#allocation3 + $0x2c] sm:$0xe] %v4765_v29  ;;  %vm15765_vm6 = vcmask 1045504   ;;  %v3799_v34 = vmax.f32 %v3451_v30, 0.0  ;;  %v5511_v17 = vrot.slane %v12898_v45, 1 }
 0x35a   : > { %v5734_v39 = vsel %vm15765_vm6, %v12837_v22, %v5733_v52  ;;  %4770 = vst [vmem:[#allocation3 + $0x34] sm:$0x3] %v4769_v10  ;;  %v4759_v42 = vsel %vm12590_vm13, %v4750_v35, %v4758_v6  ;;  %v4284_v27 = vld [vmem:[#allocation2 + $0x170] ss:$2 sm:$0xff]  ;;  %v4412_v49 = vld [vmem:[#allocation2 + $0x171] ss:$2 sm:$0xff]  ;;  %v3987_v61 = vunpack.c.l.bf16 %v3898_v13  ;;  %v3988_v18 = vunpack.c.h.bf16 %v3898_v13  ;;  %vm15769_vm6 = vmmov %vm15768_vm4 }
 0x35b   : > { %v3985_v23 = vunpack.c.l.bf16 %v3897_v62  ;;  %5820 = vrot.lane.b32.xlu0 %v5734_v39, %s15700_s27  ;;  %vm15766_vm1 = vcmask 257024   ;;  %v4516_v57 = vmax.f32 %v4284_v27, %v4412_v49  ;;  %v3986_v46 = vunpack.c.h.bf16 %v3897_v62  ;;  %v10893_v30 = vpop.f32.mrb[184].mxu1 }
 0x35c   : > { %4767 = vst.msk [vmem:[#allocation3 + $0x30] sm:$0xf] %vm15766_vm1, %v4759_v42  ;;  %v4282_v22 = vld [vmem:[#allocation2 + $0x160] ss:$2 sm:$0xff]  ;;  %v4410_v50 = vld [vmem:[#allocation2 + $0x161] ss:$2 sm:$0xff]  ;;  %v3443_v47 = vadd.f32 %v12862_v11, %v3442_v44  ;;  %v3454_v16 = vadd.f32 %v12862_v11, %v10890_v25  ;;  %v3446_v59 = vadd.f32 %v12862_v11, %v3445_v33  ;;  %vm15770_vm1 = vmmov %vm15768_vm4  ;;  %v5346_v1 = vor.u32 %v12879_v32, %v5342_v5 }
 0x35d   : > { %vm15767_vm3 = vcmask 1046528   ;;  %v4515_v43 = vmax.f32 %v4282_v22, %v4410_v50  ;;  %4115 = vst.msk [vmem:[#allocation2 + $0x190] sm:$0xff] %vm15763_vm5, %v3987_v61  ;;  %v12965_v38 = vshll.u32 %v12898_v45, 16  ;;  %v12969_v14 = vshrl.u32 %v12898_v45, 16  ;;  %v3458_v13 = vpop.f32.mrb[185].mxu1  ;;  %vm15772_vm5 = vmmov %vm15770_vm1 }
 0x35e   : > { %v5512_v6 = vsel %vm15767_vm3, %v5509_v0, %v5511_v17  ;;  %4116 = vst.msk [vmem:[#allocation2 + $0x198] sm:$0xff] %vm15768_vm4, %v3988_v18  ;;  %v4772_v0 = vmax.f32 %v4514_v56, %v4516_v57  ;;  %v3797_v51 = vmax.f32 %v3443_v47, 0.0  ;;  %v3800_v48 = vmax.f32 %v3454_v16, 0.0  ;;  %v10894_v10 = vpop.f32.mrb[186].mxu1  ;;  %vm15771_vm3 = vmmov %vm15770_vm1 }
 0x35f   : > { %4113 = vst.msk [vmem:[#allocation2 + $0x180] sm:$0xff] %vm15769_vm6, %v3985_v23  ;;  %5598 = vrot.lane.b32.xlu1 %v5512_v6, %s11537_s23  ;;  %v4771_v63 = vmax.f32 %v4513_v28, %v4515_v43  ;;  %5769 = vrot.lane.b32.xlu0 %v5734_v39, %s11536_s22  ;;  %v3798_v54 = vmax.f32 %v3446_v59, 0.0  ;;  %v5871_v21 = vrot.slane %v12965_v38, 3  ;;  %v5870_v56 = vrot.slane %v12969_v14, 2  ;;  %v11357_v39 = vld [vmem:[%s15636_s7 + $0x70] sm:$0xff]   ;;  %v3461_v61 = vpop.f32.mrb[187].mxu1  ;;  %vm15774_vm6 = vmmov %vm15770_vm1 }
 0x360   : > { %4114 = vst.msk [vmem:[#allocation2 + $0x188] sm:$0xff] %vm15770_vm1, %v3986_v46  ;;  %v10134_v44 = vpack.c.bf16 %v4772_v0, %v4772_v0  ;;  %v12978_v35 = vadd.f32 %v12862_v11, %v10893_v30  ;;  %v5350_v29 = vrot.slane %v12965_v38, 1  ;;  %v3900_v25 = vpack.c.bf16 %v3800_v48, %v3799_v34  ;;  %v12991_v22 = vld [vmem:[#allocation3 + $0x28] sm:$0xff]   ;;  %6531 = vmatpush1.bf16.msra.mxu0 %v11357_v39  ;;  %v4801_v30 = vld [vmem:[#allocation3 + $0x34] sm:$0xc] }
 0x361   : > { %v10133_v62 = vpack.c.bf16 %v4771_v63, %v4771_v63  ;;  %v3899_v5 = vpack.c.bf16 %v3798_v54, %v3797_v51  ;;  %v12983_v28 = vadd.f32 %v12862_v11, %v3458_v13  ;;  %v12988_v27 = vor.u32 %v5871_v21, %v5870_v56  ;;  %6532 = vmatprep.subr.bf16.mxu0 %v15675_v37  ;;  %v11358_v13 = vld [vmem:[%s15636_s7 + $0x78] sm:$0xff]  }
 0x362   : > { %v4789_v33 = vshrl.u32 %v10134_v44, 16  ;;  %v4792_v42 = vshll.u32 %v10134_v44, 16  ;;  %v3803_v49 = vmax.f32 %v12978_v35, 0.0  ;;  %v3991_v23 = vunpack.c.l.bf16 %v3900_v25 }
 0x363   : > { %5547 = vrot.lane.b32.xlu1 %v5512_v6, %s15700_s27  ;;  %v4780_v18 = vshrl.u32 %v10133_v62, 16  ;;  %v4783_v34 = vshll.u32 %v10133_v62, 16  ;;  %v3992_v57 = vunpack.c.h.bf16 %v3900_v25  ;;  %v3989_v43 = vunpack.c.l.bf16 %v3899_v5 }
 0x364   : > { %v4791_v50 = vrot.slane %v4789_v33, 5  ;;  %v4794_v46 = vrot.slane %v4792_v42, 6  ;;  %v3990_v16 = vunpack.c.h.bf16 %v3899_v5  ;;  %4119 = vst.msk [vmem:[#allocation2 + $0x1b0] sm:$0xff] %vm15771_vm3, %v3991_v23  ;;  %vm15773_vm4 = vsmask.f32 5376  ;;  %v10897_v33 = vpop.f32.mrb[188].mxu1  ;;  %6533 = vmatpush1.bf16.msra.mxu0 %v11358_v13 }
 0x365   : > { %v12993_v6 = vld [vmem:[#allocation2 + $0x190] ss:$2 sm:$0xff]  ;;  %v12995_v47 = vld [vmem:[#allocation2 + $0x191] ss:$2 sm:$0xff]  ;;  %v4782_v59 = vrot.slane %v4780_v18, 5  ;;  %v4785_v0 = vrot.slane %v4783_v34, 6  ;;  %v5873_v54 = vsel %vm15773_vm4, %v12890_v20, %v12988_v27  ;;  %v3470_v25 = vadd.f32 %v12862_v11, %v10894_v10  ;;  %vm15779_vm4 = vmmov %vm15770_vm1 }
 0x366   : > { %v4518_v51 = vmax.f32 %v12993_v6, %v12995_v47  ;;  %4120 = vst.msk [vmem:[#allocation2 + $0x1b8] sm:$0xff] %vm15772_vm5, %v3992_v57  ;;  %v4795_v21 = vor.u32 %v4794_v46, %v4791_v50  ;;  %5950 = vrot.lane.b32.xlu0 %v5873_v54, %s11537_s23  ;;  %vm15775_vm13 = vsmask.f32 7424  ;;  %v3801_v35 = vmax.f32 %v12983_v28, 0.0  ;;  %v4805_v20 = vld [vmem:[#allocation3 + $0x3c] sm:$0x7] }
 0x367   : > { %v13000_v63 = vld [vmem:[#allocation2 + $0x180] ss:$2 sm:$0xff]  ;;  %v13002_v48 = vld [vmem:[#allocation2 + $0x181] ss:$2 sm:$0xff]  ;;  %4117 = vst.msk [vmem:[#allocation2 + $0x1a0] sm:$0xff] %vm15774_vm6, %v3989_v43  ;;  %v5351_v56 = vsel %vm15775_vm13, %v5346_v1, %v5350_v29  ;;  %v4786_v62 = vor.u32 %v4785_v0, %v4782_v59  ;;  %v3462_v5 = vadd.f32 %v12862_v11, %v3461_v61  ;;  %v5513_v39 = vrot.slane %v12991_v22, 1  ;;  %vm15780_vm6 = vmmov %vm15770_vm1 }
 0x368   : > { %v4517_v44 = vmax.f32 %v13000_v63, %v13002_v48  ;;  %4118 = vst.msk [vmem:[#allocation2 + $0x1a8] sm:$0xff] %vm15770_vm1, %v3990_v16  ;;  %5470 = vrot.lane.b32.xlu1 %v5351_v56, %s11536_s22  ;;  %v4797_v42 = vrot.slane %v4795_v21, 4  ;;  %v5735_v1 = vrot.slane %v12991_v22, 2  ;;  %v3483_v28 = vadd.f32 %v12862_v11, %v10897_v33  ;;  %v3474_v18 = vpop.f32.mrb[189].mxu1 }
 0x369   : > { %v5354_v34 = vor.u32 %v12969_v14, %v5350_v29  ;;  %v4787_v23 = vrot.slane %v4786_v62, 4  ;;  %v4802_v57 = vsel %vm12628_vm10, %v4786_v62, %v4801_v30  ;;  %v3804_v50 = vmax.f32 %v3470_v25, 0.0  ;;  %v10898_v46 = vpop.f32.mrb[190].mxu1 }
 0x36a   : > { %v3802_v10 = vmax.f32 %v3462_v5, 0.0  ;;  %v4806_v61 = vsel %vm12638_vm8, %v4797_v42, %v4805_v20  ;;  %4803 = vst [vmem:[#allocation3 + $0x34] sm:$0xc] %v4802_v57  ;;  %vm15776_vm13 = vcmask 1046528   ;;  %vm15777_vm3 = vcmask 1045504   ;;  %v3477_v59 = vpop.f32.mrb[191].mxu1 }
 0x36b   : > { %v5514_v43 = vsel %vm15776_vm13, %v5511_v17, %v5513_v39  ;;  %v5736_v29 = vsel %vm15777_vm3, %v5733_v52, %v5735_v1  ;;  %v3807_v16 = vmax.f32 %v3483_v28, 0.0  ;;  %4807 = vst [vmem:[#allocation3 + $0x3c] sm:$0x7] %v4806_v61  ;;  %v4796_v0 = vsel %vm12648_vm14, %v4787_v23, %v4795_v21  ;;  %v10901_v61 = vpop.f32.mrb[192].mxu1  ;;  %vm15781_vm13 = vmmov %vm15770_vm1 }
 0x36c   : > { %v3902_v54 = vpack.c.bf16 %v3804_v50, %v3803_v49  ;;  %v3901_v30 = vpack.c.bf16 %v3802_v10, %v3801_v35  ;;  %5600 = vrot.lane.b32.xlu1 %v5514_v43, %s11537_s23  ;;  %5822 = vrot.lane.b32.xlu0 %v5736_v29, %s15700_s27  ;;  %v13045_v17 = vshll.u32 %v12991_v22, 16  ;;  %vm15778_vm5 = vcmask 257024  }
 0x36d   : > { %4804 = vst.msk [vmem:[#allocation3 + $0x38] sm:$0xf] %vm15778_vm5, %v4796_v0  ;;  %v4292_v45 = vld [vmem:[#allocation2 + $0x1b0] ss:$2 sm:$0xff]  ;;  %v4420_v56 = vld [vmem:[#allocation2 + $0x1b1] ss:$2 sm:$0xff]  ;;  %v3475_v52 = vadd.f32 %v12862_v11, %v3474_v18  ;;  %v3486_v13 = vadd.f32 %v12862_v11, %v10898_v46  ;;  %v3478_v20 = vadd.f32 %v12862_v11, %v3477_v59  ;;  %v3499_v59 = vadd.f32 %v12862_v11, %v10901_v61  ;;  %vm15783_vm5 = vmmov %vm15770_vm1 }
 0x36e   : > { %v13052_v49 = vshrl.u32 %v12991_v22, 16  ;;  %v4520_v21 = vmax.f32 %v4292_v45, %v4420_v56  ;;  %v3995_v25 = vunpack.c.l.bf16 %v3902_v54  ;;  %v3996_v5 = vunpack.c.h.bf16 %v3902_v54 }
 0x36f   : > { %v4290_v35 = vld [vmem:[#allocation2 + $0x1a0] ss:$2 sm:$0xff]  ;;  %v4418_v62 = vld [vmem:[#allocation2 + $0x1a1] ss:$2 sm:$0xff]  ;;  %v3993_v33 = vunpack.c.l.bf16 %v3901_v30  ;;  %v3994_v28 = vunpack.c.h.bf16 %v3901_v30  ;;  %v3805_v23 = vmax.f32 %v3475_v52, 0.0  ;;  %v3808_v57 = vmax.f32 %v3486_v13, 0.0 }
 0x370   : > { %v4519_v42 = vmax.f32 %v4290_v35, %v4418_v62  ;;  %v4809_v18 = vmax.f32 %v4518_v51, %v4520_v21  ;;  %4123 = vst.msk [vmem:[#allocation2 + $0x1d0] sm:$0xff] %vm15779_vm4, %v3995_v25  ;;  %5549 = vrot.lane.b32.xlu1 %v5514_v43, %s15700_s27  ;;  %5771 = vrot.lane.b32.xlu0 %v5736_v29, %s11536_s22  ;;  %v3806_v50 = vmax.f32 %v3478_v20, 0.0  ;;  %v5358_v10 = vrot.slane %v13045_v17, 1  ;;  %v3490_v43 = vpop.f32.mrb[193].mxu1  ;;  %vm15784_vm4 = vmmov %vm15770_vm1 }
 0x371   : > { %4124 = vst.msk [vmem:[#allocation2 + $0x1d8] sm:$0xff] %vm15780_vm6, %v3996_v5  ;;  %v5874_v46 = vrot.slane %v13052_v49, 2  ;;  %v3904_v47 = vpack.c.bf16 %v3808_v57, %v3807_v16  ;;  %v5875_v51 = vrot.slane %v13045_v17, 3  ;;  %vm15782_vm3 = vsmask.f32 7424  ;;  %v10902_v45 = vpop.f32.mrb[194].mxu1 }
 0x372   : > { %4121 = vst.msk [vmem:[#allocation2 + $0x1c0] sm:$0xff] %vm15770_vm1, %v3993_v33  ;;  %v4808_v6 = vmax.f32 %v4517_v44, %v4519_v42  ;;  %v10136_v0 = vpack.c.bf16 %v4809_v18, %v4809_v18  ;;  %v3903_v29 = vpack.c.bf16 %v3806_v50, %v3805_v23  ;;  %v5359_v54 = vsel %vm15782_vm3, %v5354_v34, %v5358_v10  ;;  %v3493_v16 = vpop.f32.mrb[195].mxu1  ;;  %v13077_v35 = vld [vmem:[#allocation3 + $0x30] sm:$0xff]  }
 0x373   : > { %4122 = vst.msk [vmem:[#allocation2 + $0x1c8] sm:$0xff] %vm15781_vm13, %v3994_v28  ;;  %v3491_v30 = vadd.f32 %v12862_v11, %v3490_v43  ;;  %v3999_v63 = vunpack.c.l.bf16 %v3904_v47  ;;  %v4000_v48 = vunpack.c.h.bf16 %v3904_v47  ;;  %v13074_v44 = vor.u32 %v5875_v51, %v5874_v46  ;;  %v4838_v28 = vld [vmem:[#allocation3 + $0x3c] sm:$0x8]  ;;  %vm15786_vm13 = vmmov %vm15770_vm1 }
 0x374   : > { %v10135_v56 = vpack.c.bf16 %v4808_v6, %v4808_v6  ;;  %v4826_v52 = vshll.u32 %v10136_v0, 16  ;;  %v4830_v13 = vshrl.u32 %v10136_v0, 16  ;;  %v3997_v20 = vunpack.c.l.bf16 %v3903_v29  ;;  %5472 = vrot.lane.b32.xlu1 %v5359_v54, %s11536_s22  ;;  %v4842_v0 = vld [vmem:[#allocation3 + $0x44] sm:$0xf] }
 0x375   : > { %v3998_v21 = vunpack.c.h.bf16 %v3903_v29  ;;  %4127 = vst.msk [vmem:[#allocation2 + $0x1f0] sm:$0xff] %vm15783_vm5, %v3999_v63  ;;  %vm15785_vm6 = vsmask.f32 5376  ;;  %v3811_v23 = vmax.f32 %v3499_v59, 0.0  ;;  %v3502_v57 = vadd.f32 %v12862_v11, %v10902_v45  ;;  %v10905_v63 = vpop.f32.mrb[196].mxu1 }
 0x376   : > { %v4817_v62 = vshll.u32 %v10135_v56, 16  ;;  %v4820_v25 = vshrl.u32 %v10135_v56, 16  ;;  %4128 = vst.msk [vmem:[#allocation2 + $0x1f8] sm:$0xff] %vm15784_vm4, %v4000_v48  ;;  %v5877_v34 = vsel %vm15785_vm6, %v12988_v27, %v13074_v44  ;;  %v4828_v33 = vrot.slane %v4826_v52, 5  ;;  %v3506_v52 = vpop.f32.mrb[197].mxu1  ;;  %vm15790_vm6 = vmmov %vm15770_vm1 }
 0x377   : > { %v4832_v42 = vrot.slane %v4830_v13, 4  ;;  %4125 = vst.msk [vmem:[#allocation2 + $0x1e0] sm:$0xff] %vm15770_vm1, %v3997_v20  ;;  %5952 = vrot.lane.b32.xlu0 %v5877_v34, %s11537_s23  ;;  %v3494_v27 = vadd.f32 %v12862_v11, %v3493_v16  ;;  %v3809_v47 = vmax.f32 %v3491_v30, 0.0  ;;  %v3812_v51 = vmax.f32 %v3502_v57, 0.0 }
 0x378   : > { %4126 = vst.msk [vmem:[#allocation2 + $0x1e8] sm:$0xff] %vm15786_vm13, %v3998_v21  ;;  %v4819_v18 = vrot.slane %v4817_v62, 5  ;;  %v4822_v50 = vrot.slane %v4820_v25, 4  ;;  %v4296_v46 = vld [vmem:[#allocation2 + $0x1d0] ss:$2 sm:$0xff]  ;;  %v5515_v43 = vrot.slane %v13077_v35, 1  ;;  %v3515_v25 = vadd.f32 %v12862_v11, %v10905_v63  ;;  %vm15791_vm13 = vmmov %vm15770_vm1 }
 0x379   : > { %v4424_v61 = vld [vmem:[#allocation2 + $0x1d1] ss:$2 sm:$0xff]  ;;  %v4833_v6 = vor.u32 %v4832_v42, %v4828_v33  ;;  %v3810_v59 = vmax.f32 %v3494_v27, 0.0  ;;  %v3906_v48 = vpack.c.bf16 %v3812_v51, %v3811_v23  ;;  %vm15787_vm3 = vcmask 1046528   ;;  %v10906_v42 = vpop.f32.mrb[198].mxu1 }
 0x37a   : > { %v4823_v29 = vor.u32 %v4822_v50, %v4819_v18  ;;  %v4839_v54 = vsel %vm12706_vm0, %v4819_v18, %v4838_v28  ;;  %v4522_v56 = vmax.f32 %v4296_v46, %v4424_v61  ;;  %v5516_v30 = vsel %vm15787_vm3, %v5513_v39, %v5515_v43  ;;  %v4294_v20 = vld [vmem:[#allocation2 + $0x1c0] ss:$2 sm:$0xff]  ;;  %v4422_v21 = vld [vmem:[#allocation2 + $0x1c1] ss:$2 sm:$0xff]  ;;  %v3509_v46 = vpop.f32.mrb[199].mxu1  ;;  %vm15792_vm3 = vmmov %vm15770_vm1 }
 0x37b   : > { %v4834_v45 = vrot.slane %v4833_v6, 4  ;;  %4840 = vst [vmem:[#allocation3 + $0x3c] sm:$0x8] %v4839_v54  ;;  %v5737_v16 = vrot.slane %v13077_v35, 2  ;;  %v3905_v62 = vpack.c.bf16 %v3810_v59, %v3809_v47  ;;  %5602 = vrot.lane.b32.xlu1 %v5516_v30, %s11537_s23  ;;  %v3507_v34 = vadd.f32 %v12862_v11, %v3506_v52 }
 0x37c   : > { %v4824_v13 = vrot.slane %v4823_v29, 4  ;;  %v4003_v39 = vunpack.c.l.bf16 %v3906_v48  ;;  %v4004_v18 = vunpack.c.h.bf16 %v3906_v48  ;;  %vm15788_vm5 = vcmask 1045504  }
 0x37d   : > { %v4843_v28 = vsel %vm12721_vm7, %v4834_v45, %v4842_v0  ;;  %v4300_v23 = vld [vmem:[#allocation2 + $0x1f0] ss:$2 sm:$0xff]  ;;  %v4428_v57 = vld [vmem:[#allocation2 + $0x1f1] ss:$2 sm:$0xff]  ;;  %v5738_v50 = vsel %vm15788_vm5, %v5735_v1, %v5737_v16  ;;  %v4001_v51 = vunpack.c.l.bf16 %v3905_v62  ;;  %v4002_v0 = vunpack.c.h.bf16 %v3905_v62 }
 0x37e   : > { %4844 = vst [vmem:[#allocation3 + $0x44] sm:$0xf] %v4843_v28  ;;  %v4829_v61 = vsel %vm12732_vm2, %v4824_v13, %v4828_v33  ;;  %v4524_v27 = vmax.f32 %v4300_v23, %v4428_v57  ;;  %5824 = vrot.lane.b32.xlu0 %v5738_v50, %s15700_s27  ;;  %vm15789_vm4 = vcmask 257024   ;;  %v4521_v29 = vmax.f32 %v4294_v20, %v4422_v21  ;;  %4131 = vst.msk [vmem:[#allocation2 + $0x210] sm:$0xff] %vm15790_vm6, %v4003_v39 }
 0x37f   : > { %v4298_v6 = vld [vmem:[#allocation2 + $0x1e0] ss:$2 sm:$0xff]  ;;  %v4426_v47 = vld [vmem:[#allocation2 + $0x1e1] ss:$2 sm:$0xff]  ;;  %4841 = vst.msk [vmem:[#allocation3 + $0x40] sm:$0xf] %vm15789_vm4, %v4829_v61  ;;  %v3518_v22 = vadd.f32 %v12862_v11, %v10906_v42  ;;  %v5362_v1 = vor.u32 %v13052_v49, %v5358_v10  ;;  %5551 = vrot.lane.b32.xlu1 %v5516_v30, %s15700_s27  ;;  %v3510_v59 = vadd.f32 %v12862_v11, %v3509_v46  ;;  %vm15794_vm4 = vmmov %vm15770_vm1 }
 0x380   : > { %v4523_v54 = vmax.f32 %v4298_v6, %v4426_v47  ;;  %4132 = vst.msk [vmem:[#allocation2 + $0x218] sm:$0xff] %vm15770_vm1, %v4004_v18  ;;  %v4846_v33 = vmax.f32 %v4522_v56, %v4524_v27  ;;  %v13124_v63 = vshll.u32 %v13077_v35, 16  ;;  %v13127_v45 = vshrl.u32 %v13077_v35, 16  ;;  %v10909_v10 = vpop.f32.mrb[200].mxu1  ;;  %v4877_v27 = vld [vmem:[#allocation3 + $0x50] sm:$0x1]  ;;  %vm15795_vm6 = vmmov %vm15770_vm1 }
 0x381   : > { %4129 = vst.msk [vmem:[#allocation2 + $0x200] sm:$0xff] %vm15791_vm13, %v4001_v51  ;;  %v3815_v52 = vmax.f32 %v3515_v25, 0.0  ;;  %v3813_v13 = vmax.f32 %v3507_v34, 0.0  ;;  %v3816_v20 = vmax.f32 %v3518_v22, 0.0  ;;  %v3814_v21 = vmax.f32 %v3510_v59, 0.0  ;;  %v3522_v42 = vpop.f32.mrb[201].mxu1  ;;  %vm15796_vm13 = vmmov %vm15770_vm1 }
 0x382   : > { %4130 = vst.msk [vmem:[#allocation2 + $0x208] sm:$0xff] %vm15792_vm3, %v4002_v0  ;;  %v4845_v48 = vmax.f32 %v4521_v29, %v4523_v54  ;;  %v10138_v56 = vpack.c.bf16 %v4846_v33, %v4846_v33  ;;  %5773 = vrot.lane.b32.xlu0 %v5738_v50, %s11536_s22  ;;  %v5366_v62 = vrot.slane %v13124_v63, 1  ;;  %v5878_v30 = vrot.slane %v13127_v45, 2  ;;  %v10910_v18 = vpop.f32.mrb[202].mxu1 }
 0x383   : > { %v3908_v23 = vpack.c.bf16 %v3816_v20, %v3815_v52  ;;  %v5879_v57 = vrot.slane %v13124_v63, 3  ;;  %v3531_v39 = vadd.f32 %v12862_v11, %v10909_v10  ;;  %v3907_v46 = vpack.c.bf16 %v3814_v21, %v3813_v13  ;;  %v3525_v61 = vpop.f32.mrb[203].mxu1  ;;  %v13144_v52 = vld [vmem:[#allocation3 + $0x38] sm:$0xff]  }
 0x384   : > { %v10137_v28 = vpack.c.bf16 %v4845_v48, %v4845_v48  ;;  %v4862_v25 = vshrl.u32 %v10138_v56, 16  ;;  %v4865_v34 = vshll.u32 %v10138_v56, 16  ;;  %vm15793_vm5 = vsmask.f32 7424 }
 0x385   : > { %v5367_v50 = vsel %vm15793_vm5, %v5362_v1, %v5366_v62  ;;  %v4007_v51 = vunpack.c.l.bf16 %v3908_v23  ;;  %v4008_v0 = vunpack.c.h.bf16 %v3908_v23  ;;  %v4005_v33 = vunpack.c.l.bf16 %v3907_v46  ;;  %v4873_v23 = vld [vmem:[#allocation3 + $0x48] sm:$0xf] }
 0x386   : > { %v4854_v6 = vshrl.u32 %v10137_v28, 16  ;;  %v4857_v47 = vshll.u32 %v10137_v28, 16  ;;  %5474 = vrot.lane.b32.xlu1 %v5367_v50, %s11536_s22  ;;  %v4864_v29 = vrot.slane %v4862_v25, 7  ;;  %v4006_v59 = vunpack.c.h.bf16 %v3907_v46 }
 0x387   : > { %v13138_v54 = vld [vmem:[#allocation2 + $0x210] ss:$2 sm:$0xff]  ;;  %v13140_v22 = vld [vmem:[#allocation2 + $0x211] ss:$2 sm:$0xff]  ;;  %v13142_v48 = vor.u32 %v5879_v57, %v5878_v30  ;;  %4135 = vst.msk [vmem:[#allocation2 + $0x230] sm:$0xff] %vm15794_vm4, %v4007_v51  ;;  %v3819_v56 = vmax.f32 %v3531_v39, 0.0  ;;  %v3523_v21 = vadd.f32 %v12862_v11, %v3522_v42  ;;  %v3534_v42 = vadd.f32 %v12862_v11, %v10910_v18 }
 0x388   : > { %v4856_v1 = vrot.slane %v4854_v6, 7  ;;  %v4526_v13 = vmax.f32 %v13138_v54, %v13140_v22  ;;  %4136 = vst.msk [vmem:[#allocation2 + $0x238] sm:$0xff] %vm15795_vm6, %v4008_v0  ;;  %v4867_v28 = vor.u32 %v4865_v34, %v4864_v29  ;;  %v4869_v30 = vrot.slane %v4864_v29, 4  ;;  %v10913_v34 = vpop.f32.mrb[204].mxu1 }
 0x389   : > { %v13148_v20 = vld [vmem:[#allocation2 + $0x200] ss:$2 sm:$0xff]  ;;  %v13150_v10 = vld [vmem:[#allocation2 + $0x201] ss:$2 sm:$0xff]  ;;  %4133 = vst.msk [vmem:[#allocation2 + $0x220] sm:$0xff] %vm15770_vm1, %v4005_v33  ;;  %v3817_v39 = vmax.f32 %v3523_v21, 0.0  ;;  %v3526_v51 = vadd.f32 %v12862_v11, %v3525_v61  ;;  %vm15798_vm5 = vnez %v15751_v41  ;;  %v3547_v18 = vadd.f32 %v12862_v11, %v10913_v34 }
 0x38a   : > { %v4525_v57 = vmax.f32 %v13148_v20, %v13150_v10  ;;  %4134 = vst.msk [vmem:[#allocation2 + $0x228] sm:$0xff] %vm15796_vm13, %v4006_v59  ;;  %vm15797_vm3 = vsmask.f32 5376  ;;  %v4859_v46 = vor.u32 %v4857_v47, %v4856_v1  ;;  %v4860_v50 = vrot.slane %v4856_v1, 4  ;;  %v3538_v54 = vpop.f32.mrb[205].mxu1 }
 0x38b   : > { %v5881_v25 = vsel %vm15797_vm3, %v13074_v44, %v13142_v48  ;;  %v4878_v6 = vsel %vm12791_vm9, %v4869_v30, %v4877_v27  ;;  %v5517_v0 = vrot.slane %v13144_v52, 1  ;;  %v5739_v29 = vrot.slane %v13144_v52, 2  ;;  %v10914_v33 = vpop.f32.mrb[206].mxu1  ;;  %vm15803_vm3 = vmmov %vm15796_vm13 }
 0x38c   : > { %5954 = vrot.lane.b32.xlu0 %v5881_v25, %s11537_s23  ;;  %4879 = vst [vmem:[#allocation3 + $0x50] sm:$0x1] %v4878_v6  ;;  %v4868_v44 = vsel %vm12811_vm15, %v4860_v50, %v4867_v28  ;;  %v4874_v47 = vsel %vm15798_vm5, %v4859_v46, %v4873_v23  ;;  %v3820_v22 = vmax.f32 %v3534_v42, 0.0  ;;  %vm15799_vm4 = vcmask 257024   ;;  %v3541_v20 = vpop.f32.mrb[207].mxu1 }
 0x38d   : > { %4875 = vst [vmem:[#allocation3 + $0x48] sm:$0xf] %v4874_v47  ;;  %4876 = vst.msk [vmem:[#allocation3 + $0x4c] sm:$0xf] %vm15799_vm4, %v4868_v44  ;;  %v3818_v61 = vmax.f32 %v3526_v51, 0.0  ;;  %vm15800_vm6 = vcmask 1046528   ;;  %v3539_v1 = vadd.f32 %v12862_v11, %v3538_v54  ;;  %v3550_v28 = vadd.f32 %v12862_v11, %v10914_v33 }
 0x38e   : > { %v5518_v27 = vsel %vm15800_vm6, %v5515_v43, %v5517_v0  ;;  %vm15801_vm1 = vcmask 1045504   ;;  %v3910_v10 = vpack.c.bf16 %v3820_v22, %v3819_v56  ;;  %v3823_v21 = vmax.f32 %v3547_v18, 0.0  ;;  %vm15805_vm4 = vmmov %vm15803_vm3 }
 0x38f   : > { %v5740_v59 = vsel %vm15801_vm1, %v5737_v16, %v5739_v29  ;;  %5604 = vrot.lane.b32.xlu1 %v5518_v27, %s11537_s23  ;;  %v3542_v30 = vadd.f32 %v12862_v11, %v3541_v20  ;;  %v4308_v43 = vld [vmem:[#allocation2 + $0x230] ss:$2 sm:$0xff]  ;;  %v4436_v23 = vld [vmem:[#allocation2 + $0x231] ss:$2 sm:$0xff]  ;;  %v3909_v25 = vpack.c.bf16 %v3818_v61, %v3817_v39  ;;  %v3821_v46 = vmax.f32 %v3539_v1, 0.0  ;;  %v10917_v61 = vpop.f32.mrb[208].mxu1  ;;  %vm15806_vm6 = vmmov %vm15803_vm3 }
 0x390   : > { %5826 = vrot.lane.b32.xlu0 %v5740_v59, %s15700_s27  ;;  %v5370_v35 = vor.u32 %v13127_v45, %v5366_v62  ;;  %v13194_v16 = vshll.u32 %v13144_v52, 16  ;;  %v4528_v56 = vmax.f32 %v4308_v43, %v4436_v23  ;;  %v4011_v34 = vunpack.c.l.bf16 %v3910_v10  ;;  %v13204_v1 = vld [vmem:[#allocation3 + $0x40] sm:$0xff]  }
 0x391   : > { %v4306_v50 = vld [vmem:[#allocation2 + $0x220] ss:$2 sm:$0xff]  ;;  %v4434_v42 = vld [vmem:[#allocation2 + $0x221] ss:$2 sm:$0xff]  ;;  %v4012_v6 = vunpack.c.h.bf16 %v3910_v10  ;;  %v3824_v51 = vmax.f32 %v3550_v28, 0.0  ;;  %v4009_v44 = vunpack.c.l.bf16 %v3909_v25  ;;  %v4010_v47 = vunpack.c.h.bf16 %v3909_v25 }
 0x392   : > { %15802 = vst [vmem:[#allocation17_spill] sm:$0xff] %v13194_v16  ;;  %v4527_v54 = vmax.f32 %v4306_v50, %v4434_v42  ;;  %v3822_v22 = vmax.f32 %v3542_v30, 0.0  ;;  %v4881_v18 = vmax.f32 %v4526_v13, %v4528_v56  ;;  %4139 = vst.msk [vmem:[#allocation2 + $0x250] sm:$0xff] %vm15796_vm13, %v4011_v34  ;;  %v5374_v39 = vrot.slane %v13194_v16, 1 }
 0x393   : > { %4140 = vst.msk [vmem:[#allocation2 + $0x258] sm:$0xff] %vm15803_vm3, %v4012_v6  ;;  %5553 = vrot.lane.b32.xlu1 %v5518_v27, %s15700_s27  ;;  %v3912_v62 = vpack.c.bf16 %v3824_v51, %v3823_v21  ;;  %v13202_v33 = vshrl.u32 %v13144_v52, 16  ;;  %v5883_v10 = vrot.slane %v13194_v16, 3  ;;  %v13210_v27 = vadd.f32 %v12862_v11, %v10917_v61  ;;  %vm15808_vm13 = vmmov %vm15803_vm3  ;;  %v13246_v52 = vld [vmem:[%s15635_s6] ss:$0 sm:$0xff] }
 0x394   : > { %5775 = vrot.lane.b32.xlu0 %v5740_v59, %s11536_s22  ;;  %v4880_v20 = vmax.f32 %v4525_v57, %v4527_v54  ;;  %4137 = vst.msk [vmem:[#allocation2 + $0x240] sm:$0xff] %vm15805_vm4, %v4009_v44  ;;  %v3911_v13 = vpack.c.bf16 %v3822_v22, %v3821_v46  ;;  %v3554_v59 = vpop.f32.mrb[209].mxu1  ;;  %v10140_v21 = vpack.c.bf16 %v4881_v18, %v4881_v18  ;;  %vm15807_vm1 = vsmask.f32 7424  ;;  %vm15809_vm4 = vmmov %vm15803_vm3 }
 0x395   : > { %15804 = vst [vmem:[#allocation18_spill] sm:$0xff] %v13202_v33  ;;  %4138 = vst.msk [vmem:[#allocation2 + $0x248] sm:$0xff] %vm15806_vm6, %v4010_v47  ;;  %v4015_v28 = vunpack.c.l.bf16 %v3912_v62  ;;  %v4016_v30 = vunpack.c.h.bf16 %v3912_v62  ;;  %v5375_v43 = vsel %vm15807_vm1, %v5370_v35, %v5374_v39  ;;  %v10918_v23 = vpop.f32.mrb[210].mxu1  ;;  %v5882_v50 = vrot.slane %v13202_v33, 2  ;;  %v4910_v62 = vld [vmem:[#allocation3 + $0x50] sm:$0xe] }
 0x396   : > { %v10139_v57 = vpack.c.bf16 %v4880_v20, %v4880_v20  ;;  %v4013_v25 = vunpack.c.l.bf16 %v3911_v13  ;;  %v4014_v56 = vunpack.c.h.bf16 %v3911_v13  ;;  %v3557_v46 = vpop.f32.mrb[211].mxu1  ;;  %v4898_v42 = vshrl.u32 %v10140_v21, 16  ;;  %vm15810_vm6 = vmmov %vm15803_vm3 }
 0x397   : > { %v4901_v34 = vshll.u32 %v10140_v21, 16  ;;  %4143 = vst.msk [vmem:[#allocation2 + $0x270] sm:$0xff] %vm15808_vm13, %v4015_v28  ;;  %5476 = vrot.lane.b32.xlu1 %v5375_v43, %s11536_s22  ;;  %v3827_v6 = vmax.f32 %v13210_v27, 0.0  ;;  %v5519_v51 = vrot.slane %v13204_v1, 1  ;;  %v13223_v44 = vor.u32 %v5883_v10, %v5882_v50  ;;  %v10921_v50 = vpop.f32.mrb[212].mxu1 }
 0x398   : > { %4144 = vst.msk [vmem:[#allocation2 + $0x278] sm:$0xff] %vm15803_vm3, %v4016_v30  ;;  %v4889_v35 = vshrl.u32 %v10139_v57, 16  ;;  %v4892_v54 = vshll.u32 %v10139_v57, 16  ;;  %v5741_v47 = vrot.slane %v13204_v1, 2  ;;  %v4900_v22 = vrot.slane %v4898_v42, 6 }
 0x399   : > { %4141 = vst.msk [vmem:[#allocation2 + $0x260] sm:$0xff] %vm15809_vm4, %v4013_v25  ;;  %v4903_v18 = vrot.slane %v4901_v34, 7  ;;  %vm15811_vm1 = vcmask 1046528   ;;  %v3555_v20 = vadd.f32 %v12862_v11, %v3554_v59  ;;  %vm15812_vm13 = vsmask.f32 5376 }
 0x39a   : > { %4142 = vst.msk [vmem:[#allocation2 + $0x268] sm:$0xff] %vm15810_vm6, %v4014_v56  ;;  %v5520_v61 = vsel %vm15811_vm1, %v5517_v0, %v5519_v51  ;;  %v4891_v13 = vrot.slane %v4889_v35, 6  ;;  %v4894_v27 = vrot.slane %v4892_v54, 7  ;;  %v4312_v21 = vld [vmem:[#allocation2 + $0x250] ss:$2 sm:$0xff]  ;;  %v5885_v10 = vsel %vm15812_vm13, %v13142_v48, %v13223_v44  ;;  %v3570_v54 = vpop.f32.mrb[213].mxu1 }
 0x39b   : > { %v4440_v28 = vld [vmem:[#allocation2 + $0x251] ss:$2 sm:$0xff]  ;;  %vm15813_vm3 = vcmask 1045504   ;;  %v4904_v43 = vor.u32 %v4903_v18, %v4900_v22  ;;  %5956 = vrot.lane.b32.xlu0 %v5885_v10, %s11537_s23  ;;  %5606 = vrot.lane.b32.xlu1 %v5520_v61, %s11537_s23  ;;  %v3825_v59 = vmax.f32 %v3555_v20, 0.0  ;;  %v3566_v56 = vadd.f32 %v12862_v11, %v10918_v23  ;;  %v10922_v20 = vpop.f32.mrb[214].mxu1 }
 0x39c   : > { %v5742_v30 = vsel %vm15813_vm3, %v5739_v29, %v5741_v47  ;;  %v4530_v57 = vmax.f32 %v4312_v21, %v4440_v28  ;;  %v4310_v25 = vld [vmem:[#allocation2 + $0x240] ss:$2 sm:$0xff]  ;;  %v4438_v0 = vld [vmem:[#allocation2 + $0x241] ss:$2 sm:$0xff]  ;;  %v4914_v42 = vld [vmem:[#allocation3 + $0x58] sm:$0x3]  ;;  %v4895_v48 = vor.u32 %v4894_v27, %v4891_v13  ;;  %v3558_v29 = vadd.f32 %v13246_v52, %v3557_v46 }
 0x39d   : > { %v4529_v34 = vmax.f32 %v4310_v25, %v4438_v0  ;;  %v13250_v35 = vadd.f32 %v13246_v52, %v10921_v50  ;;  %v4906_v22 = vrot.slane %v4904_v43, 4  ;;  %v3828_v18 = vmax.f32 %v3566_v56, 0.0 }
 0x39e   : > { %v5378_v11 = vor.u32 %v13202_v33, %v5374_v39  ;;  %v13256_v23 = vshll.u32 %v13204_v1, 16  ;;  %v4896_v13 = vrot.slane %v4895_v48, 4  ;;  %v4911_v27 = vsel %vm12574_vm11, %v4895_v48, %v4910_v62  ;;  %v3573_v62 = vpop.f32.mrb[215].mxu1 }
 0x39f   : > { %v4316_v21 = vld [vmem:[#allocation2 + $0x270] ss:$2 sm:$0xff]  ;;  %v4444_v46 = vld [vmem:[#allocation2 + $0x271] ss:$2 sm:$0xff]  ;;  %v3826_v28 = vmax.f32 %v3558_v29, 0.0  ;;  %v3571_v10 = vadd.f32 %v13246_v52, %v3570_v54  ;;  %v4915_v25 = vsel %vm12583_vm12, %v4906_v22, %v4914_v42  ;;  %5828 = vrot.lane.b32.xlu0 %v5742_v30, %s15700_s27  ;;  %v3914_v50 = vpack.c.bf16 %v3828_v18, %v3827_v6  ;;  %5555 = vrot.lane.b32.xlu1 %v5520_v61, %s15700_s27  ;;  %v13269_v22 = vld [vmem:[#allocation3 + $0x48] sm:$0xff]  }
 0x3a0   : > { %15814 = vst [vmem:[#allocation19_spill] sm:$0xff] %v13256_v23  ;;  %4912 = vst [vmem:[#allocation3 + $0x50] sm:$0xe] %v4911_v27  ;;  %v4532_v0 = vmax.f32 %v4316_v21, %v4444_v46  ;;  %v3831_v37 = vmax.f32 %v13250_v35, 0.0  ;;  %vm15815_vm4 = vnez %v15728_v40  ;;  %v5382_v42 = vrot.slane %v13256_v23, 1 }
 0x3a1   : > { %v4314_v56 = vld [vmem:[#allocation2 + $0x260] ss:$2 sm:$0xff]  ;;  %v4442_v39 = vld [vmem:[#allocation2 + $0x261] ss:$2 sm:$0xff]  ;;  %4916 = vst [vmem:[#allocation3 + $0x58] sm:$0x3] %v4915_v25  ;;  %v4905_v48 = vsel %vm15815_vm4, %v4896_v13, %v4904_v43  ;;  %v3913_v54 = vpack.c.bf16 %v3826_v28, %v3825_v59  ;;  %v4019_v21 = vunpack.c.l.bf16 %v3914_v50  ;;  %v4020_v6 = vunpack.c.h.bf16 %v3914_v50 }
 0x3a2   : > { %v4531_v29 = vmax.f32 %v4314_v56, %v4442_v39  ;;  %vm15816_vm6 = vcmask 257024   ;;  %v4918_v27 = vmax.f32 %v4530_v57, %v4532_v0  ;;  %v13273_v61 = vshrl.u32 %v13204_v1, 16  ;;  %v10925_v28 = vpop.f32.mrb[216].mxu1 }
 0x3a3   : > { %4913 = vst.msk [vmem:[#allocation3 + $0x54] sm:$0xf] %vm15816_vm6, %v4905_v48  ;;  %v4017_v18 = vunpack.c.l.bf16 %v3913_v54  ;;  %v4018_v46 = vunpack.c.h.bf16 %v3913_v54  ;;  %vm15818_vm1 = vsmask.f32 7424  ;;  %vm15819_vm13 = vcmask 261120   ;;  %5777 = vrot.lane.b32.xlu0 %v5742_v30, %s11536_s22  ;;  %v3586_v30 = vpop.f32.mrb[217].mxu1 }
 0x3a4   : > { %15817 = vst [vmem:[#allocation20_spill] sm:$0xff] %v13273_v61  ;;  %v4917_v35 = vmax.f32 %v4529_v34, %v4531_v29  ;;  %v5383_v43 = vsel %vm15818_vm1, %v5378_v11, %v5382_v42  ;;  %v10142_v59 = vpack.c.bf16 %v4918_v27, %v4918_v27  ;;  %4147 = vst.msk [vmem:[#allocation2 + $0x290] sm:$0xff] %vm15819_vm13, %v4019_v21  ;;  %v5886_v57 = vrot.slane %v13273_v61, 2 }
 0x3a5   : > { %vm15820_vm3 = vmmov %vm15819_vm13  ;;  %5478 = vrot.lane.b32.xlu1 %v5383_v43, %s11536_s22  ;;  %v5887_v13 = vrot.slane %v13256_v23, 3  ;;  %v3829_v34 = vmax.f32 %v3571_v10, 0.0  ;;  %v3582_v11 = vadd.f32 %v13246_v52, %v10922_v20  ;;  %v3574_v0 = vadd.f32 %v13246_v52, %v3573_v62  ;;  %v10926_v10 = vpop.f32.mrb[218].mxu1 }
 0x3a6   : > { %4148 = vst.msk [vmem:[#allocation2 + $0x298] sm:$0xff] %vm15820_vm3, %v4020_v6  ;;  %v10141_v25 = vpack.c.bf16 %v4917_v35, %v4917_v35  ;;  %vm15821_vm6 = vmmov %vm15820_vm3  ;;  %v15678_v56 = vrot.slane %v13269_v22, 1  ;;  %v4935_v39 = vshrl.u32 %v10142_v59, 16  ;;  %v4938_v50 = vshll.u32 %v10142_v59, 16  ;;  %v3589_v35 = vpop.f32.mrb[219].mxu1 }
 0x3a7   : > { %4145 = vst.msk [vmem:[#allocation2 + $0x280] sm:$0xff] %vm15821_vm6, %v4017_v18  ;;  %vm15822_vm4 = vmmov %vm15820_vm3  ;;  %v13289_v48 = vor.u32 %v5887_v13, %v5886_v57  ;;  %v15677_v29 = vrot.slane %v13269_v22, 2  ;;  %v3832_v21 = vmax.f32 %v3582_v11, 0.0  ;;  %v3830_v6 = vmax.f32 %v3574_v0, 0.0  ;;  %v10929_v1 = vpop.f32.mrb[220].mxu1 }
 0x3a8   : > { %4146 = vst.msk [vmem:[#allocation2 + $0x288] sm:$0xff] %vm15822_vm4, %v4018_v46  ;;  %v4926_v54 = vshrl.u32 %v10141_v25, 16  ;;  %v4929_v27 = vshll.u32 %v10141_v25, 16  ;;  %v4937_v18 = vrot.slane %v4935_v39, 5  ;;  %v4940_v46 = vrot.slane %v4938_v50, 6  ;;  %v5465_v25 = vpop.permute.xlu0 %5464  ;;  %vm15826_vm6 = vmmov %vm15820_vm3 }
 0x3a9   : > { %vm15823_vm4 = vsmask.f32 5376  ;;  %vm15824_vm1 = vcmask 1046528   ;;  %v3916_v57 = vpack.c.bf16 %v3832_v21, %v3831_v37  ;;  %v3915_v13 = vpack.c.bf16 %v3830_v6, %v3829_v34  ;;  %v4947_v39 = vld [vmem:[#allocation3 + $0x58] sm:$0xc] }
 0x3aa   : > { %v5889_v20 = vsel %vm15823_vm4, %v13223_v44, %v13289_v48  ;;  %v5522_v62 = vsel %vm15824_vm1, %v5519_v51, %v15678_v56  ;;  %v4928_v43 = vrot.slane %v4926_v54, 5  ;;  %v4931_v59 = vrot.slane %v4929_v27, 6  ;;  %v4951_v50 = vld [vmem:[#allocation3 + $0x60] sm:$0x7]  ;;  %vm15827_vm4 = vmmov %vm15820_vm3 }
 0x3ab   : > { %5958 = vrot.lane.b32.xlu0 %v5889_v20, %s11537_s23  ;;  %5608 = vrot.lane.b32.xlu1 %v5522_v62, %s11537_s23  ;;  %v13304_v11 = vrot.slane %v5332_v2, 2  ;;  %v13308_v44 = vrot.slane %v5336_v55, 1  ;;  %v4941_v0 = vor.u32 %v4940_v46, %v4937_v18  ;;  %v3595_v51 = vadd.f32 %v13246_v52, %v10925_v28  ;;  %vm15828_vm1 = vmmov %vm15820_vm3 }
 0x3ac   : > { %v4932_v54 = vor.u32 %v4931_v59, %v4928_v43  ;;  %v4023_v34 = vunpack.c.l.bf16 %v3916_v57  ;;  %v4024_v21 = vunpack.c.h.bf16 %v3916_v57  ;;  %v4021_v6 = vunpack.c.l.bf16 %v3915_v13 }
 0x3ad   : > { %v13311_v27 = vld [vmem:[#allocation2 + $0x290] ss:$2 sm:$0xff]  ;;  %v13313_v37 = vld [vmem:[#allocation2 + $0x291] ss:$2 sm:$0xff]  ;;  %v4943_v20 = vrot.slane %v4941_v0, 4  ;;  %v4022_v2 = vunpack.c.h.bf16 %v3915_v13  ;;  %vm15825_vm13 = vcmask 1045504   ;;  %v13322_v28 = vsel %vm15820_vm3, %v12579_v4, %v5465_v25  ;;  %v13340_v13 = vpop.permute.xlu1 %5541  ;;  %vm15829_vm3 = vmmov %vm15828_vm1 }
 0x3ae   : > { %v5744_v55 = vsel %vm15825_vm13, %v5741_v47, %v15677_v29  ;;  %v4933_v18 = vrot.slane %v4932_v54, 4  ;;  %v4948_v46 = vsel %vm12628_vm10, %v4932_v54, %v4947_v39  ;;  %4151 = vst.msk [vmem:[#allocation2 + $0x2b0] sm:$0xff] %vm15826_vm6, %v4023_v34  ;;  %v3587_v4 = vadd.f32 %v13246_v52, %v3586_v30  ;;  %v13334_v47 = vld [vmem:[#allocation3 + $0x50] sm:$0xff]   ;;  %v3602_v30 = vpop.f32.mrb[221].mxu1  ;;  %vm15838_vm6 = vmmov %vm15828_vm1 }
 0x3af   : > { %4152 = vst.msk [vmem:[#allocation2 + $0x2b8] sm:$0xff] %vm15827_vm4, %v4024_v21  ;;  %5830 = vrot.lane.b32.xlu0 %v5744_v55, %s15700_s27  ;;  %5557 = vrot.lane.b32.xlu1 %v5522_v62, %s15700_s27  ;;  %v4952_v59 = vsel %vm12638_vm8, %v4943_v20, %v4951_v50  ;;  %4949 = vst [vmem:[#allocation3 + $0x58] sm:$0xc] %v4948_v46  ;;  %v13338_v57 = vld [vmem:[#allocation2 + $0x280] ss:$2 sm:$0xff]  ;;  %v3835_v25 = vmax.f32 %v3595_v51, 0.0  ;;  %v3598_v39 = vadd.f32 %v13246_v52, %v10926_v10 }
 0x3b0   : > { %4149 = vst.msk [vmem:[#allocation2 + $0x2a0] sm:$0xff] %vm15828_vm1, %v4021_v6  ;;  %v3590_v62 = vadd.f32 %v13246_v52, %v3589_v35  ;;  %4953 = vst [vmem:[#allocation3 + $0x60] sm:$0x7] %v4952_v59  ;;  %v4942_v54 = vsel %vm12648_vm14, %v4933_v18, %v4941_v0  ;;  %v4446_v34 = vld [vmem:[#allocation2 + $0x281] ss:$2 sm:$0xff]  ;;  %v5386_v50 = vor.u32 %v13273_v61, %v5382_v42  ;;  %v13351_v21 = vshll.u32 %v13269_v22, 16 }
 0x3b1   : > { %4150 = vst.msk [vmem:[#allocation2 + $0x2a8] sm:$0xff] %vm15829_vm3, %v4022_v2  ;;  %v13354_v51 = vshrl.u32 %v13269_v22, 16  ;;  %v10930_v10 = vpop.f32.mrb[222].mxu1  ;;  %vm15832_vm4 = vcmask 257024   ;;  %v3833_v35 = vmax.f32 %v3587_v4, 0.0  ;;  %v3836_v6 = vmax.f32 %v3598_v39, 0.0  ;;  %v5595_v39 = vpop.permute.xlu1 %5594  ;;  %vm15839_vm13 = vmmov %vm15828_vm1 }
 0x3b2   : > { %15830 = vst [vmem:[#allocation21_spill] sm:$0xff] %v13351_v21  ;;  %4950 = vst.msk [vmem:[#allocation3 + $0x5c] sm:$0xf] %vm15832_vm4, %v4942_v54  ;;  %v3834_v20 = vmax.f32 %v3590_v62, 0.0  ;;  %v3611_v2 = vadd.f32 %v13246_v52, %v10929_v1  ;;  %v3605_v0 = vpop.f32.mrb[223].mxu1  ;;  %v5390_v18 = vrot.slane %v13351_v21, 1  ;;  %v4533_v43 = vmax.f32 %v13338_v57, %v4446_v34 }
 0x3b3   : > { %15831 = vst [vmem:[#allocation22_spill] sm:$0xff] %v13354_v51  ;;  %5779 = vrot.lane.b32.xlu0 %v5744_v55, %s11536_s22  ;;  %v5890_v42 = vrot.slane %v13354_v51, 2  ;;  %v5891_v46 = vrot.slane %v13351_v21, 3  ;;  %v3918_v5 = vpack.c.bf16 %v3836_v6, %v3835_v25  ;;  %v15682_v4 = vrot.slane %v13334_v47, 2  ;;  %v10933_v34 = vpop.f32.mrb[224].mxu1  ;;  %vm15840_vm14 = vmmov %vm15828_vm1 }
 0x3b4   : > { %v3917_v54 = vpack.c.bf16 %v3834_v20, %v3833_v35  ;;  %vm15833_vm3 = vsmask.f32 7424  ;;  %v3839_v62 = vmax.f32 %v3611_v2, 0.0  ;;  %v3603_v29 = vadd.f32 %v13246_v52, %v3602_v30 }
 0x3b5   : > { %v5391_v55 = vsel %vm15833_vm3, %v5386_v50, %v5390_v18  ;;  %v13368_v1 = vor.u32 %v5891_v46, %v5890_v42  ;;  %v4027_v59 = vunpack.c.l.bf16 %v3918_v5  ;;  %v4028_v61 = vunpack.c.h.bf16 %v3918_v5  ;;  %v3618_v46 = vpop.f32.mrb[225].mxu1 }
 0x3b6   : > { %v4324_v56 = vld [vmem:[#allocation2 + $0x2b0] ss:$2 sm:$0xff]  ;;  %v4452_v23 = vld [vmem:[#allocation2 + $0x2b1] ss:$2 sm:$0xff]  ;;  %v4025_v57 = vunpack.c.l.bf16 %v3917_v54  ;;  %v4026_v25 = vunpack.c.h.bf16 %v3917_v54  ;;  %5480 = vrot.lane.b32.xlu1 %v5391_v55, %s11536_s22  ;;  %vm15834_vm4 = vsmask.f32 5376  ;;  %v3614_v5 = vadd.f32 %v13246_v52, %v10930_v10 }
 0x3b7   : > { %v4536_v35 = vmax.f32 %v4324_v56, %v4452_v23  ;;  %v5893_v50 = vsel %vm15834_vm4, %v13289_v48, %v13368_v1  ;;  %v15835_v2 = vrot.slane %v13334_v47, 1  ;;  %v15836_v30 = vrot.slane %v13269_v22, 1  ;;  %4155 = vst.msk [vmem:[#allocation2 + $0x2d0] sm:$0xff] %vm15828_vm1, %v4027_v59  ;;  %v13394_v59 = vpop.f32.mrb[226].mxu1 }
 0x3b8   : > { %v4322_v6 = vld [vmem:[#allocation2 + $0x2a0] ss:$2 sm:$0xff]  ;;  %v4450_v20 = vld [vmem:[#allocation2 + $0x2a1] ss:$2 sm:$0xff]  ;;  %vm15837_vm3 = vcmask 1046528   ;;  %4156 = vst.msk [vmem:[#allocation2 + $0x2d8] sm:$0xff] %vm15838_vm6, %v4028_v61  ;;  %5960 = vrot.lane.b32.xlu0 %v5893_v50, %s11537_s23  ;;  %v15844_v61 = vmax.f32 %v13311_v27, %v13313_v37  ;;  %v13410_v27 = vpop.permute.xlu1 %5543  ;;  %vm15848_vm6 = vmmov %vm15828_vm1 }
 0x3b9   : > { %v5524_v42 = vsel %vm15837_vm3, %v15836_v30, %v15835_v2  ;;  %v4535_v54 = vmax.f32 %v4322_v6, %v4450_v20  ;;  %4153 = vst.msk [vmem:[#allocation2 + $0x2c0] sm:$0xff] %vm15839_vm13, %v4025_v57  ;;  %v15841_v23 = vrot.slane %v13269_v22, 2  ;;  %vm15842_vm4 = vcmask 1045504   ;;  %v13403_v22 = vpop.f32.mrb[227].mxu1 }
 0x3ba   : > { %4154 = vst.msk [vmem:[#allocation2 + $0x2c8] sm:$0xff] %vm15840_vm14, %v4026_v25  ;;  %v15843_v48 = vshrl.u32 %v12656_v8, 16  ;;  %v5638_v55 = vshll.u32 %v12656_v8, 16  ;;  %v4955_v57 = vmax.f32 %v15844_v61, %v4536_v35  ;;  %v3837_v25 = vmax.f32 %v3603_v29, 0.0  ;;  %5610 = vrot.lane.b32.xlu1 %v5524_v42, %s11537_s23  ;;  %v10937_v61 = vpop.f32.mrb[228].mxu1 }
 0x3bb   : > { %v5746_v56 = vsel %vm15842_vm4, %v15841_v23, %v15682_v4  ;;  %v3840_v6 = vmax.f32 %v3614_v5, 0.0  ;;  %v13401_v20 = vor.u32 %v13304_v11, %v13308_v44  ;;  %v4954_v50 = vmax.f32 %v4533_v43, %v4535_v54  ;;  %v13421_v44 = vld [vmem:[%s15636_s7 + $0x80] sm:$0xff]   ;;  %vm15850_vm4 = vmmov %vm15828_vm1 }
 0x3bc   : > { %v5637_v10 = vrot.slane %v15843_v48, 1  ;;  %vm15845_vm14 = vcmask 523264   ;;  %v5640_v2 = vrot.slane %v5638_v55, 2  ;;  %v3606_v30 = vadd.f32 %v13246_v52, %v3605_v0  ;;  %5832 = vrot.lane.b32.xlu0 %v5746_v56, %s15700_s27  ;;  %10963 = vmatprep.subr.bf16.mxu0 %v13421_v44  ;;  %v5766_v48 = vpop.permute.xlu0 %5765 }
 0x3bd   : > { %v6063_v8 = vsel %vm15845_vm14, %v13322_v28, %v13340_v13  ;;  %v10144_v29 = vpack.c.bf16 %v4955_v57, %v4955_v57  ;;  %v3920_v37 = vpack.c.bf16 %v3840_v6, %v3839_v62  ;;  %vm15846_vm13 = vcmask 785408   ;;  %vm15851_vm14 = vmmov %vm15828_vm1 }
 0x3be   : > { %v13413_v35 = vsel %vm15846_vm13, %v6063_v8, %v5595_v39  ;;  %v13416_v11 = vadd.f32 %v13246_v52, %v10933_v34  ;;  %v10143_v43 = vpack.c.bf16 %v4954_v50, %v4954_v50  ;;  %v5641_v28 = vor.u32 %v5640_v2, %v5637_v10  ;;  %5559 = vrot.lane.b32.xlu1 %v5524_v42, %s15700_s27  ;;  %v4984_v50 = vld [vmem:[#allocation3 + $0x60] sm:$0x8]  ;;  %vm15853_vm13 = vmmov %vm15828_vm1 }
 0x3bf   : > { %v3838_v13 = vmax.f32 %v3606_v30, 0.0  ;;  %v13425_v0 = vshll.u32 %v13334_v47, 16  ;;  %v4972_v62 = vshll.u32 %v10144_v29, 16  ;;  %v4976_v5 = vshrl.u32 %v10144_v29, 16  ;;  %v4328_v42 = vld [vmem:[#allocation2 + $0x2d0] ss:$2 sm:$0xff] }
 0x3c0   : > { %v4031_v39 = vunpack.c.l.bf16 %v3920_v37  ;;  %v4032_v54 = vunpack.c.h.bf16 %v3920_v37  ;;  %v4963_v34 = vshll.u32 %v10143_v43, 16  ;;  %v4966_v23 = vshrl.u32 %v10143_v43, 16  ;;  %v4456_v29 = vld [vmem:[#allocation2 + $0x2d1] ss:$2 sm:$0xff]  ;;  %5781 = vrot.lane.b32.xlu0 %v5746_v56, %s11536_s22  ;;  %v5467_v43 = vpop.permute.xlu1 %5466 }
 0x3c1   : > { %15847 = vst [vmem:[#allocation23_spill] sm:$0xff] %v13425_v0  ;;  %v3919_v55 = vpack.c.bf16 %v3838_v13, %v3837_v25  ;;  %v5394_v10 = vor.u32 %v13354_v51, %v5390_v18  ;;  %v4974_v57 = vrot.slane %v4972_v62, 5  ;;  %v4978_v6 = vrot.slane %v4976_v5, 4  ;;  %v4454_v4 = vld [vmem:[#allocation2 + $0x2c1] ss:$2 sm:$0xff] }
 0x3c2   : > { %4159 = vst.msk [vmem:[#allocation2 + $0x2f0] sm:$0xff] %vm15848_vm6, %v4031_v39  ;;  %vm15849_vm3 = vsmask.f32 6400  ;;  %v3843_v2 = vmax.f32 %v13416_v11, 0.0  ;;  %v4965_v25 = vrot.slane %v4963_v34, 5  ;;  %v4968_v30 = vrot.slane %v4966_v23, 4 }
 0x3c3   : > { %4160 = vst.msk [vmem:[#allocation2 + $0x2f8] sm:$0xff] %vm15828_vm1, %v4032_v54  ;;  %v5645_v8 = vsel %vm15849_vm3, %v5641_v28, %v13401_v20  ;;  %v4029_v37 = vunpack.c.l.bf16 %v3919_v55  ;;  %v3619_v18 = vadd.f32 %v13246_v52, %v3618_v46  ;;  %v4979_v13 = vor.u32 %v4978_v6, %v4974_v57  ;;  %v13443_v28 = vld [vmem:[#allocation3 + $0x58] sm:$0xff]   ;;  %v3634_v11 = vpop.f32.mrb[229].mxu1  ;;  %v4988_v54 = vld [vmem:[#allocation3 + $0x68] sm:$0xf] }
 0x3c4   : > { %v13440_v62 = vsel %vm15850_vm4, %v5645_v8, %v5766_v48  ;;  %v4030_v5 = vunpack.c.h.bf16 %v3919_v55  ;;  %v15684_v39 = vrot.slane %v13425_v0, 1  ;;  %v4969_v34 = vor.u32 %v4968_v30, %v4965_v25  ;;  %v10938_v48 = vpop.f32.mrb[230].mxu1  ;;  %v13452_v8 = vld [vmem:[#allocation2 + $0x2c0] ss:$2 sm:$0xff] }
 0x3c5   : > { %v4985_v23 = vsel %vm12706_vm0, %v4965_v25, %v4984_v50  ;;  %4157 = vst.msk [vmem:[#allocation2 + $0x2e0] sm:$0xff] %vm15851_vm14, %v4029_v37  ;;  %v13449_v46 = vshrl.u32 %v13334_v47, 16  ;;  %v5895_v56 = vrot.slane %v13425_v0, 3  ;;  %v4980_v6 = vrot.slane %v4979_v13, 4  ;;  %v3637_v25 = vpop.f32.mrb[231].mxu1  ;;  %vm15859_vm14 = vmmov %vm15853_vm13 }
 0x3c6   : > { %4986 = vst [vmem:[#allocation3 + $0x60] sm:$0x8] %v4985_v23  ;;  %v4538_v55 = vmax.f32 %v4328_v42, %v4456_v29  ;;  %4158 = vst.msk [vmem:[#allocation2 + $0x2e8] sm:$0xff] %vm15853_vm13, %v4030_v5  ;;  %vm15854_vm6 = vsmask.f32 7424  ;;  %v3630_v50 = vadd.f32 %v13246_v52, %v13394_v59  ;;  %v4970_v37 = vrot.slane %v4969_v34, 4  ;;  %v5819_v29 = vpop.permute.xlu1 %5818 }
 0x3c7   : > { %15852 = vst [vmem:[#allocation24_spill] sm:$0xff] %v13449_v46  ;;  %v5399_v30 = vsel %vm15854_vm6, %v5394_v10, %v15684_v39  ;;  %v5894_v13 = vrot.slane %v13449_v46, 2  ;;  %v3841_v23 = vmax.f32 %v3619_v18, 0.0  ;;  %v3622_v42 = vadd.f32 %v13246_v52, %v13403_v22  ;;  %vm15862_vm6 = vmmov %vm15859_vm14 }
 0x3c8   : > { %5482 = vrot.lane.b32.xlu1 %v5399_v30, %s11536_s22  ;;  %v4989_v5 = vsel %vm12721_vm7, %v4980_v6, %v4988_v54  ;;  %v3844_v21 = vmax.f32 %v3630_v50, 0.0  ;;  %v3643_v10 = vadd.f32 %v13246_v52, %v10937_v61  ;;  %v15686_v59 = vrot.slane %v13443_v28, 1 }
 0x3c9   : > { %4990 = vst [vmem:[#allocation3 + $0x68] sm:$0xf] %v4989_v5  ;;  %v4975_v34 = vsel %vm12732_vm2, %v4970_v37, %v4974_v57  ;;  %v13470_v51 = vor.u32 %v5895_v56, %v5894_v13  ;;  %v3842_v18 = vmax.f32 %v3622_v42, 0.0  ;;  %v15687_v22 = vrot.slane %v13443_v28, 2  ;;  %v10941_v57 = vpop.f32.mrb[232].mxu1 }
 0x3ca   : > { %v4332_v30 = vld [vmem:[#allocation2 + $0x2f0] ss:$2 sm:$0xff]  ;;  %v4460_v39 = vld [vmem:[#allocation2 + $0x2f1] ss:$2 sm:$0xff]  ;;  %vm15855_vm1 = vcmask 257024   ;;  %v4537_v54 = vmax.f32 %v13452_v8, %v4454_v4  ;;  %v3922_v50 = vpack.c.bf16 %v3844_v21, %v3843_v2  ;;  %v15856_v61 = vrot.slane %v13334_v47, 1  ;;  %v13489_v4 = vpop.permute.xlu1 %5596 }
 0x3cb   : > { %4987 = vst.msk [vmem:[#allocation3 + $0x64] sm:$0xf] %vm15855_vm1, %v4975_v34  ;;  %v4540_v6 = vmax.f32 %v4332_v30, %v4460_v39  ;;  %vm15857_vm3 = vcmask 1046528   ;;  %vm15858_vm4 = vsmask.f32 5376  ;;  %v13485_v37 = vsel %vm15859_vm14, %v12653_v3, %v5467_v43  ;;  %v13491_v2 = vpop.f32.mrb[233].mxu1  ;;  %vm15863_vm1 = vmmov %vm15862_vm6 }
 0x3cc   : > { %v5526_v5 = vsel %vm15857_vm3, %v15856_v61, %v15686_v59  ;;  %v5897_v56 = vsel %vm15858_vm4, %v13368_v1, %v13470_v51  ;;  %v3921_v13 = vpack.c.bf16 %v3842_v18, %v3841_v23  ;;  %v3635_v21 = vadd.f32 %v13246_v52, %v3634_v11  ;;  %v13495_v34 = vpop.f32.mrb[234].mxu1  ;;  %vm15864_vm3 = vmmov %vm15863_vm1 }
 0x3cd   : > { %5612 = vrot.lane.b32.xlu1 %v5526_v5, %s11537_s23  ;;  %v4992_v39 = vmax.f32 %v4538_v55, %v4540_v6  ;;  %5962 = vrot.lane.b32.xlu0 %v5897_v56, %s11537_s23  ;;  %v4035_v8 = vunpack.c.l.bf16 %v3922_v50  ;;  %v4036_v42 = vunpack.c.h.bf16 %v3922_v50  ;;  %v3646_v1 = vadd.f32 %v13246_v52, %v10938_v48  ;;  %v4330_v3 = vld [vmem:[#allocation2 + $0x2e0] ss:$2 sm:$0xff]  ;;  %v4458_v43 = vld [vmem:[#allocation2 + $0x2e1] ss:$2 sm:$0xff]  ;;  %v5768_v55 = vpop.permute.xlu0 %5767  ;;  %v13502_v6 = vpop.f32.mrb[235].mxu1  ;;  %vm15865_vm4 = vmmov %vm15863_vm1 }
 0x3ce   : > { %v4033_v23 = vunpack.c.l.bf16 %v3921_v13  ;;  %v4034_v30 = vunpack.c.h.bf16 %v3921_v13  ;;  %v3847_v18 = vmax.f32 %v3643_v10, 0.0  ;;  %v15860_v11 = vrot.slane %v13334_v47, 2 }
 0x3cf   : > { %vm15861_vm13 = vcmask 1045504   ;;  %v10146_v56 = vpack.c.bf16 %v4992_v39, %v4992_v39  ;;  %v4539_v50 = vmax.f32 %v4330_v3, %v4458_v43  ;;  %4163 = vst.msk [vmem:[#allocation2 + $0x310] sm:$0xff] %vm15862_vm6, %v4035_v8  ;;  %v3848_v48 = vmax.f32 %v3646_v1, 0.0  ;;  %v13514_v8 = vpop.permute.xlu1 %5545  ;;  %vm15871_vm6 = vmmov %vm15863_vm1 }
 0x3d0   : > { %v5748_v61 = vsel %vm15861_vm13, %v15860_v11, %v15687_v22  ;;  %4164 = vst.msk [vmem:[#allocation2 + $0x318] sm:$0xff] %vm15863_vm1, %v4036_v42  ;;  %v5646_v59 = vrot.slane %v12879_v32, 1  ;;  %v3845_v10 = vmax.f32 %v3635_v21, 0.0  ;;  %vm15866_vm14 = vcmask 523264   ;;  %vm15870_vm13 = vmmov %vm15863_vm1 }
 0x3d1   : > { %4161 = vst.msk [vmem:[#allocation2 + $0x300] sm:$0xff] %vm15864_vm3, %v4033_v23  ;;  %v6208_v47 = vsel %vm15866_vm14, %v13440_v62, %v5819_v29  ;;  %v5647_v13 = vrot.slane %v12841_v15, 2  ;;  %v3638_v39 = vadd.f32 %v13246_v52, %v3637_v25  ;;  %5561 = vrot.lane.b32.xlu1 %v5526_v5, %s15700_s27  ;;  %v5008_v42 = vshrl.u32 %v10146_v56, 16  ;;  %5834 = vrot.lane.b32.xlu0 %v5748_v61, %s15700_s27  ;;  %v10945_v29 = vpop.f32.mrb[236].mxu1  ;;  %vm15875_vm14 = vmmov %vm15865_vm4 }
 0x3d2   : > { %4162 = vst.msk [vmem:[#allocation2 + $0x308] sm:$0xff] %vm15865_vm4, %v4034_v30  ;;  %v4991_v1 = vmax.f32 %v4537_v54, %v4539_v50  ;;  %v3924_v32 = vpack.c.bf16 %v3848_v48, %v3847_v18  ;;  %v13518_v3 = vadd.f32 %v13246_v52, %v10941_v57  ;;  %v15867_v62 = vrot.slane %v13425_v0, 1  ;;  %v13528_v11 = vpop.f32.mrb[237].mxu1  ;;  %v5023_v57 = vld [vmem:[#allocation3 + $0x74] sm:$0x1] }
 0x3d3   : > { %v13520_v21 = vor.u32 %v5647_v13, %v5646_v59  ;;  %v3846_v43 = vmax.f32 %v3638_v39, 0.0  ;;  %v13526_v25 = vshll.u32 %v13443_v28, 16  ;;  %v5010_v5 = vrot.slane %v5008_v42, 7  ;;  %v5949_v59 = vpop.permute.xlu0 %5948  ;;  %v13534_v39 = vpop.f32.mrb[238].mxu1 }
 0x3d4   : > { %v5402_v15 = vor.u32 %v13449_v46, %v15867_v62  ;;  %v10145_v23 = vpack.c.bf16 %v4991_v1, %v4991_v1  ;;  %v4039_v54 = vunpack.c.l.bf16 %v3924_v32  ;;  %v4040_v30 = vunpack.c.h.bf16 %v3924_v32  ;;  %v13543_v42 = vpop.permute.xlu1 %5468  ;;  %v3669_v1 = vpop.f32.mrb[239].mxu1 }
 0x3d5   : > { %15868 = vst [vmem:[#allocation25_spill] sm:$0xff] %v13526_v25  ;;  %v5011_v18 = vshll.u32 %v10146_v56, 16  ;;  %v3923_v50 = vpack.c.bf16 %v3846_v43, %v3845_v10  ;;  %v13532_v13 = vshrl.u32 %v13443_v28, 16  ;;  %v5015_v62 = vrot.slane %v5010_v5, 4  ;;  %5783 = vrot.lane.b32.xlu0 %v5748_v61, %s11536_s22 }
 0x3d6   : > { %v5000_v22 = vshrl.u32 %v10145_v23, 16  ;;  %4167 = vst.msk [vmem:[#allocation2 + $0x330] sm:$0xff] %vm15870_vm13, %v4039_v54  ;;  %vm15872_vm1 = vsmask.f32 6400  ;;  %v3851_v10 = vmax.f32 %v13518_v3, 0.0  ;;  %v5003_v32 = vshll.u32 %v10145_v23, 16  ;;  %vm15876_vm13 = vmmov %vm15865_vm4 }
 0x3d7   : > { %15869 = vst [vmem:[#allocation26_spill] sm:$0xff] %v13532_v13  ;;  %4168 = vst.msk [vmem:[#allocation2 + $0x338] sm:$0xff] %vm15871_vm6, %v4040_v30  ;;  %v5649_v56 = vsel %vm15872_vm1, %v13401_v20, %v13520_v21  ;;  %v4037_v43 = vunpack.c.l.bf16 %v3923_v50  ;;  %v4038_v48 = vunpack.c.h.bf16 %v3923_v50  ;;  %v15873_v0 = vrot.slane %v13526_v25, 1  ;;  %v4336_v20 = vld [vmem:[#allocation2 + $0x310] ss:$2 sm:$0xff] }
 0x3d8   : > { %vm15874_vm3 = vsmask.f32 7424  ;;  %v5013_v46 = vor.u32 %v5011_v18, %v5010_v5  ;;  %v5024_v30 = vsel %vm12791_vm9, %v5015_v62, %v5023_v57  ;;  %v5002_v16 = vrot.slane %v5000_v22, 7  ;;  %v4464_v33 = vld [vmem:[#allocation2 + $0x311] ss:$2 sm:$0xff]  ;;  %v13561_v5 = vld [vmem:[#allocation3 + $0x60] sm:$0xff]  }
 0x3d9   : > { %v5407_v54 = vsel %vm15874_vm3, %v5402_v15, %v15873_v0  ;;  %v5898_v61 = vrot.slane %v13532_v13, 2  ;;  %5025 = vst [vmem:[#allocation3 + $0x74] sm:$0x1] %v5024_v30  ;;  %v5019_v3 = vld [vmem:[#allocation3 + $0x6c] sm:$0xf]  ;;  %v13553_v23 = vsel %vm15865_vm4, %v5649_v56, %v5768_v55  ;;  %4165 = vst.msk [vmem:[#allocation2 + $0x320] sm:$0xff] %vm15875_vm14, %v4037_v43  ;;  %v3651_v22 = vadd.f32 %v13246_v52, %v13491_v2  ;;  %v13567_v56 = vpop.permute.xlu0 %5820 }
 0x3da   : > { %5484 = vrot.lane.b32.xlu1 %v5407_v54, %s11536_s22  ;;  %4166 = vst.msk [vmem:[#allocation2 + $0x328] sm:$0xff] %vm15876_vm13, %v4038_v48  ;;  %v5899_v0 = vrot.slane %v13526_v25, 3  ;;  %vm15877_vm6 = vcmask 785408   ;;  %v5005_v18 = vor.u32 %v5003_v32, %v5002_v16  ;;  %v5006_v57 = vrot.slane %v5002_v16, 4  ;;  %v4334_v50 = vld [vmem:[#allocation2 + $0x300] ss:$2 sm:$0xff]  ;;  %v13573_v16 = vpop.permute.xlu1 %5598 }
 0x3db   : > { %v6244_v15 = vsel %vm15877_vm6, %v6208_v47, %v5949_v59  ;;  %v4462_v62 = vld [vmem:[#allocation2 + $0x301] ss:$2 sm:$0xff]  ;;  %v3662_v55 = vadd.f32 %v13246_v52, %v13495_v34  ;;  %v3654_v48 = vadd.f32 %v13246_v52, %v13502_v6  ;;  %v4542_v43 = vmax.f32 %v4336_v20, %v4464_v33  ;;  %v10949_v32 = vpop.f32.mrb[240].mxu1  ;;  %vm15884_vm6 = vmmov %vm15876_vm13 }
 0x3dc   : > { %6534 = vmatprep.mubr.bf16.mxu0 %v6244_v15  ;;  %v13569_v47 = vor.u32 %v5899_v0, %v5898_v61  ;;  %v3849_v59 = vmax.f32 %v3651_v22, 0.0  ;;  %v3675_v2 = vadd.f32 %v13246_v52, %v10945_v29  ;;  %v5014_v54 = vsel %vm12811_vm15, %v5006_v57, %v5013_v46  ;;  %v13579_v15 = vpop.f32.mrb[241].mxu1 }
 0x3dd   : > { %6535 = vmatmul.mubr.bf16.vlgmr.msra.gmra.mrb[128].mxu0 %v13413_v35  ;;  %v5020_v34 = vsel %vm15798_vm5, %v5005_v18, %v5019_v3  ;;  %v3852_v6 = vmax.f32 %v3662_v55, 0.0  ;;  %v3850_v30 = vmax.f32 %v3654_v48, 0.0  ;;  %vm15878_vm1 = vcmask 257024   ;;  %v13589_v18 = vpop.f32.mrb[242].mxu1 }
 0x3de   : > { %10964 = vmatpush3.bf16.msra.mxu0 %v13421_v44  ;;  %5021 = vst [vmem:[#allocation3 + $0x6c] sm:$0xf] %v5020_v34  ;;  %5022 = vst.msk [vmem:[#allocation3 + $0x70] sm:$0xf] %vm15878_vm1, %v5014_v54  ;;  %v4541_v33 = vmax.f32 %v4334_v50, %v4462_v62  ;;  %v4340_v35 = vld [vmem:[#allocation2 + $0x330] ss:$2 sm:$0xff]  ;;  %v3678_v62 = vadd.f32 %v13246_v52, %v13534_v39  ;;  %v3670_v55 = vadd.f32 %v13246_v52, %v3669_v1 }
 0x3df   : > { %v4468_v29 = vld [vmem:[#allocation2 + $0x331] ss:$2 sm:$0xff]  ;;  %vm15879_vm3 = vsmask.f32 5376  ;;  %v3855_v46 = vmax.f32 %v3675_v2, 0.0  ;;  %v15693_v61 = vrot.slane %v13561_v5, 1  ;;  %v3926_v0 = vpack.c.bf16 %v3852_v6, %v3851_v10  ;;  %v13601_v10 = vpop.permute.xlu1 %5547  ;;  %vm15885_vm1 = vmmov %vm15884_vm6 }
 0x3e0   : > { %v5901_v20 = vsel %vm15879_vm3, %v13470_v51, %v13569_v47  ;;  %v4544_v3 = vmax.f32 %v4340_v35, %v4468_v29  ;;  %v3925_v22 = vpack.c.bf16 %v3850_v30, %v3849_v59  ;;  %v15692_v44 = vrot.slane %v13561_v5, 2  ;;  %v13603_v48 = vpop.f32.mrb[243].mxu1  ;;  %v13606_v35 = vpop.permute.xlu0 %5769  ;;  %vm15886_vm3 = vmmov %vm15885_vm1 }
 0x3e1   : > { %5964 = vrot.lane.b32.xlu0 %v5901_v20, %s11537_s23  ;;  %v15880_v57 = vrot.slane %v13443_v28, 1  ;;  %vm15881_vm4 = vcmask 1046528   ;;  %v3667_v51 = vadd.f32 %v13246_v52, %v13528_v11  ;;  %v4338_v2 = vld [vmem:[#allocation2 + $0x320] ss:$2 sm:$0xff]  ;;  %v4466_v54 = vld [vmem:[#allocation2 + $0x321] ss:$2 sm:$0xff]  ;;  %v4043_v34 = vunpack.c.l.bf16 %v3926_v0 }
 0x3e2   : > { %v5027_v59 = vmax.f32 %v4542_v43, %v4544_v3  ;;  %v4044_v6 = vunpack.c.h.bf16 %v3926_v0  ;;  %v4041_v30 = vunpack.c.l.bf16 %v3925_v22  ;;  %v4543_v11 = vmax.f32 %v4338_v2, %v4466_v54  ;;  %v13628_v2 = vpop.f32.mrb[244].mxu1 }
 0x3e3   : > { %v5528_v50 = vsel %vm15881_vm4, %v15880_v57, %v15693_v61  ;;  %v4042_v29 = vunpack.c.h.bf16 %v3925_v22  ;;  %v15882_v39 = vrot.slane %v13443_v28, 2  ;;  %vm15883_vm14 = vcmask 1045504   ;;  %4171 = vst.msk [vmem:[#allocation2 + $0x350] sm:$0xff] %vm15876_vm13, %v4043_v34  ;;  %vm15887_vm4 = vmmov %vm15885_vm1 }
 0x3e4   : > { %5614 = vrot.lane.b32.xlu1 %v5528_v50, %s11537_s23  ;;  %v3853_v20 = vmax.f32 %v3667_v51, 0.0  ;;  %v10148_v57 = vpack.c.bf16 %v5027_v59, %v5027_v59  ;;  %4172 = vst.msk [vmem:[#allocation2 + $0x358] sm:$0xff] %vm15884_vm6, %v4044_v6  ;;  %v3856_v43 = vmax.f32 %v3678_v62, 0.0  ;;  %v3854_v3 = vmax.f32 %v3670_v55, 0.0  ;;  %vm15890_vm13 = vmmov %vm15885_vm1 }
 0x3e5   : > { %v5750_v1 = vsel %vm15883_vm14, %v15882_v39, %v15692_v44  ;;  %4169 = vst.msk [vmem:[#allocation2 + $0x340] sm:$0xff] %vm15885_vm1, %v4041_v30  ;;  %v5650_v0 = vrot.slane %v12969_v14, 1  ;;  %v5026_v22 = vmax.f32 %v4541_v33, %v4543_v11  ;;  %v13622_v28 = vsel %vm15887_vm4, %v12712_v7, %v13543_v42  ;;  %v13631_v14 = vpop.f32.mrb[245].mxu1  ;;  %v5951_v39 = vpop.permute.xlu0 %5950  ;;  %vm15889_vm14 = vmmov %vm15885_vm1 }
 0x3e6   : > { %5836 = vrot.lane.b32.xlu0 %v5750_v1, %s15700_s27  ;;  %4170 = vst.msk [vmem:[#allocation2 + $0x348] sm:$0xff] %vm15886_vm3, %v4042_v29  ;;  %v5651_v51 = vrot.slane %v12965_v38, 2  ;;  %v13626_v59 = vadd.f32 %v13246_v52, %v10949_v32  ;;  %v5044_v54 = vshrl.u32 %v10148_v57, 16  ;;  %v5047_v62 = vshll.u32 %v10148_v57, 16  ;;  %v13641_v32 = vpop.permute.xlu1 %5470  ;;  %v13643_v30 = vpop.f32.mrb[246].mxu1  ;;  %vm15892_vm3 = vmmov %vm15885_vm1 }
 0x3e7   : > { %v3928_v55 = vpack.c.bf16 %v3856_v43, %v3855_v46  ;;  %v3927_v34 = vpack.c.bf16 %v3854_v3, %v3853_v20  ;;  %v10147_v33 = vpack.c.bf16 %v5026_v22, %v5026_v22  ;;  %v15888_v7 = vrot.slane %v13526_v25, 1  ;;  %v13646_v20 = vpop.f32.mrb[247].mxu1  ;;  %v5060_v57 = vld [vmem:[#allocation3 + $0x7c] sm:$0x3] }
 0x3e8   : > { %5563 = vrot.lane.b32.xlu1 %v5528_v50, %s15700_s27  ;;  %v13633_v6 = vor.u32 %v5651_v51, %v5650_v0  ;;  %v13639_v42 = vshll.u32 %v13561_v5, 16  ;;  %v5046_v46 = vrot.slane %v5044_v54, 6  ;;  %v5049_v11 = vrot.slane %v5047_v62, 7  ;;  %v13677_v19 = vpop.f32.mrb[248].mxu1 }
 0x3e9   : > { %v5410_v38 = vor.u32 %v13532_v13, %v15888_v7  ;;  %v4047_v29 = vunpack.c.l.bf16 %v3928_v55  ;;  %v4048_v50 = vunpack.c.h.bf16 %v3928_v55  ;;  %v5035_v43 = vshrl.u32 %v10147_v33, 16  ;;  %v5056_v7 = vld [vmem:[#allocation3 + $0x74] sm:$0xe]  ;;  %v13655_v55 = vld [vmem:[#allocation3 + $0x68] sm:$0xff]   ;;  %v13684_v26 = vpop.f32.mrb[249].mxu1 }
 0x3ea   : > { %5785 = vrot.lane.b32.xlu0 %v5750_v1, %s11536_s22  ;;  %v5038_v3 = vshll.u32 %v10147_v33, 16  ;;  %v4045_v0 = vunpack.c.l.bf16 %v3927_v34  ;;  %v4046_v22 = vunpack.c.h.bf16 %v3927_v34  ;;  %v5050_v51 = vor.u32 %v5049_v11, %v5046_v46  ;;  %v13664_v46 = vpop.permute.xlu1 %5600 }
 0x3eb   : > { %4175 = vst.msk [vmem:[#allocation2 + $0x370] sm:$0xff] %vm15889_vm14, %v4047_v29  ;;  %v3859_v54 = vmax.f32 %v13626_v59, 0.0  ;;  %v15698_v62 = vrot.slane %v13639_v42, 1  ;;  %v13653_v1 = vshrl.u32 %v13561_v5, 16  ;;  %v5037_v44 = vrot.slane %v5035_v43, 6 }
 0x3ec   : > { %4176 = vst.msk [vmem:[#allocation2 + $0x378] sm:$0xff] %vm15890_vm13, %v4048_v50  ;;  %v5040_v61 = vrot.slane %v5038_v3, 7  ;;  %v4344_v33 = vld [vmem:[#allocation2 + $0x350] ss:$2 sm:$0xff]  ;;  %v4472_v25 = vld [vmem:[#allocation2 + $0x351] ss:$2 sm:$0xff]  ;;  %v3683_v59 = vadd.f32 %v13246_v52, %v13579_v15  ;;  %v13673_v3 = vpop.permute.xlu0 %5822  ;;  %v3686_v24 = vadd.f32 %v13246_v52, %v13603_v48 }
 0x3ed   : > { %vm15891_vm6 = vcmask 523264   ;;  %4173 = vst.msk [vmem:[#allocation2 + $0x360] sm:$0xff] %vm15885_vm1, %v4045_v0  ;;  %v5052_v11 = vrot.slane %v5050_v51, 4  ;;  %v4342_v29 = vld [vmem:[#allocation2 + $0x340] ss:$2 sm:$0xff]  ;;  %v5903_v13 = vrot.slane %v13639_v42, 3 }
 0x3ee   : > { %v6210_v34 = vsel %vm15891_vm6, %v13553_v23, %v13567_v56  ;;  %4174 = vst.msk [vmem:[#allocation2 + $0x368] sm:$0xff] %vm15892_vm3, %v4046_v22  ;;  %v4470_v50 = vld [vmem:[#allocation2 + $0x341] ss:$2 sm:$0xff]  ;;  %vm15893_vm4 = vsmask.f32 6400  ;;  %v5902_v56 = vrot.slane %v13653_v1, 2  ;;  %v5041_v0 = vor.u32 %v5040_v61, %v5037_v44 }
 0x3ef   : > { %v5653_v43 = vsel %vm15893_vm4, %v13520_v21, %v13633_v6  ;;  %vm15894_vm14 = vsmask.f32 7424  ;;  %v4546_v22 = vmax.f32 %v4344_v33, %v4472_v25  ;;  %v4545_v15 = vmax.f32 %v4342_v29, %v4470_v50 }
 0x3f0   : > { %v5415_v23 = vsel %vm15894_vm14, %v5410_v38, %v15698_v62  ;;  %v5061_v21 = vsel %vm12583_vm12, %v5052_v11, %v5060_v57  ;;  %v3857_v41 = vmax.f32 %v3683_v59, 0.0  ;;  %v3694_v38 = vadd.f32 %v13246_v52, %v13589_v18  ;;  %vm15896_vm12 = vmmov %vm15891_vm6 }
 0x3f1   : > { %5486 = vrot.lane.b32.xlu1 %v5415_v23, %s11536_s22  ;;  %vm15895_vm13 = vcmask 785408   ;;  %5062 = vst [vmem:[#allocation3 + $0x7c] sm:$0x3] %v5061_v21  ;;  %v5042_v25 = vrot.slane %v5041_v0, 4  ;;  %v5057_v61 = vsel %vm12574_vm11, %v5041_v0, %v5056_v7  ;;  %v13688_v44 = vor.u32 %v5903_v13, %v5902_v56 }
 0x3f2   : > { %v6247_v62 = vsel %vm15895_vm13, %v6210_v34, %v5951_v39  ;;  %5058 = vst [vmem:[#allocation3 + $0x74] sm:$0xe] %v5057_v61  ;;  %v3860_v57 = vmax.f32 %v3694_v38, 0.0  ;;  %v6065_v18 = vsel %vm15896_vm12, %v13485_v37, %v13410_v27  ;;  %v5529_v39 = vrot.slane %v13655_v55, 1  ;;  %v13697_v34 = vpop.f32.mrb[250].mxu1  ;;  %vm15899_vm1 = vmmov %vm15895_vm13  ;;  %v13706_v27 = vpop.permute.xlu1 %5549 }
 0x3f3   : > { %6542 = vmatprep.mubr.bf16.mxu0 %v6247_v62  ;;  %v5751_v33 = vrot.slane %v13655_v55, 2  ;;  %vm15897_vm11 = vnez %v15728_v40  ;;  %v4348_v13 = vld [vmem:[#allocation2 + $0x370] ss:$2 sm:$0xff]  ;;  %v4476_v7 = vld [vmem:[#allocation2 + $0x371] ss:$2 sm:$0xff]  ;;  %v3858_v48 = vmax.f32 %v3686_v24, 0.0  ;;  %v6103_v62 = vsel %vm15899_vm1, %v6065_v18, %v13489_v4  ;;  %v13717_v4 = vpop.permute.xlu0 %5771 }
 0x3f4   : > { %v5051_v36 = vsel %vm15897_vm11, %v5042_v25, %v5050_v51  ;;  %vm15898_vm6 = vsmask.f32 5376  ;;  %v13708_v37 = vpop.f32.mrb[251].mxu1  ;;  %vm15900_vm3 = vcmask 257024   ;;  %v4548_v59 = vmax.f32 %v4348_v13, %v4476_v7  ;;  %6543 = vmatmul.mubr.bf16.gmra.mrb[132].mxu0 %v6103_v62  ;;  %v11427_v40 = vld [vmem:[%s15642_s13 + $0xf0] sm:$0xff]  }
 0x3f5   : > { %v5905_v52 = vsel %vm15898_vm6, %v13569_v47, %v13688_v44  ;;  %5059 = vst.msk [vmem:[#allocation3 + $0x78] sm:$0xf] %vm15900_vm3, %v5051_v36  ;;  %v4346_v11 = vld [vmem:[#allocation2 + $0x360] ss:$2 sm:$0xff]  ;;  %v4474_v29 = vld [vmem:[#allocation2 + $0x361] ss:$2 sm:$0xff]  ;;  %v3930_v51 = vpack.c.bf16 %v3860_v57, %v3859_v54  ;;  %v3929_v56 = vpack.c.bf16 %v3858_v48, %v3857_v41 }
 0x3f6   : > { %5966 = vrot.lane.b32.xlu0 %v5905_v52, %s11537_s23  ;;  %v15901_v47 = vrot.slane %v13561_v5, 1  ;;  %vm15902_vm4 = vcmask 1046528   ;;  %v4547_v23 = vmax.f32 %v4346_v11, %v4474_v29  ;;  %v15903_v0 = vrot.slane %v13561_v5, 2  ;;  %v13728_v54 = vld [vmem:[%s15635_s6] ss:$0 sm:$0xff]  ;;  %v13735_v13 = vpop.f32.mrb[252].mxu1  ;;  %v13755_v48 = vpop.permute.xlu1 %5472 }
 0x3f7   : > { %vm15904_vm14 = vcmask 1045504   ;;  %v3707_v38 = vadd.f32 %v13728_v54, %v13628_v2  ;;  %v5064_v25 = vmax.f32 %v4546_v22, %v4548_v59  ;;  %vm15905_vm13 = vcmask 261120   ;;  %v13746_v22 = vpop.f32.mrb[253].mxu1  ;;  %v5953_v29 = vpop.permute.xlu0 %5952 }
 0x3f8   : > { %v5530_v50 = vsel %vm15902_vm4, %v15901_v47, %v5529_v39  ;;  %v5752_v21 = vsel %vm15904_vm14, %v15903_v0, %v5751_v33  ;;  %v6161_v41 = vsel %vm15905_vm13, %v5653_v43, %v13606_v35  ;;  %v4051_v61 = vunpack.c.l.bf16 %v3930_v51  ;;  %vm15906_vm12 = vmmov %vm15905_vm13 }
 0x3f9   : > { %5616 = vrot.lane.b32.xlu1 %v5530_v50, %s11537_s23  ;;  %v4052_v24 = vunpack.c.h.bf16 %v3930_v51  ;;  %v5063_v57 = vmax.f32 %v4545_v15, %v4547_v23  ;;  %v4049_v18 = vunpack.c.l.bf16 %v3929_v56  ;;  %v4050_v36 = vunpack.c.h.bf16 %v3929_v56  ;;  %vm15907_vm6 = vmmov %vm15906_vm12 }
 0x3fa   : > { %v5654_v5 = vrot.slane %v13052_v49, 1  ;;  %v10150_v7 = vpack.c.bf16 %v5064_v25, %v5064_v25  ;;  %4179 = vst.msk [vmem:[#allocation2 + $0x390] sm:$0xff] %vm15906_vm12, %v4051_v61  ;;  %5838 = vrot.lane.b32.xlu0 %v5752_v21, %s15700_s27  ;;  %v3699_v2 = vadd.f32 %v13728_v54, %v13631_v14  ;;  %v3710_v35 = vadd.f32 %v13728_v54, %v13643_v30  ;;  %vm15908_vm1 = vmmov %vm15907_vm6  ;;  %v13757_v30 = vpop.f32.mrb[254].mxu1 }
 0x3fb   : > { %4180 = vst.msk [vmem:[#allocation2 + $0x398] sm:$0xff] %vm15907_vm6, %v4052_v24  ;;  %v3702_v43 = vadd.f32 %v13728_v54, %v13646_v20  ;;  %v10149_v49 = vpack.c.bf16 %v5063_v57, %v5063_v57  ;;  %vm15909_vm3 = vmmov %vm15908_vm1  ;;  %v3863_v15 = vmax.f32 %v3707_v38, 0.0  ;;  %v5655_v52 = vrot.slane %v13045_v17, 2  ;;  %v13759_v51 = vpop.f32.mrb[255].mxu1 }
 0x3fc   : > { %4177 = vst.msk [vmem:[#allocation2 + $0x380] sm:$0xff] %vm15908_vm1, %v4049_v18  ;;  %v13753_v14 = vshll.u32 %v13655_v55, 16  ;;  %v5081_v20 = vshrl.u32 %v10150_v7, 16  ;;  %v5084_v62 = vshll.u32 %v10150_v7, 16  ;;  %v3861_v59 = vmax.f32 %v3699_v2, 0.0  ;;  %v13768_v7 = vpop.permute.xlu1 %5602  ;;  %vm15911_vm4 = vmmov %vm15908_vm1 }
 0x3fd   : > { %4178 = vst.msk [vmem:[#allocation2 + $0x388] sm:$0xff] %vm15909_vm3, %v4050_v36  ;;  %5565 = vrot.lane.b32.xlu1 %v5530_v50, %s15700_s27  ;;  %v3864_v11 = vmax.f32 %v3710_v35, 0.0  ;;  %v5072_v47 = vshrl.u32 %v10149_v49, 16  ;;  %v5075_v23 = vshll.u32 %v10149_v49, 16  ;;  %v3862_v56 = vmax.f32 %v3702_v43, 0.0  ;;  %vm15914_vm12 = vmmov %vm15908_vm1 }
 0x3fe   : > { %v13761_v50 = vor.u32 %v5655_v52, %v5654_v5  ;;  %v5083_v17 = vrot.slane %v5081_v20, 5  ;;  %v5086_v0 = vrot.slane %v5084_v62, 6  ;;  %5787 = vrot.lane.b32.xlu0 %v5752_v21, %s11536_s22  ;;  %v5422_v25 = vrot.slane %v13753_v14, 1  ;;  %v5093_v35 = vld [vmem:[#allocation3 + $0x7c] sm:$0xc]  ;;  %vm15915_vm6 = vmmov %vm15908_vm1 }
 0x3ff   : > { %v3932_v38 = vpack.c.bf16 %v3864_v11, %v3863_v15  ;;  %v5074_v61 = vrot.slane %v5072_v47, 5  ;;  %v5077_v24 = vrot.slane %v5075_v23, 6  ;;  %v3931_v57 = vpack.c.bf16 %v3862_v56, %v3861_v59  ;;  %v11455_v5 = vld [vmem:[#allocation3 + $0x18] sm:$0xff]   ;;  %v13774_v15 = vpop.permute.xlu0 %5824  ;;  %v5097_v52 = vld [vmem:[#allocation3 + $0x84] sm:$0x7] }
 0x400   : > { %v15910_v18 = vrot.slane %v13639_v42, 1  ;;  %v5087_v2 = vor.u32 %v5086_v0, %v5083_v17  ;;  %v13772_v43 = vsel %vm15911_vm4, %v11455_v5, %v13641_v32  ;;  %vm15912_vm14 = vsmask.f32 7424  ;;  %vm15917_vm4 = vmmov %vm15909_vm3  ;;  %v13819_v5 = vpop.permute.xlu1 %5551 }
 0x401   : > { %v4055_v49 = vunpack.c.l.bf16 %v3932_v38  ;;  %v4056_v21 = vunpack.c.h.bf16 %v3932_v38  ;;  %v5078_v20 = vor.u32 %v5077_v24, %v5074_v61  ;;  %v4053_v11 = vunpack.c.l.bf16 %v3931_v57  ;;  %v13794_v38 = vld [vmem:[#allocation3 + $0x70] sm:$0xff]  }
 0x402   : > { %v5418_v36 = vor.u32 %v13653_v1, %v15910_v18  ;;  %v13776_v62 = vld [vmem:[#allocation2 + $0x390] ss:$2 sm:$0xff]  ;;  %v13778_v59 = vld [vmem:[#allocation2 + $0x391] ss:$2 sm:$0xff]  ;;  %v4054_v47 = vunpack.c.h.bf16 %v3931_v57  ;;  %v5089_v56 = vrot.slane %v5087_v2, 4  ;;  %vm15913_vm13 = vcmask 523264  }
 0x403   : > { %v6212_v32 = vsel %vm15913_vm13, %v6161_v41, %v13673_v3  ;;  %4183 = vst.msk [vmem:[#allocation2 + $0x3b0] sm:$0xff] %vm15914_vm12, %v4055_v49  ;;  %vm15916_vm1 = vsmask.f32 6400  ;;  %v13792_v0 = vshrl.u32 %v13655_v55, 16  ;;  %v5079_v61 = vrot.slane %v5078_v20, 4  ;;  %v13821_v49 = vpop.permute.xlu0 %5773 }
 0x404   : > { %v5423_v23 = vsel %vm15912_vm14, %v5418_v36, %v5422_v25  ;;  %4184 = vst.msk [vmem:[#allocation2 + $0x3b8] sm:$0xff] %vm15915_vm6, %v4056_v21  ;;  %v5657_v17 = vsel %vm15916_vm1, %v13633_v6, %v13761_v50  ;;  %v5094_v24 = vsel %vm12628_vm10, %v5078_v20, %v5093_v35  ;;  %v5907_v3 = vrot.slane %v13753_v14, 3  ;;  %vm15918_vm14 = vmmov %vm15909_vm3  ;;  %v4478_v21 = vld [vmem:[#allocation2 + $0x381] ss:$2 sm:$0xff] }
 0x405   : > { %5488 = vrot.lane.b32.xlu1 %v5423_v23, %s11536_s22  ;;  %4181 = vst.msk [vmem:[#allocation2 + $0x3a0] sm:$0xff] %vm15909_vm3, %v4053_v11  ;;  %v3723_v6 = vadd.f32 %v13728_v54, %v13677_v19  ;;  %v5098_v41 = vsel %vm12638_vm8, %v5089_v56, %v5097_v52  ;;  %5095 = vst [vmem:[#allocation3 + $0x7c] sm:$0xc] %v5094_v24  ;;  %v4550_v57 = vmax.f32 %v13776_v62, %v13778_v59  ;;  %vm15920_vm8 = vcmask 785408  }
 0x406   : > { %4182 = vst.msk [vmem:[#allocation2 + $0x3a8] sm:$0xff] %vm15917_vm4, %v4054_v47  ;;  %v13809_v58 = vsel %vm15918_vm14, %v5657_v17, %v13717_v4  ;;  %v5906_v18 = vrot.slane %v13792_v0, 2  ;;  %5099 = vst [vmem:[#allocation3 + $0x84] sm:$0x7] %v5098_v41  ;;  %vm15919_vm10 = vnez %v15734_v60  ;;  %v3715_v19 = vadd.f32 %v13728_v54, %v13684_v26  ;;  %v4350_v4 = vld [vmem:[#allocation2 + $0x380] ss:$2 sm:$0xff] }
 0x407   : > { %v5088_v36 = vsel %vm15919_vm10, %v5079_v61, %v5087_v2  ;;  %v3726_v9 = vadd.f32 %v13728_v54, %v13697_v34  ;;  %v6250_v35 = vsel %vm15920_vm8, %v6212_v32, %v5953_v29  ;;  %vm15921_vm13 = vcmask 257024   ;;  %vm15923_vm6 = vmmov %vm15920_vm8 }
 0x408   : > { %5096 = vst.msk [vmem:[#allocation3 + $0x80] sm:$0xf] %vm15921_vm13, %v5088_v36  ;;  %v13824_v52 = vor.u32 %v5907_v3, %v5906_v18  ;;  %6550 = vmatprep.mubr.bf16.mxu0 %v6250_v35  ;;  %v3718_v60 = vadd.f32 %v13728_v54, %v13708_v37  ;;  %vm15922_vm12 = vcmask 523264   ;;  %v5531_v34 = vrot.slane %v13794_v38, 1  ;;  %v13858_v36 = vpop.permute.xlu0 %5954  ;;  %vm15927_vm10 = vmmov %vm15918_vm14 }
 0x409   : > { %v6067_v26 = vsel %vm15922_vm12, %v13622_v28, %v13514_v8  ;;  %v3867_v29 = vmax.f32 %v3723_v6, 0.0  ;;  %v3868_v2 = vmax.f32 %v3726_v9, 0.0  ;;  %v5753_v62 = vrot.slane %v13794_v38, 2  ;;  %vm15928_vm8 = vmmov %vm15927_vm10 }
 0x40a   : > { %v6106_v20 = vsel %vm15923_vm6, %v6067_v26, %v13573_v16  ;;  %vm15924_vm1 = vsmask.f32 5376  ;;  %v3865_v11 = vmax.f32 %v3715_v19, 0.0  ;;  %v3866_v47 = vmax.f32 %v3718_v60, 0.0  ;;  %vm15929_vm13 = vmmov %vm15928_vm8 }
 0x40b   : > { %v5909_v59 = vsel %vm15924_vm1, %v13688_v44, %v13824_v52  ;;  %6551 = vmatmul.mubr.bf16.gmra.mrb[136].mxu0 %v6106_v20  ;;  %vm15925_vm3 = vcmask 1046528   ;;  %v4549_v28 = vmax.f32 %v4350_v4, %v4478_v21  ;;  %v4356_v37 = vld [vmem:[#allocation2 + $0x3b0] ss:$2 sm:$0xff]  ;;  %v4484_v23 = vld [vmem:[#allocation2 + $0x3b1] ss:$2 sm:$0xff]  ;;  %v3934_v16 = vpack.c.bf16 %v3868_v2, %v3867_v29  ;;  %vm15930_vm12 = vmmov %vm15928_vm8 }
 0x40c   : > { %v5532_v8 = vsel %vm15925_vm3, %v5529_v39, %v5531_v34  ;;  %5968 = vrot.lane.b32.xlu0 %v5909_v59, %s11537_s23  ;;  %v3739_v44 = vadd.f32 %v13728_v54, %v13735_v13  ;;  %v4552_v56 = vmax.f32 %v4356_v37, %v4484_v23  ;;  %v3933_v61 = vpack.c.bf16 %v3866_v47, %v3865_v11  ;;  %v13856_v13 = vpop.permute.xlu1 %5474  ;;  %vm15931_vm6 = vmmov %vm15928_vm8 }
 0x40d   : > { %5618 = vrot.lane.b32.xlu1 %v5532_v8, %s11537_s23  ;;  %v4354_v32 = vld [vmem:[#allocation2 + $0x3a0] ss:$2 sm:$0xff]  ;;  %v4482_v17 = vld [vmem:[#allocation2 + $0x3a1] ss:$2 sm:$0xff]  ;;  %vm15926_vm4 = vcmask 1045504   ;;  %v3731_v24 = vadd.f32 %v13728_v54, %v13746_v22  ;;  %v4059_v6 = vunpack.c.l.bf16 %v3934_v16  ;;  %v4060_v41 = vunpack.c.h.bf16 %v3934_v16 }
 0x40e   : > { %v5754_v39 = vsel %vm15926_vm4, %v5751_v33, %v5753_v62  ;;  %v4551_v3 = vmax.f32 %v4354_v32, %v4482_v17  ;;  %v3742_v18 = vadd.f32 %v13728_v54, %v13757_v30  ;;  %v5101_v19 = vmax.f32 %v4550_v57, %v4552_v56  ;;  %v5130_v32 = vld [vmem:[#allocation3 + $0x84] sm:$0x8]  ;;  %vm15934_vm4 = vmmov %vm15931_vm6 }
 0x40f   : > { %v4057_v9 = vunpack.c.l.bf16 %v3933_v61  ;;  %v4058_v35 = vunpack.c.h.bf16 %v3933_v61  ;;  %v5658_v55 = vrot.slane %v13127_v45, 1  ;;  %4187 = vst.msk [vmem:[#allocation2 + $0x3d0] sm:$0xff] %vm15918_vm14, %v4059_v6  ;;  %v3871_v33 = vmax.f32 %v3739_v44, 0.0  ;;  %vm15935_vm14 = vmmov %vm15934_vm4 }
 0x410   : > { %v5100_v4 = vmax.f32 %v4549_v28, %v4551_v3  ;;  %4188 = vst.msk [vmem:[#allocation2 + $0x3d8] sm:$0xff] %vm15927_vm10, %v4060_v41  ;;  %5840 = vrot.lane.b32.xlu0 %v5754_v39, %s15700_s27  ;;  %v3872_v22 = vmax.f32 %v3742_v18, 0.0  ;;  %v3734_v30 = vadd.f32 %v13728_v54, %v13759_v51  ;;  %v10152_v21 = vpack.c.bf16 %v5101_v19, %v5101_v19  ;;  %v13876_v59 = vpop.permute.xlu1 %5604  ;;  %v13878_v54 = vpop.permute.xlu0 %5826  ;;  %v11373_v28 = vld [vmem:[%s15636_s7 + $0x88] sm:$0xff]  }
 0x411   : > { %5567 = vrot.lane.b32.xlu1 %v5532_v8, %s15700_s27  ;;  %4185 = vst.msk [vmem:[#allocation2 + $0x3c0] sm:$0xff] %vm15928_vm8, %v4057_v9  ;;  %v3869_v45 = vmax.f32 %v3731_v24, 0.0  ;;  %v13870_v57 = vshll.u32 %v13794_v38, 16  ;;  %v13873_v60 = vshrl.u32 %v13794_v38, 16  ;;  %v5659_v20 = vrot.slane %v13124_v63, 2  ;;  %10965 = vmatprep.subr.bf16.mxu0 %v11373_v28 }
 0x412   : > { %4186 = vst.msk [vmem:[#allocation2 + $0x3c8] sm:$0xff] %vm15929_vm13, %v4058_v35  ;;  %v10151_v26 = vpack.c.bf16 %v5100_v4, %v5100_v4  ;;  %v3936_v29 = vpack.c.bf16 %v3872_v22, %v3871_v33  ;;  %v3870_v2 = vmax.f32 %v3734_v30, 0.0  ;;  %v5118_v51 = vshll.u32 %v10152_v21, 16  ;;  %10966 = vmatpush3.bf16.msra.mxu0 %v11373_v28  ;;  %v5134_v4 = vld [vmem:[#allocation3 + $0x8c] sm:$0xf] }
 0x413   : > { %v5122_v11 = vshrl.u32 %v10152_v21, 16  ;;  %v5426_v47 = vor.u32 %v13792_v0, %v5422_v25  ;;  %v5430_v8 = vrot.slane %v13870_v57, 1  ;;  %v5910_v61 = vrot.slane %v13873_v60, 2 }
 0x414   : > { %v5109_v37 = vshll.u32 %v10151_v26, 16  ;;  %v5112_v23 = vshrl.u32 %v10151_v26, 16  ;;  %v4063_v16 = vunpack.c.l.bf16 %v3936_v29  ;;  %v4064_v63 = vunpack.c.h.bf16 %v3936_v29  ;;  %5789 = vrot.lane.b32.xlu0 %v5754_v39, %s11536_s22  ;;  %v13896_v39 = vld [vmem:[#allocation3 + $0x78] sm:$0xff]   ;;  %v13898_v41 = vpop.permute.xlu1 %5553  ;;  %v13907_v30 = vpop.permute.xlu0 %5775 }
 0x415   : > { %v5120_v44 = vrot.slane %v5118_v51, 5  ;;  %v5124_v56 = vrot.slane %v5122_v11, 4  ;;  %v3935_v17 = vpack.c.bf16 %v3870_v2, %v3869_v45  ;;  %v13891_v3 = vor.u32 %v5659_v20, %v5658_v55 }
 0x416   : > { %v5111_v25 = vrot.slane %v5109_v37, 5  ;;  %v5114_v24 = vrot.slane %v5112_v23, 4  ;;  %4191 = vst.msk [vmem:[#allocation2 + $0x3f0] sm:$0xff] %vm15930_vm12, %v4063_v16  ;;  %vm15932_vm1 = vsmask.f32 7424  ;;  %v5911_v35 = vrot.slane %v13870_v57, 3 }
 0x417   : > { %4192 = vst.msk [vmem:[#allocation2 + $0x3f8] sm:$0xff] %vm15931_vm6, %v4064_v63  ;;  %v5431_v6 = vsel %vm15932_vm1, %v5426_v47, %v5430_v8  ;;  %v5125_v18 = vor.u32 %v5124_v56, %v5120_v44  ;;  %v4061_v19 = vunpack.c.l.bf16 %v3935_v17  ;;  %v4062_v9 = vunpack.c.h.bf16 %v3935_v17  ;;  %v4360_v45 = vld [vmem:[#allocation2 + $0x3d0] ss:$2 sm:$0xff]  ;;  %v4488_v2 = vld [vmem:[#allocation2 + $0x3d1] ss:$2 sm:$0xff]  ;;  %vm15941_vm6 = vmmov %vm15934_vm4 }
 0x418   : > { %5490 = vrot.lane.b32.xlu1 %v5431_v6, %s11536_s22  ;;  %v5115_v33 = vor.u32 %v5114_v24, %v5111_v25  ;;  %v5131_v55 = vsel %vm12706_vm0, %v5111_v25, %v5130_v32  ;;  %vm15933_vm3 = vcmask 523264   ;;  %v13911_v26 = vor.u32 %v5911_v35, %v5910_v61  ;;  %v13920_v51 = vpop.permute.xlu1 %5476  ;;  %v15946_v63 = vld [vmem:[#allocation18_spill] sm:$0xff]  ;;  %v15947_v56 = vld [vmem:[#allocation17_spill] sm:$0xff]  ;;  %v5957_v61 = vpop.permute.xlu0 %5956 }
 0x419   : > { %v6214_v22 = vsel %vm15933_vm3, %v13809_v58, %v13774_v15  ;;  %v5126_v21 = vrot.slane %v5125_v18, 4  ;;  %5132 = vst [vmem:[#allocation3 + $0x84] sm:$0x8] %v5131_v55  ;;  %4189 = vst.msk [vmem:[#allocation2 + $0x3e0] sm:$0xff] %vm15934_vm4, %v4061_v19  ;;  %vm15936_vm10 = vcmask 785408   ;;  %v5533_v58 = vrot.slane %v13896_v39, 1 }
 0x41a   : > { %4190 = vst.msk [vmem:[#allocation2 + $0x3e8] sm:$0xff] %vm15935_vm14, %v4062_v9  ;;  %v6253_v29 = vsel %vm15936_vm10, %v6214_v22, %v13858_v36  ;;  %v5116_v31 = vrot.slane %v5115_v33, 4  ;;  %vm15937_vm0 = vmmov %vm15933_vm3  ;;  %v5755_v20 = vrot.slane %v13896_v39, 2  ;;  %vm15938_vm8 = vsmask.f32 6400  ;;  %v13961_v24 = vld [vmem:[#allocation3 + $0x20] sm:$0xff]  }
 0x41b   : > { %6558 = vmatprep.mubr.bf16.mxu0 %v6253_v29  ;;  %v6069_v15 = vsel %vm15937_vm0, %v13772_v43, %v13601_v10  ;;  %v5135_v11 = vsel %vm12721_vm7, %v5126_v21, %v5134_v4  ;;  %v5661_v36 = vsel %vm15938_vm8, %v13761_v50, %v13891_v3  ;;  %vm15939_vm13 = vsmask.f32 5376  ;;  %vm15940_vm12 = vmmov %vm15936_vm10  ;;  %v4358_v28 = vld [vmem:[#allocation2 + $0x3c0] ss:$2 sm:$0xff] }
 0x41c   : > { %v5913_v47 = vsel %vm15939_vm13, %v13824_v52, %v13911_v26  ;;  %v6109_v10 = vsel %vm15940_vm12, %v6069_v15, %v13664_v46  ;;  %5136 = vst [vmem:[#allocation3 + $0x8c] sm:$0xf] %v5135_v11  ;;  %v5121_v43 = vsel %vm12732_vm2, %v5116_v31, %v5120_v44  ;;  %v6167_v12 = vsel %vm15941_vm6, %v5661_v36, %v13821_v49  ;;  %vm15945_vm3 = vmmov %vm15937_vm0  ;;  %v13959_v25 = vpop.permute.xlu1 %5606  ;;  %v5829_v31 = vpop.permute.xlu0 %5828 }
 0x41d   : > { %5970 = vrot.lane.b32.xlu0 %v5913_v47, %s11537_s23  ;;  %6559 = vmatmul.mubr.bf16.gmra.mrb[140].mxu0 %v6109_v10  ;;  %vm15942_vm7 = vcmask 1046528   ;;  %vm15943_vm1 = vcmask 257024   ;;  %v4554_v46 = vmax.f32 %v4360_v45, %v4488_v2  ;;  %vm15944_vm2 = vcmask 1045504   ;;  %vm15948_vm14 = vmmov %vm15936_vm10 }
 0x41e   : > { %v5534_v50 = vsel %vm15942_vm7, %v5531_v34, %v5533_v58  ;;  %5133 = vst.msk [vmem:[#allocation3 + $0x88] sm:$0xf] %vm15943_vm1, %v5121_v43  ;;  %v4364_v52 = vld [vmem:[#allocation2 + $0x3f0] ss:$2 sm:$0xff]  ;;  %v4492_v37 = vld [vmem:[#allocation2 + $0x3f1] ss:$2 sm:$0xff]  ;;  %v5756_v53 = vsel %vm15944_vm2, %v5753_v62, %v5755_v20  ;;  %v6216_v49 = vsel %vm15945_vm3, %v6167_v12, %v13878_v54  ;;  %v6034_v62 = vsel %vm15934_vm4, %v13961_v24, %v13755_v48  ;;  %vm15949_vm10 = vmmov %vm15937_vm0 }
 0x41f   : > { %5620 = vrot.lane.b32.xlu1 %v5534_v50, %s11537_s23  ;;  %v13952_v23 = vshll.u32 %v13896_v39, 16  ;;  %v4486_v34 = vld [vmem:[#allocation2 + $0x3c1] ss:$2 sm:$0xff]  ;;  %v4556_v16 = vmax.f32 %v4364_v52, %v4492_v37  ;;  %v5662_v44 = vrot.slane %v15946_v63, 1  ;;  %v5663_v32 = vrot.slane %v15947_v56, 2  ;;  %vm15950_vm0 = vmmov %vm15940_vm12 }
 0x420   : > { %v13957_v17 = vshrl.u32 %v13896_v39, 16  ;;  %v6256_v18 = vsel %vm15948_vm14, %v6216_v49, %v5957_v61  ;;  %v13971_v33 = vld [vmem:[#allocation3 + $0x80] sm:$0xff]   ;;  %v4553_v55 = vmax.f32 %v4358_v28, %v4486_v34  ;;  %v5434_v48 = vor.u32 %v13873_v60, %v5430_v8  ;;  %v13982_v15 = vpop.permute.xlu1 %5555  ;;  %vm15953_vm12 = vmmov %vm15942_vm7  ;;  %v14015_v34 = vld [vmem:[#allocation3 + $0x28] sm:$0xff]  }
 0x421   : > { %v5438_v54 = vrot.slane %v13952_v23, 1  ;;  %v5915_v6 = vrot.slane %v13952_v23, 3  ;;  %v5138_v19 = vmax.f32 %v4554_v46, %v4556_v16  ;;  %v4362_v9 = vld [vmem:[#allocation2 + $0x3e0] ss:$2 sm:$0xff]  ;;  %v4490_v35 = vld [vmem:[#allocation2 + $0x3e1] ss:$2 sm:$0xff]  ;;  %5842 = vrot.lane.b32.xlu0 %v5756_v53, %s15700_s27  ;;  %6566 = vmatprep.mubr.bf16.mxu0 %v6256_v18  ;;  %v13977_v45 = vor.u32 %v5663_v32, %v5662_v44  ;;  %v14002_v46 = vpop.permute.xlu0 %5777  ;;  %vm15955_vm7 = vmmov %vm15934_vm4 }
 0x422   : > { %v5914_v4 = vrot.slane %v13957_v17, 2  ;;  %v4555_v22 = vmax.f32 %v4362_v9, %v4490_v35  ;;  %v6071_v29 = vsel %vm15949_vm10, %v6034_v62, %v13706_v27  ;;  %v5535_v2 = vrot.slane %v13971_v33, 1  ;;  %vm15956_vm1 = vmmov %vm15934_vm4  ;;  %v5165_v32 = vld [vmem:[#allocation3 + $0x90] sm:$0xf] }
 0x423   : > { %5569 = vrot.lane.b32.xlu1 %v5534_v50, %s15700_s27  ;;  %v10154_v21 = vpack.c.bf16 %v5138_v19, %v5138_v19  ;;  %v6112_v47 = vsel %vm15950_vm0, %v6071_v29, %v13768_v7  ;;  %vm15951_vm8 = vsmask.f32 7424  ;;  %v5757_v43 = vrot.slane %v13971_v33, 2  ;;  %vm15957_vm4 = vmmov %vm15950_vm0 }
 0x424   : > { %v5137_v11 = vmax.f32 %v4553_v55, %v4555_v22  ;;  %v13984_v36 = vor.u32 %v5915_v6, %v5914_v4  ;;  %v5439_v8 = vsel %vm15951_vm8, %v5434_v48, %v5438_v54  ;;  %vm15952_vm13 = vsmask.f32 6400  ;;  %vm15958_vm14 = vmmov %vm15945_vm3 }
 0x425   : > { %v5154_v10 = vshrl.u32 %v10154_v21, 16  ;;  %5791 = vrot.lane.b32.xlu0 %v5756_v53, %s11536_s22  ;;  %6567 = vmatmul.mubr.bf16.gmra.mrb[144].mxu0 %v6112_v47  ;;  %v5157_v12 = vshll.u32 %v10154_v21, 16  ;;  %v5665_v50 = vsel %vm15952_vm13, %v13891_v3, %v13977_v45  ;;  %v5536_v7 = vsel %vm15953_vm12, %v5533_v58, %v5535_v2  ;;  %v14007_v53 = vpop.permute.xlu1 %5478  ;;  %v5959_v6 = vpop.permute.xlu0 %5958  ;;  %v14037_v4 = vld [vmem:[#allocation3 + $0x88] sm:$0xff]   ;;  %vm15961_vm10 = vmmov %vm15950_vm0 }
 0x426   : > { %v10153_v27 = vpack.c.bf16 %v5137_v11, %v5137_v11  ;;  %vm15954_vm6 = vsmask.f32 5376  ;;  %v14010_v49 = vshll.u32 %v13971_v33, 16  ;;  %v14013_v3 = vshrl.u32 %v13971_v33, 16  ;;  %v5169_v11 = vld [vmem:[#allocation3 + $0x98] sm:$0x1] }
 0x427   : > { %5492 = vrot.lane.b32.xlu1 %v5439_v8, %s11536_s22  ;;  %v5156_v28 = vrot.slane %v5154_v10, 7  ;;  %v5917_v37 = vsel %vm15954_vm6, %v13911_v26, %v13984_v36  ;;  %v6036_v58 = vsel %vm15955_vm7, %v14015_v34, %v13856_v13  ;;  %v6170_v16 = vsel %vm15956_vm1, %v5665_v50, %v13907_v30  ;;  %v15964_v10 = vld [vmem:[#allocation19_spill] sm:$0xff]  ;;  %vm15972_vm7 = vmmov %vm15945_vm3 }
 0x428   : > { %v5146_v52 = vshrl.u32 %v10153_v27, 16  ;;  %v5149_v44 = vshll.u32 %v10153_v27, 16  ;;  %v5758_v56 = vsel %vm15944_vm2, %v5755_v20, %v5757_v43  ;;  %v6218_v61 = vsel %vm15945_vm3, %v6170_v16, %v5829_v31 }
 0x429   : > { %5972 = vrot.lane.b32.xlu0 %v5917_v37, %s11537_s23  ;;  %v5159_v26 = vor.u32 %v5157_v12, %v5156_v28  ;;  %v5918_v30 = vrot.slane %v14013_v3, 2  ;;  %v5919_v18 = vrot.slane %v14010_v49, 3  ;;  %v5161_v19 = vrot.slane %v5156_v28, 4  ;;  %v14046_v31 = vpop.permute.xlu1 %5608  ;;  %v5831_v12 = vpop.permute.xlu0 %5830 }
 0x42a   : > { %v5148_v63 = vrot.slane %v5146_v52, 7  ;;  %v5446_v9 = vrot.slane %v14010_v49, 1  ;;  %v6259_v35 = vsel %vm15957_vm4, %v6218_v61, %v5959_v6  ;;  %v6073_v20 = vsel %vm15958_vm14, %v6036_v58, %v13819_v5  ;;  %v15963_v5 = vld [vmem:[#allocation20_spill] sm:$0xff] }
 0x42b   : > { %5622 = vrot.lane.b32.xlu1 %v5536_v7, %s11537_s23  ;;  %6574 = vmatprep.mubr.bf16.mxu0 %v6259_v35  ;;  %v6115_v29 = vsel %vm15961_vm10, %v6073_v20, %v13876_v59  ;;  %vm15962_vm0 = vcmask 257024   ;;  %v5666_v47 = vrot.slane %v15963_v5, 1  ;;  %v5667_v8 = vrot.slane %v15964_v10, 2  ;;  %v15974_v35 = vld [vmem:[#allocation21_spill] sm:$0xff] }
 0x42c   : > { %v5151_v13 = vor.u32 %v5149_v44, %v5148_v63  ;;  %v5152_v62 = vrot.slane %v5148_v63, 4  ;;  %v5442_v27 = vor.u32 %v13957_v17, %v5438_v54  ;;  %v5920_v28 = vor.u32 %v5919_v18, %v5918_v30 }
 0x42d   : > { %5844 = vrot.lane.b32.xlu0 %v5758_v56, %s15700_s27  ;;  %6575 = vmatmul.mubr.bf16.gmra.mrb[148].mxu0 %v6115_v29  ;;  %v14057_v50 = vrot.slane %v14037_v4, 1  ;;  %v5170_v52 = vsel %vm12791_vm9, %v5161_v19, %v5169_v11  ;;  %v14063_v37 = vshll.u32 %v14037_v4, 16  ;;  %v14066_v54 = vshrl.u32 %v14037_v4, 16  ;;  %v14073_v63 = vpop.permute.xlu1 %5557  ;;  %v14075_v44 = vpop.permute.xlu0 %5779  ;;  %vm15968_vm9 = vmmov %vm15953_vm12 }
 0x42e   : > { %v5160_v22 = vsel %vm12811_vm15, %v5152_v62, %v5159_v26  ;;  %v5166_v21 = vsel %vm15798_vm5, %v5151_v13, %v5165_v32  ;;  %vm15965_vm15 = vmmov %vm15951_vm8  ;;  %5171 = vst [vmem:[#allocation3 + $0x98] sm:$0x1] %v5170_v52  ;;  %v14068_v58 = vor.u32 %v5667_v8, %v5666_v47  ;;  %v5759_v26 = vrot.slane %v14037_v4, 2 }
 0x42f   : > { %5571 = vrot.lane.b32.xlu1 %v5536_v7, %s15700_s27  ;;  %5167 = vst [vmem:[#allocation3 + $0x90] sm:$0xf] %v5166_v21  ;;  %5168 = vst.msk [vmem:[#allocation3 + $0x94] sm:$0xf] %vm15962_vm0, %v5160_v22  ;;  %v5447_v59 = vsel %vm15965_vm15, %v5442_v27, %v5446_v9  ;;  %v5922_v32 = vrot.slane %v14066_v54, 2  ;;  %v5923_v61 = vrot.slane %v14063_v37, 3  ;;  %v5450_v48 = vor.u32 %v14013_v3, %v5446_v9 }
 0x430   : > { %vm15967_vm5 = vmmov %vm15954_vm6  ;;  %v5669_v62 = vsel %vm15952_vm13, %v13977_v45, %v14068_v58  ;;  %v5671_v20 = vrot.slane %v15974_v35, 2  ;;  %v5454_v55 = vrot.slane %v14063_v37, 1  ;;  %v5682_v47 = vrot.slane %v13653_v1, 1 }
 0x431   : > { %5793 = vrot.lane.b32.xlu0 %v5758_v56, %s11536_s22  ;;  %v5921_v16 = vsel %vm15967_vm5, %v13984_v36, %v5920_v28  ;;  %v5538_v56 = vsel %vm15968_vm9, %v5535_v2, %v14057_v50  ;;  %v14085_v36 = vld [vmem:[#allocation3 + $0x30] sm:$0xff]   ;;  %vm15969_vm8 = vmmov %vm15956_vm1  ;;  %v5961_v45 = vpop.permute.xlu0 %5960  ;;  %v5683_v10 = vrot.slane %v13639_v42, 2  ;;  %v5686_v1 = vrot.slane %v13792_v0, 1 }
 0x432   : > { %v6038_v13 = vsel %vm15969_vm8, %v14085_v36, %v13920_v51  ;;  %vm15970_vm12 = vmmov %vm15956_vm1  ;;  %v15973_v51 = vld [vmem:[#allocation22_spill] sm:$0xff] }
 0x433   : > { %5494 = vrot.lane.b32.xlu1 %v5447_v59, %s11536_s22  ;;  %v6173_v2 = vsel %vm15970_vm12, %v5669_v62, %v14002_v46  ;;  %vm15971_vm6 = vmmov %vm15944_vm2  ;;  %v5670_v19 = vrot.slane %v15973_v51, 1  ;;  %v14110_v46 = vpop.permute.xlu1 %5480  ;;  %v14137_v52 = vor.u32 %v5683_v10, %v5682_v47  ;;  %v5694_v62 = vrot.slane %v13957_v17, 1 }
 0x434   : > { %v5760_v30 = vsel %vm15971_vm6, %v5757_v43, %v5759_v26  ;;  %v6220_v18 = vsel %vm15972_vm7, %v6173_v2, %v5831_v12  ;;  %v14113_v43 = vor.u32 %v5923_v61, %v5922_v32  ;;  %vm15975_vm1 = vmmov %vm15957_vm4  ;;  %v5458_v12 = vor.u32 %v14066_v54, %v5454_v55 }
 0x435   : > { %5974 = vrot.lane.b32.xlu0 %v5921_v16, %s11537_s23  ;;  %v6262_v21 = vsel %vm15975_vm1, %v6220_v18, %v5961_v45  ;;  %vm15976_vm2 = vmmov %vm15945_vm3  ;;  %v14126_v27 = vor.u32 %v5671_v20, %v5670_v19  ;;  %v5687_v32 = vrot.slane %v13753_v14, 2  ;;  %v5691_v61 = vrot.slane %v13870_v57, 2 }
 0x436   : > { %v14093_v6 = vld [vmem:[#allocation3 + $0x90] ss:$0 sps:$4 sm:$0x11]   ;;  %v6075_v29 = vsel %vm15976_vm2, %v6038_v13, %v13898_v41  ;;  %6582 = vmatprep.mubr.bf16.mxu0 %v6262_v21  ;;  %vm15977_vm3 = vmmov %vm15975_vm1  ;;  %v14150_v13 = vld [vmem:[#allocation3 + $0x98] ss:$0 sps:$4 sm:$0x33]  }
 0x437   : > { %5624 = vrot.lane.b32.xlu1 %v5538_v56, %s11537_s23  ;;  %v14107_v22 = vld [vmem:[#allocation3 + $0x90] sm:$0xff]   ;;  %v6118_v11 = vsel %vm15977_vm3, %v6075_v29, %v13959_v25  ;;  %v5460_v5 = vshll.u32 %v14093_v6, 16  ;;  %vm15978_vm4 = vmmov %vm15965_vm15  ;;  %v5833_v25 = vpop.permute.xlu0 %5832  ;;  %v14139_v16 = vpop.permute.xlu1 %5610  ;;  %v5695_v2 = vrot.slane %v13952_v23, 2  ;;  %v5539_v14 = vrot.slane %v14093_v6, 1  ;;  %v14181_v29 = vld [vmem:[#allocation3 + $0x38] sm:$0xff]  }
 0x438   : > { %6583 = vmatmul.mubr.bf16.gmra.mrb[152].mxu0 %v6118_v11  ;;  %v5455_v9 = vsel %vm15978_vm4, %v5450_v48, %v5454_v55  ;;  %v5590_v8 = vrot.slane %v14107_v22, 1  ;;  %vm15979_vm14 = vmmov %vm15967_vm5  ;;  %v14134_v42 = vrot.slane %v14107_v22, 2  ;;  %v5707_v7 = vshrl.u32 %v14107_v22, 16 }
 0x439   : > { %5846 = vrot.lane.b32.xlu0 %v5760_v30, %s15700_s27  ;;  %v5925_v41 = vsel %vm15979_vm14, %v5920_v28, %v14113_v43  ;;  %v5462_v59 = vrot.slane %v5460_v5, 1  ;;  %v5690_v28 = vrot.slane %v13873_v60, 1  ;;  %vm15980_vm10 = vmmov %vm15968_vm9  ;;  %v5688_v57 = vor.u32 %v5687_v32, %v5686_v1 }
 0x43a   : > { %v5591_v0 = vsel %vm15980_vm10, %v14057_v50, %v5590_v8  ;;  %v5699_v18 = vrot.slane %v14010_v49, 2  ;;  %vm15981_vm0 = vmmov %vm15971_vm6  ;;  %v5696_v17 = vor.u32 %v5695_v2, %v5694_v62  ;;  %v5702_v23 = vrot.slane %v14066_v54, 1 }
 0x43b   : > { %5573 = vrot.lane.b32.xlu1 %v5538_v56, %s15700_s27  ;;  %v5710_v56 = vshll.u32 %v14107_v22, 16  ;;  %v5692_v60 = vor.u32 %v5691_v61, %v5690_v28  ;;  %v5762_v51 = vsel %vm15981_vm0, %v5759_v26, %v14134_v42  ;;  %vm15982_vm15 = vmmov %vm15978_vm4  ;;  %v14164_v35 = vpop.permute.xlu0 %5781  ;;  %v5703_v45 = vrot.slane %v14063_v37, 2  ;;  %v11369_v26 = vld [vmem:[#allocation3 + $0x98] ss:$0 sps:$4 sm:$0x11]   ;;  %v14186_v5 = vpop.permute.xlu1 %5559 }
 0x43c   : > { %v5463_v19 = vsel %vm15982_vm15, %v5458_v12, %v5462_v59  ;;  %vm15983_vm5 = vmmov %vm15952_vm13  ;;  %v5709_v54 = vrot.slane %v5707_v7, 1  ;;  %v5716_v21 = vshrl.u32 %v14150_v13, 16  ;;  %v5719_v10 = vshll.u32 %v14150_v13, 16 }
 0x43d   : > { %5795 = vrot.lane.b32.xlu0 %v5760_v30, %s11536_s22  ;;  %v5698_v30 = vrot.slane %v14013_v3, 1  ;;  %v14166_v3 = vld [vmem:[#allocation3 + $0x98] sm:$0xff]   ;;  %v14170_v6 = vsel %vm15983_vm5, %v14137_v52, %v5688_v57  ;;  %vm15984_vm9 = vmmov %vm15983_vm5  ;;  %v5712_v48 = vrot.slane %v5710_v56, 2  ;;  %v5704_v47 = vor.u32 %v5703_v45, %v5702_v23  ;;  %v16001_v23 = vld [vmem:[#allocation23_spill] sm:$0xff] }
 0x43e   : > { %v14173_v49 = vsel %vm15984_vm9, %v5688_v57, %v5692_v60  ;;  %vm15985_vm8 = vmmov %vm15983_vm5  ;;  %v5718_v1 = vrot.slane %v5716_v21, 1  ;;  %v5814_v59 = vrot.slane %v14166_v3, 2  ;;  %v5721_v28 = vrot.slane %v5719_v10, 2 }
 0x43f   : > { %5496 = vrot.lane.b32.xlu1 %v5455_v9, %s11536_s22  ;;  %v5700_v20 = vor.u32 %v5699_v18, %v5698_v30  ;;  %v14178_v55 = vsel %vm15985_vm8, %v5692_v60, %v5696_v17  ;;  %vm15986_vm13 = vmmov %vm15970_vm12  ;;  %v5713_v12 = vor.u32 %v5712_v48, %v5709_v54  ;;  %v5592_v62 = vrot.slane %v11369_v26, 1  ;;  %v5963_v2 = vpop.permute.xlu0 %5962 }
 0x440   : > { %v6040_v11 = vsel %vm15986_vm13, %v14181_v29, %v14007_v53  ;;  %vm15987_vm12 = vmmov %vm15983_vm5  ;;  %v5927_v53 = vrot.slane %v5710_v56, 3  ;;  %vm15993_vm4 = vcmask 523264   ;;  %v5722_v30 = vor.u32 %v5721_v28, %v5718_v1  ;;  %v14242_v28 = vld [vmem:[#allocation3 + $0x40] sm:$0xff]  }
 0x441   : > { %5976 = vrot.lane.b32.xlu0 %v5925_v41, %s11537_s23  ;;  %v14190_v37 = vsel %vm15987_vm12, %v5696_v17, %v5700_v20  ;;  %vm15988_vm6 = vmmov %vm15983_vm5  ;;  %v5926_v41 = vrot.slane %v5707_v7, 2  ;;  %vm15997_vm15 = vcmask 1045504   ;;  %v5934_v18 = vshll.u32 %v14166_v3, 16 }
 0x442   : > { %v5673_v9 = vsel %vm15988_vm6, %v14068_v58, %v14126_v27  ;;  %vm15989_vm7 = vmmov %vm15983_vm5  ;;  %v5815_v60 = vsel %vm15997_vm15, %v14134_v42, %v5814_v59  ;;  %vm16002_vm8 = vsmask.f32 5376  ;;  %v5763_v54 = vrot.slane %v14150_v13, 2 }
 0x443   : > { %5626 = vrot.lane.b32.xlu1 %v5591_v0, %s11537_s23  ;;  %v14198_v32 = vsel %vm15989_vm7, %v5700_v20, %v5704_v47  ;;  %vm15990_vm1 = vmmov %vm15986_vm13  ;;  %v5675_v20 = vrot.slane %v16001_v23, 2  ;;  %v5936_v21 = vrot.slane %v5934_v18, 3  ;;  %v16013_v18 = vld [vmem:[#allocation26_spill] sm:$0xff] }
 0x444   : > { %v6176_v61 = vsel %vm15990_vm1, %v5673_v9, %v14075_v44  ;;  %vm15991_vm2 = vmmov %vm15980_vm10  ;;  %vm15995_vm10 = vcmask 785408   ;;  %v14263_v23 = vld [vmem:[#allocation3 + $0x48] sm:$0xff]  }
 0x445   : > { %5848 = vrot.lane.b32.xlu0 %v5762_v51, %s15700_s27  ;;  %v5540_v0 = vsel %vm15991_vm2, %v14057_v50, %v5539_v14  ;;  %vm15992_vm3 = vmmov %vm15983_vm5  ;;  %v6222_v7 = vsel %vm15993_vm4, %v6176_v61, %v5833_v25  ;;  %v5931_v50 = vshrl.u32 %v14166_v3, 16  ;;  %v5483_v14 = vpop.permute.xlu1 %5482  ;;  %v5928_v25 = vor.u32 %v5927_v53, %v5926_v41 }
 0x446   : > { %v14206_v58 = vsel %vm15992_vm3, %v5704_v47, %v5713_v12  ;;  %vm15994_vm14 = vmmov %vm15993_vm4  ;;  %v6265_v44 = vsel %vm15995_vm10, %v6222_v7, %v5963_v2  ;;  %v11371_v47 = vld [vmem:[#allocation3 + $0xa0] ss:$0 sps:$4 sm:$0x33]  }
 0x447   : > { %5498 = vrot.lane.b32.xlu1 %v5463_v19, %s11536_s22  ;;  %v6077_v56 = vsel %vm15994_vm14, %v6040_v11, %v13982_v15  ;;  %vm15996_vm0 = vmmov %vm15995_vm10  ;;  %6590 = vmatprep.mubr.bf16.mxu0 %v6265_v44  ;;  %v16000_v19 = vld [vmem:[#allocation24_spill] sm:$0xff]  ;;  %v5929_v45 = vsel %vm16002_vm8, %v14113_v43, %v5928_v25  ;;  %v5933_v48 = vrot.slane %v5931_v50, 2  ;;  %v14232_v11 = vld [vmem:[#allocation3 + $0xa0] ss:$0 sps:$4 sm:$0x77]   ;;  %v5816_v53 = vrot.slane %v11371_v47, 2 }
 0x448   : > { %v6121_v57 = vsel %vm15996_vm0, %v6077_v56, %v14046_v31  ;;  %vm15998_vm5 = vmmov %vm15992_vm3  ;;  %v5835_v31 = vpop.permute.xlu0 %5834  ;;  %v5674_v17 = vrot.slane %v16000_v19, 1  ;;  %v5943_v43 = vshll.u32 %v14232_v11, 16 }
 0x449   : > { %5797 = vrot.lane.b32.xlu0 %v5762_v51, %s11536_s22  ;;  %v14220_v51 = vsel %vm15998_vm5, %v5713_v12, %v5722_v30  ;;  %6591 = vmatmul.mubr.bf16.gmra.mrb[156].mxu0 %v6121_v57  ;;  %vm15999_vm9 = vmmov %vm15991_vm2  ;;  %v5613_v26 = vpop.permute.xlu1 %5612  ;;  %v5937_v41 = vor.u32 %v5936_v21, %v5933_v48  ;;  %v5940_v12 = vshrl.u32 %v14232_v11, 16 }
 0x44a   : > { %v5593_v15 = vsel %vm15999_vm9, %v5590_v8, %v5592_v62  ;;  %v5676_v8 = vor.u32 %v5675_v20, %v5674_v17  ;;  %vm16003_vm13 = vmmov %vm15997_vm15  ;;  %v5945_v62 = vrot.slane %v5943_v43, 3 }
 0x44b   : > { %5575 = vrot.lane.b32.xlu1 %v5540_v0, %s15700_s27  ;;  %v5764_v10 = vsel %vm16003_vm13, %v14134_v42, %v5763_v54  ;;  %vm16004_vm12 = vmmov %vm15992_vm3  ;;  %v5942_v0 = vrot.slane %v5940_v12, 2 }
 0x44c   : > { %v5784_v9 = vpop.permute.xlu0 %5783  ;;  %v5677_v1 = vsel %vm16004_vm12, %v14126_v27, %v5676_v8  ;;  %vm16005_vm6 = vmmov %vm15990_vm1 }
 0x44d   : > { %5850 = vrot.lane.b32.xlu0 %v5815_v60, %s15700_s27  ;;  %v5562_v13 = vpop.permute.xlu1 %5561  ;;  %v6042_v61 = vsel %vm16005_vm6, %v14242_v28, %v14110_v46  ;;  %vm16006_vm7 = vmmov %vm16002_vm8  ;;  %v6179_v7 = vsel %vm15990_vm1, %v5677_v1, %v14164_v35  ;;  %v5946_v50 = vor.u32 %v5945_v62, %v5942_v0 }
 0x44e   : > { %v5938_v42 = vsel %vm16006_vm7, %v5928_v25, %v5937_v41  ;;  %vm16007_vm2 = vmmov %vm15993_vm4 }
 0x44f   : > { %5628 = vrot.lane.b32.xlu1 %v5593_v15, %s11537_s23  ;;  %v6224_v2 = vsel %vm16007_vm2, %v6179_v7, %v5835_v31  ;;  %vm16008_vm3 = vmmov %vm15996_vm0  ;;  %v5678_v15 = vrot.slane %v16013_v18, 1 }
 0x450   : > { %vm16009_vm4 = vmmov %vm16007_vm2 }
 0x451   : > { %5978 = vrot.lane.b32.xlu0 %v5929_v45, %s11537_s23  ;;  %v6079_v30 = vsel %vm16009_vm4, %v6042_v61, %v14073_v63  ;;  %v5485_v44 = vpop.permute.xlu1 %5484  ;;  %vm16010_vm14 = vmmov %vm16003_vm13  ;;  %v16014_v63 = vld [vmem:[#allocation25_spill] sm:$0xff] }
 0x452   : > { %v5817_v46 = vsel %vm16010_vm14, %v5814_v59, %v5816_v53  ;;  %vm16011_vm10 = vmmov %vm15996_vm0  ;;  %v5679_v31 = vrot.slane %v16014_v63, 2  ;;  %v14274_v53 = vld [vmem:[#allocation3 + $0x50] sm:$0xff]  }
 0x453   : > { %v5965_v56 = vpop.permute.xlu0 %5964  ;;  %v6124_v57 = vsel %vm16011_vm10, %v6079_v30, %v14139_v16  ;;  %vm16012_vm0 = vmmov %vm16006_vm7 }
 0x454   : > { %v6268_v27 = vsel %vm16008_vm3, %v6224_v2, %v5965_v56  ;;  %v5947_v35 = vsel %vm16012_vm0, %v5937_v41, %v5946_v50  ;;  %v5680_v19 = vor.u32 %v5679_v31, %v5678_v15  ;;  %vm16015_vm15 = vmmov %vm15990_vm1 }
 0x455   : > { %5799 = vrot.lane.b32.xlu0 %v5764_v10, %s11536_s22  ;;  %6598 = vmatprep.mubr.bf16.mxu0 %v6268_v27  ;;  %v6044_v16 = vsel %vm16015_vm15, %v14263_v23, %v5483_v14  ;;  %vm16016_vm9 = vmmov %vm15990_vm1  ;;  %s15587_s22 = scalar_lea.hbm %s15648_s19, %s10119_s20 }
 0x456   : > { %6599 = vmatmul.mubr.bf16.gmra.mrb[160].mxu0 %v6124_v57  ;;  %v5615_v60 = vpop.permute.xlu1 %5614  ;;  %v5681_v20 = vsel %vm15998_vm5, %v5676_v8, %v5680_v19  ;;  %vm16017_vm8 = vmmov %vm16007_vm2 }
 0x457   : > { %v6182_v45 = vsel %vm16016_vm9, %v5681_v20, %v5784_v9  ;;  %vm16018_vm13 = vmmov %vm16008_vm3 }
 0x458   : > { %v5837_v25 = vpop.permute.xlu0 %5836  ;;  %vm16019_vm12 = vmmov %vm16007_vm2 }
 0x459   : > { %5980 = vrot.lane.b32.xlu0 %v5938_v42, %s11537_s23  ;;  %v6226_v54 = vsel %vm16017_vm8, %v6182_v45, %v5837_v25  ;;  %v6081_v10 = vsel %vm16019_vm12, %v6044_v16, %v14186_v5  ;;  %vm16020_vm6 = vmmov %vm16008_vm3 }
 0x45a   : > { %v5564_v59 = vpop.permute.xlu1 %5563  ;;  %v6127_v41 = vsel %vm16020_vm6, %v6081_v10, %v5613_v26  ;;  %vm16021_vm7 = vmmov %vm15990_vm1 }
 0x45b   : > { %v6046_v9 = vsel %vm16021_vm7, %v14274_v53, %v5485_v44  ;;  %vm16022_vm1 = vmmov %vm15998_vm5 }
 0x45c   : > { %v5786_v17 = vpop.permute.xlu0 %5785  ;;  %v5685_v61 = vsel %vm16022_vm1, %v5680_v19, %v14137_v52  ;;  %vm16023_vm2 = vmmov %vm16021_vm7 }
 0x45d   : > { %5852 = vrot.lane.b32.xlu0 %v5817_v46, %s15700_s27  ;;  %v6185_v42 = vsel %vm16023_vm2, %v5685_v61, %v5786_v17  ;;  %vm16024_vm3 = vmmov %vm16009_vm4  ;;  %v14285_v46 = vld [vmem:[#allocation3 + $0x58] sm:$0xff]   ;;  %v14295_v17 = vld [vmem:[#allocation3 + $0x60] sm:$0xff]   ;;  %s16206_s27 = smov 64  }
 0x45e   : > { %vm16025_vm4 = vmmov %vm16020_vm6 }
 0x45f   : > { %vm16026_vm14 = vmmov %vm16024_vm3 }
 0x460   : > { %v6083_v62 = vsel %vm16026_vm14, %v6046_v9, %v5562_v13  ;;  %vm16027_vm10 = vmmov %vm16025_vm4 }
 0x461   : > { %5982 = vrot.lane.b32.xlu0 %v5947_v35, %s11537_s23  ;;  %v6130_v2 = vsel %vm16027_vm10, %v6083_v62, %v5615_v60  ;;  %vm16028_vm0 = vmmov %vm16023_vm2  ;;  %s9539_s23 = scalar_lea.sflag [#allocation7], %s593_s24 }
 0x462   : > { %vm16029_vm15 = vmmov %vm16028_vm0 }
 0x463   : > { %v5487_v48 = vpop.permute.xlu1 %5486  ;;  %vm16030_vm5 = vmmov %vm16024_vm3 }
 0x464   : > { %v6048_v52 = vsel %vm16028_vm0, %v14285_v46, %v5487_v48  ;;  %vm16031_vm9 = vmmov %vm16025_vm4 }
 0x465   : > { %vm16032_vm8 = vmmov %vm16024_vm3 }
 0x466   : > { %v6085_v60 = vsel %vm16032_vm8, %v6048_v52, %v5564_v59  ;;  %vm16034_vm12 = vmmov %vm16028_vm0 }
 0x467   : > { %vm16035_vm6 = vmmov %vm16028_vm0 }
 0x468   : > { %v5967_v21 = vpop.permute.xlu0 %5966  ;;  %vm16036_vm7 = vmmov %vm16024_vm3 }
 0x469   : > { %v6271_v47 = vsel %vm16018_vm13, %v6226_v54, %v5967_v21  ;;  %vm16033_vm13 = vmmov %vm16025_vm4 }
 0x46a   : > { %6606 = vmatprep.mubr.bf16.mxu0 %v6271_v47  ;;  %vm16037_vm1 = vmmov %vm16025_vm4 }
 0x46b   : > { %6607 = vmatmul.mubr.bf16.gmra.mrb[164].mxu0 %v6127_v41  ;;  %v5617_v12 = vpop.permute.xlu1 %5616  ;;  %vm16038_vm2 = vmmov %vm16024_vm3 }
 0x46c   : > { %v5839_v43 = vpop.permute.xlu0 %5838  ;;  %v6133_v18 = vsel %vm16033_vm13, %v6085_v60, %v5617_v12  ;;  %v14305_v12 = vld [vmem:[#allocation3 + $0x68] sm:$0xff]   ;;  %vm16041_vm14 = vmmov %vm16028_vm0 }
 0x46d   : > { %v6228_v5 = vsel %vm16024_vm3, %v6185_v42, %v5839_v43  ;;  %vm16039_vm3 = vmmov %vm16037_vm1 }
 0x46e   : > { %vm16042_vm10 = vmmov %vm16038_vm2 }
 0x46f   : > { %v5566_v14 = vpop.permute.xlu1 %5565  ;;  %vm16048_vm13 = vmmov %vm16038_vm2 }
 0x470   : > { %v5788_v1 = vpop.permute.xlu0 %5787 }
 0x471   : > { %v6188_v57 = vsel %vm16029_vm15, %v14170_v6, %v5788_v1  ;;  %vm16044_vm15 = vmmov %vm16038_vm2 }
 0x477   : > { %v5489_v8 = vpop.permute.xlu1 %5488 }
 0x478   : > { %v6050_v6 = vsel %vm16034_vm12, %v14295_v17, %v5489_v8 }
 0x479   : > { %v6087_v54 = vsel %vm16038_vm2, %v6050_v6, %v5566_v14 }
 0x47e   : > { %v5969_v0 = vpop.permute.xlu0 %5968 }
 0x47f   : > { %v6274_v26 = vsel %vm16025_vm4, %v6228_v5, %v5969_v0  ;;  %v5619_v7 = vpop.permute.xlu1 %5618  ;;  %vm16040_vm4 = vmmov %vm16028_vm0 }
 0x480   : > { %6614 = vmatprep.mubr.bf16.mxu0 %v6274_v26  ;;  %v6136_v21 = vsel %vm16039_vm3, %v6087_v54, %v5619_v7  ;;  %vm16043_vm0 = vmmov %vm16037_vm1 }
 0x481   : > { %6615 = vmatmul.mubr.bf16.gmra.mrb[168].mxu0 %v6130_v2  ;;  %vm16047_vm8 = vmmov %vm16040_vm4 }
 0x482   : > { %v5841_v56 = vpop.permute.xlu0 %5840  ;;  %vm16049_vm12 = vmmov %vm16043_vm0 }
 0x483   : > { %v5568_v27 = vpop.permute.xlu1 %5567  ;;  %v6230_v50 = vsel %vm16030_vm5, %v6188_v57, %v5841_v56  ;;  %vm16045_vm5 = vmmov %vm16043_vm0 }
 0x486   : > { %v5790_v30 = vpop.permute.xlu0 %5789 }
 0x487   : > { %v6191_v16 = vsel %vm16035_vm6, %v14173_v49, %v5790_v30  ;;  %vm16050_vm6 = vmmov %vm16038_vm2 }
 0x488   : > { %vm16054_vm3 = vmmov %vm16050_vm6 }
 0x48a   : > { %v5491_v44 = vpop.permute.xlu1 %5490 }
 0x48b   : > { %v6052_v49 = vsel %vm16040_vm4, %v14305_v12, %v5491_v44 }
 0x48c   : > { %v6089_v61 = vsel %vm16044_vm15, %v6052_v49, %v5568_v27 }
 0x48f   : > { %v5971_v13 = vpop.permute.xlu0 %5970 }
 0x490   : > { %v6277_v35 = vsel %vm16031_vm9, %v6230_v50, %v5971_v13  ;;  %vm16046_vm9 = vmmov %vm16040_vm4 }
 0x491   : > { %v5621_v25 = vpop.permute.xlu1 %5620  ;;  %6622 = vmatprep.mubr.bf16.mxu0 %v6277_v35 }
 0x492   : > { %6623 = vmatmul.mubr.bf16.gmra.mrb[172].mxu0 %v6133_v18  ;;  %v6139_v42 = vsel %vm16045_vm5, %v6089_v61, %v5621_v25  ;;  %vm16060_vm5 = vmmov %vm16054_vm3 }
 0x493   : > { %v5843_v15 = vpop.permute.xlu0 %5842 }
 0x494   : > { %v6232_v20 = vsel %vm16036_vm7, %v6191_v16, %v5843_v15  ;;  %vm16051_vm7 = vmmov %vm16043_vm0 }
 0x495   : > { %v5570_v63 = vpop.permute.xlu1 %5569 }
 0x497   : > { %v5792_v31 = vpop.permute.xlu0 %5791 }
 0x498   : > { %v6194_v43 = vsel %vm16041_vm14, %v14178_v55, %v5792_v31  ;;  %vm16056_vm14 = vmmov %vm16054_vm3 }
 0x499   : > { %v5493_v19 = vpop.permute.xlu1 %5492 }
 0x49a   : > { %v6054_v62 = vsel %vm16046_vm9, %v13794_v38, %v5493_v19 }
 0x49b   : > { %v5973_v59 = vpop.permute.xlu0 %5972  ;;  %v6091_v27 = vsel %vm16050_vm6, %v6054_v62, %v5570_v63 }
 0x49c   : > { %v6280_v45 = vsel %vm16037_vm1, %v6232_v20, %v5973_v59  ;;  %vm16052_vm1 = vmmov %vm16040_vm4 }
 0x49d   : > { %v5623_v48 = vpop.permute.xlu1 %5622  ;;  %6630 = vmatprep.mubr.bf16.mxu0 %v6280_v45  ;;  %vm16053_vm2 = vmmov %vm16052_vm1 }
 0x49e   : > { %6631 = vmatmul.mubr.bf16.gmra.mrb[176].mxu0 %v6136_v21  ;;  %v6142_v44 = vsel %vm16051_vm7, %v6091_v27, %v5623_v48  ;;  %vm16055_vm4 = vmmov %vm16043_vm0 }
 0x49f   : > { %v5845_v47 = vpop.permute.xlu0 %5844  ;;  %vm16061_vm9 = vmmov %vm16055_vm4 }
 0x4a0   : > { %v6234_v1 = vsel %vm16042_vm10, %v6194_v43, %v5845_v47  ;;  %vm16057_vm10 = vmmov %vm16043_vm0 }
 0x4a1   : > { %v5572_v10 = vpop.permute.xlu1 %5571  ;;  %vm16066_vm7 = vmmov %vm16054_vm3 }
 0x4a3   : > { %v5794_v41 = vpop.permute.xlu0 %5793 }
 0x4a4   : > { %v6197_v55 = vsel %vm16047_vm8, %v14190_v37, %v5794_v41  ;;  %vm16062_vm8 = vmmov %vm16054_vm3 }
 0x4a5   : > { %v5495_v14 = vpop.permute.xlu1 %5494 }
 0x4a6   : > { %v6056_v18 = vsel %vm16052_vm1, %v13896_v39, %v5495_v14  ;;  %v5221_v14 = vld [vmem:[#allocation3 + $0x10] sm:$0x8] }
 0x4a7   : > { %v5975_v8 = vpop.permute.xlu0 %5974  ;;  %v6093_v6 = vsel %vm16056_vm14, %v6056_v18, %v5572_v10 }
 0x4a8   : > { %v6283_v9 = vsel %vm16043_vm0, %v6234_v1, %v5975_v8  ;;  %vm16058_vm0 = vmmov %vm16052_vm1 }
 0x4a9   : > { %6638 = vmatprep.mubr.bf16.mxu0 %v6283_v9  ;;  %v5625_v0 = vpop.permute.xlu1 %5624  ;;  %vm16059_vm15 = vmmov %vm16058_vm0  ;;  %v11466_v9 = vld [vmem:[#allocation3 + $0x14] sm:$0xf] }
 0x4aa   : > { %6639 = vmatmul.mubr.bf16.gmra.mrb[180].mxu0 %v6139_v42  ;;  %v6145_v16 = vsel %vm16057_vm10, %v6093_v6, %v5625_v0  ;;  %v9941_v61 = vcombine.low %v5221_v14, %v11466_v9  ;;  %v11467_v0 = vld [vmem:[#allocation3 + $0x18] sm:$0xff]   ;;  %vm16065_vm6 = vmmov %vm16058_vm0 }
 0x4ab   : > { %v5847_v5 = vpop.permute.xlu0 %5846  ;;  %vm16067_vm1 = vmmov %vm16054_vm3 }
 0x4ac   : > { %v6236_v7 = vsel %vm16048_vm13, %v6197_v55, %v5847_v5  ;;  %vm16063_vm13 = vmmov %vm16055_vm4 }
 0x4ad   : > { %v5574_v56 = vpop.permute.xlu1 %5573  ;;  %vm16071_vm14 = vmmov %vm16058_vm0 }
 0x4af   : > { %v5796_v26 = vpop.permute.xlu0 %5795 }
 0x4b0   : > { %v14323_v57 = vpop.f32.mrb[128].mxu0  ;;  %v6200_v15 = vsel %vm16053_vm2, %v14198_v32, %v5796_v26  ;;  %v5989_v26 = vrot.slane %v11467_v0, 3  ;;  %vm16068_vm2 = vmmov %vm16055_vm4  ;;  %v6015_v0 = vrot.slane %v13971_v33, 3 }
 0x4b1   : > { %v6538_v50 = vpop.f32.mrb[129].mxu0  ;;  %v5497_v38 = vpop.permute.xlu1 %5496 }
 0x4b2   : > { %v14325_v13 = vpop.f32.mrb[130].mxu0  ;;  %v6058_v45 = vsel %vm16058_vm0, %v13971_v33, %v5497_v38  ;;  %v6019_v33 = vrot.slane %v14107_v22, 3 }
 0x4b3   : > { %v5977_v2 = vpop.permute.xlu0 %5976  ;;  %v6541_v35 = vpop.f32.mrb[131].mxu0  ;;  %v6095_v10 = vsel %vm16062_vm8, %v6058_v45, %v5574_v56  ;;  %vm16076_vm8 = vmmov %vm16058_vm0 }
 0x4b4   : > { %v6286_v30 = vsel %vm16049_vm12, %v6236_v7, %v5977_v2  ;;  %vm16064_vm12 = vmmov %vm16058_vm0 }
 0x4b5   : > { %6646 = vmatprep.mubr.bf16.mxu0 %v6286_v30  ;;  %v5627_v25 = vpop.permute.xlu1 %5626  ;;  %v5988_v30 = vrot.slane %v9941_v61, 3 }
 0x4b6   : > { %6647 = vmatmul.mubr.bf16.gmra.mrb[184].mxu0 %v6142_v44  ;;  %v6148_v41 = vsel %vm16063_vm13, %v6095_v10, %v5627_v25  ;;  %v5995_v25 = vrot.slane %v14085_v36, 3 }
 0x4b7   : > { %v5849_v52 = vpop.permute.xlu0 %5848 }
 0x4b8   : > { %v6238_v63 = vsel %vm16054_vm3, %v6200_v15, %v5849_v52  ;;  %vm16069_vm3 = vmmov %vm16068_vm2  ;;  %v5993_v52 = vrot.slane %v14015_v34, 3 }
 0x4b9   : > { %v5499_v20 = vpop.permute.xlu1 %5498 }
 0x4ba   : > { %v6060_v62 = vsel %vm16065_vm6, %v14037_v4, %v5499_v20 }
 0x4bb   : > { %v5798_v37 = vpop.permute.xlu0 %5797 }
 0x4bc   : > { %v6203_v54 = vsel %vm16059_vm15, %v14206_v58, %v5798_v37 }
 0x4bd   : > { %v5576_v21 = vpop.permute.xlu1 %5575 }
 0x4be   : > { %v6097_v2 = vsel %vm16067_vm1, %v6060_v62, %v5576_v21  ;;  %v6009_v21 = vrot.slane %v14305_v12, 3 }
 0x4bf   : > { %v5851_v60 = vpop.permute.xlu0 %5850 }
 0x4c0   : > { %v6240_v32 = vsel %vm16060_vm5, %v6203_v54, %v5851_v60  ;;  %vm16074_vm5 = vmmov %vm16058_vm0 }
 0x4c1   : > { %v5629_v42 = vpop.permute.xlu1 %5628 }
 0x4c2   : > { %v6151_v27 = vsel %vm16069_vm3, %v6097_v2, %v5629_v42 }
 0x4c3   : > { %v5979_v31 = vpop.permute.xlu0 %5978 }
 0x4c4   : > { %v6289_v19 = vsel %vm16055_vm4, %v6238_v63, %v5979_v31  ;;  %vm16070_vm4 = vcmask 1044480   ;;  %v5999_v63 = vrot.slane %v14242_v28, 3  ;;  %v6001_v31 = vrot.slane %v14263_v23, 3  ;;  %v11374_v23 = vld [vmem:[%s15638_s9] sm:$0xff]  }
 0x4c5   : > { %6654 = vmatprep.mubr.bf16.mxu0 %v6289_v19  ;;  %v5990_v44 = vsel %vm16070_vm4, %v5988_v30, %v5989_v26  ;;  %vm16072_vm10 = vmmov %vm16070_vm4  ;;  %11003 = vmatprep.subr.bf16.mxu0 %v11374_v23 }
 0x4c6   : > { %6655 = vmatmul.mubr.bf16.gmra.mrb[188].mxu0 %v6145_v16  ;;  %vm16073_vm15 = vmmov %vm16070_vm4  ;;  %v6003_v16 = vrot.slane %v14274_v53, 3 }
 0x4c7   : > { %v5800_v59 = vpop.permute.xlu0 %5799  ;;  %v14343_v49 = vpop.f32.mrb[132].mxu0  ;;  %vm16077_vm13 = vmmov %vm16070_vm4 }
 0x4c8   : > { %v6546_v43 = vpop.f32.mrb[133].mxu0  ;;  %v6206_v5 = vsel %vm16064_vm12, %v14220_v51, %v5800_v59  ;;  %v5991_v51 = vrot.slane %v13961_v24, 3  ;;  %v5997_v24 = vrot.slane %v14181_v29, 3  ;;  %vm16078_vm12 = vmmov %vm16058_vm0  ;;  %v6005_v59 = vrot.slane %v14285_v46, 3 }
 0x4c9   : > { %v14345_v8 = vpop.f32.mrb[134].mxu0  ;;  %vm16079_vm6 = vmmov %vm16070_vm4  ;;  %v6007_v46 = vrot.slane %v14295_v17, 3  ;;  %v11375_v43 = vld [vmem:[%s15638_s9 + $0x8] sm:$0xff]   ;;  %v6013_v17 = vrot.slane %v13896_v39, 3  ;;  %v6017_v39 = vrot.slane %v14037_v4, 3 }
 0x4ca   : > { %v6549_v58 = vpop.f32.mrb[135].mxu0  ;;  %v5992_v50 = vsel %vm16072_vm10, %v5989_v26, %v5991_v51  ;;  %v5994_v38 = vsel %vm16073_vm15, %v5991_v51, %v5993_v52  ;;  %v5998_v15 = vsel %vm16077_vm13, %v5995_v25, %v5997_v24  ;;  %v6000_v19 = vsel %vm16079_vm6, %v5997_v24, %v5999_v63  ;;  %vm16081_vm1 = vmmov %vm16070_vm4  ;;  %v11376_v26 = vld [vmem:[%s15638_s9 + $0x10] sm:$0xff]  }
 0x4cb   : > { %v5981_v48 = vpop.permute.xlu0 %5980  ;;  %v6002_v36 = vsel %vm16081_vm1, %v5999_v63, %v6001_v31  ;;  %vm16083_vm3 = vmmov %vm16081_vm1  ;;  %v6023_v51 = vrot.slane %v14232_v11, 3  ;;  %v11378_v11 = vld [vmem:[%s15638_s9 + $0x18] sm:$0xff]  }
 0x4cc   : > { %v6292_v47 = vsel %vm16061_vm9, %v6240_v32, %v5981_v48  ;;  %vm16075_vm9 = vmmov %vm16070_vm4  ;;  %v6004_v45 = vsel %vm16083_vm3, %v6001_v31, %v6003_v16 }
 0x4cd   : > { %6662 = vmatprep.mubr.bf16.mxu0 %v6292_v47  ;;  %v5996_v34 = vsel %vm16075_vm9, %v5993_v52, %v5995_v25  ;;  %vm16084_vm4 = vmmov %vm16058_vm0  ;;  %v11377_v52 = vld [vmem:[%s15640_s11] sm:$0xff]  }
 0x4ce   : > { %6663 = vmatmul.mubr.bf16.gmra.mrb[192].mxu0 %v6148_v41  ;;  %vm16086_vm10 = vmmov %vm16058_vm0  ;;  %11047 = vmatprep.subr.bf16.mxu1 %v11377_v52 }
 0x4cf   : > { %v5853_v1 = vpop.permute.xlu0 %5852  ;;  %11048 = vmatpush3.bf16.msra.mxu1 %v11377_v52 }
 0x4d0   : > { %v6242_v55 = vsel %vm16066_vm7, %v6206_v5, %v5853_v1  ;;  %vm16080_vm7 = vmmov %vm16058_vm0  ;;  %v11468_v1 = vld [vmem:[#allocation3 + $0x70] sm:$0xff]  }
 0x4d1   : > { %v6011_v14 = vrot.slane %v11468_v1, 3 }
 0x4d3   : > { %v5983_v7 = vpop.permute.xlu0 %5982 }
 0x4d4   : > { %v6295_v56 = vsel %vm16068_vm2, %v6242_v55, %v5983_v7  ;;  %vm16082_vm2 = vmmov %vm16058_vm0 }
 0x4d5   : > { %6670 = vmatprep.mubr.bf16.mxu0 %v6295_v56  ;;  %vm16088_vm15 = vmmov %vm16082_vm2  ;;  %v6021_v56 = vrot.slane %v14166_v3, 3 }
 0x4d6   : > { %6671 = vmatmul.mubr.bf16.gmra.mrb[196].mxu0 %v6151_v27  ;;  %vm16090_vm9 = vmmov %vm16082_vm2 }
 0x4d7   : > { %10967 = vmatprep.mubr.msk.bf16.mxu0 %vm16071_vm14, %v5990_v44  ;;  %vm16085_vm14 = vmmov %vm16081_vm1 }
 0x4d8   : > { %v6006_v54 = vsel %vm16085_vm14, %v6003_v16, %v6005_v59  ;;  %vm16092_vm13 = vmmov %vm16082_vm2 }
 0x4d9   : > { %vm16094_vm6 = vmmov %vm16082_vm2 }
 0x4de   : > { %10968 = vmatmul.mubr.msk.bf16.vlgmr.msra.gmra.mrb[200].mxu0 %vm16058_vm0, %v5992_v50  ;;  %v14362_v37 = vpop.f32.mrb[136].mxu0  ;;  %vm16087_vm0 = vmmov %vm16081_vm1 }
 0x4df   : > { %10971 = vmatprep.mubr.msk.bf16.mxu0 %vm16074_vm5, %v5994_v38  ;;  %v6554_v35 = vpop.f32.mrb[137].mxu0  ;;  %11004 = vmatpush3.bf16.msra.mxu0 %v11374_v23  ;;  %v6008_v10 = vsel %vm16087_vm0, %v6005_v59, %v6007_v46  ;;  %vm16089_vm5 = vmmov %vm16087_vm0 }
 0x4e0   : > { %v14365_v60 = vpop.f32.mrb[138].mxu0  ;;  %v6010_v41 = vsel %vm16089_vm5, %v6007_v46, %v6009_v21  ;;  %11005 = vmatprep.subr.bf16.mxu0 %v11375_v43  ;;  %vm16096_vm1 = vmmov %vm16082_vm2 }
 0x4e1   : > { %v6557_v18 = vpop.f32.mrb[139].mxu0  ;;  %vm16098_vm3 = vmmov %vm16096_vm1 }
 0x4e2   : > { %vm16100_vm14 = vmmov %vm16096_vm1 }
 0x4e3   : > { %11006 = vmatpush3.bf16.msra.mxu0 %v11375_v43  ;;  %v11381_v43 = vld [vmem:[%s15640_s11 + $0x18] sm:$0xff]  }
 0x4e4   : > { %11007 = vmatprep.subr.bf16.mxu0 %v11376_v26 }
 0x4e6   : > { %10972 = vmatmul.mubr.msk.bf16.gmra.mrb[204].mxu0 %vm16076_vm8, %v5996_v34  ;;  %vm16091_vm8 = vmmov %vm16087_vm0 }
 0x4e7   : > { %10975 = vmatprep.mubr.msk.bf16.mxu0 %vm16078_vm12, %v5998_v15  ;;  %v6012_v61 = vsel %vm16091_vm8, %v6009_v21, %v6011_v14  ;;  %vm16093_vm12 = vmmov %vm16087_vm0  ;;  %11008 = vmatpush3.bf16.msra.mxu0 %v11376_v26 }
 0x4e8   : > { %v6014_v5 = vsel %vm16093_vm12, %v6011_v14, %v6013_v17  ;;  %11009 = vmatprep.subr.bf16.mxu0 %v11378_v11 }
 0x4eb   : > { %11010 = vmatpush3.bf16.msra.mxu0 %v11378_v11 }
 0x4ee   : > { %10976 = vmatmul.mubr.msk.bf16.gmra.mrb[208].mxu0 %vm16080_vm7, %v6000_v19  ;;  %vm16095_vm7 = vmmov %vm16087_vm0 }
 0x4ef   : > { %10979 = vmatprep.mubr.msk.bf16.mxu0 %vm16082_vm2, %v6002_v36  ;;  %v6016_v62 = vsel %vm16095_vm7, %v6013_v17, %v6015_v0  ;;  %vm16097_vm2 = vmmov %vm16087_vm0 }
 0x4f0   : > { %v14379_v29 = vpop.f32.mrb[140].mxu0  ;;  %v6018_v55 = vsel %vm16097_vm2, %v6015_v0, %v6017_v39 }
 0x4f1   : > { %v6562_v6 = vpop.f32.mrb[141].mxu0 }
 0x4f2   : > { %v14382_v20 = vpop.f32.mrb[142].mxu0 }
 0x4f3   : > { %v6565_v28 = vpop.f32.mrb[143].mxu0 }
 0x4f4   : > { %v11379_v28 = vld [vmem:[%s15640_s11 + $0x8] sm:$0xff]  }
 0x4f5   : > { %11049 = vmatprep.subr.bf16.mxu1 %v11379_v28 }
 0x4f6   : > { %10980 = vmatmul.mubr.msk.bf16.gmra.mrb[212].mxu0 %vm16084_vm4, %v6004_v45  ;;  %vm16099_vm4 = vmmov %vm16087_vm0  ;;  %11050 = vmatpush3.bf16.msra.mxu1 %v11379_v28 }
 0x4f7   : > { %10983 = vmatprep.mubr.msk.bf16.mxu0 %vm16086_vm10, %v6006_v54  ;;  %v6020_v27 = vsel %vm16099_vm4, %v6017_v39, %v6019_v33  ;;  %vm16101_vm10 = vmmov %vm16087_vm0 }
 0x4f8   : > { %v14392_v53 = vpop.f32.mrb[144].mxu0  ;;  %v6022_v44 = vsel %vm16101_vm10, %v6019_v33, %v6021_v56  ;;  %vm16102_vm0 = vmmov %vm16096_vm1 }
 0x4f9   : > { %v6570_v32 = vpop.f32.mrb[145].mxu0  ;;  %vm16104_vm5 = vmmov %vm16102_vm0 }
 0x4fa   : > { %v14395_v48 = vpop.f32.mrb[146].mxu0 }
 0x4fb   : > { %v6573_v47 = vpop.f32.mrb[147].mxu0 }
 0x4fe   : > { %10984 = vmatmul.mubr.msk.bf16.gmra.mrb[216].mxu0 %vm16088_vm15, %v6008_v10  ;;  %vm16103_vm15 = vmmov %vm16097_vm2 }
 0x4ff   : > { %10987 = vmatprep.mubr.msk.bf16.mxu0 %vm16090_vm9, %v6010_v41  ;;  %v6024_v22 = vsel %vm16103_vm15, %v6021_v56, %v6023_v51  ;;  %v11380_v41 = vld [vmem:[%s15640_s11 + $0x10] sm:$0xff]   ;;  %vm16105_vm9 = vcmask 523264  }
 0x500   : > { %v14406_v58 = vpop.f32.mrb[148].mxu0  ;;  %11051 = vmatprep.subr.bf16.mxu1 %v11380_v41  ;;  %vm16106_vm8 = vmmov %vm16105_vm9 }
 0x501   : > { %v6578_v12 = vpop.f32.mrb[149].mxu0  ;;  %11052 = vmatpush3.bf16.msra.mxu1 %v11380_v41  ;;  %vm16108_vm12 = vmmov %vm16106_vm8 }
 0x502   : > { %v14408_v9 = vpop.f32.mrb[150].mxu0  ;;  %11053 = vmatprep.subr.bf16.mxu1 %v11381_v43 }
 0x503   : > { %v6581_v42 = vpop.f32.mrb[151].mxu0 }
 0x505   : > { %11054 = vmatpush3.bf16.msra.mxu1 %v11381_v43 }
 0x506   : > { %10988 = vmatmul.mubr.msk.bf16.gmra.mrb[220].mxu0 %vm16092_vm13, %v6012_v61  ;;  %vm16107_vm13 = vmmov %vm16106_vm8 }
 0x507   : > { %10991 = vmatprep.mubr.msk.bf16.mxu0 %vm16094_vm6, %v6014_v5  ;;  %vm16109_vm6 = vmmov %vm16106_vm8 }
 0x508   : > { %vm16110_vm7 = vmmov %vm16109_vm6 }
 0x50b   : > { %v14423_v7 = vpop.f32.mrb[152].mxu0 }
 0x50c   : > { %v6586_v2 = vpop.f32.mrb[153].mxu0 }
 0x50d   : > { %v14426_v4 = vpop.f32.mrb[154].mxu0 }
 0x50e   : > { %10992 = vmatmul.mubr.msk.bf16.gmra.mrb[224].mxu0 %vm16096_vm1, %v6016_v62  ;;  %v6589_v30 = vpop.f32.mrb[155].mxu0  ;;  %vm16111_vm1 = vmmov %vm16109_vm6 }
 0x50f   : > { %10995 = vmatprep.mubr.msk.bf16.mxu0 %vm16098_vm3, %v6018_v55  ;;  %vm16112_vm2 = vmmov %vm16111_vm1 }
 0x510   : > { %vm16113_vm3 = vmmov %vm16111_vm1 }
 0x511   : > { %vm16114_vm4 = vmmov %vm16111_vm1 }
 0x512   : > { %vm16116_vm10 = vmmov %vm16111_vm1 }
 0x516   : > { %10996 = vmatmul.mubr.msk.bf16.gmra.mrb[228].mxu0 %vm16100_vm14, %v6020_v27  ;;  %vm16115_vm14 = vmmov %vm16111_vm1 }
 0x517   : > { %10999 = vmatprep.mubr.msk.bf16.mxu0 %vm16102_vm0, %v6022_v44  ;;  %vm16117_vm0 = vmmov %vm16111_vm1 }
 0x518   : > { %vm16118_vm15 = vmmov %vm16117_vm0 }
 0x51c   : > { %v14439_v3 = vpop.f32.mrb[156].mxu0 }
 0x51d   : > { %v6594_v50 = vpop.f32.mrb[157].mxu0 }
 0x51e   : > { %11000 = vmatmul.mubr.msk.bf16.gmra.mrb[232].mxu0 %vm16104_vm5, %v6024_v22  ;;  %v14441_v38 = vpop.f32.mrb[158].mxu0  ;;  %v14498_v22 = vld [vmem:[%s15637_s8] ss:$0 sm:$0xff]  ;;  %vm16119_vm5 = vmmov %vm16117_vm0 }
 0x51f   : > { %v6597_v35 = vpop.f32.mrb[159].mxu0  ;;  %v6545_v50 = vadd.f32 %v14498_v22, %v14343_v49 }
 0x520   : > { %v6537_v35 = vadd.f32 %v14498_v22, %v14323_v57  ;;  %v6561_v57 = vadd.f32 %v14498_v22, %v14379_v29 }
 0x529   : > { %v14446_v25 = vpop.f32.mrb[160].mxu0 }
 0x52a   : > { %v6602_v18 = vpop.f32.mrb[161].mxu0 }
 0x52b   : > { %v14448_v24 = vpop.f32.mrb[162].mxu0  ;;  %v6548_v18 = vadd.f32 %v14498_v22, %v14345_v8  ;;  %v6553_v8 = vadd.f32 %v14498_v22, %v14362_v37 }
 0x52c   : > { %v6605_v34 = vpop.f32.mrb[163].mxu0 }
 0x53e   : > { %v14450_v15 = vpop.f32.mrb[164].mxu0 }
 0x53f   : > { %v6610_v63 = vpop.f32.mrb[165].mxu0 }
 0x540   : > { %v14452_v31 = vpop.f32.mrb[166].mxu0 }
 0x541   : > { %v6613_v19 = vpop.f32.mrb[167].mxu0 }
 0x542   : > { %v6540_v19 = vadd.f32 %v14498_v22, %v14325_v13  ;;  %v6564_v13 = vadd.f32 %v14498_v22, %v14382_v20  ;;  %v6577_v20 = vadd.f32 %v14498_v22, %v14406_v58 }
 0x554   : > { %v14454_v36 = vpop.f32.mrb[168].mxu0 }
 0x555   : > { %v6618_v6 = vpop.f32.mrb[169].mxu0 }
 0x556   : > { %v14456_v16 = vpop.f32.mrb[170].mxu0 }
 0x557   : > { %v6621_v59 = vpop.f32.mrb[171].mxu0 }
 0x565   : > { %v14461_v23 = vpop.f32.mrb[172].mxu0 }
 0x566   : > { %v6626_v45 = vpop.f32.mrb[173].mxu0 }
 0x567   : > { %v14463_v54 = vpop.f32.mrb[174].mxu0 }
 0x568   : > { %v6629_v32 = vpop.f32.mrb[175].mxu0 }
 0x571   : > { %v14465_v46 = vpop.f32.mrb[176].mxu0 }
 0x572   : > { %v6634_v21 = vpop.f32.mrb[177].mxu0 }
 0x573   : > { %v14467_v47 = vpop.f32.mrb[178].mxu0 }
 0x574   : > { %v6637_v10 = vpop.f32.mrb[179].mxu0 }
 0x57d   : > { %v14475_v1 = vpop.f32.mrb[180].mxu0 }
 0x57e   : > { %v6642_v14 = vpop.f32.mrb[181].mxu0 }
 0x57f   : > { %v14477_v17 = vpop.f32.mrb[182].mxu0 }
 0x580   : > { %v6645_v12 = vpop.f32.mrb[183].mxu0 }
 0x589   : > { %v14479_v61 = vpop.f32.mrb[184].mxu0 }
 0x58a   : > { %v6650_v42 = vpop.f32.mrb[185].mxu0 }
 0x58b   : > { %v14481_v5 = vpop.f32.mrb[186].mxu0 }
 0x58c   : > { %v6653_v0 = vpop.f32.mrb[187].mxu0 }
 0x599   : > { %v14483_v39 = vpop.f32.mrb[188].mxu0 }
 0x59a   : > { %v6658_v26 = vpop.f32.mrb[189].mxu0 }
 0x59b   : > { %v14485_v62 = vpop.f32.mrb[190].mxu0  ;;  %v6556_v26 = vadd.f32 %v14498_v22, %v14365_v60  ;;  %v6569_v60 = vadd.f32 %v14498_v22, %v14392_v53 }
 0x59c   : > { %v6661_v55 = vpop.f32.mrb[191].mxu0 }
 0x5a1   : > { %v14487_v2 = vpop.f32.mrb[192].mxu0 }
 0x5a2   : > { %v6666_v33 = vpop.f32.mrb[193].mxu0 }
 0x5a3   : > { %v14489_v56 = vpop.f32.mrb[194].mxu0 }
 0x5a4   : > { %v6669_v30 = vpop.f32.mrb[195].mxu0 }
 0x5a9   : > { %v14491_v27 = vpop.f32.mrb[196].mxu0 }
 0x5aa   : > { %v6674_v44 = vpop.f32.mrb[197].mxu0 }
 0x5ab   : > { %v14493_v51 = vpop.f32.mrb[198].mxu0 }
 0x5ac   : > { %v6677_v52 = vpop.f32.mrb[199].mxu0 }
 0x5b1   : > { %v10969_v11 = vpop.f32.mrb[200].mxu0 }
 0x5b2   : > { %v6722_v34 = vadd.f32 %v10969_v11, %v6545_v50  ;;  %v6713_v63 = vpop.f32.mrb[201].mxu0 }
 0x5b3   : > { %v6714_v6 = vadd.f32 %v6713_v63, %v6537_v35  ;;  %v10970_v59 = vpop.f32.mrb[202].mxu0  ;;  %v6580_v63 = vadd.f32 %v14498_v22, %v14408_v9  ;;  %v6593_v9 = vadd.f32 %v14498_v22, %v14439_v3 }
 0x5b4   : > { %v6725_v28 = vadd.f32 %v10970_v59, %v6548_v18  ;;  %v6716_v45 = vpop.f32.mrb[203].mxu0  ;;  %v6858_v21 = vmax.f32 %v6722_v34, 0.0  ;;  %v6572_v59 = vadd.f32 %v14498_v22, %v14395_v48  ;;  %v6585_v48 = vadd.f32 %v14498_v22, %v14423_v7 }
 0x5b5   : > { %v6717_v32 = vadd.f32 %v6716_v45, %v6540_v19  ;;  %v6856_v49 = vmax.f32 %v6714_v6, 0.0 }
 0x5b6   : > { %v6859_v10 = vmax.f32 %v6725_v28, 0.0 }
 0x5b7   : > { %v6857_v41 = vmax.f32 %v6717_v32, 0.0 }
 0x5b8   : > { %v6893_v43 = vpack.c.bf16 %v6859_v10, %v6858_v21 }
 0x5b9   : > { %v6892_v14 = vpack.c.bf16 %v6857_v41, %v6856_v49  ;;  %v10973_v12 = vpop.f32.mrb[204].mxu0 }
 0x5ba   : > { %v6738_v42 = vadd.f32 %v10973_v12, %v6561_v57  ;;  %v6729_v0 = vpop.f32.mrb[205].mxu0 }
 0x5bb   : > { %v6730_v55 = vadd.f32 %v6729_v0, %v6553_v8  ;;  %v10974_v33 = vpop.f32.mrb[206].mxu0  ;;  %11011 = vmatprep.mubr.msk.bf16.mxu0 %vm16105_vm9, %v6892_v14  ;;  %v6596_v14 = vadd.f32 %v14498_v22, %v14441_v38  ;;  %v6609_v38 = vadd.f32 %v14498_v22, %v14450_v15  ;;  %vm16120_vm9 = vmmov %vm16117_vm0 }
 0x5bc   : > { %v6741_v30 = vadd.f32 %v10974_v33, %v6564_v13  ;;  %v6732_v29 = vpop.f32.mrb[207].mxu0  ;;  %11012 = vmatmul.mubr.msk.bf16.vlgmr.msra.gmra.mrb[236].mxu0 %vm16106_vm8, %v6893_v43  ;;  %v6862_v37 = vmax.f32 %v6738_v42, 0.0  ;;  %v6588_v42 = vadd.f32 %v14498_v22, %v14426_v4  ;;  %v6601_v4 = vadd.f32 %v14498_v22, %v14446_v25  ;;  %vm16121_vm8 = vmmov %vm16117_vm0 }
 0x5bd   : > { %v6733_v44 = vadd.f32 %v6732_v29, %v6556_v26  ;;  %v6860_v50 = vmax.f32 %v6730_v55, 0.0 }
 0x5be   : > { %v6863_v52 = vmax.f32 %v6741_v30, 0.0 }
 0x5bf   : > { %v6861_v35 = vmax.f32 %v6733_v44, 0.0 }
 0x5c0   : > { %v6895_v11 = vpack.c.bf16 %v6863_v52, %v6862_v37 }
 0x5c1   : > { %v6894_v18 = vpack.c.bf16 %v6861_v35, %v6860_v50  ;;  %v10977_v34 = vpop.f32.mrb[208].mxu0  ;;  %v6612_v35 = vadd.f32 %v14498_v22, %v14452_v31  ;;  %v6625_v31 = vadd.f32 %v14498_v22, %v14461_v23 }
 0x5c2   : > { %v6754_v19 = vadd.f32 %v10977_v34, %v6577_v20  ;;  %v6745_v6 = vpop.f32.mrb[209].mxu0 }
 0x5c3   : > { %v6746_v28 = vadd.f32 %v6745_v6, %v6569_v60  ;;  %v10978_v45 = vpop.f32.mrb[210].mxu0  ;;  %11015 = vmatprep.mubr.msk.bf16.mxu0 %vm16107_vm13, %v6894_v18  ;;  %v6604_v60 = vadd.f32 %v14498_v22, %v14448_v24  ;;  %v6617_v24 = vadd.f32 %v14498_v22, %v14454_v36  ;;  %vm16122_vm13 = vmmov %vm16117_vm0 }
 0x5c4   : > { %v6757_v32 = vadd.f32 %v10978_v45, %v6580_v63  ;;  %v6748_v58 = vpop.f32.mrb[211].mxu0  ;;  %11016 = vmatmul.mubr.msk.bf16.gmra.mrb[240].mxu0 %vm16108_vm12, %v6895_v11  ;;  %v6866_v53 = vmax.f32 %v6754_v19, 0.0  ;;  %vm16123_vm12 = vmmov %vm16117_vm0 }
 0x5c5   : > { %v6749_v21 = vadd.f32 %v6748_v58, %v6572_v59  ;;  %v6864_v49 = vmax.f32 %v6746_v28, 0.0 }
 0x5c6   : > { %v6867_v10 = vmax.f32 %v6757_v32, 0.0 }
 0x5c7   : > { %v6865_v41 = vmax.f32 %v6749_v21, 0.0  ;;  %v6628_v21 = vadd.f32 %v14498_v22, %v14463_v54  ;;  %v6641_v54 = vadd.f32 %v14498_v22, %v14475_v1 }
 0x5c8   : > { %v6897_v57 = vpack.c.bf16 %v6867_v10, %v6866_v53 }
 0x5c9   : > { %v6896_v43 = vpack.c.bf16 %v6865_v41, %v6864_v49  ;;  %v10981_v8 = vpop.f32.mrb[212].mxu0  ;;  %v6620_v49 = vadd.f32 %v14498_v22, %v14456_v16  ;;  %v6633_v16 = vadd.f32 %v14498_v22, %v14465_v46 }
 0x5ca   : > { %v6770_v12 = vadd.f32 %v10981_v8, %v6593_v9  ;;  %v6761_v13 = vpop.f32.mrb[213].mxu0 }
 0x5cb   : > { %v6762_v0 = vadd.f32 %v6761_v13, %v6585_v48  ;;  %v10982_v26 = vpop.f32.mrb[214].mxu0  ;;  %11019 = vmatprep.mubr.msk.bf16.mxu0 %vm16109_vm6, %v6896_v43  ;;  %vm16124_vm6 = vmmov %vm16117_vm0 }
 0x5cc   : > { %v6773_v55 = vadd.f32 %v10982_v26, %v6596_v14  ;;  %v6764_v3 = vpop.f32.mrb[215].mxu0  ;;  %11020 = vmatmul.mubr.msk.bf16.gmra.mrb[244].mxu0 %vm16110_vm7, %v6897_v57  ;;  %v6870_v7 = vmax.f32 %v6770_v12, 0.0  ;;  %vm16125_vm7 = vmmov %vm16117_vm0 }
 0x5cd   : > { %v6765_v33 = vadd.f32 %v6764_v3, %v6588_v42  ;;  %v6868_v29 = vmax.f32 %v6762_v0, 0.0  ;;  %v6644_v0 = vadd.f32 %v14498_v22, %v14477_v17  ;;  %v6636_v3 = vadd.f32 %v14498_v22, %v14467_v47 }
 0x5ce   : > { %v6871_v30 = vmax.f32 %v6773_v55, 0.0  ;;  %v6657_v17 = vadd.f32 %v14498_v22, %v14483_v39  ;;  %v6649_v47 = vadd.f32 %v14498_v22, %v14479_v61 }
 0x5cf   : > { %v6869_v44 = vmax.f32 %v6765_v33, 0.0 }
 0x5d0   : > { %v6899_v37 = vpack.c.bf16 %v6871_v30, %v6870_v7 }
 0x5d1   : > { %v6898_v52 = vpack.c.bf16 %v6869_v44, %v6868_v29  ;;  %v10985_v50 = vpop.f32.mrb[216].mxu0 }
 0x5d2   : > { %v6786_v20 = vadd.f32 %v10985_v50, %v6609_v38  ;;  %v6777_v11 = vpop.f32.mrb[217].mxu0 }
 0x5d3   : > { %v6778_v18 = vadd.f32 %v6777_v11, %v6601_v4  ;;  %v10986_v34 = vpop.f32.mrb[218].mxu0  ;;  %11023 = vmatprep.mubr.msk.bf16.mxu0 %vm16111_vm1, %v6898_v52  ;;  %vm16126_vm1 = vmmov %vm16117_vm0 }
 0x5d4   : > { %v6789_v63 = vadd.f32 %v10986_v34, %v6612_v35  ;;  %v6780_v15 = vpop.f32.mrb[219].mxu0  ;;  %11024 = vmatmul.mubr.msk.bf16.gmra.mrb[248].mxu0 %vm16112_vm2, %v6899_v37  ;;  %v6874_v25 = vmax.f32 %v6786_v20, 0.0  ;;  %v6660_v35 = vadd.f32 %v14498_v22, %v14485_v62  ;;  %v6673_v62 = vadd.f32 %v14498_v22, %v14491_v27  ;;  %vm16127_vm2 = vmmov %vm16117_vm0 }
 0x5d5   : > { %v6781_v19 = vadd.f32 %v6780_v15, %v6604_v60  ;;  %v6872_v59 = vmax.f32 %v6778_v18, 0.0  ;;  %v6652_v60 = vadd.f32 %v14498_v22, %v14481_v5  ;;  %v6665_v5 = vadd.f32 %v14498_v22, %v14487_v2 }
 0x5d6   : > { %v6875_v6 = vmax.f32 %v6789_v63, 0.0 }
 0x5d7   : > { %v6873_v28 = vmax.f32 %v6781_v19, 0.0 }
 0x5d8   : > { %v6901_v45 = vpack.c.bf16 %v6875_v6, %v6874_v25 }
 0x5d9   : > { %v6900_v32 = vpack.c.bf16 %v6873_v28, %v6872_v59  ;;  %v10989_v58 = vpop.f32.mrb[220].mxu0 }
 0x5da   : > { %v6802_v53 = vadd.f32 %v10989_v58, %v6625_v31  ;;  %v6793_v10 = vpop.f32.mrb[221].mxu0  ;;  %v6668_v58 = vadd.f32 %v14498_v22, %v14489_v56  ;;  %v14593_v56 = vld [vmem:[%s15639_s10] ss:$0 sm:$0xff] }
 0x5db   : > { %v6794_v41 = vadd.f32 %v6793_v10, %v6617_v24  ;;  %v10990_v9 = vpop.f32.mrb[222].mxu0  ;;  %11027 = vmatprep.mubr.msk.bf16.mxu0 %vm16113_vm3, %v6900_v32  ;;  %vm16128_vm3 = vmmov %vm16117_vm0 }
 0x5dc   : > { %v6805_v57 = vadd.f32 %v10990_v9, %v6628_v21  ;;  %v6796_v23 = vpop.f32.mrb[223].mxu0  ;;  %11028 = vmatmul.mubr.msk.bf16.gmra.mrb[252].mxu0 %vm16114_vm4, %v6901_v45  ;;  %v6878_v36 = vmax.f32 %v6802_v53, 0.0  ;;  %v6676_v45 = vadd.f32 %v14498_v22, %v14493_v51  ;;  %vm16129_vm4 = vmmov %vm16117_vm0 }
 0x5dd   : > { %v6797_v48 = vadd.f32 %v6796_v23, %v6620_v49  ;;  %v6876_v8 = vmax.f32 %v6794_v41, 0.0 }
 0x5de   : > { %v6879_v43 = vmax.f32 %v6805_v57, 0.0 }
 0x5df   : > { %v6877_v14 = vmax.f32 %v6797_v48, 0.0 }
 0x5e0   : > { %v6903_v12 = vpack.c.bf16 %v6879_v43, %v6878_v36 }
 0x5e1   : > { %v6902_v13 = vpack.c.bf16 %v6877_v14, %v6876_v8  ;;  %v10993_v42 = vpop.f32.mrb[224].mxu0 }
 0x5e2   : > { %v6818_v26 = vadd.f32 %v10993_v42, %v6641_v54  ;;  %v6809_v55 = vpop.f32.mrb[225].mxu0 }
 0x5e3   : > { %v6810_v33 = vadd.f32 %v6809_v55, %v6633_v16  ;;  %v10994_v7 = vpop.f32.mrb[226].mxu0  ;;  %11031 = vmatprep.mubr.msk.bf16.mxu0 %vm16115_vm14, %v6902_v13  ;;  %vm16130_vm14 = vmmov %vm16117_vm0 }
 0x5e4   : > { %v6821_v30 = vadd.f32 %v10994_v7, %v6644_v0  ;;  %v6812_v1 = vpop.f32.mrb[227].mxu0  ;;  %11032 = vmatmul.mubr.msk.bf16.gmra.mrb[0].mxu0 %vm16116_vm10, %v6903_v12  ;;  %v6882_v46 = vmax.f32 %v6818_v26, 0.0  ;;  %vm16131_vm10 = vmmov %vm16117_vm0 }
 0x5e5   : > { %v6813_v29 = vadd.f32 %v6812_v1, %v6636_v3  ;;  %v6880_v38 = vmax.f32 %v6810_v33, 0.0 }
 0x5e6   : > { %v6883_v44 = vmax.f32 %v6821_v30, 0.0 }
 0x5e7   : > { %v6881_v37 = vmax.f32 %v6813_v29, 0.0 }
 0x5e8   : > { %v6905_v4 = vpack.c.bf16 %v6883_v44, %v6882_v46 }
 0x5e9   : > { %v6904_v52 = vpack.c.bf16 %v6881_v37, %v6880_v38  ;;  %v10997_v50 = vpop.f32.mrb[228].mxu0 }
 0x5ea   : > { %v6834_v20 = vadd.f32 %v10997_v50, %v6657_v17  ;;  %v6825_v11 = vpop.f32.mrb[229].mxu0 }
 0x5eb   : > { %v6826_v18 = vadd.f32 %v6825_v11, %v6649_v47  ;;  %v10998_v34 = vpop.f32.mrb[230].mxu0  ;;  %11035 = vmatprep.mubr.msk.bf16.mxu0 %vm16117_vm0, %v6904_v52 }
 0x5ec   : > { %v6837_v63 = vadd.f32 %v10998_v34, %v6660_v35  ;;  %v6828_v39 = vpop.f32.mrb[231].mxu0  ;;  %11036 = vmatmul.mubr.msk.bf16.gmra.mrb[4].mxu0 %vm16118_vm15, %v6905_v4  ;;  %v6886_v61 = vmax.f32 %v6834_v20, 0.0  ;;  %vm16132_vm15 = vmmov %vm16117_vm0 }
 0x5ed   : > { %v6829_v15 = vadd.f32 %v6828_v39, %v6652_v60  ;;  %v6884_v25 = vmax.f32 %v6826_v18, 0.0 }
 0x5ee   : > { %v6887_v19 = vmax.f32 %v6837_v63, 0.0 }
 0x5ef   : > { %v6885_v6 = vmax.f32 %v6829_v15, 0.0 }
 0x5f0   : > { %v6907_v59 = vpack.c.bf16 %v6887_v19, %v6886_v61 }
 0x5f1   : > { %v6906_v28 = vpack.c.bf16 %v6885_v6, %v6884_v25  ;;  %v11001_v31 = vpop.f32.mrb[232].mxu0 }
 0x5f2   : > { %v6850_v24 = vadd.f32 %v11001_v31, %v6673_v62  ;;  %v6841_v32 = vpop.f32.mrb[233].mxu0 }
 0x5f3   : > { %v6842_v21 = vadd.f32 %v6841_v32, %v6665_v5  ;;  %v11002_v53 = vpop.f32.mrb[234].mxu0  ;;  %11039 = vmatprep.mubr.msk.bf16.mxu0 %vm16119_vm5, %v6906_v28  ;;  %vm16133_vm5 = vmmov %vm16117_vm0 }
 0x5f4   : > { %v6853_v10 = vadd.f32 %v11002_v53, %v6676_v45  ;;  %v6844_v27 = vpop.f32.mrb[235].mxu0  ;;  %11040 = vmatmul.mubr.msk.bf16.gmra.mrb[8].mxu0 %vm16120_vm9, %v6907_v59  ;;  %v6890_v2 = vmax.f32 %v6850_v24, 0.0  ;;  %vm16134_vm9 = vmmov %vm16117_vm0 }
 0x5f5   : > { %v6845_v49 = vadd.f32 %v6844_v27, %v6668_v58  ;;  %v6888_v9 = vmax.f32 %v6842_v21, 0.0 }
 0x5f6   : > { %v6891_v41 = vmax.f32 %v6853_v10, 0.0 }
 0x5f7   : > { %v6889_v57 = vmax.f32 %v6845_v49, 0.0 }
 0x5f8   : > { %v6909_v23 = vpack.c.bf16 %v6891_v41, %v6890_v2 }
 0x5f9   : > { %v6908_v51 = vpack.c.bf16 %v6889_v57, %v6888_v9 }
 0x5fb   : > { %11043 = vmatprep.mubr.msk.bf16.mxu0 %vm16121_vm8, %v6908_v51  ;;  %vm16135_vm8 = vmmov %vm16117_vm0 }
 0x5fc   : > { %11044 = vmatmul.mubr.msk.bf16.gmra.mrb[12].mxu0 %vm16122_vm13, %v6909_v23  ;;  %vm16136_vm13 = vmmov %vm16117_vm0 }
 0x68f   : > { %v11013_v22 = vpop.f32.mrb[236].mxu0 }
 0x690   : > { %v7046_v48 = vadd.f32 %v11013_v22, %v14593_v56  ;;  %v7037_v36 = vpop.f32.mrb[237].mxu0 }
 0x691   : > { %v7038_v43 = vadd.f32 %v14593_v56, %v7037_v36  ;;  %v11014_v8 = vpop.f32.mrb[238].mxu0 }
 0x692   : > { %v7049_v14 = vadd.f32 %v11014_v8, %v14593_v56  ;;  %v7040_v54 = vpop.f32.mrb[239].mxu0  ;;  %v7182_v16 = vmax.f32 %v7046_v48, 0.0 }
 0x693   : > { %v7041_v12 = vadd.f32 %v14593_v56, %v7040_v54  ;;  %v7180_v42 = vmax.f32 %v7038_v43, 0.0 }
 0x694   : > { %v7183_v13 = vmax.f32 %v7049_v14, 0.0 }
 0x695   : > { %v7181_v0 = vmax.f32 %v7041_v12, 0.0 }
 0x696   : > { %v7217_v26 = vpack.c.bf16 %v7183_v13, %v7182_v16 }
 0x697   : > { %v7216_v55 = vpack.c.bf16 %v7181_v0, %v7180_v42  ;;  %v11017_v3 = vpop.f32.mrb[240].mxu0 }
 0x698   : > { %v7062_v33 = vadd.f32 %v11017_v3, %v14593_v56  ;;  %v7053_v7 = vpop.f32.mrb[241].mxu0 }
 0x699   : > { %v7054_v30 = vadd.f32 %v14593_v56, %v7053_v7  ;;  %v11018_v1 = vpop.f32.mrb[242].mxu0  ;;  %11055 = vmatprep.mubr.msk.bf16.mxu1 %vm16123_vm12, %v7216_v55  ;;  %vm16137_vm12 = vmmov %vm16117_vm0 }
 0x69a   : > { %v7065_v29 = vadd.f32 %v11018_v1, %v14593_v56  ;;  %v7056_v46 = vpop.f32.mrb[243].mxu0  ;;  %11056 = vmatmul.mubr.msk.bf16.vlgmr.msra.gmra.mrb[0].mxu1 %vm16124_vm6, %v7217_v26  ;;  %v7186_v38 = vmax.f32 %v7062_v33, 0.0  ;;  %vm16138_vm6 = vmmov %vm16117_vm0 }
 0x69b   : > { %v7057_v44 = vadd.f32 %v14593_v56, %v7056_v46  ;;  %v7184_v17 = vmax.f32 %v7054_v30, 0.0 }
 0x69c   : > { %v7187_v37 = vmax.f32 %v7065_v29, 0.0 }
 0x69d   : > { %v7185_v4 = vmax.f32 %v7057_v44, 0.0 }
 0x69e   : > { %v7219_v47 = vpack.c.bf16 %v7187_v37, %v7186_v38 }
 0x69f   : > { %v7218_v52 = vpack.c.bf16 %v7185_v4, %v7184_v17  ;;  %v11021_v50 = vpop.f32.mrb[244].mxu0 }
 0x6a0   : > { %v7078_v35 = vadd.f32 %v11021_v50, %v14593_v56  ;;  %v7069_v20 = vpop.f32.mrb[245].mxu0 }
 0x6a1   : > { %v7070_v11 = vadd.f32 %v14593_v56, %v7069_v20  ;;  %v11022_v60 = vpop.f32.mrb[246].mxu0  ;;  %11059 = vmatprep.mubr.msk.bf16.mxu1 %vm16125_vm7, %v7218_v52  ;;  %vm16139_vm7 = vmmov %vm16117_vm0 }
 0x6a2   : > { %v7081_v18 = vadd.f32 %v11022_v60, %v14593_v56  ;;  %v7072_v34 = vpop.f32.mrb[247].mxu0  ;;  %11060 = vmatmul.mubr.msk.bf16.gmra.mrb[4].mxu1 %vm16126_vm1, %v7219_v47  ;;  %v7190_v39 = vmax.f32 %v7078_v35, 0.0  ;;  %vm7630_vm1 = vcmask 519168  }
 0x6a3   : > { %v7073_v63 = vadd.f32 %v14593_v56, %v7072_v34  ;;  %v7188_v61 = vmax.f32 %v7070_v11, 0.0 }
 0x6a4   : > { %v7191_v15 = vmax.f32 %v7081_v18, 0.0 }
 0x6a5   : > { %v7189_v19 = vmax.f32 %v7073_v63, 0.0 }
 0x6a6   : > { %v7221_v25 = vpack.c.bf16 %v7191_v15, %v7190_v39 }
 0x6a7   : > { %v7220_v6 = vpack.c.bf16 %v7189_v19, %v7188_v61  ;;  %v11025_v62 = vpop.f32.mrb[248].mxu0 }
 0x6a8   : > { %v7094_v59 = vadd.f32 %v11025_v62, %v14593_v56  ;;  %v7085_v5 = vpop.f32.mrb[249].mxu0 }
 0x6a9   : > { %v7086_v28 = vadd.f32 %v14593_v56, %v7085_v5  ;;  %v11026_v31 = vpop.f32.mrb[250].mxu0  ;;  %11063 = vmatprep.mubr.msk.bf16.mxu1 %vm16127_vm2, %v7220_v6  ;;  %vm7644_vm2 = vcmask 518144  }
 0x6aa   : > { %v7097_v45 = vadd.f32 %v11026_v31, %v14593_v56  ;;  %v7088_v24 = vpop.f32.mrb[251].mxu0  ;;  %11064 = vmatmul.mubr.msk.bf16.gmra.mrb[8].mxu1 %vm16128_vm3, %v7221_v25  ;;  %v7194_v58 = vmax.f32 %v7094_v59, 0.0  ;;  %vm16141_vm3 = vmmov %vm16117_vm0 }
 0x6ab   : > { %v7089_v32 = vadd.f32 %v14593_v56, %v7088_v24  ;;  %v7192_v53 = vmax.f32 %v7086_v28, 0.0 }
 0x6ac   : > { %v7195_v21 = vmax.f32 %v7097_v45, 0.0 }
 0x6ad   : > { %v7193_v10 = vmax.f32 %v7089_v32, 0.0 }
 0x6ae   : > { %v7223_v27 = vpack.c.bf16 %v7195_v21, %v7194_v58 }
 0x6af   : > { %v7222_v49 = vpack.c.bf16 %v7193_v10, %v7192_v53  ;;  %v11029_v2 = vpop.f32.mrb[252].mxu0 }
 0x6b0   : > { %v7110_v41 = vadd.f32 %v11029_v2, %v14593_v56  ;;  %v7101_v9 = vpop.f32.mrb[253].mxu0 }
 0x6b1   : > { %v7102_v57 = vadd.f32 %v14593_v56, %v7101_v9  ;;  %v11030_v23 = vpop.f32.mrb[254].mxu0  ;;  %11067 = vmatprep.mubr.msk.bf16.mxu1 %vm16129_vm4, %v7222_v49  ;;  %vm16142_vm4 = vmmov %vm16117_vm0 }
 0x6b2   : > { %v7113_v51 = vadd.f32 %v11030_v23, %v14593_v56  ;;  %v7104_v22 = vpop.f32.mrb[255].mxu0  ;;  %11068 = vmatmul.mubr.msk.bf16.gmra.mrb[12].mxu1 %vm16130_vm14, %v7223_v27  ;;  %v7198_v36 = vmax.f32 %v7110_v41, 0.0  ;;  %vm16143_vm14 = vmmov %vm16117_vm0 }
 0x6b3   : > { %v7105_v48 = vadd.f32 %v14593_v56, %v7104_v22  ;;  %v7196_v8 = vmax.f32 %v7102_v57, 0.0 }
 0x6b4   : > { %v7199_v43 = vmax.f32 %v7113_v51, 0.0 }
 0x6b5   : > { %v7197_v14 = vmax.f32 %v7105_v48, 0.0 }
 0x6b6   : > { %v7225_v54 = vpack.c.bf16 %v7199_v43, %v7198_v36  ;;  %v16140_v36 = vmov 0  }
 0x6b7   : > { %v7224_v12 = vpack.c.bf16 %v7197_v14, %v7196_v8  ;;  %v11033_v16 = vpop.f32.mrb[0].mxu0  ;;  %7642 = vst.msk [vmem:[#allocation5 + $0x2c] sm:$0xf] %vm7630_vm1, %v16140_v36  ;;  %7631 = vst.msk [vmem:[#allocation5] sm:$0xf] %vm7630_vm1, %v16140_v36 }
 0x6b8   : > { %v7126_v13 = vadd.f32 %v11033_v16, %v14593_v56  ;;  %v7117_v42 = vpop.f32.mrb[1].mxu0  ;;  %7632 = vst.msk [vmem:[#allocation5 + $0x4] sm:$0xf] %vm7630_vm1, %v16140_v36  ;;  %7633 = vst.msk [vmem:[#allocation5 + $0x8] sm:$0xf] %vm7630_vm1, %v16140_v36 }
 0x6b9   : > { %v7118_v0 = vadd.f32 %v14593_v56, %v7117_v42  ;;  %v11034_v26 = vpop.f32.mrb[2].mxu0  ;;  %11071 = vmatprep.mubr.msk.bf16.mxu1 %vm16131_vm10, %v7224_v12  ;;  %7634 = vst.msk [vmem:[#allocation5 + $0xc] sm:$0xf] %vm7630_vm1, %v16140_v36  ;;  %7635 = vst.msk [vmem:[#allocation5 + $0x10] sm:$0xf] %vm7630_vm1, %v16140_v36 }
 0x6ba   : > { %v7129_v55 = vadd.f32 %v11034_v26, %v14593_v56  ;;  %v7120_v3 = vpop.f32.mrb[3].mxu0  ;;  %11072 = vmatmul.mubr.msk.bf16.gmra.mrb[16].mxu1 %vm16117_vm0, %v7225_v54  ;;  %v7202_v7 = vmax.f32 %v7126_v13, 0.0  ;;  %7636 = vst.msk [vmem:[#allocation5 + $0x14] sm:$0xf] %vm7630_vm1, %v16140_v36  ;;  %7637 = vst.msk [vmem:[#allocation5 + $0x18] sm:$0xf] %vm7630_vm1, %v16140_v36 }
 0x6bb   : > { %v7121_v33 = vadd.f32 %v14593_v56, %v7120_v3  ;;  %v7200_v1 = vmax.f32 %v7118_v0, 0.0  ;;  %7638 = vst.msk [vmem:[#allocation5 + $0x1c] sm:$0xf] %vm7630_vm1, %v16140_v36  ;;  %7639 = vst.msk [vmem:[#allocation5 + $0x20] sm:$0xf] %vm7630_vm1, %v16140_v36 }
 0x6bc   : > { %v7203_v30 = vmax.f32 %v7129_v55, 0.0  ;;  %7640 = vst.msk [vmem:[#allocation5 + $0x24] sm:$0xf] %vm7630_vm1, %v16140_v36  ;;  %7641 = vst.msk [vmem:[#allocation5 + $0x28] sm:$0xf] %vm7630_vm1, %v16140_v36 }
 0x6bd   : > { %v7201_v29 = vmax.f32 %v7121_v33, 0.0  ;;  %7643 = vst.msk [vmem:[#allocation5 + $0x30] sm:$0xf] %vm7630_vm1, %v16140_v36  ;;  %vm16144_vm10 = vmmov %vm16117_vm0 }
 0x6be   : > { %v7227_v46 = vpack.c.bf16 %v7203_v30, %v7202_v7 }
 0x6bf   : > { %v7226_v44 = vpack.c.bf16 %v7201_v29, %v7200_v1  ;;  %v11037_v38 = vpop.f32.mrb[4].mxu0 }
 0x6c0   : > { %v7142_v37 = vadd.f32 %v11037_v38, %v14593_v56  ;;  %v7133_v17 = vpop.f32.mrb[5].mxu0  ;;  %v11394_v38 = vld [vmem:[%s15642_s13 + $0x40] sm:$0xff]  }
 0x6c1   : > { %v7134_v4 = vadd.f32 %v14593_v56, %v7133_v17  ;;  %v11038_v47 = vpop.f32.mrb[6].mxu0  ;;  %11075 = vmatprep.mubr.msk.bf16.mxu1 %vm16132_vm15, %v7226_v44  ;;  %10434 = vmatprep.subr.bf16.mxu0 %v11394_v38  ;;  %vm16145_vm15 = vmmov %vm16117_vm0 }
 0x6c2   : > { %v7145_v52 = vadd.f32 %v11038_v47, %v14593_v56  ;;  %v7136_v50 = vpop.f32.mrb[7].mxu0  ;;  %11076 = vmatmul.mubr.msk.bf16.gmra.mrb[20].mxu1 %vm16133_vm5, %v7227_v46  ;;  %v7206_v20 = vmax.f32 %v7142_v37, 0.0  ;;  %vm16146_vm5 = vmmov %vm16117_vm0 }
 0x6c3   : > { %v7137_v35 = vadd.f32 %v14593_v56, %v7136_v50  ;;  %v7204_v60 = vmax.f32 %v7134_v4, 0.0 }
 0x6c4   : > { %v7207_v11 = vmax.f32 %v7145_v52, 0.0 }
 0x6c5   : > { %v7205_v18 = vmax.f32 %v7137_v35, 0.0  ;;  %v11395_v35 = vld [vmem:[%s15642_s13] sm:$0xff]  }
 0x6c6   : > { %v7229_v34 = vpack.c.bf16 %v7207_v11, %v7206_v20  ;;  %10435 = vmatpush3.bf16.msra.mxu0 %v11395_v35 }
 0x6c7   : > { %v7228_v63 = vpack.c.bf16 %v7205_v18, %v7204_v60  ;;  %v11041_v39 = vpop.f32.mrb[8].mxu0 }
 0x6c8   : > { %v7158_v15 = vadd.f32 %v11041_v39, %v14593_v56  ;;  %v7149_v61 = vpop.f32.mrb[9].mxu0  ;;  %v11398_v39 = vld [vmem:[%s15642_s13 + $0x48] sm:$0xff]  }
 0x6c9   : > { %v7150_v19 = vadd.f32 %v14593_v56, %v7149_v61  ;;  %v11042_v25 = vpop.f32.mrb[10].mxu0  ;;  %11079 = vmatprep.mubr.msk.bf16.mxu1 %vm16134_vm9, %v7228_v63  ;;  %v11400_v61 = vld [vmem:[%s15642_s13 + $0x50] sm:$0xff]   ;;  %10436 = vmatprep.subr.bf16.mxu0 %v11398_v39  ;;  %vm16147_vm9 = vmmov %vm16117_vm0 }
 0x6ca   : > { %v7161_v6 = vadd.f32 %v11042_v25, %v14593_v56  ;;  %v7152_v62 = vpop.f32.mrb[11].mxu0  ;;  %11080 = vmatmul.mubr.msk.bf16.gmra.mrb[24].mxu1 %vm16135_vm8, %v7229_v34  ;;  %v7210_v5 = vmax.f32 %v7158_v15, 0.0  ;;  %v11399_v15 = vld [vmem:[%s15642_s13 + $0x8] sm:$0xff]   ;;  %vm16148_vm8 = vmmov %vm16117_vm0 }
 0x6cb   : > { %v7153_v59 = vadd.f32 %v14593_v56, %v7152_v62  ;;  %v7208_v31 = vmax.f32 %v7150_v19, 0.0  ;;  %10437 = vmatpush3.bf16.msra.mxu0 %v11399_v15  ;;  %v11412_v15 = vld [vmem:[%s15642_s13 + $0x70] sm:$0xff]  }
 0x6cc   : > { %v7211_v28 = vmax.f32 %v7161_v6, 0.0  ;;  %10438 = vmatprep.subr.bf16.mxu0 %v11400_v61 }
 0x6cd   : > { %v7209_v45 = vmax.f32 %v7153_v59, 0.0 }
 0x6ce   : > { %v7231_v24 = vpack.c.bf16 %v7211_v28, %v7210_v5  ;;  %v11404_v28 = vld [vmem:[%s15642_s13 + $0xc0] sm:$0xff]  }
 0x6cf   : > { %v7230_v32 = vpack.c.bf16 %v7209_v45, %v7208_v31  ;;  %v11045_v58 = vpop.f32.mrb[12].mxu0  ;;  %v11406_v31 = vld [vmem:[%s15642_s13 + $0x80] sm:$0xff]   ;;  %10480 = vmatprep.subr.bf16.mxu1 %v11404_v28 }
 0x6d0   : > { %v7174_v21 = vadd.f32 %v11045_v58, %v14593_v56  ;;  %v7165_v53 = vpop.f32.mrb[13].mxu0  ;;  %10481 = vmatpush3.bf16.msra.mxu1 %v11406_v31 }
 0x6d1   : > { %v7166_v10 = vadd.f32 %v14593_v56, %v7165_v53  ;;  %v11046_v27 = vpop.f32.mrb[14].mxu0  ;;  %11083 = vmatprep.mubr.msk.bf16.mxu1 %vm16136_vm13, %v7230_v32  ;;  %vm16149_vm13 = vmmov %vm16117_vm0 }
 0x6d2   : > { %v7177_v49 = vadd.f32 %v11046_v27, %v14593_v56  ;;  %v7168_v2 = vpop.f32.mrb[15].mxu0  ;;  %11084 = vmatmul.mubr.msk.bf16.gmra.mrb[28].mxu1 %vm16137_vm12, %v7231_v24  ;;  %v7214_v9 = vmax.f32 %v7174_v21, 0.0  ;;  %v11401_v21 = vld [vmem:[%s15642_s13 + $0x10] sm:$0xff]   ;;  %v11402_v27 = vld [vmem:[%s15642_s13 + $0x58] sm:$0xff]   ;;  %vm16150_vm12 = vmmov %vm16117_vm0 }
 0x6d3   : > { %v7169_v41 = vadd.f32 %v14593_v56, %v7168_v2  ;;  %v7212_v23 = vmax.f32 %v7166_v10, 0.0  ;;  %v14678_v56 = vld [vmem:[%s15641_s12] ss:$0 sm:$0xff]  ;;  %v11408_v2 = vld [vmem:[%s15642_s13 + $0xc8] sm:$0xff]   ;;  %10439 = vmatpush3.bf16.msra.mxu0 %v11401_v21 }
 0x6d4   : > { %v7215_v57 = vmax.f32 %v7177_v49, 0.0  ;;  %10482 = vmatprep.subr.bf16.mxu1 %v11408_v2  ;;  %10440 = vmatprep.subr.bf16.mxu0 %v11402_v27 }
 0x6d5   : > { %v7213_v51 = vmax.f32 %v7169_v41, 0.0 }
 0x6d6   : > { %v7233_v22 = vpack.c.bf16 %v7215_v57, %v7214_v9  ;;  %v11410_v57 = vld [vmem:[%s15642_s13 + $0x88] sm:$0xff]  }
 0x6d7   : > { %v7232_v48 = vpack.c.bf16 %v7213_v51, %v7212_v23  ;;  %10483 = vmatpush3.bf16.msra.mxu1 %v11410_v57 }
 0x6d9   : > { %11087 = vmatprep.mubr.msk.bf16.mxu1 %vm16138_vm6, %v7232_v48  ;;  %vm16151_vm6 = vmmov %vm16117_vm0 }
 0x6da   : > { %11088 = vmatmul.mubr.msk.bf16.gmra.mrb[32].mxu1 %vm16139_vm7, %v7233_v22  ;;  %v11403_v22 = vld [vmem:[%s15642_s13 + $0x18] sm:$0xff]   ;;  %vm16152_vm7 = vcmask 1046528  }
 0x6db   : > { %10441 = vmatpush3.bf16.msra.mxu0 %v11403_v22 }
 0x76d   : > { %v11057_v43 = vpop.f32.mrb[0].mxu1 }
 0x76e   : > { %v7370_v8 = vadd.f32 %v11057_v43, %v14678_v56  ;;  %v7361_v14 = vpop.f32.mrb[1].mxu1 }
 0x76f   : > { %v7362_v54 = vadd.f32 %v14678_v56, %v7361_v14  ;;  %v11058_v12 = vpop.f32.mrb[2].mxu1 }
 0x770   : > { %v7373_v16 = vadd.f32 %v11058_v12, %v14678_v56  ;;  %v7364_v13 = vpop.f32.mrb[3].mxu1  ;;  %v7506_v0 = vmax.f32 %v7370_v8, 0.0  ;;  %v11405_v8 = vld [vmem:[%s15642_s13 + $0x60] sm:$0xff]  }
 0x771   : > { %v7365_v42 = vadd.f32 %v14678_v56, %v7364_v13  ;;  %v7504_v55 = vmax.f32 %v7362_v54, 0.0  ;;  %10442 = vmatprep.subr.bf16.mxu0 %v11405_v8 }
 0x772   : > { %v7507_v26 = vmax.f32 %v7373_v16, 0.0 }
 0x773   : > { %v7505_v3 = vmax.f32 %v7365_v42, 0.0 }
 0x774   : > { %v7541_v33 = vpack.c.bf16 %v7507_v26, %v7506_v0 }
 0x775   : > { %v7540_v7 = vpack.c.bf16 %v7505_v3, %v7504_v55  ;;  %v11061_v30 = vpop.f32.mrb[4].mxu1 }
 0x776   : > { %v7560_v1 = vunpack.c.l.bf16 %v7541_v33  ;;  %v7561_v29 = vunpack.c.h.bf16 %v7541_v33  ;;  %v7386_v46 = vadd.f32 %v11061_v30, %v14678_v56  ;;  %v7377_v44 = vpop.f32.mrb[5].mxu1 }
 0x777   : > { %v7558_v37 = vunpack.c.l.bf16 %v7540_v7  ;;  %v7559_v17 = vunpack.c.h.bf16 %v7540_v7  ;;  %v7378_v4 = vadd.f32 %v14678_v56, %v7377_v44  ;;  %v11062_v47 = vpop.f32.mrb[6].mxu1  ;;  %v11407_v7 = vld [vmem:[%s15642_s13 + $0x20] sm:$0xff]   ;;  %v11409_v44 = vld [vmem:[%s15642_s13 + $0x68] sm:$0xff]  }
 0x778   : > { %7596 = vst.msk [vmem:[#allocation4 + $0x10] sm:$0xff] %vm16141_vm3, %v7560_v1  ;;  %v7389_v52 = vadd.f32 %v11062_v47, %v14678_v56  ;;  %v7380_v50 = vpop.f32.mrb[7].mxu1  ;;  %v7510_v11 = vmax.f32 %v7386_v46, 0.0  ;;  %10443 = vmatpush3.bf16.msra.mxu0 %v11407_v7  ;;  %vm16153_vm3 = vmmov %vm16117_vm0 }
 0x779   : > { %7597 = vst.msk [vmem:[#allocation4 + $0x18] sm:$0xff] %vm16142_vm4, %v7561_v29  ;;  %v7381_v20 = vadd.f32 %v14678_v56, %v7380_v50  ;;  %v7508_v18 = vmax.f32 %v7378_v4, 0.0  ;;  %10444 = vmatprep.subr.bf16.mxu0 %v11409_v44  ;;  %vm16154_vm4 = vmmov %vm16117_vm0 }
 0x77a   : > { %7594 = vst.msk [vmem:[#allocation4] sm:$0xff] %vm16143_vm14, %v7558_v37  ;;  %v7511_v60 = vmax.f32 %v7389_v52, 0.0  ;;  %vm16155_vm14 = vmmov %vm16117_vm0 }
 0x77b   : > { %7595 = vst.msk [vmem:[#allocation4 + $0x8] sm:$0xff] %vm16144_vm10, %v7559_v17  ;;  %v7509_v34 = vmax.f32 %v7381_v20, 0.0  ;;  %vm16156_vm10 = vmmov %vm16117_vm0 }
 0x77c   : > { %v7543_v63 = vpack.c.bf16 %v7511_v60, %v7510_v11  ;;  %v11411_v60 = vld [vmem:[%s15642_s13 + $0x28] sm:$0xff]  }
 0x77d   : > { %v7542_v19 = vpack.c.bf16 %v7509_v34, %v7508_v18  ;;  %v11065_v25 = vpop.f32.mrb[8].mxu1  ;;  %10445 = vmatpush3.bf16.msra.mxu0 %v11411_v60 }
 0x77e   : > { %v7564_v6 = vunpack.c.l.bf16 %v7543_v63  ;;  %v7565_v62 = vunpack.c.h.bf16 %v7543_v63  ;;  %v7402_v59 = vadd.f32 %v11065_v25, %v14678_v56  ;;  %v7393_v5 = vpop.f32.mrb[9].mxu1  ;;  %10446 = vmatprep.subr.bf16.mxu0 %v11412_v15 }
 0x77f   : > { %v7562_v45 = vunpack.c.l.bf16 %v7542_v19  ;;  %v7563_v24 = vunpack.c.h.bf16 %v7542_v19  ;;  %v7394_v32 = vadd.f32 %v14678_v56, %v7393_v5  ;;  %v11066_v58 = vpop.f32.mrb[10].mxu1 }
 0x780   : > { %7600 = vst.msk [vmem:[#allocation4 + $0x30] sm:$0xff] %vm16117_vm0, %v7564_v6  ;;  %v7405_v53 = vadd.f32 %v11066_v58, %v14678_v56  ;;  %v7396_v10 = vpop.f32.mrb[11].mxu1  ;;  %v7514_v41 = vmax.f32 %v7402_v59, 0.0  ;;  %v7648_v48 = vld [vmem:[#allocation4 + $0x10] ss:$2 sm:$0xff]  ;;  %vm7758_vm0 = vcmask 519169  }
 0x781   : > { %7601 = vst.msk [vmem:[#allocation4 + $0x38] sm:$0xff] %vm16145_vm15, %v7565_v62  ;;  %v7397_v49 = vadd.f32 %v14678_v56, %v7396_v10  ;;  %v7512_v23 = vmax.f32 %v7394_v32, 0.0  ;;  %v7684_v36 = vld [vmem:[#allocation4 + $0x11] ss:$2 sm:$0xff]  ;;  %v11413_v10 = vld [vmem:[%s15642_s13 + $0x30] sm:$0xff]   ;;  %vm7763_vm15 = vcmask 517120  }
 0x782   : > { %7598 = vst.msk [vmem:[#allocation4 + $0x20] sm:$0xff] %vm16146_vm5, %v7562_v45  ;;  %v7515_v9 = vmax.f32 %v7405_v53, 0.0  ;;  %v7718_v0 = vmax.f32 %v7648_v48, %v7684_v36  ;;  %v7646_v38 = vld [vmem:[#allocation4] ss:$2 sm:$0xff]  ;;  %v7682_v37 = vld [vmem:[#allocation4 + $0x1] ss:$2 sm:$0xff]  ;;  %10447 = vmatpush3.bf16.msra.mxu0 %v11413_v10  ;;  %vm16157_vm5 = vmmov %vm16152_vm7 }
 0x783   : > { %7599 = vst.msk [vmem:[#allocation4 + $0x28] sm:$0xff] %vm16147_vm9, %v7563_v24  ;;  %v7513_v51 = vmax.f32 %v7397_v49, 0.0  ;;  %v7717_v18 = vmax.f32 %v7646_v38, %v7682_v37  ;;  %vm16158_vm9 = vmmov %vm16153_vm3 }
 0x784   : > { %v7545_v43 = vpack.c.bf16 %v7515_v9, %v7514_v41  ;;  %v7738_v50 = vrot.slane %v7718_v0, 1 }
 0x785   : > { %v7544_v14 = vpack.c.bf16 %v7513_v51, %v7512_v23  ;;  %v11069_v54 = vpop.f32.mrb[12].mxu1 }
 0x786   : > { %v7568_v12 = vunpack.c.l.bf16 %v7545_v43  ;;  %v7569_v16 = vunpack.c.h.bf16 %v7545_v43  ;;  %v7418_v13 = vadd.f32 %v11069_v54, %v14678_v56  ;;  %v7409_v42 = vpop.f32.mrb[13].mxu1 }
 0x787   : > { %v7566_v26 = vunpack.c.l.bf16 %v7544_v14  ;;  %v7567_v55 = vunpack.c.h.bf16 %v7544_v14  ;;  %v7410_v3 = vadd.f32 %v14678_v56, %v7409_v42  ;;  %v11070_v33 = vpop.f32.mrb[14].mxu1 }
 0x788   : > { %7604 = vst.msk [vmem:[#allocation4 + $0x50] sm:$0xff] %vm16148_vm8, %v7568_v12  ;;  %v7421_v29 = vadd.f32 %v11070_v33, %v14678_v56  ;;  %v7412_v46 = vpop.f32.mrb[15].mxu1  ;;  %v7518_v47 = vmax.f32 %v7418_v13, 0.0  ;;  %v7652_v34 = vld [vmem:[#allocation4 + $0x30] ss:$2 sm:$0xff]  ;;  %vm16159_vm8 = vmmov %vm16153_vm3 }
 0x789   : > { %7605 = vst.msk [vmem:[#allocation4 + $0x58] sm:$0xff] %vm16149_vm13, %v7569_v16  ;;  %v7413_v4 = vadd.f32 %v14678_v56, %v7412_v46  ;;  %v7516_v20 = vmax.f32 %v7410_v3, 0.0  ;;  %v7688_v63 = vld [vmem:[#allocation4 + $0x31] ss:$2 sm:$0xff]  ;;  %vm16160_vm13 = vmmov %vm16153_vm3 }
 0x78a   : > { %v7650_v30 = vld [vmem:[#allocation4 + $0x20] ss:$2 sm:$0xff]  ;;  %v7686_v1 = vld [vmem:[#allocation4 + $0x21] ss:$2 sm:$0xff]  ;;  %7602 = vst.msk [vmem:[#allocation4 + $0x40] sm:$0xff] %vm16150_vm12, %v7566_v26  ;;  %v7519_v52 = vmax.f32 %v7421_v29, 0.0  ;;  %v7720_v31 = vmax.f32 %v7652_v34, %v7688_v63  ;;  %vm16161_vm12 = vmmov %vm16153_vm3 }
 0x78b   : > { %v14750_v17 = vmax.f32 %v7650_v30, %v7686_v1  ;;  %7603 = vst.msk [vmem:[#allocation4 + $0x48] sm:$0xff] %vm16151_vm6, %v7567_v55  ;;  %v7517_v11 = vmax.f32 %v7413_v4, 0.0  ;;  %vm16162_vm6 = vsmask.f32 7942 }
 0x78c   : > { %v7547_v39 = vpack.c.bf16 %v7519_v52, %v7518_v47  ;;  %v7770_v8 = vrot.slane %v7720_v31, 1 }
 0x78d   : > { %v7739_v35 = vrot.slane %v14750_v17, 1  ;;  %v7546_v19 = vpack.c.bf16 %v7517_v11, %v7516_v20  ;;  %v11073_v25 = vpop.f32.mrb[16].mxu1 }
 0x78e   : > { %v7572_v62 = vunpack.c.l.bf16 %v7547_v39  ;;  %v7573_v59 = vunpack.c.h.bf16 %v7547_v39  ;;  %v7434_v5 = vadd.f32 %v11073_v25, %v14678_v56  ;;  %v7425_v28 = vpop.f32.mrb[17].mxu1  ;;  %v7760_v25 = vld [vmem:[#allocation5 + $0x4] sm:$0xe] }
 0x78f   : > { %v7740_v61 = vsel %vm16152_vm7, %v7738_v50, %v7739_v35  ;;  %v7570_v32 = vunpack.c.l.bf16 %v7546_v19  ;;  %v7571_v58 = vunpack.c.h.bf16 %v7546_v19  ;;  %v7426_v21 = vadd.f32 %v14678_v56, %v7425_v28  ;;  %v11074_v53 = vpop.f32.mrb[18].mxu1  ;;  %vm14797_vm7 = vmand %vm7758_vm0, %vm16162_vm6 }
 0x790   : > { %v7742_v6 = vmax.f32 %v7717_v18, %v7740_v61  ;;  %v7656_v45 = vld [vmem:[#allocation4 + $0x50] ss:$2 sm:$0xff]  ;;  %v7692_v24 = vld [vmem:[#allocation4 + $0x51] ss:$2 sm:$0xff]  ;;  %7608 = vst.msk [vmem:[#allocation4 + $0x70] sm:$0xff] %vm16153_vm3, %v7572_v62  ;;  %v7437_v41 = vadd.f32 %v11074_v53, %v14678_v56  ;;  %v7428_v9 = vpop.f32.mrb[19].mxu1  ;;  %vm16169_vm0 = vmmov %vm16159_vm8 }
 0x791   : > { %7609 = vst.msk [vmem:[#allocation4 + $0x78] sm:$0xff] %vm16154_vm4, %v7573_v59  ;;  %v14771_v57 = vmax.f32 %v7656_v45, %v7692_v24  ;;  %v7429_v51 = vadd.f32 %v14678_v56, %v7428_v9  ;;  %v7522_v36 = vmax.f32 %v7434_v5, 0.0  ;;  %v7520_v54 = vmax.f32 %v7426_v21, 0.0  ;;  %vm16176_vm6 = vmmov %vm16169_vm0 }
 0x792   : > { %v10155_v27 = vpack.c.bf16 %v7742_v6, %v7742_v6  ;;  %v7654_v49 = vld [vmem:[#allocation4 + $0x40] ss:$2 sm:$0xff]  ;;  %v7690_v2 = vld [vmem:[#allocation4 + $0x41] ss:$2 sm:$0xff]  ;;  %7606 = vst.msk [vmem:[#allocation4 + $0x60] sm:$0xff] %vm16155_vm14, %v7570_v32  ;;  %v7523_v43 = vmax.f32 %v7437_v41, 0.0 }
 0x793   : > { %v14773_v23 = vmax.f32 %v7654_v49, %v7690_v2  ;;  %7607 = vst.msk [vmem:[#allocation4 + $0x68] sm:$0xff] %vm16156_vm10, %v7571_v58  ;;  %v7521_v12 = vmax.f32 %v7429_v51, 0.0  ;;  %v7815_v0 = vrot.slane %v14771_v57, 1  ;;  %vm7803_vm3 = vcmask 519170   ;;  %vm16168_vm10 = vmmov %vm16157_vm5 }
 0x794   : > { %v7748_v22 = vshrl.u32 %v10155_v27, 16  ;;  %v7751_v48 = vshll.u32 %v10155_v27, 16  ;;  %v7549_v42 = vpack.c.bf16 %v7523_v43, %v7522_v36  ;;  %vm16165_vm4 = vsmask.f32 1280  ;;  %v7765_v27 = vld [vmem:[#allocation5 + $0x8] sm:$0x3] }
 0x795   : > { %v7771_v14 = vrot.slane %v14773_v23, 1  ;;  %v7548_v3 = vpack.c.bf16 %v7521_v12, %v7520_v54  ;;  %v11077_v33 = vpop.f32.mrb[20].mxu1  ;;  %vm14810_vm14 = vmand %vm7763_vm15, %vm16165_vm4  ;;  %vm16177_vm4 = vsmask.f32 2304 }
 0x796   : > { %v7750_v16 = vrot.slane %v7748_v22, 6  ;;  %v7753_v13 = vrot.slane %v7751_v48, 7  ;;  %v7576_v1 = vunpack.c.l.bf16 %v7549_v42  ;;  %v7577_v29 = vunpack.c.h.bf16 %v7549_v42  ;;  %v7441_v46 = vpop.f32.mrb[21].mxu1  ;;  %vm16170_vm15 = vmmov %vm16169_vm0 }
 0x797   : > { %v7772_v26 = vsel %vm16157_vm5, %v7770_v8, %v7771_v14  ;;  %v7776_v55 = vmax.f32 %v7720_v31, %v7771_v14  ;;  %v7574_v4 = vunpack.c.l.bf16 %v7548_v3  ;;  %v7575_v47 = vunpack.c.h.bf16 %v7548_v3  ;;  %v11078_v50 = vpop.f32.mrb[22].mxu1 }
 0x798   : > { %v14781_v7 = vor.u32 %v7753_v13, %v7750_v16  ;;  %v7775_v30 = vmax.f32 %v14750_v17, %v7772_v26  ;;  %v7660_v38 = vld [vmem:[#allocation4 + $0x70] ss:$2 sm:$0xff]  ;;  %v7696_v37 = vld [vmem:[#allocation4 + $0x71] ss:$2 sm:$0xff]  ;;  %v7450_v52 = vadd.f32 %v11077_v33, %v14678_v56  ;;  %7612 = vst.msk [vmem:[#allocation4 + $0x90] sm:$0xff] %vm16158_vm9, %v7576_v1  ;;  %v7442_v17 = vadd.f32 %v14678_v56, %v7441_v46  ;;  %v7444_v34 = vpop.f32.mrb[23].mxu1 }
 0x799   : > { %v10157_v44 = vpack.c.bf16 %v7776_v55, %v7776_v55  ;;  %v14786_v11 = vmax.f32 %v7660_v38, %v7696_v37  ;;  %7613 = vst.msk [vmem:[#allocation4 + $0x98] sm:$0xff] %vm16159_vm8, %v7577_v29  ;;  %v7453_v24 = vadd.f32 %v11078_v50, %v14678_v56  ;;  %v7445_v21 = vadd.f32 %v14678_v56, %v7444_v34  ;;  %vm16174_vm8 = vmmov %vm16168_vm10 }
 0x79a   : > { %v7755_v35 = vrot.slane %v14781_v7, 4  ;;  %v10156_v20 = vpack.c.bf16 %v7775_v30, %v7775_v30  ;;  %v7658_v60 = vld [vmem:[#allocation4 + $0x60] ss:$2 sm:$0xff]  ;;  %v7694_v18 = vld [vmem:[#allocation4 + $0x61] ss:$2 sm:$0xff]  ;;  %7610 = vst.msk [vmem:[#allocation4 + $0x80] sm:$0xff] %vm16160_vm13, %v7574_v4  ;;  %v7761_v53 = vsel %vm14797_vm7, %v14781_v7, %v7760_v25  ;;  %vm16175_vm13 = vmmov %vm16169_vm0 }
 0x79b   : > { %v7793_v63 = vshrl.u32 %v10157_v44, 16  ;;  %v7796_v39 = vshll.u32 %v10157_v44, 16  ;;  %v14791_v15 = vmax.f32 %v7658_v60, %v7694_v18  ;;  %7611 = vst.msk [vmem:[#allocation4 + $0x88] sm:$0xff] %vm16161_vm12, %v7575_v47  ;;  %v7526_v61 = vmax.f32 %v7450_v52, 0.0  ;;  %7762 = vst [vmem:[#allocation5 + $0x4] sm:$0xe] %v7761_v53 }
 0x79c   : > { %v7784_v6 = vshrl.u32 %v10156_v20, 16  ;;  %v7787_v62 = vshll.u32 %v10156_v20, 16  ;;  %v7860_v59 = vrot.slane %v14786_v11, 1  ;;  %v7524_v5 = vmax.f32 %v7442_v17, 0.0 }
 0x79d   : > { %v7795_v28 = vrot.slane %v7793_v63, 6  ;;  %v7798_v31 = vrot.slane %v7796_v39, 7  ;;  %v7816_v45 = vrot.slane %v14791_v15, 1  ;;  %v7527_v9 = vmax.f32 %v7453_v24, 0.0  ;;  %v11081_v51 = vpop.f32.mrb[24].mxu1 }
 0x79e   : > { %v7786_v32 = vrot.slane %v7784_v6, 6  ;;  %v7789_v58 = vrot.slane %v7787_v62, 7  ;;  %v7525_v36 = vmax.f32 %v7445_v21, 0.0  ;;  %v14820_v43 = vadd.f32 %v11081_v51, %v14678_v56  ;;  %v7457_v8 = vpop.f32.mrb[25].mxu1  ;;  %v7805_v63 = vld [vmem:[#allocation5 + $0x8] sm:$0xc] }
 0x79f   : > { %v7799_v49 = vor.u32 %v7798_v31, %v7795_v28  ;;  %v7817_v2 = vsel %vm16168_vm10, %v7815_v0, %v7816_v45  ;;  %v7821_v41 = vmax.f32 %v14771_v57, %v7816_v45  ;;  %v7551_v16 = vpack.c.bf16 %v7527_v9, %v7526_v61  ;;  %v11082_v13 = vpop.f32.mrb[26].mxu1  ;;  %vm14881_vm10 = vmand %vm7644_vm2, %vm16177_vm4 }
 0x7a0   : > { %v14816_v22 = vor.u32 %v7789_v58, %v7786_v32  ;;  %v7820_v48 = vmax.f32 %v14773_v23, %v7817_v2  ;;  %v14822_v54 = vld [vmem:[#allocation4 + $0x90] ss:$2 sm:$0xff]  ;;  %v14824_v12 = vld [vmem:[#allocation4 + $0x91] ss:$2 sm:$0xff]  ;;  %v14827_v57 = vadd.f32 %v14678_v56, %v7457_v8  ;;  %v7766_v42 = vsel %vm14810_vm14, %v7755_v35, %v7765_v27  ;;  %v7460_v7 = vpop.f32.mrb[27].mxu1  ;;  %vm16182_vm2 = vmmov %vm16169_vm0 }
 0x7a1   : > { %v10159_v14 = vpack.c.bf16 %v7821_v41, %v7821_v41  ;;  %v7726_v26 = vmax.f32 %v14822_v54, %v14824_v12  ;;  %v7550_v33 = vpack.c.bf16 %v7525_v36, %v7524_v5  ;;  %7767 = vst [vmem:[#allocation5 + $0x8] sm:$0x3] %v7766_v42  ;;  %v7580_v46 = vunpack.c.l.bf16 %v7551_v16 }
 0x7a2   : > { %v7791_v23 = vrot.slane %v14816_v22, 4  ;;  %v10158_v0 = vpack.c.bf16 %v7820_v48, %v7820_v48  ;;  %v7662_v55 = vld [vmem:[#allocation4 + $0x80] ss:$2 sm:$0xff]  ;;  %v7698_v3 = vld [vmem:[#allocation4 + $0x81] ss:$2 sm:$0xff]  ;;  %v7581_v4 = vunpack.c.h.bf16 %v7551_v16  ;;  %v7530_v17 = vmax.f32 %v14820_v43, 0.0 }
 0x7a3   : > { %v7838_v30 = vshrl.u32 %v10159_v14, 16  ;;  %v7841_v1 = vshll.u32 %v10159_v14, 16  ;;  %v7725_v29 = vmax.f32 %v7662_v55, %v7698_v3  ;;  %7616 = vst.msk [vmem:[#allocation4 + $0xb0] sm:$0xff] %vm16169_vm0, %v7580_v46  ;;  %v7578_v35 = vunpack.c.l.bf16 %v7550_v33 }
 0x7a4   : > { %v14836_v44 = vsel %vm15897_vm11, %v7791_v23, %v7799_v49  ;;  %v7829_v38 = vshll.u32 %v10158_v0, 16  ;;  %v7832_v37 = vshrl.u32 %v10158_v0, 16  ;;  %7617 = vst.msk [vmem:[#allocation4 + $0xb8] sm:$0xff] %vm16170_vm15, %v7581_v4  ;;  %v7579_v18 = vunpack.c.h.bf16 %v7550_v33  ;;  %vm16180_vm15 = vmmov %vm16169_vm0 }
 0x7a5   : > { %v14838_v47 = vrot.slane %v7838_v30, 6  ;;  %v14840_v52 = vrot.slane %v7841_v1, 7  ;;  %v7861_v50 = vrot.slane %v7725_v29, 1  ;;  %vm16171_vm5 = vsmask.f32 7946  ;;  %7614 = vst.msk [vmem:[#allocation4 + $0xa0] sm:$0xff] %vm16175_vm13, %v7578_v35 }
 0x7a6   : > { %v14843_v20 = vrot.slane %v7829_v38, 7  ;;  %v7834_v60 = vrot.slane %v7832_v37, 6  ;;  %vm14849_vm9 = vmand %vm7803_vm3, %vm16171_vm5  ;;  %v7528_v6 = vmax.f32 %v14827_v57, 0.0  ;;  %v11085_v62 = vpop.f32.mrb[28].mxu1  ;;  %vm7848_vm12 = vcmask 519171   ;;  %7615 = vst.msk [vmem:[#allocation4 + $0xa8] sm:$0xff] %vm16176_vm6, %v7579_v18 }
 0x7a7   : > { %v7844_v39 = vor.u32 %v14840_v52, %v14838_v47  ;;  %v7862_v61 = vsel %vm16174_vm8, %v7860_v59, %v7861_v50  ;;  %v7866_v25 = vmax.f32 %v14786_v11, %v7861_v50  ;;  %v7469_v31 = vadd.f32 %v11082_v13, %v14678_v56  ;;  %v7473_v24 = vpop.f32.mrb[29].mxu1  ;;  %vm16181_vm5 = vmmov %vm16169_vm0  ;;  %v11425_v50 = vld [vmem:[%s15642_s13 + $0xa8] sm:$0xff]  }
 0x7a8   : > { %v7835_v5 = vor.u32 %v7834_v60, %v14843_v20  ;;  %v7865_v28 = vmax.f32 %v14791_v15, %v7862_v61  ;;  %v7461_v45 = vadd.f32 %v14678_v56, %v7460_v7  ;;  %v7482_v11 = vadd.f32 %v11085_v62, %v14678_v56  ;;  %v11086_v58 = vpop.f32.mrb[30].mxu1  ;;  %v7810_v7 = vld [vmem:[#allocation5 + $0xc] sm:$0x7] }
 0x7a9   : > { %v10161_v59 = vpack.c.bf16 %v7866_v25, %v7866_v25  ;;  %v7474_v32 = vadd.f32 %v14678_v56, %v7473_v24  ;;  %v7806_v21 = vsel %vm14849_vm9, %v14816_v22, %v7805_v63  ;;  %v7531_v27 = vmax.f32 %v7469_v31, 0.0  ;;  %v7476_v2 = vpop.f32.mrb[31].mxu1 }
 0x7aa   : > { %v14869_v53 = vrot.slane %v7835_v5, 4  ;;  %v10160_v15 = vpack.c.bf16 %v7865_v28, %v7865_v28  ;;  %v7529_v49 = vmax.f32 %v7461_v45, 0.0  ;;  %7807 = vst [vmem:[#allocation5 + $0x8] sm:$0xc] %v7806_v21  ;;  %v7534_v51 = vmax.f32 %v7482_v11, 0.0 }
 0x7ab   : > { %v7883_v41 = vshrl.u32 %v10161_v59, 16  ;;  %v7886_v9 = vshll.u32 %v10161_v59, 16  ;;  %v7532_v48 = vmax.f32 %v7474_v32, 0.0  ;;  %v7553_v8 = vpack.c.bf16 %v7531_v27, %v7530_v17  ;;  %v7668_v13 = vld [vmem:[#allocation4 + $0xb0] ss:$2 sm:$0xff] }
 0x7ac   : > { %v7874_v36 = vshrl.u32 %v10160_v15, 16  ;;  %v7877_v43 = vshll.u32 %v10160_v15, 16  ;;  %v7552_v14 = vpack.c.bf16 %v7529_v49, %v7528_v6  ;;  %v7704_v22 = vld [vmem:[#allocation4 + $0xb1] ss:$2 sm:$0xff]  ;;  %v7485_v42 = vadd.f32 %v11086_v58, %v14678_v56  ;;  %v7850_v27 = vld [vmem:[#allocation5 + $0xc] sm:$0x8] }
 0x7ad   : > { %v14871_v16 = vrot.slane %v7883_v41, 6  ;;  %v7888_v57 = vrot.slane %v7886_v9, 7  ;;  %v7477_v23 = vadd.f32 %v14678_v56, %v7476_v2  ;;  %v14875_v3 = vmax.f32 %v7668_v13, %v7704_v22  ;;  %v7666_v29 = vld [vmem:[#allocation4 + $0xa0] ss:$2 sm:$0xff]  ;;  %v7702_v46 = vld [vmem:[#allocation4 + $0xa1] ss:$2 sm:$0xff] }
 0x7ae   : > { %v7876_v0 = vrot.slane %v7874_v36, 6  ;;  %v7879_v55 = vrot.slane %v7877_v43, 7  ;;  %v7584_v33 = vunpack.c.l.bf16 %v7553_v8  ;;  %vm7898_vm3 = vcmask 516096   ;;  %v11089_v4 = vpop.f32.mrb[32].mxu1  ;;  %v8055_v49 = vld [vmem:[#allocation5] sm:$0xf] }
 0x7af   : > { %v7889_v30 = vor.u32 %v7888_v57, %v14871_v16  ;;  %v7891_v1 = vrot.slane %v14871_v16, 4  ;;  %v7585_v38 = vunpack.c.h.bf16 %v7553_v8  ;;  %v7582_v37 = vunpack.c.l.bf16 %v7552_v14  ;;  %v7489_v63 = vpop.f32.mrb[33].mxu1  ;;  %v14906_v36 = vld [vmem:[#allocation5 + $0x4] sm:$0xf]  ;;  %v7855_v13 = vld [vmem:[#allocation5 + $0x10] sm:$0xf] }
 0x7b0   : > { %v7880_v35 = vor.u32 %v7879_v55, %v7876_v0  ;;  %v7906_v60 = vrot.slane %v14875_v3, 1  ;;  %v7727_v18 = vmax.f32 %v7666_v29, %v7702_v46  ;;  %7620 = vst.msk [vmem:[#allocation4 + $0xd0] sm:$0xff] %vm16169_vm0, %v7584_v33  ;;  %v7583_v17 = vunpack.c.h.bf16 %v7552_v14  ;;  %v11090_v5 = vpop.f32.mrb[34].mxu1 }
 0x7b1   : > { %7621 = vst.msk [vmem:[#allocation4 + $0xd8] sm:$0xff] %vm16180_vm15, %v7585_v38  ;;  %v7535_v61 = vmax.f32 %v7485_v42, 0.0  ;;  %v7533_v25 = vmax.f32 %v7477_v23, 0.0  ;;  %v7498_v6 = vadd.f32 %v11089_v4, %v14678_v56  ;;  %v7490_v62 = vadd.f32 %v14678_v56, %v7489_v63  ;;  %v7492_v24 = vpop.f32.mrb[35].mxu1  ;;  %v14941_v38 = vld [vmem:[#allocation5 + $0x8] sm:$0xf] }
 0x7b2   : > { %7618 = vst.msk [vmem:[#allocation4 + $0xc0] sm:$0xff] %vm16181_vm5, %v7582_v37  ;;  %v7881_v28 = vrot.slane %v7880_v35, 4  ;;  %v7905_v31 = vrot.slane %v7727_v18, 1  ;;  %v7501_v45 = vadd.f32 %v11090_v5, %v14678_v56  ;;  %v7811_v59 = vsel %vm14881_vm10, %v14836_v44, %v7810_v7  ;;  %vm16193_vm5 = vmmov %vm16182_vm2  ;;  %v11424_v35 = vld [vmem:[%s15642_s13 + $0xe8] sm:$0xff]  }
 0x7b3   : > { %7619 = vst.msk [vmem:[#allocation4 + $0xc8] sm:$0xff] %vm16182_vm2, %v7583_v17  ;;  %vm16183_vm8 = vsmask.f32 7950  ;;  %v7555_v32 = vpack.c.bf16 %v7535_v61, %v7534_v51  ;;  %v7554_v58 = vpack.c.bf16 %v7533_v25, %v7532_v48  ;;  %v7538_v21 = vmax.f32 %v7498_v6, 0.0  ;;  %7812 = vst [vmem:[#allocation5 + $0xc] sm:$0x7] %v7811_v59 }
 0x7b4   : > { %vm14898_vm13 = vmand %vm7848_vm12, %vm16183_vm8  ;;  %v7536_v15 = vmax.f32 %v7490_v62, 0.0  ;;  %v7890_v2 = vsel %vm15897_vm11, %v7881_v28, %v7889_v30  ;;  %vm16186_vm6 = vcmask 1046528   ;;  %v7539_v9 = vmax.f32 %v7501_v45, 0.0  ;;  %v7895_v48 = vld [vmem:[#allocation5 + $0x14] sm:$0xf]  ;;  %v11414_v61 = vld [vmem:[%s15642_s13 + $0x78] sm:$0xff]  }
 0x7b5   : > { %v7907_v41 = vsel %vm16186_vm6, %v7905_v31, %v7906_v60  ;;  %v7493_v44 = vadd.f32 %v14678_v56, %v7492_v24  ;;  %vm16187_vm12 = vsmask.f32 7938  ;;  %v7588_v8 = vunpack.c.l.bf16 %v7555_v32  ;;  %vm16194_vm8 = vmmov %vm16182_vm2  ;;  %v8067_v60 = vld [vmem:[#allocation5 + $0x4] sm:$0xe]  ;;  %v11416_v6 = vld [vmem:[%s15642_s13 + $0x38] sm:$0xff]   ;;  %10448 = vmatprep.subr.bf16.mxu0 %v11414_v61 }
 0x7b6   : > { %vm14910_vm4 = vmand %vm7630_vm1, %vm16187_vm12  ;;  %v7909_v43 = vmax.f32 %v7726_v26, %v7907_v41  ;;  %v7589_v14 = vunpack.c.h.bf16 %v7555_v32  ;;  %v7586_v57 = vunpack.c.l.bf16 %v7554_v58  ;;  %vm16190_vm0 = vsmask.f32 3328  ;;  %v11415_v25 = vld [vmem:[%s15642_s13 + $0xd0] sm:$0xff]   ;;  %10449 = vmatpush3.bf16.msra.mxu0 %v11416_v6 }
 0x7b7   : > { %vm14919_vm15 = vmand %vm7630_vm1, %vm16190_vm0  ;;  %v7587_v22 = vunpack.c.h.bf16 %v7554_v58  ;;  %v7557_v42 = vpack.c.bf16 %v7539_v9, %v7538_v21  ;;  %v7537_v23 = vmax.f32 %v7493_v44, 0.0  ;;  %v7851_v0 = vsel %vm14898_vm13, %v14843_v20, %v7850_v27  ;;  %7624 = vst.msk [vmem:[#allocation4 + $0xf0] sm:$0xff] %vm16193_vm5, %v7588_v8  ;;  %v7900_v20 = vld [vmem:[#allocation5 + $0x18] sm:$0x1]  ;;  %v11417_v45 = vld [vmem:[%s15642_s13 + $0x90] sm:$0xff]   ;;  %10484 = vmatprep.subr.bf16.mxu1 %v11415_v25 }
 0x7b8   : > { %v10162_v55 = vpack.c.bf16 %v7909_v43, %v7909_v43  ;;  %7625 = vst.msk [vmem:[#allocation4 + $0xf8] sm:$0xff] %vm16182_vm2, %v7589_v14  ;;  %7852 = vst [vmem:[#allocation5 + $0xc] sm:$0x8] %v7851_v0  ;;  %v14930_v54 = vcombine.low %v8055_v49, %v14906_v36  ;;  %v7845_v12 = vsel %vm15897_vm11, %v14869_v53, %v7844_v39  ;;  %v7672_v33 = vld [vmem:[#allocation4 + $0xd0] ss:$2 sm:$0xff]  ;;  %10485 = vmatpush3.bf16.msra.mxu1 %v11417_v45 }
 0x7b9   : > { %7622 = vst.msk [vmem:[#allocation4 + $0xe0] sm:$0xff] %vm16194_vm8, %v7586_v57  ;;  %v7896_v26 = vsel %vm14910_vm4, %v7890_v2, %v7895_v48  ;;  %v7708_v7 = vld [vmem:[#allocation4 + $0xd1] ss:$2 sm:$0xff]  ;;  %vm16195_vm1 = vmmov %vm16182_vm2  ;;  %v7592_v30 = vunpack.c.l.bf16 %v7557_v42  ;;  %v7593_v29 = vunpack.c.h.bf16 %v7557_v42  ;;  %v7556_v46 = vpack.c.bf16 %v7537_v23, %v7536_v15 }
 0x7ba   : > { %7623 = vst.msk [vmem:[#allocation4 + $0xe8] sm:$0xff] %vm16195_vm1, %v7587_v22  ;;  %v7856_v47 = vsel %vm14919_vm15, %v7845_v12, %v7855_v13  ;;  %7897 = vst [vmem:[#allocation5 + $0x14] sm:$0xf] %v7896_v26  ;;  %v7915_v52 = vshrl.u32 %v10162_v55, 16  ;;  %v7918_v37 = vshll.u32 %v10162_v55, 16  ;;  %v14945_v39 = vmax.f32 %v7672_v33, %v7708_v7  ;;  %v11419_v7 = vld [vmem:[%s15642_s13 + $0xd8] sm:$0xff]  }
 0x7bb   : > { %v7670_v53 = vld [vmem:[#allocation4 + $0xc0] ss:$2 sm:$0xff]  ;;  %v7706_v4 = vld [vmem:[#allocation4 + $0xc1] ss:$2 sm:$0xff]  ;;  %vm16196_vm6 = vsmask.f32 256  ;;  %vm16199_vm0 = vmmov %vm16195_vm1  ;;  %v7590_v17 = vunpack.c.l.bf16 %v7556_v46  ;;  %v7591_v63 = vunpack.c.h.bf16 %v7556_v46  ;;  %v14972_v59 = vcombine.low %v8067_v60, %v14941_v38  ;;  %10486 = vmatprep.subr.bf16.mxu1 %v11419_v7 }
 0x7bc   : > { %vm14949_vm12 = vmand %vm7898_vm3, %vm16196_vm6  ;;  %7857 = vst [vmem:[#allocation5 + $0x10] sm:$0xf] %v7856_v47  ;;  %v7729_v18 = vmax.f32 %v7670_v53, %v7706_v4  ;;  %v7917_v62 = vrot.slane %v7915_v52, 6  ;;  %v7920_v5 = vrot.slane %v7918_v37, 7  ;;  %v7934_v28 = vrot.slane %v14945_v39, 1 }
 0x7bd   : > { %7628 = vst.msk [vmem:[#allocation4 + $0x110] sm:$0xff] %vm16199_vm0, %v7592_v30  ;;  %vm16200_vm5 = vmmov %vm16199_vm0  ;;  %v8108_v31 = vshll.u32 %v14930_v54, 16  ;;  %v7901_v32 = vsel %vm14949_vm12, %v7891_v1, %v7900_v20  ;;  %vm16203_vm8 = vcmask 1046528   ;;  %v8106_v14 = vshrl.u32 %v14930_v54, 16 }
 0x7be   : > { %7629 = vst.msk [vmem:[#allocation4 + $0x118] sm:$0xff] %vm16200_vm5, %v7593_v29  ;;  %v7933_v24 = vrot.slane %v7729_v18, 1  ;;  %vm16201_vm3 = vmmov %vm16199_vm0  ;;  %v7939_v58 = vmax.f32 %v7729_v18, %v7934_v28  ;;  %v14978_v15 = vor.u32 %v7920_v5, %v7917_v62  ;;  %v8185_v13 = vrot.slane %v14972_v59, 1 }
 0x7bf   : > { %7626 = vst.msk [vmem:[#allocation4 + $0x100] sm:$0xff] %vm16201_vm3, %v7590_v17  ;;  %vm16202_vm2 = vmmov %vm16199_vm0  ;;  %v8110_v21 = vrot.slane %v8108_v31, 1  ;;  %v7676_v49 = vld [vmem:[#allocation4 + $0xf0] ss:$2 sm:$0xff]  ;;  %v7712_v2 = vld [vmem:[#allocation4 + $0xf1] ss:$2 sm:$0xff] }
 0x7c0   : > { %7627 = vst.msk [vmem:[#allocation4 + $0x108] sm:$0xff] %vm16202_vm2, %v7591_v63  ;;  %7902 = vst [vmem:[#allocation5 + $0x18] sm:$0x1] %v7901_v32  ;;  %v7935_v27 = vsel %vm16203_vm8, %v7933_v24, %v7934_v28  ;;  %v14981_v41 = vld [vmem:[#allocation5 + $0xc] sm:$0xf]  ;;  %v10164_v9 = vpack.c.bf16 %v7939_v58, %v7939_v58  ;;  %v7732_v44 = vmax.f32 %v7676_v49, %v7712_v2  ;;  %v7922_v55 = vrot.slane %v14978_v15, 4 }
 0x7c1   : > { %v7938_v16 = vmax.f32 %v14875_v3, %v7935_v27  ;;  %v7674_v1 = vld [vmem:[#allocation4 + $0xe0] ss:$2 sm:$0xff]  ;;  %v7710_v48 = vld [vmem:[#allocation4 + $0xe1] ss:$2 sm:$0xff]  ;;  %v14986_v8 = vcombine.low %v14941_v38, %v14981_v41  ;;  %v14989_v57 = vld [vmem:[#allocation5 + $0x14] sm:$0xf]  ;;  %v8111_v20 = vor.u32 %v8110_v21, %v8106_v14 }
 0x7c2   : > { %v7731_v43 = vmax.f32 %v7674_v1, %v7710_v48  ;;  %v7956_v42 = vshrl.u32 %v10164_v9, 16  ;;  %v7959_v23 = vshll.u32 %v10164_v9, 16  ;;  %v7975_v0 = vrot.slane %v7732_v44, 1  ;;  %vm16204_vm1 = vmmov %vm16203_vm8  ;;  %v11420_v63 = vld [vmem:[%s15642_s13 + $0x98] sm:$0xff]  }
 0x7c3   : > { %v10163_v22 = vpack.c.bf16 %v7938_v16, %v7938_v16  ;;  %v8113_v33 = vshll.u32 %v14986_v8, 16  ;;  %v8059_v17 = vld [vmem:[#allocation5 + $0x10] sm:$0xf]  ;;  %vm16205_vm6 = vsmask.f32 7424  ;;  %10487 = vmatpush3.bf16.msra.mxu1 %v11420_v63  ;;  %vm16207_vm0 = vmmov %vm16204_vm1 }
 0x7c4   : > { %v7974_v12 = vrot.slane %v7731_v43, 1  ;;  %v7958_v46 = vrot.slane %v7956_v42, 6  ;;  %v7961_v47 = vrot.slane %v7959_v23, 7  ;;  %v7980_v53 = vmax.f32 %v7731_v43, %v7975_v0  ;;  %v7925_v23 = vld [vmem:[#allocation5 + $0x18] sm:$0xe]  ;;  %vm16208_vm5 = vmmov %vm16207_vm0 }
 0x7c5   : > { %v7680_v3 = vld [vmem:[#allocation4 + $0x110] ss:$2 sm:$0xff]  ;;  %v7716_v26 = vld [vmem:[#allocation4 + $0x111] ss:$2 sm:$0xff]  ;;  %v7947_v30 = vshrl.u32 %v10163_v22, 16  ;;  %v7950_v29 = vshll.u32 %v10163_v22, 16  ;;  %v15003_v62 = vcombine.low %v8059_v17, %v14989_v57  ;;  %v15008_v21 = vcombine.low %v14981_v41, %v8059_v17 }
 0x7c6   : > { %v7976_v37 = vsel %vm16204_vm1, %v7974_v12, %v7975_v0  ;;  %v7734_v4 = vmax.f32 %v7680_v3, %v7716_v26  ;;  %v8115_v18 = vrot.slane %v8113_v33, 1  ;;  %v10166_v5 = vpack.c.bf16 %v7980_v53, %v7980_v53  ;;  %v7969_v63 = vld [vmem:[#allocation5 + $0x20] sm:$0x7] }
 0x7c7   : > { %v7678_v52 = vld [vmem:[#allocation4 + $0x100] ss:$2 sm:$0xff]  ;;  %v7714_v60 = vld [vmem:[#allocation4 + $0x101] ss:$2 sm:$0xff]  ;;  %v7949_v61 = vrot.slane %v7947_v30, 6  ;;  %v7952_v25 = vrot.slane %v7950_v29, 7  ;;  %v7979_v6 = vmax.f32 %v14945_v39, %v7976_v37  ;;  %v7962_v32 = vor.u32 %v7961_v47, %v7958_v46 }
 0x7c8   : > { %v8016_v28 = vrot.slane %v7734_v4, 1  ;;  %v7733_v31 = vmax.f32 %v7678_v52, %v7714_v60  ;;  %v8116_v45 = vsel %vm16205_vm6, %v8111_v20, %v8115_v18  ;;  %v7997_v27 = vshrl.u32 %v10166_v5, 16  ;;  %v7928_v20 = vld [vmem:[#allocation5 + $0x1c] sm:$0x3]  ;;  %v8052_v4 = vld [vmem:[#allocation5 + $0x2c] sm:$0x1] }
 0x7c9   : > { %v7953_v24 = vor.u32 %v7952_v25, %v7949_v61  ;;  %v10165_v58 = vpack.c.bf16 %v7979_v6, %v7979_v6  ;;  %8149 = vrot.lane.b32.xlu1 %v8116_v45, %s16206_s27  ;;  %v8000_v49 = vshll.u32 %v10166_v5, 16  ;;  %v8186_v48 = vrot.slane %v15008_v21, 1  ;;  %v8010_v45 = vld [vmem:[#allocation5 + $0x24] sm:$0xf] }
 0x7ca   : > { %v8015_v39 = vrot.slane %v7733_v31, 1  ;;  %v8021_v2 = vmax.f32 %v7733_v31, %v8016_v28  ;;  %v7999_v43 = vrot.slane %v7997_v27, 6  ;;  %v8117_v26 = vshrl.u32 %v14986_v8, 16  ;;  %v11422_v27 = vld [vmem:[%s15642_s13 + $0xa0] sm:$0xff]  }
 0x7cb   : > { %v7954_v16 = vrot.slane %v7953_v24, 4  ;;  %v7988_v9 = vshll.u32 %v10165_v58, 16  ;;  %v7991_v1 = vshrl.u32 %v10165_v58, 16  ;;  %v8002_v14 = vrot.slane %v8000_v49, 7  ;;  %v11421_v58 = vld [vmem:[%s15642_s13 + $0xe0] sm:$0xff]  }
 0x7cc   : > { %v8017_v22 = vsel %vm16207_vm0, %v8015_v39, %v8016_v28  ;;  %v10168_v42 = vpack.c.bf16 %v8021_v2, %v8021_v2  ;;  %v8187_v29 = vsel %vm16208_vm5, %v8185_v13, %v8186_v48  ;;  %v8121_v37 = vshll.u32 %v15003_v62, 16  ;;  %v8007_v28 = vld [vmem:[#allocation5 + $0x20] sm:$0x8]  ;;  %10488 = vmatprep.subr.bf16.mxu1 %v11421_v58 }
 0x7cd   : > { %v7990_v0 = vrot.slane %v7988_v9, 7  ;;  %v7993_v3 = vrot.slane %v7991_v1, 6  ;;  %v8020_v12 = vmax.f32 %v7732_v44, %v8017_v22  ;;  %v7963_v33 = vsel %vm15897_vm11, %v7954_v16, %v7962_v32  ;;  %8196 = vrot.lane.b32.xlu0 %v8187_v29, %s16206_s27  ;;  %v7966_v44 = vld [vmem:[#allocation5 + $0x1c] sm:$0xc]  ;;  %10489 = vmatpush3.bf16.msra.mxu1 %v11422_v27  ;;  %v8049_v9 = vld [vmem:[#allocation5 + $0x28] sm:$0xf] }
 0x7ce   : > { %v8038_v7 = vshrl.u32 %v10168_v42, 16  ;;  %v8041_v30 = vshll.u32 %v10168_v42, 16  ;;  %v8003_v47 = vor.u32 %v8002_v14, %v7999_v43  ;;  %v8119_v60 = vor.u32 %v8117_v26, %v8115_v18  ;;  %10490 = vmatprep.subr.bf16.mxu1 %v11424_v35 }
 0x7cf   : > { %v7994_v46 = vor.u32 %v7993_v3, %v7990_v0  ;;  %v10167_v52 = vpack.c.bf16 %v8020_v12, %v8020_v12  ;;  %v7926_v17 = vsel %vm14797_vm7, %v14978_v15, %v7925_v23  ;;  %v7929_v13 = vsel %vm14810_vm14, %v7922_v55, %v7928_v20  ;;  %vm16209_vm7 = vmmov %vm16205_vm6  ;;  %v8072_v3 = vld [vmem:[#allocation5 + $0x8] sm:$0xc] }
 0x7d0   : > { %v8040_v53 = vrot.slane %v8038_v7, 6  ;;  %v8123_v5 = vrot.slane %v8121_v37, 1  ;;  %7927 = vst [vmem:[#allocation5 + $0x18] sm:$0xe] %v7926_v17  ;;  %7930 = vst [vmem:[#allocation5 + $0x1c] sm:$0x3] %v7929_v13  ;;  %v7967_v19 = vsel %vm14849_vm9, %v7953_v24, %v7966_v44  ;;  %v7970_v24 = vsel %vm14881_vm10, %v7963_v33, %v7969_v63 }
 0x7d1   : > { %v7995_v61 = vrot.slane %v7994_v46, 4  ;;  %v8029_v25 = vshrl.u32 %v10167_v52, 16  ;;  %v8032_v6 = vshll.u32 %v10167_v52, 16  ;;  %v8043_v18 = vrot.slane %v8041_v30, 7  ;;  %7968 = vst [vmem:[#allocation5 + $0x1c] sm:$0xc] %v7967_v19  ;;  %10491 = vmatpush3.bf16.msra.mxu1 %v11425_v50  ;;  %vm16211_vm14 = vmmov %vm16205_vm6 }
 0x7d2   : > { %v8046_v31 = vrot.slane %v8040_v53, 4  ;;  %v8124_v32 = vsel %vm16209_vm7, %v8119_v60, %v8123_v5  ;;  %v8008_v49 = vsel %vm14898_vm13, %v7990_v0, %v8007_v28  ;;  %7971 = vst [vmem:[#allocation5 + $0x20] sm:$0x7] %v7970_v24  ;;  %v11538_v42 = vmov 0.0   ;;  %10492 = vmatprep.subr.bf16.mxu1 %v11427_v40  ;;  %vm16212_vm9 = vmmov %vm16207_vm0  ;;  %v8071_v13 = vld [vmem:[#allocation5 + $0x4] sm:$0xc] }
 0x7d3   : > { %v8004_v10 = vsel %vm15897_vm11, %v7995_v61, %v8003_v47  ;;  %v8031_v15 = vrot.slane %v8029_v25, 6  ;;  %v8034_v55 = vrot.slane %v8032_v6, 7  ;;  %8151 = vrot.lane.b32.xlu1 %v8124_v32, %s16206_s27  ;;  %8009 = vst [vmem:[#allocation5 + $0x20] sm:$0x8] %v8008_v49  ;;  %v8044_v16 = vor.u32 %v8043_v18, %v8040_v53  ;;  %11091 = vmatprep.subr.bf16.mxu0 %v11538_v42  ;;  %vm16213_vm10 = vmmov %vm16205_vm6 }
 0x7d4   : > { %v8053_v34 = vsel %vm14949_vm12, %v8046_v31, %v8052_v4  ;;  %v8011_v2 = vsel %vm14919_vm15, %v8004_v10, %v8010_v45  ;;  %v15073_v12 = vcombine.low %v8072_v3, %v14981_v41  ;;  %v8125_v20 = vshrl.u32 %v15003_v62, 16  ;;  %v15092_v63 = vld [vmem:[#allocation5 + $0x30] ss:$0 sps:$4 sm:$0x77]   ;;  %vm16214_vm13 = vmmov %vm16207_vm0 }
 0x7d5   : > { %v8035_v39 = vor.u32 %v8034_v55, %v8031_v15  ;;  %8054 = vst [vmem:[#allocation5 + $0x2c] sm:$0x1] %v8053_v34  ;;  %8012 = vst [vmem:[#allocation5 + $0x24] sm:$0xf] %v8011_v2  ;;  %v8318_v19 = vrot.slane %v8121_v37, 3  ;;  %v11430_v45 = vld [vmem:[%s15642_s13 + $0xf8] sm:$0xff]  }
 0x7d6   : > { %v8127_v46 = vor.u32 %v8125_v20, %v8123_v5  ;;  %v8310_v53 = vshrl.u32 %v15073_v12, 16  ;;  %v8313_v4 = vshll.u32 %v15073_v12, 16  ;;  %v10053_v5 = vcombine.low %v8071_v13, %v14941_v38  ;;  %v11431_v10 = vld [vmem:[%s15642_s13 + $0xb8] sm:$0xff]   ;;  %vm16216_vm15 = vmmov %vm16205_vm6 }
 0x7d7   : > { %v8036_v11 = vrot.slane %v8035_v39, 4  ;;  %v8061_v1 = vld [vmem:[#allocation5 + $0x18] sm:$0xf]  ;;  %v8317_v28 = vrot.slane %v8125_v20, 2  ;;  %v8266_v38 = vrot.slane %v15008_v21, 2  ;;  %v8339_v49 = vshrl.u32 %v15092_v63, 16  ;;  %vm16217_vm12 = vmmov %vm16207_vm0 }
 0x7d8   : > { %v15058_v43 = vcombine.low %v14989_v57, %v8061_v1  ;;  %v8062_v14 = vld [vmem:[#allocation5 + $0x1c] sm:$0xf]  ;;  %v11428_v57 = vld [vmem:[%s15642_s13 + $0xb0] sm:$0xff]   ;;  %v8312_v55 = vrot.slane %v8310_v53, 2  ;;  %v8315_v32 = vrot.slane %v8313_v4, 3  ;;  %v8265_v24 = vrot.slane %v10053_v5, 2 }
 0x7d9   : > { %v8045_v56 = vsel %vm15897_vm11, %v8036_v11, %v8044_v16  ;;  %v15063_v23 = vcombine.low %v8061_v1, %v8062_v14  ;;  %vm16210_vm11 = vmmov %vm16207_vm0  ;;  %10493 = vmatpush3.bf16.msra.mxu1 %v11428_v57  ;;  %v8319_v50 = vor.u32 %v8318_v19, %v8317_v28  ;;  %v8342_v1 = vshll.u32 %v15092_v63, 16 }
 0x7da   : > { %v8050_v22 = vsel %vm14910_vm4, %v8045_v56, %v8049_v9  ;;  %v8188_v0 = vrot.slane %v15058_v43, 1  ;;  %v8063_v51 = vld [vmem:[#allocation5 + $0x20] sm:$0xf]  ;;  %10494 = vmatprep.subr.bf16.mxu1 %v11430_v45  ;;  %vm16215_vm4 = vcmask 1045504   ;;  %v8210_v3 = vshrl.u32 %v14972_v59, 16 }
 0x7db   : > { %8051 = vst [vmem:[#allocation5 + $0x28] sm:$0xf] %v8050_v22  ;;  %v8129_v33 = vshll.u32 %v15063_v23, 16  ;;  %v15080_v30 = vcombine.low %v8062_v14, %v8063_v51  ;;  %v8133_v44 = vshrl.u32 %v15063_v23, 16  ;;  %v8267_v11 = vsel %vm16215_vm4, %v8265_v24, %v8266_v38  ;;  %vm16219_vm2 = vmmov %vm16215_vm4 }
 0x7dc   : > { %v8189_v26 = vsel %vm16210_vm11, %v8186_v48, %v8188_v0  ;;  %v8064_v7 = vld [vmem:[#allocation5 + $0x24] sm:$0xf]  ;;  %v11391_v34 = vld [vmem:[#allocation5 + $0x2c] ss:$0 sps:$4 sm:$0x11]   ;;  %v8213_v57 = vshll.u32 %v14972_v59, 16  ;;  %vm16224_vm5 = vmmov %vm16219_vm2 }
 0x7dd   : > { %8198 = vrot.lane.b32.xlu0 %v8189_v26, %s16206_s27  ;;  %v15083_v29 = vcombine.low %v8063_v51, %v8064_v7  ;;  %v8131_v47 = vrot.slane %v8129_v33, 1  ;;  %v8190_v52 = vrot.slane %v15080_v30, 1  ;;  %10495 = vmatpush3.bf16.msra.mxu1 %v11431_v10  ;;  %v8321_v16 = vrot.slane %v8133_v44, 2  ;;  %v8073_v56 = vld [vmem:[#allocation5 + $0x2c] sm:$0xf] }
 0x7de   : > { %11119 = vmatprep.subr.bf16.mxu1 %v11538_v42  ;;  %v8322_v9 = vrot.slane %v8129_v33, 3  ;;  %v8194_v22 = vrot.slane %v11391_v34, 1  ;;  %v8218_v51 = vshrl.u32 %v15008_v21, 16  ;;  %v8221_v26 = vshll.u32 %v15008_v21, 16 }
 0x7df   : > { %v8137_v48 = vshll.u32 %v15083_v29, 16  ;;  %v8132_v60 = vsel %vm16211_vm14, %v8127_v46, %v8131_v47  ;;  %v8191_v17 = vsel %vm16212_vm9, %v8188_v0, %v8190_v52  ;;  %v8135_v61 = vor.u32 %v8133_v44, %v8131_v47  ;;  %v11396_v45 = vld [vmem:[#allocation5 + $0x2c] ss:$0 sps:$4 sm:$0x33]   ;;  %vm16227_vm14 = vmmov %vm16219_vm2 }
 0x7e0   : > { %8153 = vrot.lane.b32.xlu1 %v8132_v60, %s16206_s27  ;;  %v8141_v27 = vshrl.u32 %v15083_v29, 16  ;;  %v8316_v0 = vor.u32 %v8315_v32, %v8312_v55  ;;  %vm16218_vm3 = vsmask.f32 5376  ;;  %v8212_v46 = vrot.slane %v8210_v3, 1 }
 0x7e1   : > { %8200 = vrot.lane.b32.xlu0 %v8191_v17, %s16206_s27  ;;  %v8139_v25 = vrot.slane %v8137_v48, 1  ;;  %v8323_v47 = vor.u32 %v8322_v9, %v8321_v16  ;;  %v8215_v44 = vrot.slane %v8213_v57, 2  ;;  %v8220_v53 = vrot.slane %v8218_v51, 1  ;;  %vm16221_vm1 = vmmov %vm16218_vm3 }
 0x7e2   : > { %v8068_v6 = vld [vmem:[#allocation5 + $0x28] sm:$0xf]  ;;  %v8320_v33 = vsel %vm16218_vm3, %v8316_v0, %v8319_v50  ;;  %v8326_v4 = vrot.slane %v8137_v48, 3  ;;  %v8223_v60 = vrot.slane %v8221_v26, 2  ;;  %v8227_v59 = vshrl.u32 %v15058_v43, 16  ;;  %vm16225_vm7 = vmmov %vm16221_vm1 }
 0x7e3   : > { %v15097_v18 = vcombine.low %v8064_v7, %v8068_v6  ;;  %v15099_v31 = vld [vmem:[#allocation5 + $0x28] ss:$0 sps:$4 sm:$0x11]   ;;  %v8140_v15 = vsel %vm16213_vm10, %v8135_v61, %v8139_v25  ;;  %v8143_v2 = vor.u32 %v8141_v27, %v8139_v25  ;;  %v15123_v40 = vcombine.low %v8068_v6, %v8073_v56  ;;  %vm16229_vm10 = vmmov %vm16221_vm1 }
 0x7e4   : > { %v8145_v37 = vshll.u32 %v15099_v31, 16  ;;  %8155 = vrot.lane.b32.xlu1 %v8140_v15, %s16206_s27  ;;  %v8268_v7 = vrot.slane %v15058_v43, 2  ;;  %v8230_v17 = vshll.u32 %v15058_v43, 16  ;;  %v8236_v61 = vshrl.u32 %v15080_v30, 16  ;;  %vm16231_vm4 = vmmov %vm16221_vm1 }
 0x7e5   : > { %v8192_v58 = vrot.slane %v15097_v18, 1  ;;  %v8330_v21 = vshrl.u32 %v15123_v40, 16  ;;  %v8333_v13 = vshll.u32 %v15123_v40, 16  ;;  %v8239_v25 = vshll.u32 %v15080_v30, 16 }
 0x7e6   : > { %v8147_v35 = vrot.slane %v8145_v37, 1  ;;  %v8216_v6 = vor.u32 %v8215_v44, %v8212_v46  ;;  %v8224_v5 = vor.u32 %v8223_v60, %v8220_v53  ;;  %v8229_v28 = vrot.slane %v8227_v59, 1  ;;  %v8066_v60 = vld [vmem:[#allocation5] sm:$0xe] }
 0x7e7   : > { %v8193_v39 = vsel %vm16214_vm13, %v8190_v52, %v8192_v58  ;;  %v8195_v20 = vsel %vm16217_vm12, %v8192_v58, %v8194_v22  ;;  %v8325_v52 = vrot.slane %v8141_v27, 2  ;;  %v8232_v19 = vrot.slane %v8230_v17, 2  ;;  %vm16230_vm13 = vmmov %vm16219_vm2 }
 0x7e8   : > { %8202 = vrot.lane.b32.xlu0 %v8193_v39, %s16206_s27  ;;  %v8148_v14 = vsel %vm16216_vm15, %v8143_v2, %v8147_v35  ;;  %v8269_v48 = vsel %vm16219_vm2, %v8266_v38, %v8268_v7  ;;  %v8238_v43 = vrot.slane %v8236_v61, 1  ;;  %v8241_v10 = vrot.slane %v8239_v25, 2 }
 0x7e9   : > { %8157 = vrot.lane.b32.xlu1 %v8148_v14, %s16206_s27  ;;  %v8245_v15 = vshrl.u32 %v15097_v18, 16  ;;  %v8270_v55 = vrot.slane %v15080_v30, 2  ;;  %vm16220_vm8 = vsmask.f32 6400  ;;  %v8233_v58 = vor.u32 %v8232_v19, %v8229_v28  ;;  %v11429_v28 = vld [vmem:[%s15642_s13 + $0x110] sm:$0xff]  }
 0x7ea   : > { %v15145_v32 = vsel %vm16220_vm8, %v8216_v6, %v8224_v5  ;;  %v8248_v27 = vshll.u32 %v15097_v18, 16  ;;  %v8324_v37 = vsel %vm16221_vm1, %v8319_v50, %v8323_v47  ;;  %v8327_v34 = vor.u32 %v8326_v4, %v8325_v52  ;;  %vm16222_vm6 = vmmov %vm16220_vm8 }
 0x7eb   : > { %v8242_v24 = vor.u32 %v8241_v10, %v8238_v43  ;;  %v8247_v38 = vrot.slane %v8245_v15, 1  ;;  %v8332_v39 = vrot.slane %v8330_v21, 2  ;;  %v8335_v2 = vrot.slane %v8333_v13, 3  ;;  %vm16223_vm0 = vmmov %vm16222_vm6 }
 0x7ec   : > { %8204 = vrot.lane.b32.xlu0 %v8195_v20, %s16206_s27  ;;  %v15151_v35 = vsel %vm16222_vm6, %v8224_v5, %v8233_v58  ;;  %v8254_v16 = vshrl.u32 %v11396_v45, 16  ;;  %v8257_v9 = vshll.u32 %v11396_v45, 16  ;;  %v8271_v56 = vsel %vm16224_vm5, %v8268_v7, %v8270_v55  ;;  %vm16226_vm11 = vmmov %vm16223_vm0 }
 0x7ed   : > { %8276 = vrot.lane.b32.xlu1 %v8267_v11, %s16206_s27  ;;  %v8250_v11 = vrot.slane %v8248_v27, 2  ;;  %v15155_v30 = vsel %vm16223_vm0, %v8233_v58, %v8242_v24  ;;  %v8272_v50 = vrot.slane %v15097_v18, 2  ;;  %v8341_v22 = vrot.slane %v8339_v49, 2  ;;  %vm16228_vm9 = vmmov %vm16223_vm0 }
 0x7ee   : > { %v8256_v0 = vrot.slane %v8254_v16, 1  ;;  %v8259_v3 = vrot.slane %v8257_v9, 2  ;;  %v8328_v57 = vsel %vm16225_vm7, %v8323_v47, %v8327_v34  ;;  %v8336_v51 = vor.u32 %v8335_v2, %v8332_v39  ;;  %vm16235_vm8 = vmmov %vm16217_vm12 }
 0x7ef   : > { %v8251_v14 = vor.u32 %v8250_v11, %v8247_v38  ;;  %v8344_v26 = vrot.slane %v8342_v1, 3  ;;  %v8274_v46 = vrot.slane %v11396_v45, 2  ;;  %v8369_v44 = vrot.slane %v15092_v63, 3  ;;  %v11423_v63 = vld [vmem:[%s15642_s13 + $0x100] sm:$0xff]   ;;  %vm16238_vm0 = vmmov %vm16235_vm8 }
 0x7f0   : > { %8347 = vrot.lane.b32.xlu0 %v8320_v33, %s16206_s27  ;;  %v8260_v18 = vor.u32 %v8259_v3, %v8256_v0  ;;  %v8273_v33 = vsel %vm16227_vm14, %v8270_v55, %v8272_v50  ;;  %v8337_v7 = vsel %vm16229_vm10, %v8327_v34, %v8336_v51  ;;  %v8367_v53 = vrot.slane %v15123_v40, 3 }
 0x7f1   : > { %8278 = vrot.lane.b32.xlu1 %v8269_v48, %s16206_s27  ;;  %v15166_v20 = vsel %vm16226_vm11, %v8242_v24, %v8251_v14  ;;  %v8345_v47 = vor.u32 %v8344_v26, %v8341_v22  ;;  %v8275_v1 = vsel %vm16230_vm13, %v8272_v50, %v8274_v46  ;;  %vm16232_vm15 = vcmask 1044480   ;;  %vm16241_vm11 = vmmov %vm16238_vm0 }
 0x7f2   : > { %v15172_v49 = vsel %vm16228_vm9, %v8251_v14, %v8260_v18  ;;  %v15185_v4 = vsel %vm16232_vm15, %v8367_v53, %v8369_v44  ;;  %v10045_v59 = vcombine.low %v8066_v60, %v14906_v36  ;;  %v8163_v17 = vrot.slane %v14986_v8, 1  ;;  %v11426_v36 = vld [vmem:[%s15642_s13 + $0x108] sm:$0xff]   ;;  %vm16243_vm9 = vmmov %vm16238_vm0  ;;  %v8076_v60 = vld [vmem:[#allocation5 + $0x8] sm:$0x8] }
 0x7f3   : > { %v8346_v52 = vsel %vm16231_vm4, %v8336_v51, %v8345_v47  ;;  %vm16233_vm3 = vcmask 523264   ;;  %v8165_v19 = vrot.slane %v15003_v62, 1  ;;  %v8167_v10 = vrot.slane %v15063_v23, 1 }
 0x7f4   : > { %8349 = vrot.lane.b32.xlu0 %v8324_v37, %s16206_s27  ;;  %v8162_v21 = vrot.slane %v10045_v59, 1  ;;  %vm16234_vm2 = vmmov %vm16233_vm3  ;;  %v8169_v24 = vrot.slane %v15083_v29, 1  ;;  %v8171_v9 = vrot.slane %v15099_v31, 1  ;;  %v8296_v50 = vrot.slane %v15003_v62, 2 }
 0x7f5   : > { %8280 = vrot.lane.b32.xlu1 %v8271_v56, %s16206_s27  ;;  %v8166_v43 = vsel %vm16235_vm8, %v8163_v17, %v8165_v19  ;;  %vm16236_vm1 = vmmov %vm16234_vm2  ;;  %v8168_v37 = vsel %vm16238_vm0, %v8165_v19, %v8167_v10  ;;  %v8295_v22 = vrot.slane %v15073_v12, 2  ;;  %vm16246_vm4 = vcmask 1045504  }
 0x7f6   : > { %v8164_v25 = vsel %vm16217_vm12, %v8162_v21, %v8163_v17  ;;  %vm16237_vm6 = vmmov %vm16236_vm1  ;;  %v8172_v14 = vsel %vm16243_vm9, %v8169_v24, %v8171_v9  ;;  %v8298_v18 = vrot.slane %v15063_v23, 2  ;;  %v8300_v47 = vrot.slane %v15083_v29, 2 }
 0x7f7   : > { %vm16239_vm5 = vmmov %vm16236_vm1  ;;  %v8297_v26 = vsel %vm16246_vm4, %v8295_v22, %v8296_v50  ;;  %v10058_v59 = vcombine.low %v8076_v60, %v14981_v41 }
 0x7f8   : > { %8351 = vrot.lane.b32.xlu0 %v8328_v57, %s16206_s27  ;;  %vm16240_vm7 = vmmov %vm16236_vm1 }
 0x7f9   : > { %8282 = vrot.lane.b32.xlu1 %v8273_v33, %s16206_s27  ;;  %vm16242_vm14 = vmmov %vm16236_vm1 }
 0x7fa   : > { %vm16244_vm10 = vmmov %vm16236_vm1 }
 0x7fb   : > { %vm16245_vm13 = vmmov %vm16236_vm1 }
 0x7fc   : > { %8353 = vrot.lane.b32.xlu0 %v8337_v7, %s16206_s27  ;;  %vm16247_vm15 = vmmov %vm16236_vm1 }
 0x7fd   : > { %8284 = vrot.lane.b32.xlu1 %v8275_v1, %s16206_s27  ;;  %vm16248_vm12 = vmmov %vm16236_vm1 }
 0x7fe   : > { %vm16251_vm8 = vmmov %vm16236_vm1 }
 0x800   : > { %8355 = vrot.lane.b32.xlu0 %v8346_v52, %s16206_s27  ;;  %s594_s27 = scalar_lea.vmem [#allocation6], %s593_s24 }
 0x801   : > { %s9551_s28 = sshll.u32 %s594_s27, 4  ;;  %s15589_s28 = int_to_ptr.vmem [resolvable:$true] %s9551_s28 }
 0x802   : > { %s11469_s2 = scalar_lea.vmem %s15589_s28, 16  ;;  %p11476_p0 = scmp.lt.s32.totalorder %s15589_s28, %s11474_s4 }
 0x803   : > { %p11470_p11 = scmp.ne.s32.totalorder %s15589_s28, %s11469_s2  ;;  %p11477_p1 = scmp.lt.s32.totalorder %s11475_s5, %s11469_s2 }
 0x805   : > { %p11471_p12 = pnand %p11470_p11, %p11679_p5  ;;  %p11478_p2 = por %p11477_p1, %p11476_p0 }
 0x807   : > { %p11472_p13 = pneg %p11471_p12 }
 0x809   : > { %p11479_p3 = pnand %p11478_p2, %p11472_p13 }
 0x83b   : > { %v8150_v13 = vpop.permute.xlu1 %8149 }
 0x83c   : > { %v8372_v5 = vsel %vm16234_vm2, %v14930_v54, %v8150_v13  ;;  %v11432_v54 = vld [vmem:[%s15642_s13 + $0x118] sm:$0xff]   ;;  %vm16250_vm2 = vmmov %vm16236_vm1  ;;  %v8361_v13 = vrot.slane %v15003_v62, 3 }
 0x83f   : > { %v8197_v61 = vpop.permute.xlu0 %8196 }
 0x840   : > { %v8388_v6 = vsel %vm16233_vm3, %v8164_v25, %v8197_v61  ;;  %vm16249_vm3 = vmmov %vm16246_vm4  ;;  %v8360_v61 = vrot.slane %v10058_v59, 3  ;;  %v8302_v25 = vrot.slane %v15123_v40, 2  ;;  %v11435_v40 = vld [vmem:[%s15644_s15 + $0x8] sm:$0xff]  }
 0x841   : > { %8788 = vmatprep.mubr.bf16.mxu0 %v8388_v6  ;;  %v8299_v7 = vsel %vm16249_vm3, %v8296_v50, %v8298_v18  ;;  %vm16252_vm0 = vmmov %vm16249_vm3 }
 0x842   : > { %8789 = vmatmul.mubr.bf16.vlgmr.msra.gmra.mrb[16].mxu0 %v8372_v5  ;;  %v8301_v17 = vsel %vm16252_vm0, %v8298_v18, %v8300_v47  ;;  %vm16257_vm9 = vmmov %vm16252_vm0 }
 0x843   : > { %11092 = vmatpush3.bf16.msra.mxu0 %v11423_v63  ;;  %v8303_v5 = vsel %vm16257_vm9, %v8300_v47, %v8302_v25  ;;  %vm16260_vm4 = vmmov %vm16236_vm1 }
 0x844   : > { %11093 = vmatprep.subr.bf16.mxu0 %v11538_v42  ;;  %vm16263_vm3 = vmmov %vm16236_vm1 }
 0x845   : > { %v8152_v48 = vpop.permute.xlu1 %8151 }
 0x846   : > { %v8375_v55 = vsel %vm16237_vm6, %v14986_v8, %v8152_v48  ;;  %v8170_v8 = vsel %vm16241_vm11, %v8167_v10, %v8169_v24  ;;  %vm11539_vm6 = vmmov 0   ;;  %vm16255_vm11 = vmmov %vm16236_vm1  ;;  %v11442_v24 = vld [vmem:[%s15646_s17] sm:$0xff]  }
 0x847   : > { %11094 = vmatpush3.bf16.msra.mxu0 %v11426_v36  ;;  %v11433_v36 = vld [vmem:[#allocation5 + $0x30] ss:$0 sps:$4 sm:$0x33]  }
 0x848   : > { %11095 = vmatprep.subr.bf16.mxu0 %v11538_v42  ;;  %v8304_v19 = vrot.slane %v11433_v36, 2 }
 0x84b   : > { %11096 = vmatpush3.bf16.msra.mxu0 %v11429_v28  ;;  %v8363_v28 = vrot.slane %v15063_v23, 3 }
 0x84c   : > { %11097 = vmatprep.subr.bf16.mxu0 %v11538_v42 }
 0x84f   : > { %v8199_v45 = vpop.permute.xlu0 %8198  ;;  %11098 = vmatpush3.bf16.msra.mxu0 %v11432_v54 }
 0x850   : > { %v8392_v15 = vsel %vm16236_vm1, %v8166_v43, %v8199_v45  ;;  %11155 = vmatprep.subr.bf16.mxu0 %v11538_v42 }
 0x851   : > { %8796 = vmatprep.mubr.bf16.mxu0 %v8392_v15 }
 0x852   : > { %8797 = vmatmul.mubr.bf16.gmra.mrb[20].mxu0 %v8375_v55  ;;  %v8154_v58 = vpop.permute.xlu1 %8153 }
 0x853   : > { %v8201_v27 = vpop.permute.xlu0 %8200  ;;  %v8378_v39 = vsel %vm16240_vm7, %v15003_v62, %v8154_v58  ;;  %vm16254_vm7 = vcmask 1044480  }
 0x854   : > { %v8396_v34 = vsel %vm16239_vm5, %v8168_v37, %v8201_v27  ;;  %vm16253_vm5 = vmmov %vm16236_vm1  ;;  %v8362_v41 = vsel %vm16254_vm7, %v8360_v61, %v8361_v13  ;;  %v11439_v27 = vld [vmem:[%s15644_s15 + $0x28] sm:$0xff]   ;;  %v11440_v37 = vld [vmem:[%s15644_s15 + $0x30] sm:$0xff]  }
 0x855   : > { %8804 = vmatprep.mubr.bf16.mxu0 %v8396_v34  ;;  %v11441_v34 = vld [vmem:[%s15644_s15 + $0x38] sm:$0xff]  }
 0x856   : > { %v8156_v38 = vpop.permute.xlu1 %8155 }
 0x857   : > { %v8381_v57 = vsel %vm16245_vm13, %v15063_v23, %v8156_v38  ;;  %vm16259_vm13 = vmmov %vm16254_vm7  ;;  %v8365_v23 = vrot.slane %v15083_v29, 3  ;;  %v11443_v38 = vld [vmem:[%s15646_s17 + $0x8] sm:$0xff]  }
 0x858   : > { %v8364_v45 = vsel %vm16259_vm13, %v8361_v13, %v8363_v28 }
 0x85a   : > { %v8203_v2 = vpop.permute.xlu0 %8202  ;;  %8805 = vmatmul.mubr.bf16.gmra.mrb[24].mxu0 %v8378_v39  ;;  %v11444_v39 = vld [vmem:[%s15646_s17 + $0x10] sm:$0xff]  }
 0x85b   : > { %v8400_v11 = vsel %vm16242_vm14, %v8170_v8, %v8203_v2  ;;  %v8158_v16 = vpop.permute.xlu1 %8157  ;;  %vm16256_vm14 = vmmov %vm16236_vm1  ;;  %v11445_v2 = vld [vmem:[%s15646_s17 + $0x18] sm:$0xff]   ;;  %v11446_v8 = vld [vmem:[%s15646_s17 + $0x20] sm:$0xff]  }
 0x85c   : > { %8812 = vmatprep.mubr.bf16.mxu0 %v8400_v11  ;;  %v8384_v52 = vsel %vm16251_vm8, %v15083_v29, %v8158_v16  ;;  %vm16265_vm8 = vmmov %vm16236_vm1  ;;  %v11447_v11 = vld [vmem:[%s15646_s17 + $0x28] sm:$0xff]   ;;  %v11448_v16 = vld [vmem:[%s15646_s17 + $0x30] sm:$0xff]  }
 0x85e   : > { %v8205_v56 = vpop.permute.xlu0 %8204 }
 0x85f   : > { %v8404_v0 = vsel %vm16244_vm10, %v8172_v14, %v8205_v56  ;;  %v8277_v3 = vpop.permute.xlu1 %8276  ;;  %vm16258_vm10 = vmmov %vm16236_vm1 }
 0x860   : > { %v8408_v33 = vsel %vm16248_vm12, %v15145_v32, %v8277_v3  ;;  %vm16262_vm12 = vmmov %vm16252_vm0 }
 0x861   : > { %v8305_v43 = vsel %vm16262_vm12, %v8302_v25, %v8304_v19 }
 0x862   : > { %v8348_v51 = vpop.permute.xlu0 %8347  ;;  %8813 = vmatmul.mubr.bf16.gmra.mrb[28].mxu0 %v8381_v57 }
 0x863   : > { %v8428_v31 = vsel %vm16247_vm15, %v8297_v26, %v8348_v51  ;;  %8820 = vmatprep.mubr.bf16.mxu0 %v8404_v0  ;;  %v8279_v1 = vpop.permute.xlu1 %8278  ;;  %vm16261_vm15 = vmmov %vm16236_vm1 }
 0x864   : > { %8861 = vmatprep.mubr.bf16.mxu1 %v8428_v31  ;;  %v8412_v32 = vsel %vm16236_vm1, %v15151_v35, %v8279_v1 }
 0x865   : > { %8862 = vmatmul.mubr.bf16.vlgmr.msra.gmra.mrb[36].mxu1 %v8408_v33 }
 0x866   : > { %v8350_v12 = vpop.permute.xlu0 %8349 }
 0x867   : > { %v8432_v46 = vsel %vm16250_vm2, %v8299_v7, %v8350_v12  ;;  %v8281_v63 = vpop.permute.xlu1 %8280  ;;  %vm16264_vm2 = vmmov %vm16254_vm7 }
 0x868   : > { %8869 = vmatprep.mubr.bf16.mxu1 %v8432_v46  ;;  %v8416_v35 = vsel %vm16256_vm14, %v15155_v30, %v8281_v63  ;;  %v8366_v55 = vsel %vm16264_vm2, %v8363_v28, %v8365_v23  ;;  %vm16266_vm0 = vmmov %vm16264_vm2 }
 0x869   : > { %v8368_v29 = vsel %vm16266_vm0, %v8365_v23, %v8367_v53  ;;  %vm16268_vm7 = vmmov %vm16236_vm1  ;;  %v11437_v53 = vld [vmem:[%s15644_s15 + $0x18] sm:$0xff]  }
 0x86a   : > { %v8352_v44 = vpop.permute.xlu0 %8351  ;;  %8821 = vmatmul.mubr.bf16.gmra.mrb[32].mxu0 %v8384_v52 }
 0x86b   : > { %11099 = vmatprep.mubr.msk.bf16.mxu0 %vm11539_vm6, %v11538_v42  ;;  %v8436_v21 = vsel %vm16253_vm5, %v8301_v17, %v8352_v44  ;;  %v8283_v54 = vpop.permute.xlu1 %8282  ;;  %vm16267_vm5 = vmmov %vm16236_vm1  ;;  %v15346_v44 = vld [vmem:[%s15643_s14] ss:$0 sm:$0xff] }
 0x86c   : > { %v8420_v30 = vsel %vm16261_vm15, %v15166_v20, %v8283_v54  ;;  %v11434_v20 = vld [vmem:[%s15644_s15] sm:$0xff]  }
 0x86d   : > { %8870 = vmatmul.mubr.bf16.gmra.mrb[40].mxu1 %v8412_v32 }
 0x86e   : > { %8877 = vmatprep.mubr.bf16.mxu1 %v8436_v21  ;;  %v8354_v6 = vpop.permute.xlu0 %8353  ;;  %11120 = vmatpush3.bf16.msra.mxu1 %v11434_v20 }
 0x86f   : > { %v8440_v62 = vsel %vm16258_vm10, %v8303_v5, %v8354_v6  ;;  %v8285_v15 = vpop.permute.xlu1 %8284  ;;  %11121 = vmatprep.subr.bf16.mxu1 %v11538_v42 }
 0x870   : > { %v8424_v58 = vsel %vm16236_vm1, %v15172_v49, %v8285_v15  ;;  %v11436_v49 = vld [vmem:[%s15644_s15 + $0x10] sm:$0xff]  }
 0x872   : > { %11100 = vmatmul.mubr.msk.bf16.vlgmr.msra.gmra.mrb[36].mxu0 %vm16255_vm11, %v8362_v41  ;;  %v8356_v48 = vpop.permute.xlu0 %8355  ;;  %11122 = vmatpush3.bf16.msra.mxu1 %v11435_v40 }
 0x873   : > { %11103 = vmatprep.mubr.msk.bf16.mxu0 %vm11539_vm6, %v11538_v42  ;;  %v8444_v10 = vsel %vm16263_vm3, %v8305_v43, %v8356_v48  ;;  %11123 = vmatprep.subr.bf16.mxu1 %v11538_v42 }
 0x874   : > { %11156 = vmatpush3.bf16.msra.mxu0 %v11442_v24 }
 0x875   : > { %8878 = vmatmul.mubr.bf16.gmra.mrb[44].mxu1 %v8416_v35  ;;  %11157 = vmatprep.subr.bf16.mxu0 %v11538_v42 }
 0x876   : > { %8885 = vmatprep.mubr.bf16.mxu1 %v8440_v62  ;;  %11124 = vmatpush3.bf16.msra.mxu1 %v11436_v49 }
 0x877   : > { %11125 = vmatprep.subr.bf16.mxu1 %v11538_v42 }
 0x878   : > { %11158 = vmatpush3.bf16.msra.mxu0 %v11443_v38 }
 0x879   : > { %11159 = vmatprep.subr.bf16.mxu0 %v11538_v42 }
 0x87a   : > { %11104 = vmatmul.mubr.msk.bf16.gmra.mrb[40].mxu0 %vm16260_vm4, %v8364_v45  ;;  %11126 = vmatpush3.bf16.msra.mxu1 %v11437_v53 }
 0x87b   : > { %11107 = vmatprep.mubr.msk.bf16.mxu0 %vm11539_vm6, %v11538_v42  ;;  %11127 = vmatprep.subr.bf16.mxu1 %v11538_v42 }
 0x87c   : > { %11160 = vmatpush3.bf16.msra.mxu0 %v11444_v39 }
 0x87d   : > { %8886 = vmatmul.mubr.bf16.gmra.mrb[48].mxu1 %v8420_v30  ;;  %11161 = vmatprep.subr.bf16.mxu0 %v11538_v42 }
 0x87e   : > { %8893 = vmatprep.mubr.bf16.mxu1 %v8444_v10 }
 0x880   : > { %11162 = vmatpush3.bf16.msra.mxu0 %v11445_v2 }
 0x881   : > { %11163 = vmatprep.subr.bf16.mxu0 %v11538_v42 }
 0x882   : > { %11108 = vmatmul.mubr.msk.bf16.gmra.mrb[44].mxu0 %vm16265_vm8, %v8366_v55 }
 0x883   : > { %11111 = vmatprep.mubr.msk.bf16.mxu0 %vm11539_vm6, %v11538_v42 }
 0x884   : > { %11164 = vmatpush3.bf16.msra.mxu0 %v11446_v8 }
 0x885   : > { %8894 = vmatmul.mubr.bf16.gmra.mrb[52].mxu1 %v8424_v58  ;;  %11165 = vmatprep.subr.bf16.mxu0 %v11538_v42 }
 0x886   : > { %11135 = vmatprep.mubr.msk.bf16.mxu1 %vm11539_vm6, %v11538_v42 }
 0x888   : > { %11166 = vmatpush3.bf16.msra.mxu0 %v11447_v11 }
 0x889   : > { %11167 = vmatprep.subr.bf16.mxu0 %v11538_v42 }
 0x88a   : > { %11112 = vmatmul.mubr.msk.bf16.gmra.mrb[48].mxu0 %vm16267_vm5, %v8368_v29  ;;  %vm9509_vm5 = vcmask 80896  }
 0x88b   : > { %11115 = vmatprep.mubr.msk.bf16.mxu0 %vm11539_vm6, %v11538_v42 }
 0x88c   : > { %11168 = vmatpush3.bf16.msra.mxu0 %v11448_v16 }
 0x88d   : > { %11169 = vmatprep.subr.bf16.mxu0 %v11538_v42 }
 0x892   : > { %11116 = vmatmul.mubr.msk.bf16.gmra.mrb[52].mxu0 %vm16268_vm7, %v15185_v4  ;;  %v11438_v4 = vld [vmem:[%s15644_s15 + $0x20] sm:$0xff]  }
 0x893   : > { %11171 = vmatprep.mubr.msk.bf16.mxu0 %vm11539_vm6, %v11538_v42  ;;  %11128 = vmatpush3.bf16.msra.mxu1 %v11438_v4 }
 0x894   : > { %11129 = vmatprep.subr.bf16.mxu1 %v11538_v42 }
 0x897   : > { %11130 = vmatpush3.bf16.msra.mxu1 %v11439_v27 }
 0x898   : > { %11131 = vmatprep.subr.bf16.mxu1 %v11538_v42 }
 0x89b   : > { %11132 = vmatpush3.bf16.msra.mxu1 %v11440_v37 }
 0x89c   : > { %11133 = vmatprep.subr.bf16.mxu1 %v11538_v42 }
 0x89f   : > { %11134 = vmatpush3.bf16.msra.mxu1 %v11441_v34 }
 0x915   : > { %v10450_v9 = vpop.f32.mrb[16].mxu0 }
 0x916   : > { %v10451_v56 = vpop.f32.mrb[17].mxu0 }
 0x917   : > { %v10452_v50 = vadd.f32 %v10451_v56, %v10450_v9  ;;  %v10453_v14 = vpop.f32.mrb[18].mxu0 }
 0x918   : > { %v10454_v22 = vpop.f32.mrb[19].mxu0 }
 0x919   : > { %v10455_v0 = vadd.f32 %v10454_v22, %v10453_v14  ;;  %v8791_v61 = vadd.f32 %v10452_v50, %v15346_v44 }
 0x91b   : > { %v8794_v35 = vadd.f32 %v10455_v0, %v15346_v44 }
 0x925   : > { %v10456_v3 = vpop.f32.mrb[20].mxu0 }
 0x926   : > { %v10457_v57 = vpop.f32.mrb[21].mxu0 }
 0x927   : > { %v10458_v51 = vadd.f32 %v10457_v57, %v10456_v3  ;;  %v10459_v26 = vpop.f32.mrb[22].mxu0 }
 0x928   : > { %v10460_v18 = vpop.f32.mrb[23].mxu0 }
 0x929   : > { %v10461_v31 = vadd.f32 %v10460_v18, %v10459_v26  ;;  %v8799_v10 = vadd.f32 %v10458_v51, %v15346_v44 }
 0x92b   : > { %v8802_v29 = vadd.f32 %v10461_v31, %v15346_v44 }
 0x92d   : > { %v10462_v33 = vpop.f32.mrb[24].mxu0 }
 0x92e   : > { %v10463_v12 = vpop.f32.mrb[25].mxu0 }
 0x92f   : > { %v10464_v7 = vadd.f32 %v10463_v12, %v10462_v33  ;;  %v10465_v46 = vpop.f32.mrb[26].mxu0 }
 0x930   : > { %v10466_v47 = vpop.f32.mrb[27].mxu0 }
 0x931   : > { %v10467_v1 = vadd.f32 %v10466_v47, %v10465_v46  ;;  %v8807_v2 = vadd.f32 %v10464_v7, %v15346_v44 }
 0x933   : > { %v8810_v50 = vadd.f32 %v10467_v1, %v15346_v44 }
 0x935   : > { %v10468_v52 = vpop.f32.mrb[28].mxu0 }
 0x936   : > { %v10469_v60 = vpop.f32.mrb[29].mxu0 }
 0x937   : > { %v10470_v59 = vadd.f32 %v10469_v60, %v10468_v52  ;;  %v10471_v32 = vpop.f32.mrb[30].mxu0 }
 0x938   : > { %v10496_v17 = vpop.f32.mrb[36].mxu1  ;;  %v10472_v21 = vpop.f32.mrb[31].mxu0 }
 0x939   : > { %v10497_v13 = vpop.f32.mrb[37].mxu1  ;;  %v10473_v25 = vadd.f32 %v10472_v21, %v10471_v32  ;;  %v8815_v46 = vadd.f32 %v10470_v59, %v15346_v44 }
 0x93a   : > { %v10498_v63 = vadd.f32 %v10497_v13, %v10496_v17  ;;  %v10499_v41 = vpop.f32.mrb[38].mxu1 }
 0x93b   : > { %v10500_v6 = vpop.f32.mrb[39].mxu1  ;;  %v8818_v17 = vadd.f32 %v10473_v25, %v15346_v44 }
 0x93c   : > { %v10501_v5 = vadd.f32 %v10500_v6, %v10499_v41  ;;  %v8864_v36 = vadd.f32 %v10498_v63, %v8791_v61 }
 0x93d   : > { %v10474_v62 = vpop.f32.mrb[32].mxu0 }
 0x93e   : > { %v8867_v28 = vadd.f32 %v10501_v5, %v8794_v35  ;;  %v10475_v19 = vpop.f32.mrb[33].mxu0 }
 0x93f   : > { %v15350_v54 = vadd.f32 %v10475_v19, %v10474_v62  ;;  %v10477_v48 = vpop.f32.mrb[34].mxu0 }
 0x940   : > { %v10502_v45 = vpop.f32.mrb[40].mxu1  ;;  %v10478_v30 = vpop.f32.mrb[35].mxu0 }
 0x941   : > { %v10503_v43 = vpop.f32.mrb[41].mxu1  ;;  %v15353_v23 = vadd.f32 %v10478_v30, %v10477_v48  ;;  %v8823_v19 = vadd.f32 %v15350_v54, %v15346_v44 }
 0x942   : > { %v10504_v15 = vadd.f32 %v10503_v43, %v10502_v45  ;;  %v10505_v55 = vpop.f32.mrb[42].mxu1 }
 0x943   : > { %v10506_v58 = vpop.f32.mrb[43].mxu1 }
 0x944   : > { %v10507_v20 = vadd.f32 %v10506_v58, %v10505_v55  ;;  %v8872_v40 = vadd.f32 %v10504_v15, %v8799_v10  ;;  %v8826_v10 = vadd.f32 %v15353_v23, %v15346_v44 }
 0x945   : > { %v8936_v49 = vpop.f32.mrb[36].mxu0 }
 0x946   : > { %v8875_v53 = vadd.f32 %v10507_v20, %v8802_v29  ;;  %v8937_v4 = vadd.f32 %v8936_v49, %v8864_v36  ;;  %v11101_v27 = vpop.f32.mrb[37].mxu0 }
 0x947   : > { %v8939_v37 = vpop.f32.mrb[38].mxu0 }
 0x948   : > { %v10508_v34 = vpop.f32.mrb[44].mxu1  ;;  %v8940_v24 = vadd.f32 %v8939_v37, %v8867_v28  ;;  %v11102_v38 = vpop.f32.mrb[39].mxu0  ;;  %v8975_v16 = vmax.f32 %v8937_v4, 0.0 }
 0x949   : > { %v10509_v39 = vpop.f32.mrb[45].mxu1 }
 0x94a   : > { %v10510_v8 = vadd.f32 %v10509_v39, %v10508_v34  ;;  %v10511_v11 = vpop.f32.mrb[46].mxu1  ;;  %v8976_v9 = vmax.f32 %v8940_v24, 0.0 }
 0x94b   : > { %v10512_v56 = vpop.f32.mrb[47].mxu1 }
 0x94c   : > { %v10513_v14 = vadd.f32 %v10512_v56, %v10511_v11  ;;  %v8880_v22 = vadd.f32 %v10510_v8, %v8807_v2  ;;  %v8985_v0 = vpack.c.bf16 %v8976_v9, %v8975_v16  ;;  %v11449_v9 = vld [vmem:[%s15646_s17 + $0x38] sm:$0xff]   ;;  %v10101_v56 = vld [vmem:[%s15645_s16] ss:$0 sm:$0xff] }
 0x94d   : > { %v8944_v3 = vpop.f32.mrb[40].mxu0  ;;  %11170 = vmatpush3.bf16.msra.mxu0 %v11449_v9 }
 0x94e   : > { %v8883_v57 = vadd.f32 %v10513_v14, %v8810_v50  ;;  %v8945_v51 = vadd.f32 %v8944_v3, %v8872_v40  ;;  %v11105_v26 = vpop.f32.mrb[41].mxu0  ;;  %11136 = vmatmul.mubr.bf16.vlgmr.msra.gmra.mrb[56].mxu1 %v8985_v0 }
 0x94f   : > { %v8947_v18 = vpop.f32.mrb[42].mxu0  ;;  %11139 = vmatprep.mubr.msk.bf16.mxu1 %vm11539_vm6, %v11538_v42 }
 0x950   : > { %v10514_v31 = vpop.f32.mrb[48].mxu1  ;;  %v8948_v33 = vadd.f32 %v8947_v18, %v8875_v53  ;;  %v11106_v12 = vpop.f32.mrb[43].mxu0  ;;  %v8977_v52 = vmax.f32 %v8945_v51, 0.0 }
 0x951   : > { %v10515_v7 = vpop.f32.mrb[49].mxu1 }
 0x952   : > { %v10516_v47 = vadd.f32 %v10515_v7, %v10514_v31  ;;  %v10517_v1 = vpop.f32.mrb[50].mxu1  ;;  %v8978_v60 = vmax.f32 %v8948_v33, 0.0 }
 0x953   : > { %v10518_v32 = vpop.f32.mrb[51].mxu1 }
 0x954   : > { %v10519_v21 = vadd.f32 %v10518_v32, %v10517_v1  ;;  %v8888_v13 = vadd.f32 %v10516_v47, %v8815_v46  ;;  %v8986_v61 = vpack.c.bf16 %v8978_v60, %v8977_v52 }
 0x955   : > { %v8952_v63 = vpop.f32.mrb[44].mxu0 }
 0x956   : > { %v8891_v41 = vadd.f32 %v10519_v21, %v8818_v17  ;;  %v8953_v6 = vadd.f32 %v8952_v63, %v8880_v22  ;;  %v11109_v35 = vpop.f32.mrb[45].mxu0  ;;  %11140 = vmatmul.mubr.bf16.gmra.mrb[60].mxu1 %v8986_v61 }
 0x957   : > { %v8955_v5 = vpop.f32.mrb[46].mxu0  ;;  %11143 = vmatprep.mubr.msk.bf16.mxu1 %vm11539_vm6, %v11538_v42 }
 0x958   : > { %v10520_v36 = vpop.f32.mrb[52].mxu1  ;;  %v8956_v59 = vadd.f32 %v8955_v5, %v8883_v57  ;;  %v11110_v62 = vpop.f32.mrb[47].mxu0  ;;  %v8979_v45 = vmax.f32 %v8953_v6, 0.0 }
 0x959   : > { %v10521_v28 = vpop.f32.mrb[53].mxu1 }
 0x95a   : > { %v10522_v25 = vadd.f32 %v10521_v28, %v10520_v36  ;;  %v10523_v48 = vpop.f32.mrb[54].mxu1  ;;  %v8980_v30 = vmax.f32 %v8956_v59, 0.0 }
 0x95b   : > { %v10524_v43 = vpop.f32.mrb[55].mxu1 }
 0x95c   : > { %v10525_v15 = vadd.f32 %v10524_v43, %v10523_v48  ;;  %v8896_v55 = vadd.f32 %v10522_v25, %v8823_v19  ;;  %v8987_v58 = vpack.c.bf16 %v8980_v30, %v8979_v45 }
 0x95d   : > { %v8960_v29 = vpop.f32.mrb[48].mxu0 }
 0x95e   : > { %v8899_v20 = vadd.f32 %v10525_v15, %v8826_v10  ;;  %v8961_v40 = vadd.f32 %v8960_v29, %v8888_v13  ;;  %v11113_v49 = vpop.f32.mrb[49].mxu0  ;;  %11144 = vmatmul.mubr.bf16.gmra.mrb[64].mxu1 %v8987_v58 }
 0x95f   : > { %v8963_v53 = vpop.f32.mrb[50].mxu0  ;;  %11147 = vmatprep.mubr.msk.bf16.mxu1 %vm11539_vm6, %v11538_v42  ;;  %v9318_v49 = vlaneseq }
 0x960   : > { %v8964_v54 = vadd.f32 %v8963_v53, %v8891_v41  ;;  %v11114_v4 = vpop.f32.mrb[51].mxu0  ;;  %v8981_v27 = vmax.f32 %v8961_v40, 0.0 }
 0x961   : > { %v15386_v53 = vshrl.u32 %v9318_v49, 7 }
 0x962   : > { %v8982_v37 = vmax.f32 %v8964_v54, 0.0 }
 0x963   : > { %v9320_v54 = vadd.s32 8, %v15386_v53 }
 0x964   : > { %v8988_v34 = vpack.c.bf16 %v8982_v37, %v8981_v27  ;;  %v15390_v4 = vmul.u32.u64.low 3435973837, %v15386_v53  ;;  %v15391_v27 = vmul.u32.u64.high 3435973837, %v15386_v53, %v15390_v4 }
 0x965   : > { %v8968_v24 = vpop.f32.mrb[52].mxu0 }
 0x966   : > { %v8969_v38 = vadd.f32 %v8968_v24, %v8896_v55  ;;  %v11117_v44 = vpop.f32.mrb[53].mxu0  ;;  %11148 = vmatmul.mubr.bf16.gmra.mrb[68].mxu1 %v8988_v34  ;;  %v15393_v37 = vmul.u32.u64.low 3435973837, %v9320_v54  ;;  %v15394_v34 = vmul.u32.u64.high 3435973837, %v9320_v54, %v15393_v37  ;;  %v9322_v24 = vadd.s32 24, %v15386_v53 }
 0x967   : > { %v8971_v23 = vpop.f32.mrb[54].mxu0  ;;  %11151 = vmatprep.mubr.msk.bf16.mxu1 %vm11539_vm6, %v11538_v42 }
 0x968   : > { %v8972_v39 = vadd.f32 %v8971_v23, %v8899_v20  ;;  %v11118_v2 = vpop.f32.mrb[55].mxu0  ;;  %v8983_v8 = vmax.f32 %v8969_v38, 0.0  ;;  %v9335_v38 = vshrl.u32 %v15391_v27, 3 }
 0x96a   : > { %v8984_v11 = vmax.f32 %v8972_v39, 0.0  ;;  %v9346_v39 = vshrl.u32 %v15394_v34, 3  ;;  %v9336_v9 = vmul.u32 10, %v9335_v38 }
 0x96c   : > { %v8989_v16 = vpack.c.bf16 %v8984_v11, %v8983_v8  ;;  %v15403_v2 = vmul.u32.u64.low 3435973837, %v9322_v24  ;;  %v15404_v8 = vmul.u32.u64.high 3435973837, %v9322_v24, %v15403_v2  ;;  %v9323_v11 = vadd.s32 32, %v15386_v53 }
 0x96e   : > { %11152 = vmatmul.mubr.bf16.gmra.mrb[72].mxu1 %v8989_v16  ;;  %v9324_v16 = vadd.s32 40, %v15386_v53 }
 0xa21   : > { %v9095_v50 = vpop.f32.mrb[56].mxu1 }
 0xa22   : > { %v9096_v14 = vadd.f32 %v10101_v56, %v9095_v50  ;;  %v11137_v22 = vpop.f32.mrb[57].mxu1 }
 0xa23   : > { %v9098_v0 = vpop.f32.mrb[58].mxu1 }
 0xa24   : > { %v9099_v3 = vadd.f32 %v10101_v56, %v9098_v0  ;;  %v11138_v57 = vpop.f32.mrb[59].mxu1  ;;  %v9134_v51 = vmax.f32 %v9096_v14, 0.0  ;;  %v15408_v50 = vmul.u32.u64.low 3435973837, %v9323_v11  ;;  %v15409_v14 = vmul.u32.u64.high 3435973837, %v9323_v11, %v15408_v50 }
 0xa25   : > { %v15411_v22 = vmul.u32.u64.low 3435973837, %v9324_v16  ;;  %v15412_v0 = vmul.u32.u64.high 3435973837, %v9324_v16, %v15411_v22 }
 0xa26   : > { %v9135_v26 = vmax.f32 %v9099_v3, 0.0  ;;  %v9337_v3 = vsub.s32 %v15386_v53, %v9336_v9 }
 0xa28   : > { %v9144_v18 = vpack.c.bf16 %v9135_v26, %v9134_v51  ;;  %v9368_v26 = vshrl.u32 %v15404_v8, 3  ;;  %vm9449_vm11 = vcmp.lt.s32.totalorder %v9337_v3, 0 }
 0xa29   : > { %v9103_v31 = vpop.f32.mrb[60].mxu1 }
 0xa2a   : > { %v9104_v33 = vadd.f32 %v10101_v56, %v9103_v31  ;;  %v11141_v12 = vpop.f32.mrb[61].mxu1  ;;  %11172 = vmatmul.mubr.bf16.vlgmr.msra.gmra.mrb[56].mxu0 %v9144_v18  ;;  %v15418_v18 = vadd.s32 48, %v15386_v53 }
 0xa2b   : > { %v9106_v7 = vpop.f32.mrb[62].mxu1  ;;  %11175 = vmatprep.mubr.msk.bf16.mxu0 %vm11539_vm6, %v11538_v42  ;;  %v15426_v12 = vld [vmem:[%s15647_s18] ss:$0 sm:$0xff] }
 0xa2c   : > { %v9107_v46 = vadd.f32 %v10101_v56, %v9106_v7  ;;  %v11142_v47 = vpop.f32.mrb[63].mxu1  ;;  %v9136_v1 = vmax.f32 %v9104_v33, 0.0  ;;  %v15421_v33 = vadd.s32 56, %v15386_v53  ;;  %v9369_v7 = vmul.u32 10, %v9368_v26 }
 0xa2e   : > { %v9137_v52 = vmax.f32 %v9107_v46, 0.0  ;;  %v9469_v46 = vadd.s32 10, %v9337_v3 }
 0xa30   : > { %v9145_v60 = vpack.c.bf16 %v9137_v52, %v9136_v1 }
 0xa31   : > { %v9111_v32 = vpop.f32.mrb[64].mxu1 }
 0xa32   : > { %v9112_v17 = vadd.f32 %v10101_v56, %v9111_v32  ;;  %v11145_v21 = vpop.f32.mrb[65].mxu1  ;;  %11176 = vmatmul.mubr.bf16.gmra.mrb[60].mxu0 %v9145_v60  ;;  %v9379_v60 = vshrl.u32 %v15409_v14, 3  ;;  %v9390_v32 = vshrl.u32 %v15412_v0, 3 }
 0xa33   : > { %v9114_v13 = vpop.f32.mrb[66].mxu1  ;;  %11179 = vmatprep.mubr.msk.bf16.mxu0 %vm11539_vm6, %v11538_v42 }
 0xa34   : > { %v9115_v61 = vadd.f32 %v10101_v56, %v9114_v13  ;;  %v11146_v63 = vpop.f32.mrb[67].mxu1  ;;  %v9138_v41 = vmax.f32 %v9112_v17, 0.0  ;;  %v15435_v17 = vmul.u32.u64.low 3435973837, %v15418_v18  ;;  %v15436_v21 = vmul.u32.u64.high 3435973837, %v15418_v18, %v15435_v17 }
 0xa36   : > { %v9139_v6 = vmax.f32 %v9115_v61, 0.0  ;;  %v9401_v4 = vshrl.u32 %v15436_v21, 3 }
 0xa38   : > { %v9146_v35 = vpack.c.bf16 %v9139_v6, %v9138_v41  ;;  %v9402_v50 = vmul.u32 10, %v9401_v4 }
 0xa39   : > { %v9119_v5 = vpop.f32.mrb[68].mxu1 }
 0xa3a   : > { %v9120_v36 = vadd.f32 %v10101_v56, %v9119_v5  ;;  %v11149_v59 = vpop.f32.mrb[69].mxu1  ;;  %11180 = vmatmul.mubr.bf16.gmra.mrb[64].mxu0 %v9146_v35  ;;  %v15444_v6 = vmul.u32.u64.low 3435973837, %v15421_v33  ;;  %v15445_v35 = vmul.u32.u64.high 3435973837, %v15421_v33, %v15444_v6  ;;  %v9403_v63 = vsub.s32 %v15418_v18, %v9402_v50 }
 0xa3b   : > { %v9122_v62 = vpop.f32.mrb[70].mxu1  ;;  %11183 = vmatprep.mubr.msk.bf16.mxu0 %vm11539_vm6, %v11538_v42 }
 0xa3c   : > { %v9123_v28 = vadd.f32 %v10101_v56, %v9122_v62  ;;  %v11150_v19 = vpop.f32.mrb[71].mxu1  ;;  %v9140_v25 = vmax.f32 %v9120_v36, 0.0  ;;  %v9370_v36 = vsub.s32 %v9322_v24, %v9369_v7  ;;  %v9412_v38 = vshrl.u32 %v15445_v35, 3 }
 0xa3e   : > { %v9141_v48 = vmax.f32 %v9123_v28, 0.0  ;;  %vm9442_vm12 = vcmp.ne.s32.totalorder %v9370_v36, 0  ;;  %vm9452_vm3 = vcmp.lt.s32.totalorder %v9370_v36, 0  ;;  %v9472_v49 = vadd.s32 10, %v9370_v36 }
 0xa3f   : > { %vm15478_vm0 = vmand %vm9452_vm3, %vm9442_vm12  ;;  %vm9455_vm3 = vcmp.lt.s32.totalorder %v9403_v63, 0 }
 0xa40   : > { %v9147_v45 = vpack.c.bf16 %v9141_v48, %v9140_v25  ;;  %v9380_v25 = vmul.u32 10, %v9379_v60  ;;  %v9391_v48 = vmul.u32 10, %v9390_v32 }
 0xa41   : > { %v9127_v30 = vpop.f32.mrb[72].mxu1 }
 0xa42   : > { %v9128_v43 = vadd.f32 %v10101_v56, %v9127_v30  ;;  %v11153_v10 = vpop.f32.mrb[73].mxu1  ;;  %11184 = vmatmul.mubr.bf16.gmra.mrb[68].mxu0 %v9147_v45 }
 0xa43   : > { %v9130_v15 = vpop.f32.mrb[74].mxu1  ;;  %11187 = vmatprep.mubr.msk.bf16.mxu0 %vm11539_vm6, %v11538_v42  ;;  %v9321_v42 = vadd.s32 16, %v15386_v53  ;;  %vm9439_vm6 = vcmp.ne.s32.totalorder %v9337_v3, 0  ;;  %v15456_v10 = vadd.s32 72, %v15386_v53 }
 0xa44   : > { %v9131_v55 = vadd.f32 %v10101_v56, %v9130_v15  ;;  %v11154_v58 = vpop.f32.mrb[75].mxu1  ;;  %v9142_v29 = vmax.f32 %v9128_v43, 0.0  ;;  %v9347_v56 = vmul.u32 10, %v9346_v39  ;;  %vm15428_vm10 = vmand %vm9449_vm11, %vm9439_vm6  ;;  %v15453_v43 = vadd.s32 64, %v15386_v53 }
 0xa45   : > { %v15399_v44 = vmul.u32.u64.low 3435973837, %v9321_v42  ;;  %v15400_v23 = vmul.u32.u64.high 3435973837, %v9321_v42, %v15399_v44  ;;  %v9479_v28 = vsel %vm15428_vm10, %v9469_v46, %v9337_v3  ;;  %v15472_v53 = vsub.s32 %v9324_v16, %v9391_v48 }
 0xa46   : > { %v9143_v20 = vmax.f32 %v9131_v55, 0.0  ;;  %v9348_v51 = vsub.s32 %v9320_v54, %v9347_v56  ;;  %vm15458_vm2 = vcmp.lt.s32.totalorder %v9479_v28, 8  ;;  %v15470_v54 = vsub.s32 %v9323_v11, %v9380_v25 }
 0xa47   : > { %v9357_v57 = vshrl.u32 %v15400_v23, 3  ;;  %v15484_v23 = vmul.u32.u64.low 3435973837, %v15453_v43  ;;  %v15485_v39 = vmul.u32.u64.high 3435973837, %v15453_v43, %v15484_v23  ;;  %v9482_v56 = vsel %vm15478_vm0, %v9472_v49, %v9370_v36 }
 0xa48   : > { %v9148_v40 = vpack.c.bf16 %v9143_v20, %v9142_v29  ;;  %vm9440_vm14 = vcmp.ne.s32.totalorder %v9348_v51, 0  ;;  %vm9450_vm9 = vcmp.lt.s32.totalorder %v9348_v51, 0  ;;  %v9470_v47 = vadd.s32 10, %v9348_v51 }
 0xa49   : > { %v9358_v31 = vmul.u32 10, %v9357_v57  ;;  %vm15439_vm13 = vmand %vm9450_vm9, %vm9440_vm14  ;;  %v15488_v2 = vmul.u32.u64.low 3435973837, %v15456_v10  ;;  %v15489_v8 = vmul.u32.u64.high 3435973837, %v15456_v10, %v15488_v2  ;;  %vm9443_vm7 = vcmp.ne.s32.totalorder %v15470_v54, 0 }
 0xa4a   : > { %11188 = vmatmul.mubr.bf16.gmra.mrb[72].mxu0 %v9148_v40  ;;  %v9480_v19 = vsel %vm15439_vm13, %v9470_v47, %v9348_v51  ;;  %vm9453_vm6 = vcmp.lt.s32.totalorder %v15470_v54, 0  ;;  %vm9444_vm11 = vcmp.ne.s32.totalorder %v15472_v53, 0  ;;  %vm9454_vm14 = vcmp.lt.s32.totalorder %v15472_v53, 0 }
 0xa4b   : > { %v9359_v41 = vsub.s32 %v9321_v42, %v9358_v31  ;;  %vm15462_vm8 = vcmp.lt.s32.totalorder %v9480_v19, 8  ;;  %v9413_v57 = vmul.u32 10, %v9412_v38  ;;  %vm15508_vm10 = vcmp.lt.s32.totalorder %v9482_v56, 8  ;;  %vm15518_vm13 = vmand %vm9453_vm6, %vm9443_vm7 }
 0xa4c   : > { %v9473_v52 = vadd.s32 10, %v15470_v54  ;;  %v9474_v60 = vadd.s32 10, %v15472_v53  ;;  %v9423_v35 = vshrl.u32 %v15485_v39, 3  ;;  %v9475_v49 = vadd.s32 10, %v9403_v63 }
 0xa4d   : > { %vm9441_vm4 = vcmp.ne.s32.totalorder %v9359_v41, 0  ;;  %vm9451_vm15 = vcmp.lt.s32.totalorder %v9359_v41, 0  ;;  %v9471_v29 = vadd.s32 10, %v9359_v41  ;;  %v9414_v6 = vsub.s32 %v15421_v33, %v9413_v57 }
 0xa4e   : > { %vm15466_vm1 = vmand %vm9451_vm15, %vm9441_vm4  ;;  %v9483_v18 = vsel %vm15518_vm13, %v9473_v52, %v15470_v54  ;;  %vm9445_vm15 = vcmp.ne.s32.totalorder %v9403_v63, 0  ;;  %v9424_v55 = vmul.u32 10, %v9423_v35 }
 0xa4f   : > { %v9481_v16 = vsel %vm15466_vm1, %v9471_v29, %v9359_v41  ;;  %vm15529_vm4 = vmand %vm9454_vm14, %vm9444_vm11  ;;  %vm9446_vm12 = vcmp.ne.s32.totalorder %v9414_v6, 0 }
 0xa50   : > { %vm15504_vm9 = vcmp.lt.s32.totalorder %v9481_v16, 8  ;;  %v9484_v33 = vsel %vm15529_vm4, %v9474_v60, %v15472_v53  ;;  %vm15552_vm0 = vmand %vm9455_vm3, %vm9445_vm15  ;;  %v9425_v38 = vsub.s32 %v15453_v43, %v9424_v55 }
 0xa51   : > { %vm9494_vm1 = vcmp.lt.s32.totalorder %v9484_v33, 8  ;;  %v9485_v16 = vsel %vm15552_vm0, %v9475_v49, %v9403_v63 }
 0xa52   : > { %vm9447_vm6 = vcmp.ne.s32.totalorder %v9425_v38, 0  ;;  %vm9457_vm11 = vcmp.lt.s32.totalorder %v9425_v38, 0 }
 0xa53   : > { %vm15571_vm4 = vmand %vm9457_vm11, %vm9447_vm6 }
 0xafd   : > { %v9254_v1 = vpop.f32.mrb[56].mxu0 }
 0xafe   : > { %v9255_v13 = vadd.f32 %v15426_v12, %v9254_v1  ;;  %v11173_v61 = vpop.f32.mrb[57].mxu0 }
 0xaff   : > { %v9257_v5 = vpop.f32.mrb[58].mxu0 }
 0xb00   : > { %v9258_v59 = vadd.f32 %v15426_v12, %v9257_v5  ;;  %v11174_v62 = vpop.f32.mrb[59].mxu0  ;;  %v9293_v45 = vmax.f32 %v9255_v13, 0.0  ;;  %v9434_v5 = vshrl.u32 %v15489_v8, 3 }
 0xb02   : > { %v9294_v30 = vmax.f32 %v9258_v59, 0.0 }
 0xb04   : > { %v9303_v15 = vpack.c.bf16 %v9294_v30, %v9293_v45 }
 0xb05   : > { %v9262_v20 = vpop.f32.mrb[60].mxu0 }
 0xb06   : > { %v9308_v27 = vunpack.c.l.bf16 %v9303_v15  ;;  %v9309_v37 = vunpack.c.h.bf16 %v9303_v15  ;;  %v9263_v34 = vadd.f32 %v15426_v12, %v9262_v20  ;;  %v11177_v42 = vpop.f32.mrb[61].mxu0  ;;  %v9435_v20 = vmul.u32 10, %v9434_v5 }
 0xb07   : > { %v9265_v44 = vpop.f32.mrb[62].mxu0 }
 0xb08   : > { %v9266_v11 = vadd.f32 %v15426_v12, %v9265_v44  ;;  %v11178_v9 = vpop.f32.mrb[63].mxu0  ;;  %v9499_v14 = vsel %vm15458_vm2, %v9308_v27, 0.0  ;;  %v9500_v22 = vsel %vm15462_vm8, %v9309_v37, 0.0  ;;  %v9295_v0 = vmax.f32 %v9263_v34, 0.0 }
 0xb09   : > { %v9510_v7 = vsel %vm9509_vm5, %v9499_v14, 0.0  ;;  %v9511_v46 = vsel %vm9509_vm5, %v9500_v22, 0.0  ;;  %vm9456_vm2 = vcmp.lt.s32.totalorder %v9414_v6, 0  ;;  %vm9493_vm8 = vcmp.lt.s32.totalorder %v9483_v18, 8 }
 0xb0a   : > { %v9296_v3 = vmax.f32 %v9266_v11, 0.0  ;;  %v9512_v36 = vadd.f32 %v9511_v46, %v9510_v7  ;;  %v9476_v34 = vadd.s32 10, %v9414_v6  ;;  %vm15557_vm7 = vmand %vm9456_vm2, %vm9446_vm12  ;;  %v9436_v8 = vsub.s32 %v15456_v10, %v9435_v20 }
 0xb0b   : > { %vm9536_vm2 = vcmask 73728  }
 0xb0c   : > { %v9304_v51 = vpack.c.bf16 %v9296_v3, %v9295_v0  ;;  %v9486_v14 = vsel %vm15557_vm7, %v9476_v34, %v9414_v6  ;;  %vm9448_vm14 = vcmp.ne.s32.totalorder %v9436_v8, 0  ;;  %v9477_v3 = vadd.s32 10, %v9425_v38 }
 0xb0d   : > { %v9270_v47 = vpop.f32.mrb[64].mxu0  ;;  %vm9496_vm13 = vcmp.lt.s32.totalorder %v9486_v14, 8  ;;  %v9478_v46 = vadd.s32 10, %v9436_v8 }
 0xb0e   : > { %v9310_v32 = vunpack.c.l.bf16 %v9304_v51  ;;  %v9311_v17 = vunpack.c.h.bf16 %v9304_v51  ;;  %v9271_v21 = vadd.f32 %v15426_v12, %v9270_v47  ;;  %v11181_v13 = vpop.f32.mrb[65].mxu0 }
 0xb0f   : > { %v9273_v41 = vpop.f32.mrb[66].mxu0 }
 0xb10   : > { %v9501_v59 = vsel %vm15504_vm9, %v9310_v32, 0.0  ;;  %v9502_v62 = vsel %vm15508_vm10, %v9311_v17, 0.0  ;;  %v9274_v28 = vadd.f32 %v15426_v12, %v9273_v41  ;;  %v11182_v19 = vpop.f32.mrb[67].mxu0  ;;  %v9297_v45 = vmax.f32 %v9271_v21, 0.0 }
 0xb11   : > { %v9513_v25 = vsel %vm9509_vm5, %v9501_v59, 0.0  ;;  %v9515_v15 = vsel %vm9509_vm5, %v9502_v62, 0.0  ;;  %vm9458_vm9 = vcmp.lt.s32.totalorder %v9436_v8, 0  ;;  %vm9495_vm10 = vcmp.lt.s32.totalorder %v9485_v16, 8 }
 0xb12   : > { %v9514_v48 = vadd.f32 %v9513_v25, %v9512_v36  ;;  %v9298_v30 = vmax.f32 %v9274_v28, 0.0  ;;  %vm9468_vm15 = vmand %vm9458_vm9, %vm9448_vm14  ;;  %v9487_v21 = vsel %vm15571_vm4, %v9477_v3, %v9425_v38 }
 0xb13   : > { %v9488_v41 = vsel %vm9468_vm15, %v9478_v46, %v9436_v8  ;;  %vm9497_vm12 = vcmp.lt.s32.totalorder %v9487_v21, 8 }
 0xb14   : > { %v9516_v58 = vadd.f32 %v9515_v15, %v9514_v48  ;;  %v9305_v29 = vpack.c.bf16 %v9298_v30, %v9297_v45  ;;  %vm9498_vm3 = vcmp.lt.s32.totalorder %v9488_v41, 8 }
 0xb15   : > { %v9278_v40 = vpop.f32.mrb[68].mxu0 }
 0xb16   : > { %v9312_v54 = vunpack.c.l.bf16 %v9305_v29  ;;  %v9313_v4 = vunpack.c.h.bf16 %v9305_v29  ;;  %v9279_v53 = vadd.f32 %v15426_v12, %v9278_v40  ;;  %v11185_v27 = vpop.f32.mrb[69].mxu0 }
 0xb17   : > { %v9281_v42 = vpop.f32.mrb[70].mxu0 }
 0xb18   : > { %v9503_v44 = vsel %vm9493_vm8, %v9312_v54, 0.0  ;;  %v9504_v23 = vsel %vm9494_vm1, %v9313_v4, 0.0  ;;  %v9282_v39 = vadd.f32 %v15426_v12, %v9281_v42  ;;  %v11186_v2 = vpop.f32.mrb[71].mxu0  ;;  %v9299_v56 = vmax.f32 %v9279_v53, 0.0 }
 0xb19   : > { %v9517_v11 = vsel %vm9509_vm5, %v9503_v44, 0.0  ;;  %v9519_v43 = vsel %vm9509_vm5, %v9504_v23, 0.0 }
 0xb1a   : > { %v9518_v9 = vadd.f32 %v9517_v11, %v9516_v58  ;;  %v9300_v50 = vmax.f32 %v9282_v39, 0.0 }
 0xb1c   : > { %v9520_v22 = vadd.f32 %v9519_v43, %v9518_v9  ;;  %v9306_v0 = vpack.c.bf16 %v9300_v50, %v9299_v56 }
 0xb1d   : > { %v9286_v10 = vpop.f32.mrb[72].mxu0 }
 0xb1e   : > { %v9314_v57 = vunpack.c.l.bf16 %v9306_v0  ;;  %v9315_v51 = vunpack.c.h.bf16 %v9306_v0  ;;  %v9287_v26 = vadd.f32 %v15426_v12, %v9286_v10  ;;  %v11189_v31 = vpop.f32.mrb[73].mxu0 }
 0xb1f   : > { %v9289_v47 = vpop.f32.mrb[74].mxu0 }
 0xb20   : > { %v9505_v1 = vsel %vm9495_vm10, %v9314_v57, 0.0  ;;  %v9506_v52 = vsel %vm9496_vm13, %v9315_v51, 0.0  ;;  %v9290_v60 = vadd.f32 %v15426_v12, %v9289_v47  ;;  %v11190_v32 = vpop.f32.mrb[75].mxu0  ;;  %v9301_v61 = vmax.f32 %v9287_v26, 0.0 }
 0xb21   : > { %v9521_v17 = vsel %vm9509_vm5, %v9505_v1, 0.0  ;;  %v9523_v6 = vsel %vm9509_vm5, %v9506_v52, 0.0 }
 0xb22   : > { %v9522_v13 = vadd.f32 %v9521_v17, %v9520_v22  ;;  %v9302_v63 = vmax.f32 %v9290_v60, 0.0 }
 0xb24   : > { %v9524_v35 = vadd.f32 %v9523_v6, %v9522_v13  ;;  %v9307_v5 = vpack.c.bf16 %v9302_v63, %v9301_v61 }
 0xb26   : > { %v9316_v36 = vunpack.c.l.bf16 %v9307_v5  ;;  %v9317_v12 = vunpack.c.h.bf16 %v9307_v5 }
 0xb28   : > { %v9507_v59 = vsel %vm9497_vm12, %v9316_v36, 0.0  ;;  %v9508_v62 = vsel %vm9498_vm3, %v9317_v12, 0.0 }
 0xb29   : > { %v9525_v28 = vsel %vm9509_vm5, %v9507_v59, 0.0  ;;  %v9527_v25 = vsel %vm9509_vm5, %v9508_v62, 0.0 }
 0xb2a   : > { %v9526_v19 = vadd.f32 %v9525_v28, %v9524_v35 }
 0xb2c   : > { %v9528_v18 = vadd.f32 %v9527_v25, %v9526_v19 }
 0xb2e   : > { %v9529_v33 = vrot.slane %v9528_v18, 4 }
 0xb30   : > { %v9530_v48 = vadd.f32 %v9529_v33, %v9528_v18 }
 0xb32   : > { %v9531_v45 = vrot.slane %v9530_v48, 2 }
 0xb34   : > { %v9532_v30 = vadd.f32 %v9531_v45, %v9530_v48 }
 0xb36   : > { %v9533_v15 = vrot.slane %v9532_v30, 1 }
 0xb38   : > { %v9534_v55 = vadd.f32 %v9533_v15, %v9532_v30 }
 0xb3a   : > { %v9535_v58 = vmul.f32 0.015625, %v9534_v55 }
 0xb3c   : > { %9537 = vst.msk [vmem:[%s594_s27] sm:$0x1] %vm9536_vm2, %v9535_v58 }
 0xb3d   : > { %11482 = shalt.err (!%p11479_p3)
}
 0xb3e   : > { %s11483_s24 = scalar_lea.hbm %s15587_s22, 16  ;;  %s11487_s0 = scalar_lea.hbm %s15648_s19, 32 }
 0xb3f   : > { %p11484_p4 = scmp.ne.s32.totalorder %s15587_s22, %s11483_s24  ;;  %p11488_p9 = scmp.lt.u32.totalorder %s15587_s22, %s15648_s19 }
 0xb40   : > { %p11489_p10 = scmp.lt.u32.totalorder %s11487_s0, %s11483_s24  ;;  %p11491_p12 = scmp.lt.u32.totalorder %s11483_s24, %s15587_s22 }
 0xb41   : > { %p11485_p7 = pnand %p11484_p4, %p11679_p5 }
 0xb42   : > { %p11490_p11 = por %p11489_p10, %p11488_p9 }
 0xb43   : > { %p11486_p8 = pneg %p11485_p7 }
 0xb44   : > { %p11492_p13 = por %p11491_p12, %p11490_p11 }
 0xb46   : > { %p11493_p0 = pnand %p11492_p13, %p11486_p8 }
 0xb48   : > { %11496 = shalt.err (!%p11493_p0)
}
 0xb49   : > { %11211 = dma.vmem_to_hbm [thread:$0]  (%p11679_p5), %s15589_s28, 16, %s15587_s22, %s9539_s23  }
 0xb4a PF: > { %s16295_s5 = sld [smem:[#allocation9_spill]]  ;;  %p11217_p1 = scmp.ge.s32.totalorder %s11531_s21, 2 }
 0xb4c   : > { %p11214_p2 = pnand %p11217_p1, %p11683_p6 }
 0xb50   : > { %s9563_s1 = sand.u32 1, %s16295_s5  }
 0xb51   : > { %s9564_s20 = scalar_lea.sflag [#allocation7], %s9563_s1 }
 0xb52   : > { %11514 = dma.done.wait (!%p11214_p2), %s9564_s20, 16  }
 0xb53   : > { %11516 = vsyncadd (!%p11214_p2), %s9564_s20, 4294967280  ;;  %s16297_s21 = sld [smem:[#allocation11_spill]]  ;;  %s16298_s24 = sld [smem:[#allocation10_spill]] }
 0xb54   : > { %s16299_s20 = sld [smem:[#allocation12_spill]]  ;;  %s16300_s0 = smov %s11523_s30 }
 0xb59   : > { %p29_p3 = scmp.ge.s32.totalorder %s16297_s21, 4   ;;  %s16301_s30 = smov %s16298_s24 }
 0xb5b   :  { %31 = sbr.rel (!%p29_p3) target bundleno = 10 (0xa), region = 293 }
 0xb62   :  { %9568 = vsyncpa [#allocation7], 1 }
 0xb63   :  { %9570 = vsyncpa [#allocation7 + $0x1], 1 }

</bundles_post_ra>
